<compile_context>
chip_gen: v7x
topology: tpu7x:2x2x1
jax: 0.10.0
libtpu: 0.0.40
codegen_flags: <defaults>
</compile_context>

<pallas_src>
import functools

import numpy as np
import jax
import jax.numpy as jnp
from jax import lax
from jax.experimental import pallas as pl
from jax.experimental.pallas import tpu as pltpu


def _round_up(v, m):
    return (v + m - 1) // m * m


# ----------------------------------------------------------------------------
# Fused kernel: up-conv + concat + conv0..conv3 (+ shared PReLU).
# ----------------------------------------------------------------------------
def _fused_decode_kernel(sel_ref, vmask_ref, x_ref, m_ref,
                         wup_ref, w0_ref, w1_ref, w2_ref, w3_ref,
                         bup_ref, b0_ref, b1_ref, b2_ref, b3_ref,
                         alpha_ref, o_ref, pad_ref, *, Wip, NQP, Ho, Wo):
    Wp = Wo + 2                      # full-width row length (+2 wrap columns)
    ROWS = Ho * Wp                   # flattened full-width output rows
    INT = Wp + 1                     # interior start inside the padded buffer
    alpha = alpha_ref[0]
    vmask = vmask_ref[...]           # (ROWS, 1) f32: 1 at real pixels, 0 at wrap

    # Zero the padded activation buffer; its border rows/cols provide the
    # 1-pixel SAME padding for every fused conv layer.
    pad_ref[...] = jnp.zeros_like(pad_ref)

    # ---- up = ConvTranspose2d(256 -> 64, k=3, s=2, p=1) --------------------
    # (1) One matmul evaluates all 9 taps on the zero-bordered dense input.
    big = jnp.dot(x_ref[0], wup_ref[...],
                  preferred_element_type=jnp.float32)        # (NPIXP, 9*64)

    def tap(ky, kx, roff):           # tap block, shifted by `roff` input pixels
        t = ky * 3 + kx
        return big[roff:roff + NQP, t * 64:(t + 1) * 64]

    # (2) 4-phase combine: with o = 2*i - 1 + k, the output parity (dy, dx)
    # decides which taps contribute; +1 / +Wip row offsets are the x / y input
    # shifts (pad row/column of the input grid supplies exact zeros).
    p00 = tap(1, 1, 0)
    p01 = tap(1, 2, 0) + tap(1, 0, 1)
    p10 = tap(2, 1, 0) + tap(0, 1, Wip)
    p11 = tap(2, 2, 0) + tap(2, 0, 1) + tap(0, 2, Wip) + tap(0, 0, Wip + 1)
    phases = jnp.concatenate([p00, p01, p10, p11], axis=0).astype(jnp.bfloat16)

    # (3) Scatter phase rows into row-major (Ho, Wp) order with one
    # precomputed 0/1 permutation matmul (each valid output row selects exactly
    # one phase row; wrap columns select nothing and stay exactly zero).
    up = jnp.dot(sel_ref[...], phases,
                 preferred_element_type=jnp.float32)          # (ROWS, 64)
    up = up + vmask * bup_ref[0]                              # bias only where valid

    cat = jnp.concatenate([up, m_ref[0].astype(jnp.float32)], axis=-1)
    pad_ref[pl.ds(INT, ROWS), :] = cat                        # buffer interior

    # ---- conv0..conv3: full-width im2col -> one K=9*Cin matmul per layer ---
    def conv3x3(cin, w_ref, b_ref, act):
        cols = [pad_ref[pl.ds(ky * Wp + kx, ROWS), 0:cin].astype(jnp.bfloat16)
                for ky in range(3) for kx in range(3)]
        lhs = jnp.concatenate(cols, axis=-1)                  # (ROWS, 9*cin)
        acc = jnp.dot(lhs, w_ref[...],
                      preferred_element_type=jnp.float32)     # (ROWS, cout)
        acc = acc + b_ref[0]
        if act:
            acc = jnp.where(acc >= 0.0, acc, alpha * acc)     # shared PReLU
        return acc

    h = conv3x3(128, w0_ref, b0_ref, True)
    pad_ref[pl.ds(INT, ROWS), 0:64] = h * vmask               # keep wrap cols 0
    h = conv3x3(64, w1_ref, b1_ref, True)
    pad_ref[pl.ds(INT, ROWS), 0:64] = h * vmask
    h = conv3x3(64, w2_ref, b2_ref, True)
    pad_ref[pl.ds(INT, ROWS), 0:64] = h * vmask
    # Final conv: weights zero-padded to 128 output channels -> lane-dense
    # (ROWS, 128) f32 store; the wrapper slices the real c_out channels.
    o_ref[0] = conv3x3(64, w3_ref, b3_ref, False)


# ----------------------------------------------------------------------------
# Wrapper (NCHW in / NCHW out).
# ----------------------------------------------------------------------------
def feature_decoding_end(kparams, x_nchw, map_nchw, *, c_out):
    N, ci, Hi, Wi = x_nchw.shape
    Ho, Wo = map_nchw.shape[2], map_nchw.shape[3]
    assert ci == 256 and map_nchw.shape[1] == 64
    assert Ho in (2 * Hi - 1, 2 * Hi) and Wo in (2 * Wi - 1, 2 * Wi)
    Wp = Wo + 2
    ROWS = Ho * Wp
    Wip = Wi + 1
    NQP = _round_up(Hi * Wip, 8)                         # phase rows (padded)
    NPIXP = _round_up(max((Hi + 1) * Wip, NQP + Wip + 1), 8)
    PADR = _round_up(ROWS + 2 * Wp + 2, 8)

    # Dense up-conv input with one zero pad column/row so all phase shifts are
    # contiguous row offsets; already bf16 (it is an MXU operand anyway).
    x = jnp.transpose(x_nchw, (0, 2, 3, 1)).astype(jnp.bfloat16)
    x = jnp.pad(x, ((0, 0), (0, 1), (0, 1), (0, 0)))
    x = x.reshape(N, (Hi + 1) * Wip, 256)
    x = jnp.pad(x, ((0, 0), (0, NPIXP - (Hi + 1) * Wip), (0, 0)))

    m = jnp.transpose(map_nchw, (0, 2, 3, 1)).astype(jnp.bfloat16)
    m = jnp.pad(m, ((0, 0), (0, 0), (0, Wp - Wo), (0, 0))).reshape(N, ROWS, 64)

    # Precomputed 0/1 scatter (phase row -> row-major (Ho, Wp) position) and
    # valid-pixel mask (0 at the two wrap columns of every row).
    # TODO(synk): this scatter matrix scales as O(Ho*Wp x 4*Hi*Wi); for large
    # spatial decoder sizes a spatially tiled variant would be needed.
    r = np.arange(ROWS)
    oy, ox = r // Wp, r % Wp
    valid = ox < Wo
    sel_np = np.zeros((ROWS, 4 * NQP), np.float32)
    col = ((oy % 2) * 2 + (ox % 2)) * NQP + (oy // 2) * Wip + (ox // 2)
    sel_np[r[valid], col[valid]] = 1.0
    sel = jnp.asarray(sel_np, jnp.bfloat16)
    vmask = jnp.asarray(valid.astype(np.float32).reshape(ROWS, 1))

    kernel = functools.partial(_fused_decode_kernel,
                               Wip=Wip, NQP=NQP, Ho=Ho, Wo=Wo)
    cst = lambda n: (0, 0)
    out = pl.pallas_call(
        kernel,
        out_shape=jax.ShapeDtypeStruct((N, ROWS, 128), jnp.float32),
        grid=(N,),
        in_specs=[
            pl.BlockSpec((ROWS, 4 * NQP), cst),               # sel
            pl.BlockSpec((ROWS, 1), cst),                     # vmask
            pl.BlockSpec((1, NPIXP, 256), lambda n: (n, 0, 0)),
            pl.BlockSpec((1, ROWS, 64), lambda n: (n, 0, 0)),
            pl.BlockSpec((256, 9 * 64), cst),
            pl.BlockSpec((9 * 128, 64), cst),
            pl.BlockSpec((9 * 64, 64), cst),
            pl.BlockSpec((9 * 64, 64), cst),
            pl.BlockSpec((9 * 64, 128), cst),
            pl.BlockSpec((1, 64), cst),
            pl.BlockSpec((1, 64), cst),
            pl.BlockSpec((1, 64), cst),
            pl.BlockSpec((1, 64), cst),
            pl.BlockSpec((1, 128), cst),
            pl.BlockSpec(memory_space=pltpu.MemorySpace.SMEM),
        ],
        out_specs=pl.BlockSpec((1, ROWS, 128), lambda n: (n, 0, 0)),
        scratch_shapes=[pltpu.VMEM((PADR, 128), jnp.float32)],
        compiler_params=pltpu.CompilerParams(
            dimension_semantics=("parallel",)),
    )(sel, vmask, x, m,
      kparams["wup"], kparams["w0"], kparams["w1"], kparams["w2"],
      kparams["w3"], kparams["bup"], kparams["b0"], kparams["b1"],
      kparams["b2"], kparams["b3"], kparams["alpha"])

    out = out.reshape(N, Ho, Wp, 128)[:, :, :Wo, :c_out]
    return jnp.transpose(out, (0, 3, 1, 2))


# ----------------------------------------------------------------------------
# Parameters (PyTorch-layout) + one-time kernel-layout preparation.
# ----------------------------------------------------------------------------
def init_params(key, c_out):
    keys = jax.random.split(key, 10)

    def xavier(k, cout, cin):          # xavier_normal_ on (cout, cin, 3, 3)
        std = (2.0 / (cin * 9 + cout * 9)) ** 0.5
        return std * jax.random.normal(k, (cout, cin, 3, 3), jnp.float32)

    p = {}
    # ConvTranspose2d(256, 64, 3, stride=2, padding=1): weight (256, 64, 3, 3)
    p["up_w"] = 0.02 * jax.random.normal(keys[0], (256, 64, 3, 3), jnp.float32)
    p["up_b"] = 0.01 * jax.random.normal(keys[1], (64,), jnp.float32)
    p["w0"] = xavier(keys[2], 64, 128)
    p["b0"] = 0.01 * jax.random.normal(keys[3], (64,), jnp.float32)
    p["w1"] = xavier(keys[4], 64, 64)
    p["b1"] = 0.01 * jax.random.normal(keys[5], (64,), jnp.float32)
    p["w2"] = xavier(keys[6], 64, 64)
    p["b2"] = 0.01 * jax.random.normal(keys[7], (64,), jnp.float32)
    p["w3"] = xavier(keys[8], c_out, 64)
    p["b3"] = 0.01 * jax.random.normal(keys[9], (c_out,), jnp.float32)
    p["alpha"] = jnp.array([0.25], jnp.float32)   # nn.PReLU() shared parameter
    return p


def prepare_kernel_params(p, c_out):
    """Hoisted layout transforms + bf16 casts (done once, not per forward)."""
    assert c_out <= 128
    bf = jnp.bfloat16

    def conv_cat(w):                   # (cout, cin, 3, 3) -> (9*cin, cout) bf16
        cout, cin = w.shape[0], w.shape[1]
        return jnp.transpose(w, (2, 3, 1, 0)).reshape(9 * cin, cout).astype(bf)

    w3c = jnp.pad(conv_cat(p["w3"]), ((0, 0), (0, 128 - c_out)))
    b3p = jnp.pad(p["b3"], (0, 128 - c_out)).reshape(1, 128)
    return dict(
        wup=jnp.transpose(p["up_w"], (0, 2, 3, 1)).reshape(256, 9 * 64).astype(bf),
        w0=conv_cat(p["w0"]), w1=conv_cat(p["w1"]), w2=conv_cat(p["w2"]), w3=w3c,
        bup=p["up_b"].reshape(1, 64), b0=p["b0"].reshape(1, 64),
        b1=p["b1"].reshape(1, 64), b2=p["b2"].reshape(1, 64), b3=b3p,
        alpha=p["alpha"])


# ----------------------------------------------------------------------------
# Pure-JAX reference (same bf16 matmul-input quantization, f32 accumulation).
# ----------------------------------------------------------------------------
def reference_forward(p, x_nchw, map_nchw):
    bf = jnp.bfloat16
    x = jnp.transpose(x_nchw, (0, 2, 3, 1)).astype(jnp.float32)
    m = jnp.transpose(map_nchw, (0, 2, 3, 1)).astype(jnp.float32)
    Ho, Wo = m.shape[1], m.shape[2]
    oph = Ho - (2 * x.shape[1] - 1)
    opw = Wo - (2 * x.shape[2] - 1)

    wup = jnp.transpose(p["up_w"][:, :, ::-1, ::-1], (2, 3, 0, 1)).astype(bf)
    up = lax.conv_general_dilated(
        x.astype(bf), wup, window_strides=(1, 1),
        padding=((1, 1 + oph), (1, 1 + opw)), lhs_dilation=(2, 2),
        dimension_numbers=("NHWC", "HWIO", "NHWC"),
        preferred_element_type=jnp.float32) + p["up_b"]
    cat = jnp.concatenate([up, m], axis=-1)
    a = p["alpha"][0]

    def conv(h, w, b, act):
        wh = jnp.transpose(w, (2, 3, 1, 0)).astype(bf)
        o = lax.conv_general_dilated(
            h.astype(bf), wh, (1, 1), ((1, 1), (1, 1)),
            dimension_numbers=("NHWC", "HWIO", "NHWC"),
            preferred_element_type=jnp.float32) + b
        return jnp.where(o >= 0.0, o, a * o) if act else o

    h = conv(cat, p["w0"], p["b0"], True)
    h = conv(h, p["w1"], p["b1"], True)
    h = conv(h, p["w2"], p["b2"], True)
    o = conv(h, p["w3"], p["b3"], False)
    return jnp.transpose(o, (0, 3, 1, 2))


if __name__ == "__main__":
    key = jax.random.PRNGKey(0)
    k_in, k_map, k_par = jax.random.split(key, 3)

    c_out = 8
    # NCHW inputs: `input` has 256 ch (feeds `up`), `map` has 64 ch so the
    # concatenation has 128 ch for conv0; map spatial = 2x input spatial.
    x = jax.random.normal(k_in, (2, 256, 8, 8), jnp.float32)
    m = jax.random.normal(k_map, (2, 64, 16, 16), jnp.float32)

    params = init_params(k_par, c_out)
    kparams = prepare_kernel_params(params, c_out)   # one-time weight prep

    fwd = jax.jit(functools.partial(feature_decoding_end, c_out=c_out))
    out = jax.block_until_ready(fwd(kparams, x, m))
    assert out.shape == (2, c_out, 16, 16), out.shape

    ref = jax.block_until_ready(jax.jit(reference_forward)(params, x, m))
    err = float(jnp.max(jnp.abs(out - ref)))
    assert err < 5e-2, f"max abs err {err}"

    print("KERNEL_OK")
</pallas_src>

<mosaic_0001>
module attributes {stable_mosaic.version = 11 : i64} {
  func.func @_fused_decode_kernel(%arg0: i32, %arg1: memref<288x288xbf16, #tpu.memory_space<vmem>>, %arg2: memref<288x1xf32, #tpu.memory_space<vmem>>, %arg3: memref<1x88x256xbf16, #tpu.memory_space<vmem>>, %arg4: memref<1x288x64xbf16, #tpu.memory_space<vmem>>, %arg5: memref<256x576xbf16, #tpu.memory_space<vmem>>, %arg6: memref<1152x64xbf16, #tpu.memory_space<vmem>>, %arg7: memref<576x64xbf16, #tpu.memory_space<vmem>>, %arg8: memref<576x64xbf16, #tpu.memory_space<vmem>>, %arg9: memref<576x128xbf16, #tpu.memory_space<vmem>>, %arg10: memref<1x64xf32, #tpu.memory_space<vmem>>, %arg11: memref<1x64xf32, #tpu.memory_space<vmem>>, %arg12: memref<1x64xf32, #tpu.memory_space<vmem>>, %arg13: memref<1x64xf32, #tpu.memory_space<vmem>>, %arg14: memref<1x128xf32, #tpu.memory_space<vmem>>, %arg15: memref<1xf32, #tpu.memory_space<smem>>, %arg16: memref<1x288x128xf32, #tpu.memory_space<vmem>>, %arg17: memref<328x128xf32, #tpu.memory_space<vmem>>) attributes {dimension_semantics = [#tpu.dimension_semantics<parallel>], iteration_bounds = array<i64: 2>, scalar_prefetch = 0 : i64, scratch_operands = 1 : i64, tpu.core_type = #tpu.core_type<tc>, window_params = [{pipeline_mode = #tpu.pipeline_mode<synchronous>, transform_indices = @transform_0, window_bounds = array<i64: 288, 288>}, {pipeline_mode = #tpu.pipeline_mode<synchronous>, transform_indices = @transform_1, window_bounds = array<i64: 288, 1>}, {transform_indices = @transform_2, window_bounds = array<i64: 1, 88, 256>}, {transform_indices = @transform_3, window_bounds = array<i64: 1, 288, 64>}, {pipeline_mode = #tpu.pipeline_mode<synchronous>, transform_indices = @transform_4, window_bounds = array<i64: 256, 576>}, {pipeline_mode = #tpu.pipeline_mode<synchronous>, transform_indices = @transform_5, window_bounds = array<i64: 1152, 64>}, {pipeline_mode = #tpu.pipeline_mode<synchronous>, transform_indices = @transform_6, window_bounds = array<i64: 576, 64>}, {pipeline_mode = #tpu.pipeline_mode<synchronous>, transform_indices = @transform_7, window_bounds = array<i64: 576, 64>}, {pipeline_mode = #tpu.pipeline_mode<synchronous>, transform_indices = @transform_8, window_bounds = array<i64: 576, 128>}, {pipeline_mode = #tpu.pipeline_mode<synchronous>, transform_indices = @transform_9, window_bounds = array<i64: 1, 64>}, {pipeline_mode = #tpu.pipeline_mode<synchronous>, transform_indices = @transform_10, window_bounds = array<i64: 1, 64>}, {pipeline_mode = #tpu.pipeline_mode<synchronous>, transform_indices = @transform_11, window_bounds = array<i64: 1, 64>}, {pipeline_mode = #tpu.pipeline_mode<synchronous>, transform_indices = @transform_12, window_bounds = array<i64: 1, 64>}, {pipeline_mode = #tpu.pipeline_mode<synchronous>, transform_indices = @transform_13, window_bounds = array<i64: 1, 128>}, {transform_indices = @transform_14, window_bounds = array<i64: 1>}, {transform_indices = @transform_15, window_bounds = array<i64: 1, 288, 128>}]} {
    %c0 = arith.constant 0 : index
    %0 = memref.load %arg15[%c0] : memref<1xf32, #tpu.memory_space<smem>>
    %c0_0 = arith.constant 0 : index
    %c0_1 = arith.constant 0 : index
    %1 = vector.load %arg2[%c0_0, %c0_1] : memref<288x1xf32, #tpu.memory_space<vmem>>, vector<288x1xf32>
    %cst = arith.constant 0.000000e+00 : f32
    %2 = vector.broadcast %cst : f32 to vector<328x128xf32>
    %c0_2 = arith.constant 0 : index
    %c0_3 = arith.constant 0 : index
    %3 = vector.load %arg17[%c0_2, %c0_3] : memref<328x128xf32, #tpu.memory_space<vmem>>, vector<328x128xf32>
    tpu.vector_store %arg17[%c0_2, %c0_3], %2 {strides = array<i32>} : memref<328x128xf32, #tpu.memory_space<vmem>>, vector<328x128xf32>,
    %c0_4 = arith.constant 0 : index
    %c0_5 = arith.constant 0 : index
    %c0_6 = arith.constant 0 : index
    %4 = vector.load %arg3[%c0_4, %c0_5, %c0_6] : memref<1x88x256xbf16, #tpu.memory_space<vmem>>, vector<1x88x256xbf16>
    %5 = vector.shape_cast %4 : vector<1x88x256xbf16> to vector<88x256xbf16>
    %c0_7 = arith.constant 0 : index
    %c0_8 = arith.constant 0 : index
    %6 = vector.load %arg5[%c0_7, %c0_8] : memref<256x576xbf16, #tpu.memory_space<vmem>>, vector<256x576xbf16>
    %cst_9 = arith.constant dense<0.000000e+00> : vector<88x576xf32>
    %7 = tpu.matmul %5, %6, %cst_9 {dimension_numbers = #tpu.dot_dimension_numbers<[1], [0], [0], [1], [0, 0, 1, 1], [], []>} : vector<88x256xbf16>, vector<256x576xbf16>, vector<88x576xf32> -> vector<88x576xf32>
    %8 = vector.extract_strided_slice %7 {offsets = [0, 256], sizes = [72, 64], strides = [1, 1]} : vector<88x576xf32> to vector<72x64xf32>
    %9 = vector.extract_strided_slice %7 {offsets = [0, 320], sizes = [72, 64], strides = [1, 1]} : vector<88x576xf32> to vector<72x64xf32>
    %10 = vector.extract_strided_slice %7 {offsets = [1, 192], sizes = [72, 64], strides = [1, 1]} : vector<88x576xf32> to vector<72x64xf32>
    %11 = arith.addf %9, %10 : vector<72x64xf32>
    %12 = vector.extract_strided_slice %7 {offsets = [0, 448], sizes = [72, 64], strides = [1, 1]} : vector<88x576xf32> to vector<72x64xf32>
    %13 = vector.extract_strided_slice %7 {offsets = [9, 64], sizes = [72, 64], strides = [1, 1]} : vector<88x576xf32> to vector<72x64xf32>
    %14 = arith.addf %12, %13 : vector<72x64xf32>
    %15 = vector.extract_strided_slice %7 {offsets = [0, 512], sizes = [72, 64], strides = [1, 1]} : vector<88x576xf32> to vector<72x64xf32>
    %16 = vector.extract_strided_slice %7 {offsets = [1, 384], sizes = [72, 64], strides = [1, 1]} : vector<88x576xf32> to vector<72x64xf32>
    %17 = arith.addf %15, %16 : vector<72x64xf32>
    %18 = vector.extract_strided_slice %7 {offsets = [9, 128], sizes = [72, 64], strides = [1, 1]} : vector<88x576xf32> to vector<72x64xf32>
    %19 = arith.addf %17, %18 : vector<72x64xf32>
    %20 = vector.extract_strided_slice %7 {offsets = [10, 0], sizes = [72, 64], strides = [1, 1]} : vector<88x576xf32> to vector<72x64xf32>
    %21 = arith.addf %19, %20 : vector<72x64xf32>
    %22 = tpu.concatenate %8, %11, %14, %21 in 0 : vector<72x64xf32>, vector<72x64xf32>, vector<72x64xf32>, vector<72x64xf32> -> vector<288x64xf32>
    %23 = arith.truncf %22 : vector<288x64xf32> to vector<288x64xbf16>
    %c0_10 = arith.constant 0 : index
    %c0_11 = arith.constant 0 : index
    %24 = vector.load %arg1[%c0_10, %c0_11] : memref<288x288xbf16, #tpu.memory_space<vmem>>, vector<288x288xbf16>
    %cst_12 = arith.constant dense<0.000000e+00> : vector<288x64xf32>
    %25 = tpu.matmul %24, %23, %cst_12 {dimension_numbers = #tpu.dot_dimension_numbers<[1], [0], [0], [1], [0, 0, 1, 1], [], []>} : vector<288x288xbf16>, vector<288x64xbf16>, vector<288x64xf32> -> vector<288x64xf32>
    %c0_13 = arith.constant 0 : index
    %c0_14 = arith.constant 0 : index
    %26 = vector.load %arg10[%c0_13, %c0_14] : memref<1x64xf32, #tpu.memory_space<vmem>>, vector<1x64xf32>
    %27 = vector.shape_cast %26 : vector<1x64xf32> to vector<64xf32>
    %28 = vector.shape_cast %27 : vector<64xf32> to vector<1x64xf32>
    %29 = vector.broadcast %1 : vector<288x1xf32> to vector<288x64xf32>
    %30 = vector.broadcast %28 : vector<1x64xf32> to vector<288x64xf32>
    %31 = arith.mulf %29, %30 : vector<288x64xf32>
    %32 = arith.addf %25, %31 : vector<288x64xf32>
    %c0_15 = arith.constant 0 : index
    %c0_16 = arith.constant 0 : index
    %c0_17 = arith.constant 0 : index
    %33 = vector.load %arg4[%c0_15, %c0_16, %c0_17] : memref<1x288x64xbf16, #tpu.memory_space<vmem>>, vector<1x288x64xbf16>
    %34 = vector.shape_cast %33 : vector<1x288x64xbf16> to vector<288x64xbf16>
    %35 = arith.extf %34 : vector<288x64xbf16> to vector<288x64xf32>
    %36 = tpu.concatenate %32, %35 in 1 : vector<288x64xf32>, vector<288x64xf32> -> vector<288x128xf32>
    %c19 = arith.constant 19 : index
    %c0_18 = arith.constant 0 : index
    %37 = vector.load %arg17[%c19, %c0_18] : memref<328x128xf32, #tpu.memory_space<vmem>>, vector<288x128xf32>
    tpu.vector_store %arg17[%c19, %c0_18], %36 {strides = array<i32>} : memref<328x128xf32, #tpu.memory_space<vmem>>, vector<288x128xf32>,
    %c0_19 = arith.constant 0 : index
    %c0_20 = arith.constant 0 : index
    %38 = vector.load %arg17[%c0_19, %c0_20] : memref<328x128xf32, #tpu.memory_space<vmem>>, vector<288x128xf32>
    %39 = arith.truncf %38 : vector<288x128xf32> to vector<288x128xbf16>
    %c1 = arith.constant 1 : index
    %c0_21 = arith.constant 0 : index
    %40 = vector.load %arg17[%c1, %c0_21] : memref<328x128xf32, #tpu.memory_space<vmem>>, vector<288x128xf32>
    %41 = arith.truncf %40 : vector<288x128xf32> to vector<288x128xbf16>
    %c2 = arith.constant 2 : index
    %c0_22 = arith.constant 0 : index
    %42 = vector.load %arg17[%c2, %c0_22] : memref<328x128xf32, #tpu.memory_space<vmem>>, vector<288x128xf32>
    %43 = arith.truncf %42 : vector<288x128xf32> to vector<288x128xbf16>
    %c18 = arith.constant 18 : index
    %c0_23 = arith.constant 0 : index
    %44 = vector.load %arg17[%c18, %c0_23] : memref<328x128xf32, #tpu.memory_space<vmem>>, vector<288x128xf32>
    %45 = arith.truncf %44 : vector<288x128xf32> to vector<288x128xbf16>
    %c19_24 = arith.constant 19 : index
    %c0_25 = arith.constant 0 : index
    %46 = vector.load %arg17[%c19_24, %c0_25] : memref<328x128xf32, #tpu.memory_space<vmem>>, vector<288x128xf32>
    %47 = arith.truncf %46 : vector<288x128xf32> to vector<288x128xbf16>
    %c20 = arith.constant 20 : index
    %c0_26 = arith.constant 0 : index
    %48 = vector.load %arg17[%c20, %c0_26] : memref<328x128xf32, #tpu.memory_space<vmem>>, vector<288x128xf32>
    %49 = arith.truncf %48 : vector<288x128xf32> to vector<288x128xbf16>
    %c36 = arith.constant 36 : index
    %c0_27 = arith.constant 0 : index
    %50 = vector.load %arg17[%c36, %c0_27] : memref<328x128xf32, #tpu.memory_space<vmem>>, vector<288x128xf32>
    %51 = arith.truncf %50 : vector<288x128xf32> to vector<288x128xbf16>
    %c37 = arith.constant 37 : index
    %c0_28 = arith.constant 0 : index
    %52 = vector.load %arg17[%c37, %c0_28] : memref<328x128xf32, #tpu.memory_space<vmem>>, vector<288x128xf32>
    %53 = arith.truncf %52 : vector<288x128xf32> to vector<288x128xbf16>
    %c38 = arith.constant 38 : index
    %c0_29 = arith.constant 0 : index
    %54 = vector.load %arg17[%c38, %c0_29] : memref<328x128xf32, #tpu.memory_space<vmem>>, vector<288x128xf32>
    %55 = arith.truncf %54 : vector<288x128xf32> to vector<288x128xbf16>
    %56 = tpu.concatenate %39, %41, %43, %45, %47, %49, %51, %53, %55 in 1 : vector<288x128xbf16>, vector<288x128xbf16>, vector<288x128xbf16>, vector<288x128xbf16>, vector<288x128xbf16>, vector<288x128xbf16>, vector<288x128xbf16>, vector<288x128xbf16>, vector<288x128xbf16> -> vector<288x1152xbf16>
    %c0_30 = arith.constant 0 : index
    %c0_31 = arith.constant 0 : index
    %57 = vector.load %arg6[%c0_30, %c0_31] : memref<1152x64xbf16, #tpu.memory_space<vmem>>, vector<1152x64xbf16>
    %cst_32 = arith.constant dense<0.000000e+00> : vector<288x64xf32>
    %58 = tpu.matmul %56, %57, %cst_32 {dimension_numbers = #tpu.dot_dimension_numbers<[1], [0], [0], [1], [0, 0, 1, 1], [], []>} : vector<288x1152xbf16>, vector<1152x64xbf16>, vector<288x64xf32> -> vector<288x64xf32>
    %c0_33 = arith.constant 0 : index
    %c0_34 = arith.constant 0 : index
    %59 = vector.load %arg11[%c0_33, %c0_34] : memref<1x64xf32, #tpu.memory_space<vmem>>, vector<1x64xf32>
    %60 = vector.shape_cast %59 : vector<1x64xf32> to vector<64xf32>
    %61 = vector.shape_cast %60 : vector<64xf32> to vector<1x64xf32>
    %62 = vector.broadcast %61 : vector<1x64xf32> to vector<288x64xf32>
    %63 = arith.addf %58, %62 : vector<288x64xf32>
    %cst_35 = arith.constant 0.000000e+00 : f32
    %64 = vector.broadcast %cst_35 : f32 to vector<288x64xf32>
    %65 = arith.cmpf oge, %63, %64 : vector<288x64xf32>
    %66 = vector.broadcast %0 : f32 to vector<288x64xf32>
    %67 = arith.mulf %66, %63 : vector<288x64xf32>
    %68 = arith.select %65, %63, %67 : vector<288x64xi1>, vector<288x64xf32>
    %69 = vector.broadcast %1 : vector<288x1xf32> to vector<288x64xf32>
    %70 = arith.mulf %68, %69 : vector<288x64xf32>
    %c19_36 = arith.constant 19 : index
    %c0_37 = arith.constant 0 : index
    %71 = vector.load %arg17[%c19_36, %c0_37] : memref<328x128xf32, #tpu.memory_space<vmem>>, vector<288x64xf32>
    tpu.vector_store %arg17[%c19_36, %c0_37], %70 {strides = array<i32>} : memref<328x128xf32, #tpu.memory_space<vmem>>, vector<288x64xf32>,
    %c0_38 = arith.constant 0 : index
    %c0_39 = arith.constant 0 : index
    %72 = vector.load %arg17[%c0_38, %c0_39] : memref<328x128xf32, #tpu.memory_space<vmem>>, vector<288x64xf32>
    %73 = arith.truncf %72 : vector<288x64xf32> to vector<288x64xbf16>
    %c1_40 = arith.constant 1 : index
    %c0_41 = arith.constant 0 : index
    %74 = vector.load %arg17[%c1_40, %c0_41] : memref<328x128xf32, #tpu.memory_space<vmem>>, vector<288x64xf32>
    %75 = arith.truncf %74 : vector<288x64xf32> to vector<288x64xbf16>
    %c2_42 = arith.constant 2 : index
    %c0_43 = arith.constant 0 : index
    %76 = vector.load %arg17[%c2_42, %c0_43] : memref<328x128xf32, #tpu.memory_space<vmem>>, vector<288x64xf32>
    %77 = arith.truncf %76 : vector<288x64xf32> to vector<288x64xbf16>
    %c18_44 = arith.constant 18 : index
    %c0_45 = arith.constant 0 : index
    %78 = vector.load %arg17[%c18_44, %c0_45] : memref<328x128xf32, #tpu.memory_space<vmem>>, vector<288x64xf32>
    %79 = arith.truncf %78 : vector<288x64xf32> to vector<288x64xbf16>
    %c19_46 = arith.constant 19 : index
    %c0_47 = arith.constant 0 : index
    %80 = vector.load %arg17[%c19_46, %c0_47] : memref<328x128xf32, #tpu.memory_space<vmem>>, vector<288x64xf32>
    %81 = arith.truncf %80 : vector<288x64xf32> to vector<288x64xbf16>
    %c20_48 = arith.constant 20 : index
    %c0_49 = arith.constant 0 : index
    %82 = vector.load %arg17[%c20_48, %c0_49] : memref<328x128xf32, #tpu.memory_space<vmem>>, vector<288x64xf32>
    %83 = arith.truncf %82 : vector<288x64xf32> to vector<288x64xbf16>
    %c36_50 = arith.constant 36 : index
    %c0_51 = arith.constant 0 : index
    %84 = vector.load %arg17[%c36_50, %c0_51] : memref<328x128xf32, #tpu.memory_space<vmem>>, vector<288x64xf32>
    %85 = arith.truncf %84 : vector<288x64xf32> to vector<288x64xbf16>
    %c37_52 = arith.constant 37 : index
    %c0_53 = arith.constant 0 : index
    %86 = vector.load %arg17[%c37_52, %c0_53] : memref<328x128xf32, #tpu.memory_space<vmem>>, vector<288x64xf32>
    %87 = arith.truncf %86 : vector<288x64xf32> to vector<288x64xbf16>
    %c38_54 = arith.constant 38 : index
    %c0_55 = arith.constant 0 : index
    %88 = vector.load %arg17[%c38_54, %c0_55] : memref<328x128xf32, #tpu.memory_space<vmem>>, vector<288x64xf32>
    %89 = arith.truncf %88 : vector<288x64xf32> to vector<288x64xbf16>
    %90 = tpu.concatenate %73, %75, %77, %79, %81, %83, %85, %87, %89 in 1 : vector<288x64xbf16>, vector<288x64xbf16>, vector<288x64xbf16>, vector<288x64xbf16>, vector<288x64xbf16>, vector<288x64xbf16>, vector<288x64xbf16>, vector<288x64xbf16>, vector<288x64xbf16> -> vector<288x576xbf16>
    %c0_56 = arith.constant 0 : index
    %c0_57 = arith.constant 0 : index
    %91 = vector.load %arg7[%c0_56, %c0_57] : memref<576x64xbf16, #tpu.memory_space<vmem>>, vector<576x64xbf16>
    %cst_58 = arith.constant dense<0.000000e+00> : vector<288x64xf32>
    %92 = tpu.matmul %90, %91, %cst_58 {dimension_numbers = #tpu.dot_dimension_numbers<[1], [0], [0], [1], [0, 0, 1, 1], [], []>} : vector<288x576xbf16>, vector<576x64xbf16>, vector<288x64xf32> -> vector<288x64xf32>
    %c0_59 = arith.constant 0 : index
    %c0_60 = arith.constant 0 : index
    %93 = vector.load %arg12[%c0_59, %c0_60] : memref<1x64xf32, #tpu.memory_space<vmem>>, vector<1x64xf32>
    %94 = vector.shape_cast %93 : vector<1x64xf32> to vector<64xf32>
    %95 = vector.shape_cast %94 : vector<64xf32> to vector<1x64xf32>
    %96 = vector.broadcast %95 : vector<1x64xf32> to vector<288x64xf32>
    %97 = arith.addf %92, %96 : vector<288x64xf32>
    %cst_61 = arith.constant 0.000000e+00 : f32
    %98 = vector.broadcast %cst_61 : f32 to vector<288x64xf32>
    %99 = arith.cmpf oge, %97, %98 : vector<288x64xf32>
    %100 = vector.broadcast %0 : f32 to vector<288x64xf32>
    %101 = arith.mulf %100, %97 : vector<288x64xf32>
    %102 = arith.select %99, %97, %101 : vector<288x64xi1>, vector<288x64xf32>
    %103 = vector.broadcast %1 : vector<288x1xf32> to vector<288x64xf32>
    %104 = arith.mulf %102, %103 : vector<288x64xf32>
    %c19_62 = arith.constant 19 : index
    %c0_63 = arith.constant 0 : index
    %105 = vector.load %arg17[%c19_62, %c0_63] : memref<328x128xf32, #tpu.memory_space<vmem>>, vector<288x64xf32>
    tpu.vector_store %arg17[%c19_62, %c0_63], %104 {strides = array<i32>} : memref<328x128xf32, #tpu.memory_space<vmem>>, vector<288x64xf32>,
    %c0_64 = arith.constant 0 : index
    %c0_65 = arith.constant 0 : index
    %106 = vector.load %arg17[%c0_64, %c0_65] : memref<328x128xf32, #tpu.memory_space<vmem>>, vector<288x64xf32>
    %107 = arith.truncf %106 : vector<288x64xf32> to vector<288x64xbf16>
    %c1_66 = arith.constant 1 : index
    %c0_67 = arith.constant 0 : index
    %108 = vector.load %arg17[%c1_66, %c0_67] : memref<328x128xf32, #tpu.memory_space<vmem>>, vector<288x64xf32>
    %109 = arith.truncf %108 : vector<288x64xf32> to vector<288x64xbf16>
    %c2_68 = arith.constant 2 : index
    %c0_69 = arith.constant 0 : index
    %110 = vector.load %arg17[%c2_68, %c0_69] : memref<328x128xf32, #tpu.memory_space<vmem>>, vector<288x64xf32>
    %111 = arith.truncf %110 : vector<288x64xf32> to vector<288x64xbf16>
    %c18_70 = arith.constant 18 : index
    %c0_71 = arith.constant 0 : index
    %112 = vector.load %arg17[%c18_70, %c0_71] : memref<328x128xf32, #tpu.memory_space<vmem>>, vector<288x64xf32>
    %113 = arith.truncf %112 : vector<288x64xf32> to vector<288x64xbf16>
    %c19_72 = arith.constant 19 : index
    %c0_73 = arith.constant 0 : index
    %114 = vector.load %arg17[%c19_72, %c0_73] : memref<328x128xf32, #tpu.memory_space<vmem>>, vector<288x64xf32>
    %115 = arith.truncf %114 : vector<288x64xf32> to vector<288x64xbf16>
    %c20_74 = arith.constant 20 : index
    %c0_75 = arith.constant 0 : index
    %116 = vector.load %arg17[%c20_74, %c0_75] : memref<328x128xf32, #tpu.memory_space<vmem>>, vector<288x64xf32>
    %117 = arith.truncf %116 : vector<288x64xf32> to vector<288x64xbf16>
    %c36_76 = arith.constant 36 : index
    %c0_77 = arith.constant 0 : index
    %118 = vector.load %arg17[%c36_76, %c0_77] : memref<328x128xf32, #tpu.memory_space<vmem>>, vector<288x64xf32>
    %119 = arith.truncf %118 : vector<288x64xf32> to vector<288x64xbf16>
    %c37_78 = arith.constant 37 : index
    %c0_79 = arith.constant 0 : index
    %120 = vector.load %arg17[%c37_78, %c0_79] : memref<328x128xf32, #tpu.memory_space<vmem>>, vector<288x64xf32>
    %121 = arith.truncf %120 : vector<288x64xf32> to vector<288x64xbf16>
    %c38_80 = arith.constant 38 : index
    %c0_81 = arith.constant 0 : index
    %122 = vector.load %arg17[%c38_80, %c0_81] : memref<328x128xf32, #tpu.memory_space<vmem>>, vector<288x64xf32>
    %123 = arith.truncf %122 : vector<288x64xf32> to vector<288x64xbf16>
    %124 = tpu.concatenate %107, %109, %111, %113, %115, %117, %119, %121, %123 in 1 : vector<288x64xbf16>, vector<288x64xbf16>, vector<288x64xbf16>, vector<288x64xbf16>, vector<288x64xbf16>, vector<288x64xbf16>, vector<288x64xbf16>, vector<288x64xbf16>, vector<288x64xbf16> -> vector<288x576xbf16>
    %c0_82 = arith.constant 0 : index
    %c0_83 = arith.constant 0 : index
    %125 = vector.load %arg8[%c0_82, %c0_83] : memref<576x64xbf16, #tpu.memory_space<vmem>>, vector<576x64xbf16>
    %cst_84 = arith.constant dense<0.000000e+00> : vector<288x64xf32>
    %126 = tpu.matmul %124, %125, %cst_84 {dimension_numbers = #tpu.dot_dimension_numbers<[1], [0], [0], [1], [0, 0, 1, 1], [], []>} : vector<288x576xbf16>, vector<576x64xbf16>, vector<288x64xf32> -> vector<288x64xf32>
    %c0_85 = arith.constant 0 : index
    %c0_86 = arith.constant 0 : index
    %127 = vector.load %arg13[%c0_85, %c0_86] : memref<1x64xf32, #tpu.memory_space<vmem>>, vector<1x64xf32>
    %128 = vector.shape_cast %127 : vector<1x64xf32> to vector<64xf32>
    %129 = vector.shape_cast %128 : vector<64xf32> to vector<1x64xf32>
    %130 = vector.broadcast %129 : vector<1x64xf32> to vector<288x64xf32>
    %131 = arith.addf %126, %130 : vector<288x64xf32>
    %cst_87 = arith.constant 0.000000e+00 : f32
    %132 = vector.broadcast %cst_87 : f32 to vector<288x64xf32>
    %133 = arith.cmpf oge, %131, %132 : vector<288x64xf32>
    %134 = vector.broadcast %0 : f32 to vector<288x64xf32>
    %135 = arith.mulf %134, %131 : vector<288x64xf32>
    %136 = arith.select %133, %131, %135 : vector<288x64xi1>, vector<288x64xf32>
    %137 = vector.broadcast %1 : vector<288x1xf32> to vector<288x64xf32>
    %138 = arith.mulf %136, %137 : vector<288x64xf32>
    %c19_88 = arith.constant 19 : index
    %c0_89 = arith.constant 0 : index
    %139 = vector.load %arg17[%c19_88, %c0_89] : memref<328x128xf32, #tpu.memory_space<vmem>>, vector<288x64xf32>
    tpu.vector_store %arg17[%c19_88, %c0_89], %138 {strides = array<i32>} : memref<328x128xf32, #tpu.memory_space<vmem>>, vector<288x64xf32>,
    %c0_90 = arith.constant 0 : index
    %c0_91 = arith.constant 0 : index
    %140 = vector.load %arg17[%c0_90, %c0_91] : memref<328x128xf32, #tpu.memory_space<vmem>>, vector<288x64xf32>
    %141 = arith.truncf %140 : vector<288x64xf32> to vector<288x64xbf16>
    %c1_92 = arith.constant 1 : index
    %c0_93 = arith.constant 0 : index
    %142 = vector.load %arg17[%c1_92, %c0_93] : memref<328x128xf32, #tpu.memory_space<vmem>>, vector<288x64xf32>
    %143 = arith.truncf %142 : vector<288x64xf32> to vector<288x64xbf16>
    %c2_94 = arith.constant 2 : index
    %c0_95 = arith.constant 0 : index
    %144 = vector.load %arg17[%c2_94, %c0_95] : memref<328x128xf32, #tpu.memory_space<vmem>>, vector<288x64xf32>
    %145 = arith.truncf %144 : vector<288x64xf32> to vector<288x64xbf16>
    %c18_96 = arith.constant 18 : index
    %c0_97 = arith.constant 0 : index
    %146 = vector.load %arg17[%c18_96, %c0_97] : memref<328x128xf32, #tpu.memory_space<vmem>>, vector<288x64xf32>
    %147 = arith.truncf %146 : vector<288x64xf32> to vector<288x64xbf16>
    %c19_98 = arith.constant 19 : index
    %c0_99 = arith.constant 0 : index
    %148 = vector.load %arg17[%c19_98, %c0_99] : memref<328x128xf32, #tpu.memory_space<vmem>>, vector<288x64xf32>
    %149 = arith.truncf %148 : vector<288x64xf32> to vector<288x64xbf16>
    %c20_100 = arith.constant 20 : index
    %c0_101 = arith.constant 0 : index
    %150 = vector.load %arg17[%c20_100, %c0_101] : memref<328x128xf32, #tpu.memory_space<vmem>>, vector<288x64xf32>
    %151 = arith.truncf %150 : vector<288x64xf32> to vector<288x64xbf16>
    %c36_102 = arith.constant 36 : index
    %c0_103 = arith.constant 0 : index
    %152 = vector.load %arg17[%c36_102, %c0_103] : memref<328x128xf32, #tpu.memory_space<vmem>>, vector<288x64xf32>
    %153 = arith.truncf %152 : vector<288x64xf32> to vector<288x64xbf16>
    %c37_104 = arith.constant 37 : index
    %c0_105 = arith.constant 0 : index
    %154 = vector.load %arg17[%c37_104, %c0_105] : memref<328x128xf32, #tpu.memory_space<vmem>>, vector<288x64xf32>
    %155 = arith.truncf %154 : vector<288x64xf32> to vector<288x64xbf16>
    %c38_106 = arith.constant 38 : index
    %c0_107 = arith.constant 0 : index
    %156 = vector.load %arg17[%c38_106, %c0_107] : memref<328x128xf32, #tpu.memory_space<vmem>>, vector<288x64xf32>
    %157 = arith.truncf %156 : vector<288x64xf32> to vector<288x64xbf16>
    %158 = tpu.concatenate %141, %143, %145, %147, %149, %151, %153, %155, %157 in 1 : vector<288x64xbf16>, vector<288x64xbf16>, vector<288x64xbf16>, vector<288x64xbf16>, vector<288x64xbf16>, vector<288x64xbf16>, vector<288x64xbf16>, vector<288x64xbf16>, vector<288x64xbf16> -> vector<288x576xbf16>
    %c0_108 = arith.constant 0 : index
    %c0_109 = arith.constant 0 : index
    %159 = vector.load %arg9[%c0_108, %c0_109] : memref<576x128xbf16, #tpu.memory_space<vmem>>, vector<576x128xbf16>
    %cst_110 = arith.constant dense<0.000000e+00> : vector<288x128xf32>
    %160 = tpu.matmul %158, %159, %cst_110 {dimension_numbers = #tpu.dot_dimension_numbers<[1], [0], [0], [1], [0, 0, 1, 1], [], []>} : vector<288x576xbf16>, vector<576x128xbf16>, vector<288x128xf32> -> vector<288x128xf32>
    %c0_111 = arith.constant 0 : index
    %c0_112 = arith.constant 0 : index
    %161 = vector.load %arg14[%c0_111, %c0_112] : memref<1x128xf32, #tpu.memory_space<vmem>>, vector<1x128xf32>
    %162 = vector.shape_cast %161 : vector<1x128xf32> to vector<128xf32>
    %163 = vector.shape_cast %162 : vector<128xf32> to vector<1x128xf32>
    %164 = vector.broadcast %163 : vector<1x128xf32> to vector<288x128xf32>
    %165 = arith.addf %160, %164 : vector<288x128xf32>
    %c0_113 = arith.constant 0 : index
    %c0_114 = arith.constant 0 : index
    %c0_115 = arith.constant 0 : index
    %166 = vector.load %arg16[%c0_113, %c0_114, %c0_115] : memref<1x288x128xf32, #tpu.memory_space<vmem>>, vector<1x288x128xf32>
    %167 = vector.shape_cast %166 : vector<1x288x128xf32> to vector<288x128xf32>
    %168 = vector.shape_cast %165 : vector<288x128xf32> to vector<1x288x128xf32>
    tpu.vector_store %arg16[%c0_113, %c0_114, %c0_115], %168 {strides = array<i32>} : memref<1x288x128xf32, #tpu.memory_space<vmem>>, vector<1x288x128xf32>,
    return
  }
  func.func @transform_0(%arg0: i32) -> (i32, i32) {
    %c0_i32 = arith.constant 0 : i32
    %c0_i32_0 = arith.constant 0 : i32
    %c0_i32_1 = arith.constant 0 : i32
    return %c0_i32, %c0_i32_0 : i32, i32
  }
  func.func @transform_1(%arg0: i32) -> (i32, i32) {
    %c0_i32 = arith.constant 0 : i32
    %c0_i32_0 = arith.constant 0 : i32
    %c0_i32_1 = arith.constant 0 : i32
    return %c0_i32, %c0_i32_0 : i32, i32
  }
  func.func @transform_2(%arg0: i32) -> (i32, i32, i32) {
    %c0_i32 = arith.constant 0 : i32
    %c0_i32_0 = arith.constant 0 : i32
    %c0_i32_1 = arith.constant 0 : i32
    return %arg0, %c0_i32, %c0_i32_0 : i32, i32, i32
  }
  func.func @transform_3(%arg0: i32) -> (i32, i32, i32) {
    %c0_i32 = arith.constant 0 : i32
    %c0_i32_0 = arith.constant 0 : i32
    %c0_i32_1 = arith.constant 0 : i32
    return %arg0, %c0_i32, %c0_i32_0 : i32, i32, i32
  }
  func.func @transform_4(%arg0: i32) -> (i32, i32) {
    %c0_i32 = arith.constant 0 : i32
    %c0_i32_0 = arith.constant 0 : i32
    %c0_i32_1 = arith.constant 0 : i32
    return %c0_i32, %c0_i32_0 : i32, i32
  }
  func.func @transform_5(%arg0: i32) -> (i32, i32) {
    %c0_i32 = arith.constant 0 : i32
    %c0_i32_0 = arith.constant 0 : i32
    %c0_i32_1 = arith.constant 0 : i32
    return %c0_i32, %c0_i32_0 : i32, i32
  }
  func.func @transform_6(%arg0: i32) -> (i32, i32) {
    %c0_i32 = arith.constant 0 : i32
    %c0_i32_0 = arith.constant 0 : i32
    %c0_i32_1 = arith.constant 0 : i32
    return %c0_i32, %c0_i32_0 : i32, i32
  }
  func.func @transform_7(%arg0: i32) -> (i32, i32) {
    %c0_i32 = arith.constant 0 : i32
    %c0_i32_0 = arith.constant 0 : i32
    %c0_i32_1 = arith.constant 0 : i32
    return %c0_i32, %c0_i32_0 : i32, i32
  }
  func.func @transform_8(%arg0: i32) -> (i32, i32) {
    %c0_i32 = arith.constant 0 : i32
    %c0_i32_0 = arith.constant 0 : i32
    %c0_i32_1 = arith.constant 0 : i32
    return %c0_i32, %c0_i32_0 : i32, i32
  }
  func.func @transform_9(%arg0: i32) -> (i32, i32) {
    %c0_i32 = arith.constant 0 : i32
    %c0_i32_0 = arith.constant 0 : i32
    %c0_i32_1 = arith.constant 0 : i32
    return %c0_i32, %c0_i32_0 : i32, i32
  }
  func.func @transform_10(%arg0: i32) -> (i32, i32) {
    %c0_i32 = arith.constant 0 : i32
    %c0_i32_0 = arith.constant 0 : i32
    %c0_i32_1 = arith.constant 0 : i32
    return %c0_i32, %c0_i32_0 : i32, i32
  }
  func.func @transform_11(%arg0: i32) -> (i32, i32) {
    %c0_i32 = arith.constant 0 : i32
    %c0_i32_0 = arith.constant 0 : i32
    %c0_i32_1 = arith.constant 0 : i32
    return %c0_i32, %c0_i32_0 : i32, i32
  }
  func.func @transform_12(%arg0: i32) -> (i32, i32) {
    %c0_i32 = arith.constant 0 : i32
    %c0_i32_0 = arith.constant 0 : i32
    %c0_i32_1 = arith.constant 0 : i32
    return %c0_i32, %c0_i32_0 : i32, i32
  }
  func.func @transform_13(%arg0: i32) -> (i32, i32) {
    %c0_i32 = arith.constant 0 : i32
    %c0_i32_0 = arith.constant 0 : i32
    %c0_i32_1 = arith.constant 0 : i32
    return %c0_i32, %c0_i32_0 : i32, i32
  }
  func.func @transform_14(%arg0: i32) -> i32 {
    %c0_i32 = arith.constant 0 : i32
    %c0_i32_0 = arith.constant 0 : i32
    return %c0_i32 : i32
  }
  func.func @transform_15(%arg0: i32) -> (i32, i32, i32) {
    %c0_i32 = arith.constant 0 : i32
    %c0_i32_0 = arith.constant 0 : i32
    %c0_i32_1 = arith.constant 0 : i32
    return %arg0, %c0_i32, %c0_i32_0 : i32, i32, i32
  }
}

</mosaic_0001>

<bundles_post_ra>
// kernel: feature_decoding_end.1
= control target key start
LH: loop header
LB: loop body
LE: loop exit
PB: predicated region body
PF: predicated region fallthrough
CT: control target
= control target key end

     0   :  { %s12870_s20 = smov 0   ;;  %s16656_s0 = inlined_call_operand.vmem [shape: bf16[288,288], index: 0, kind: input, shape index: {}]   ;;  %s16657_s1 = inlined_call_operand.vmem [shape: f32[288,1], index: 1, kind: input, shape index: {}]   ;;  %s16658_s2 = inlined_call_operand.vmem [shape: bf16[2,88,256], index: 2, kind: input, shape index: {}]   ;;  %s16659_s3 = inlined_call_operand.vmem [shape: bf16[2,288,64], index: 3, kind: input, shape index: {}]   ;;  %s16660_s4 = inlined_call_operand.vmem [shape: bf16[256,576], index: 4, kind: input, shape index: {}]   ;;  %s16661_s5 = inlined_call_operand.vmem [shape: bf16[1152,64], index: 5, kind: input, shape index: {}]   ;;  %s16662_s6 = inlined_call_operand.vmem [shape: bf16[576,64], index: 6, kind: input, shape index: {}]   ;;  %s16663_s7 = inlined_call_operand.vmem [shape: bf16[576,64], index: 7, kind: input, shape index: {}]   ;;  %s16664_s8 = inlined_call_operand.vmem [shape: bf16[576,128], index: 8, kind: input, shape index: {}]   ;;  %s16665_s9 = inlined_call_operand.vmem [shape: f32[1,64], index: 9, kind: input, shape index: {}]   ;;  %s16666_s10 = inlined_call_operand.vmem [shape: f32[1,64], index: 10, kind: input, shape index: {}]   ;;  %s16667_s11 = inlined_call_operand.vmem [shape: f32[1,64], index: 11, kind: input, shape index: {}]   ;;  %s16668_s12 = inlined_call_operand.vmem [shape: f32[1,64], index: 12, kind: input, shape index: {}]   ;;  %s16669_s13 = inlined_call_operand.vmem [shape: f32[1,128], index: 13, kind: input, shape index: {}]   ;;  %s16670_s14 = inlined_call_operand.<no memory space> [shape: f32[1], index: 14, kind: input, shape index: {}]   ;;  %s16671_s15 = inlined_call_operand.vmem [shape: f32[2,288,128], index: 15, kind: output, shape index: {}]  }
   0x1   :  { %20 = sst [smem:[#allocation3]] %s16670_s14 }
   0x2 LB: > { %s10777_s21 = sadd.s32 4294967295, %s12781_s20   ;;  %p10781_p0 = scmp.ge.s32.totalorder %s12781_s20, 1  ;;  %s12781_s20 = sphi %s12870_s20, %s26_s20  }
   0x3   : > { %p448_p1 = scmp.lt.s32.totalorder %s12781_s20, 3 }
   0x5   : > { %p449_p2 = pnand %p10781_p0, %p448_p1 }
   0x7   : > { %452 = sbr.rel (%p449_p2) target bundleno = 3119 (0xc2f), region = 80 }
   0xe   : > { %v12389_v0 = vld [vmem:[%s16660_s4 + $0x4] ss:$20 sps:$4 sm:$0xff]   ;;  %v12391_v1 = vld [vmem:[%s16660_s4 + $0xc] ss:$20 sps:$4 sm:$0xff]   ;;  %v12394_v3 = vld [vmem:[%s16660_s4 + $0x8] ss:$20 sps:$4 sm:$0xff]  }
   0xf   : > { %1175 = vmatprep.subr.bf16.mxu0 %v12389_v0  ;;  %v12393_v2 = vld [vmem:[%s16660_s4] ss:$20 sps:$4 sm:$0xff]   ;;  %1265 = vmatprep.subr.bf16.mxu1 %v12391_v1  ;;  %v12399_v6 = vld [vmem:[%s16660_s4 + $0x28] ss:$20 sps:$4 sm:$0xff]   ;;  %v12400_v7 = vld [vmem:[%s16660_s4 + $0x30] ss:$20 sps:$4 sm:$0xff]  }
  0x10   : > { %v12395_v4 = vld [vmem:[%s16660_s4 + $0x2c] ss:$20 sps:$4 sm:$0xff]   ;;  %1176 = vmatpush1.bf16.msra.mxu0 %v12393_v2  ;;  %1266 = vmatpush1.bf16.msra.mxu1 %v12394_v3  ;;  %v12397_v5 = vld [vmem:[%s16660_s4 + $0x34] ss:$20 sps:$4 sm:$0xff]   ;;  %v12403_v9 = vld [vmem:[%s16660_s4 + $0x5c] ss:$20 sps:$4 sm:$0xff]  }
  0x11   : > { %1177 = vmatprep.subr.bf16.mxu0 %v12395_v4  ;;  %1267 = vmatprep.subr.bf16.mxu1 %v12397_v5  ;;  %v12401_v8 = vld [vmem:[%s16660_s4 + $0x54] ss:$20 sps:$4 sm:$0xff]   ;;  %v12405_v10 = vld [vmem:[%s16660_s4 + $0x50] ss:$20 sps:$4 sm:$0xff]   ;;  %v12406_v11 = vld [vmem:[%s16660_s4 + $0x58] ss:$20 sps:$4 sm:$0xff]  }
  0x12   : > { %v12407_v12 = vld [vmem:[%s16660_s4 + $0x7c] ss:$20 sps:$4 sm:$0xff]   ;;  %v12409_v13 = vld [vmem:[%s16660_s4 + $0x84] ss:$20 sps:$4 sm:$0xff]   ;;  %v12412_v15 = vld [vmem:[%s16660_s4 + $0x80] ss:$20 sps:$4 sm:$0xff]  }
  0x13   : > { %v12411_v14 = vld [vmem:[%s16660_s4 + $0x78] ss:$20 sps:$4 sm:$0xff]   ;;  %v12417_v18 = vld [vmem:[%s16660_s4 + $0xa0] ss:$20 sps:$4 sm:$0xff]   ;;  %v12418_v19 = vld [vmem:[%s16660_s4 + $0xa8] ss:$20 sps:$4 sm:$0xff]  }
  0x14   : > { %1178 = vmatpush1.bf16.msra.mxu0 %v12399_v6  ;;  %1268 = vmatpush1.bf16.msra.mxu1 %v12400_v7  ;;  %v12413_v16 = vld [vmem:[%s16660_s4 + $0xa4] ss:$20 sps:$4 sm:$0xff]   ;;  %v12415_v17 = vld [vmem:[%s16660_s4 + $0xac] ss:$20 sps:$4 sm:$0xff]   ;;  %v12421_v21 = vld [vmem:[%s16660_s4 + $0xd4] ss:$20 sps:$4 sm:$0xff]  }
  0x15   : > { %1179 = vmatprep.subr.bf16.mxu0 %v12401_v8  ;;  %1269 = vmatprep.subr.bf16.mxu1 %v12403_v9  ;;  %v12419_v20 = vld [vmem:[%s16660_s4 + $0xcc] ss:$20 sps:$4 sm:$0xff]   ;;  %v12423_v22 = vld [vmem:[%s16660_s4 + $0xc8] ss:$20 sps:$4 sm:$0xff]   ;;  %v12424_v23 = vld [vmem:[%s16660_s4 + $0xd0] ss:$20 sps:$4 sm:$0xff]  }
  0x16   : > { %v12425_v24 = vld [vmem:[%s16660_s4 + $0xf4] ss:$20 sps:$4 sm:$0xff]   ;;  %v12427_v25 = vld [vmem:[%s16660_s4 + $0xfc] ss:$20 sps:$4 sm:$0xff]   ;;  %v12430_v27 = vld [vmem:[%s16660_s4 + $0xf8] ss:$20 sps:$4 sm:$0xff]  }
  0x17   : > { %v12429_v26 = vld [vmem:[%s16660_s4 + $0xf0] ss:$20 sps:$4 sm:$0xff]   ;;  %v12435_v30 = vld [vmem:[%s16660_s4 + $0x118] ss:$20 sps:$4 sm:$0xff]   ;;  %v12436_v31 = vld [vmem:[%s16660_s4 + $0x120] ss:$20 sps:$4 sm:$0xff]  }
  0x18   : > { %1180 = vmatpush1.bf16.msra.mxu0 %v12405_v10  ;;  %1270 = vmatpush1.bf16.msra.mxu1 %v12406_v11  ;;  %v12431_v28 = vld [vmem:[%s16660_s4 + $0x11c] ss:$20 sps:$4 sm:$0xff]   ;;  %v12433_v29 = vld [vmem:[%s16660_s4 + $0x124] ss:$20 sps:$4 sm:$0xff]   ;;  %p501_p3 = scmp.lt.s32.totalorder %s10777_s21, 1  ;;  %vm1441_vm0 = vcmask 1046528  }
  0x19   : > { %1181 = vmatprep.subr.bf16.mxu0 %v12407_v12  ;;  %1271 = vmatprep.subr.bf16.mxu1 %v12409_v13  ;;  %v12437_v32 = vld [vmem:[%s16660_s4 + $0x144] ss:$20 sps:$4 sm:$0xff]   ;;  %v12439_v33 = vld [vmem:[%s16660_s4 + $0x14c] ss:$20 sps:$4 sm:$0xff]   ;;  %v12442_v35 = vld [vmem:[%s16660_s4 + $0x148] ss:$20 sps:$4 sm:$0xff]  }
  0x1a   : > { %v12441_v34 = vld [vmem:[%s16660_s4 + $0x140] ss:$20 sps:$4 sm:$0xff]   ;;  %s16881_s21 = smov (!%p501_p3, %s10777_s21), 1  ;;  %v12447_v38 = vld [vmem:[%s16660_s4 + $0x168] ss:$20 sps:$4 sm:$0xff]   ;;  %vm1586_vm1 = vcmask 1045504  }
  0x1b   : > { %v12443_v36 = vld [vmem:[%s16660_s4 + $0x16c] ss:$20 sps:$4 sm:$0xff]   ;;  %v12445_v37 = vld [vmem:[%s16660_s4 + $0x174] ss:$20 sps:$4 sm:$0xff]   ;;  %v12448_v39 = vld [vmem:[%s16660_s4 + $0x170] ss:$20 sps:$4 sm:$0xff]  }
  0x1c   : > { %1182 = vmatpush1.bf16.msra.mxu0 %v12411_v14  ;;  %1272 = vmatpush1.bf16.msra.mxu1 %v12412_v15  ;;  %v12449_v40 = vld [vmem:[%s16660_s4 + $0x194] ss:$20 sps:$4 sm:$0xff]   ;;  %s12243_s18 = smul.u32 88, %s16881_s21  ;;  %v12451_v41 = vld [vmem:[%s16660_s4 + $0x19c] ss:$20 sps:$4 sm:$0xff]   ;;  %vm2279_vm2 = vcmask 261120  }
  0x1d   : > { %1183 = vmatprep.subr.bf16.mxu0 %v12413_v16  ;;  %1273 = vmatprep.subr.bf16.mxu1 %v12415_v17  ;;  %v12453_v42 = vld [vmem:[%s16660_s4 + $0x190] ss:$20 sps:$4 sm:$0xff]   ;;  %v12454_v43 = vld [vmem:[%s16660_s4 + $0x198] ss:$20 sps:$4 sm:$0xff]   ;;  %v12460_v47 = vld [vmem:[%s16660_s4 + $0x1c0] ss:$20 sps:$4 sm:$0xff]  }
  0x1e   : > { %v12455_v44 = vld [vmem:[%s16660_s4 + $0x1bc] ss:$20 sps:$4 sm:$0xff]   ;;  %s13023_s30 = scalar_lea.vmem %s16658_s2, %s12243_s18  ;;  %v12457_v45 = vld [vmem:[%s16660_s4 + $0x1c4] ss:$20 sps:$4 sm:$0xff]   ;;  %v12463_v50 = vld [vmem:[%s16660_s4 + $0x1ec] ss:$20 sps:$4 sm:$0xff]  }
  0x1f   : > { %v12459_v46 = vld [vmem:[%s16660_s4 + $0x1b8] ss:$20 sps:$4 sm:$0xff]   ;;  %v12465_v51 = vld [vmem:[%s16660_s4 + $0x1e0] ss:$20 sps:$4 sm:$0xff]   ;;  %v12466_v52 = vld [vmem:[%s16660_s4 + $0x1e8] ss:$20 sps:$4 sm:$0xff]  }
  0x20   : > { %1184 = vmatpush1.bf16.msra.mxu0 %v12417_v18  ;;  %1274 = vmatpush1.bf16.msra.mxu1 %v12418_v19  ;;  %v13035_v48 = vld [vmem:[%s13023_s30 + $0x4] ss:$8 sps:$4 sm:$0xff]   ;;  %v12469_v54 = vld [vmem:[%s16660_s4 + $0x214] ss:$20 sps:$4 sm:$0xff]   ;;  %v12475_v58 = vld [vmem:[%s16660_s4 + $0x23c] ss:$20 sps:$4 sm:$0xff]  }
  0x21   : > { %1185 = vmatprep.subr.bf16.mxu0 %v12419_v20  ;;  %1275 = vmatprep.subr.bf16.mxu1 %v12421_v21  ;;  %v12461_v49 = vld [vmem:[%s16660_s4 + $0x1e4] ss:$20 sps:$4 sm:$0xff]   ;;  %v12467_v53 = vld [vmem:[%s16660_s4 + $0x20c] ss:$20 sps:$4 sm:$0xff]   ;;  %v12471_v55 = vld [vmem:[%s16660_s4 + $0x208] ss:$20 sps:$4 sm:$0xff]  }
  0x22   : > { %1207 = vmatprep.mubr.bf16.mxu0 %v13035_v48  ;;  %1297 = vmatprep.mubr.bf16.mxu1 %v13035_v48  ;;  %v12472_v56 = vld [vmem:[%s16660_s4 + $0x210] ss:$20 sps:$4 sm:$0xff]   ;;  %v12473_v57 = vld [vmem:[%s16660_s4 + $0x234] ss:$20 sps:$4 sm:$0xff]   ;;  %v12478_v60 = vld [vmem:[%s16660_s4 + $0x238] ss:$20 sps:$4 sm:$0xff]  }
  0x23   : > { %v12477_v59 = vld [vmem:[%s16660_s4 + $0x230] ss:$20 sps:$4 sm:$0xff]   ;;  %v12483_v63 = vld [vmem:[%s16660_s4 + $0x258] ss:$20 sps:$4 sm:$0xff]   ;;  %v12484_v0 = vld [vmem:[%s16660_s4 + $0x260] ss:$20 sps:$4 sm:$0xff]  }
  0x24   : > { %1186 = vmatpush1.bf16.msra.mxu0 %v12423_v22  ;;  %1276 = vmatpush1.bf16.msra.mxu1 %v12424_v23  ;;  %v12479_v61 = vld [vmem:[%s16660_s4 + $0x25c] ss:$20 sps:$4 sm:$0xff]   ;;  %v12481_v62 = vld [vmem:[%s16660_s4 + $0x264] ss:$20 sps:$4 sm:$0xff]   ;;  %v13091_v2 = vld [vmem:[%s13023_s30] ss:$8 sps:$4 sm:$0xff]  }
  0x25   : > { %1187 = vmatprep.subr.bf16.mxu0 %v12425_v24  ;;  %1277 = vmatprep.subr.bf16.mxu1 %v12427_v25  ;;  %v12494_v1 = vld [vmem:[%s16660_s4 + $0x150] ss:$20 sps:$4 sm:$0xff]   ;;  %v13094_v3 = vld [vmem:[%s13023_s30 + $0x14] ss:$8 sps:$4 sm:$0xff]   ;;  %v12496_v5 = vld [vmem:[%s16660_s4 + $0x178] ss:$20 sps:$4 sm:$0xff]  }
  0x26   : > { %v12495_v4 = vld [vmem:[%s16660_s4 + $0x10] ss:$20 sps:$4 sm:$0xff]   ;;  %v12497_v6 = vld [vmem:[%s16660_s4 + $0x38] ss:$20 sps:$4 sm:$0xff]   ;;  %v12501_v7 = vld [vmem:[%s16660_s4 + $0x1a0] ss:$20 sps:$4 sm:$0xff]  }
  0x27   : > { %v12490_v8 = vld [vmem:[%s13023_s30 + $0x10] ss:$8 sps:$4 sm:$0xff]   ;;  %v12491_v9 = vld [vmem:[%s13023_s30 + $0x24] ss:$8 sps:$4 sm:$0xff]   ;;  %v12502_v10 = vld [vmem:[%s16660_s4 + $0x60] ss:$20 sps:$4 sm:$0xff]  }
  0x28   : > { %1188 = vmatpush1.bf16.msra.mxu0 %v12429_v26  ;;  %1278 = vmatpush1.bf16.msra.mxu1 %v12430_v27  ;;  %v12503_v11 = vld [vmem:[%s16660_s4 + $0x1c8] ss:$20 sps:$4 sm:$0xff]   ;;  %v12508_v13 = vld [vmem:[%s16660_s4 + $0x1f0] ss:$20 sps:$4 sm:$0xff]   ;;  %v12510_v17 = vld [vmem:[%s16660_s4 + $0x218] ss:$20 sps:$4 sm:$0xff]  }
  0x29   : > { %1189 = vmatprep.subr.bf16.mxu0 %v12431_v28  ;;  %1279 = vmatprep.subr.bf16.mxu1 %v12433_v29  ;;  %v12504_v12 = vld [vmem:[%s16660_s4 + $0x88] ss:$20 sps:$4 sm:$0xff]   ;;  %v12509_v16 = vld [vmem:[%s16660_s4 + $0xb0] ss:$20 sps:$4 sm:$0xff]   ;;  %v12511_v18 = vld [vmem:[%s16660_s4 + $0xd8] ss:$20 sps:$4 sm:$0xff]  }
  0x2a   : > { %v12493_v14 = vld [vmem:[%s13023_s30 + $0x20] ss:$8 sps:$4 sm:$0xff]   ;;  %v12498_v15 = vld [vmem:[%s13023_s30 + $0x34] ss:$8 sps:$4 sm:$0xff]   ;;  %v12500_v20 = vld [vmem:[%s13023_s30 + $0x30] ss:$8 sps:$4 sm:$0xff]  }
  0x2b   : > { %v12514_v19 = vld [vmem:[%s16660_s4 + $0x240] ss:$20 sps:$4 sm:$0xff]   ;;  %v12505_v21 = vld [vmem:[%s13023_s30 + $0x44] ss:$8 sps:$4 sm:$0xff]   ;;  %v12516_v23 = vld [vmem:[%s16660_s4 + $0x268] ss:$20 sps:$4 sm:$0xff]  }
  0x2c   : > { %1190 = vmatpush1.bf16.msra.mxu0 %v12435_v30  ;;  %1280 = vmatpush1.bf16.msra.mxu1 %v12436_v31  ;;  %v12515_v22 = vld [vmem:[%s16660_s4 + $0x100] ss:$20 sps:$4 sm:$0xff]   ;;  %v12517_v25 = vld [vmem:[%s16660_s4 + $0x128] ss:$20 sps:$4 sm:$0xff]   ;;  %v16672_v29 = vmov 0   ;;  %s12244_s14 = smul.u32 144, %s16881_s21 }
  0x2d   : > { %1191 = vmatprep.subr.bf16.mxu0 %v12437_v32  ;;  %1281 = vmatprep.subr.bf16.mxu1 %v12439_v33  ;;  %v605_v24 = vld [vmem:[%s13023_s30 + $0x50] sm:$0xff]  ;;  %v12507_v26 = vld [vmem:[%s13023_s30 + $0x40] ss:$8 sps:$4 sm:$0xff]   ;;  %s12784_s30 = smov 64   ;;  %vm2904_vm3 = vcmask 523264   ;;  %s517_s29 = sld [smem:[#allocation3]] }
  0x2e   : > { %v10796_v27 = vcombine.high %v605_v24, %v605_v24  ;;  %v10795_v28 = vcombine.low %v605_v24, %v605_v24  ;;  %12298 = vset.pattern.permute.xlu1 %v16672_v29  ;;  %12297 = vset.pattern.permute.xlu0 %v16672_v29  ;;  %s13291_s25 = scalar_lea.vmem %s16659_s3, %s12244_s14 }
  0x30   : > { %1192 = vmatpush1.bf16.msra.mxu0 %v12441_v34  ;;  %1282 = vmatpush1.bf16.msra.mxu1 %v12442_v35 }
  0x31   : > { %1193 = vmatprep.subr.bf16.mxu0 %v12443_v36  ;;  %1283 = vmatprep.subr.bf16.mxu1 %v12445_v37 }
  0x34   : > { %1194 = vmatpush1.bf16.msra.mxu0 %v12447_v38  ;;  %1284 = vmatpush1.bf16.msra.mxu1 %v12448_v39 }
  0x35   : > { %1195 = vmatprep.subr.bf16.mxu0 %v12449_v40  ;;  %1285 = vmatprep.subr.bf16.mxu1 %v12451_v41 }
  0x38   : > { %1196 = vmatpush1.bf16.msra.mxu0 %v12453_v42  ;;  %1286 = vmatpush1.bf16.msra.mxu1 %v12454_v43 }
  0x39   : > { %1197 = vmatprep.subr.bf16.mxu0 %v12455_v44  ;;  %1287 = vmatprep.subr.bf16.mxu1 %v12457_v45 }
  0x3c   : > { %1198 = vmatpush1.bf16.msra.mxu0 %v12459_v46  ;;  %1288 = vmatpush1.bf16.msra.mxu1 %v12460_v47 }
  0x3d   : > { %1199 = vmatprep.subr.bf16.mxu0 %v12461_v49  ;;  %1289 = vmatprep.subr.bf16.mxu1 %v12463_v50 }
  0x40   : > { %1200 = vmatpush1.bf16.msra.mxu0 %v12465_v51  ;;  %1290 = vmatpush1.bf16.msra.mxu1 %v12466_v52 }
  0x41   : > { %1201 = vmatprep.subr.bf16.mxu0 %v12467_v53  ;;  %1291 = vmatprep.subr.bf16.mxu1 %v12469_v54 }
  0x44   : > { %1202 = vmatpush1.bf16.msra.mxu0 %v12471_v55  ;;  %1292 = vmatpush1.bf16.msra.mxu1 %v12472_v56 }
  0x45   : > { %1203 = vmatprep.subr.bf16.mxu0 %v12473_v57  ;;  %1293 = vmatprep.subr.bf16.mxu1 %v12475_v58 }
  0x48   : > { %1204 = vmatpush1.bf16.msra.mxu0 %v12477_v59  ;;  %1294 = vmatpush1.bf16.msra.mxu1 %v12478_v60 }
  0x49   : > { %1205 = vmatprep.subr.bf16.mxu0 %v12479_v61  ;;  %1295 = vmatprep.subr.bf16.mxu1 %v12481_v62 }
  0x4c   : > { %1206 = vmatpush1.bf16.msra.mxu0 %v12483_v63  ;;  %1296 = vmatpush1.bf16.msra.mxu1 %v12484_v0 }
  0x4d   : > { %11279 = vmatprep.subr.bf16.mxu1 %v12494_v1 }
  0x4f   : > { %1208 = vmatmul.mubr.bf16.vlgmr.msra.gmra.mrb[0].mxu0 %v13091_v2  ;;  %1298 = vmatmul.mubr.bf16.vlgmr.msra.gmra.mrb[0].mxu1 %v13091_v2 }
  0x50   : > { %1216 = vmatprep.mubr.bf16.mxu0 %v13094_v3  ;;  %1307 = vmatprep.mubr.bf16.mxu1 %v13094_v3 }
  0x51   : > { %11280 = vmatpush3.bf16.msra.mxu1 %v12495_v4 }
  0x52   : > { %11281 = vmatprep.subr.bf16.mxu1 %v12496_v5 }
  0x55   : > { %11282 = vmatpush3.bf16.msra.mxu1 %v12497_v6 }
  0x56   : > { %11283 = vmatprep.subr.bf16.mxu1 %v12501_v7 }
  0x57   : > { %1217 = vmatmul.mubr.bf16.gmra.mrb[4].mxu0 %v12490_v8  ;;  %1308 = vmatmul.mubr.bf16.gmra.mrb[4].mxu1 %v12490_v8 }
  0x58   : > { %1226 = vmatprep.mubr.bf16.mxu0 %v12491_v9  ;;  %1317 = vmatprep.mubr.bf16.mxu1 %v12491_v9 }
  0x59   : > { %11284 = vmatpush3.bf16.msra.mxu1 %v12502_v10 }
  0x5a   : > { %11285 = vmatprep.subr.bf16.mxu1 %v12503_v11 }
  0x5d   : > { %11286 = vmatpush3.bf16.msra.mxu1 %v12504_v12 }
  0x5e   : > { %11287 = vmatprep.subr.bf16.mxu1 %v12508_v13 }
  0x5f   : > { %1227 = vmatmul.mubr.bf16.gmra.mrb[8].mxu0 %v12493_v14  ;;  %1318 = vmatmul.mubr.bf16.gmra.mrb[8].mxu1 %v12493_v14 }
  0x60   : > { %1236 = vmatprep.mubr.bf16.mxu0 %v12498_v15  ;;  %1327 = vmatprep.mubr.bf16.mxu1 %v12498_v15 }
  0x61   : > { %11288 = vmatpush3.bf16.msra.mxu1 %v12509_v16 }
  0x62   : > { %11289 = vmatprep.subr.bf16.mxu1 %v12510_v17 }
  0x65   : > { %11290 = vmatpush3.bf16.msra.mxu1 %v12511_v18 }
  0x66   : > { %11291 = vmatprep.subr.bf16.mxu1 %v12514_v19 }
  0x67   : > { %1237 = vmatmul.mubr.bf16.gmra.mrb[12].mxu0 %v12500_v20  ;;  %1328 = vmatmul.mubr.bf16.gmra.mrb[12].mxu1 %v12500_v20 }
  0x68   : > { %1246 = vmatprep.mubr.bf16.mxu0 %v12505_v21  ;;  %1337 = vmatprep.mubr.bf16.mxu1 %v12505_v21 }
  0x69   : > { %11292 = vmatpush3.bf16.msra.mxu1 %v12515_v22 }
  0x6a   : > { %11293 = vmatprep.subr.bf16.mxu1 %v12516_v23 }
  0x6d   : > { %11294 = vmatpush3.bf16.msra.mxu1 %v12517_v25 }
  0x6e   : > { %2334 = vmatprep.subr.bf16.mxu1 %v16672_v29 }
  0x6f   : > { %1247 = vmatmul.mubr.bf16.gmra.mrb[16].mxu0 %v12507_v26  ;;  %1338 = vmatmul.mubr.bf16.gmra.mrb[16].mxu1 %v12507_v26 }
  0x70   : > { %1256 = vmatprep.mubr.bf16.mxu0 %v10796_v27  ;;  %1346 = vmatprep.mubr.bf16.mxu1 %v10796_v27 }
  0x77   : > { %1257 = vmatmul.mubr.bf16.gmra.mrb[20].mxu0 %v10795_v28  ;;  %1347 = vmatmul.mubr.bf16.gmra.mrb[20].mxu1 %v10795_v28 }
  0x78   : > { %1385 = vmatprep.mubr.bf16.mxu1 %v13035_v48 }
  0x7f   : > { %1386 = vmatmul.mubr.bf16.vlgmr.msra.gmra.mrb[24].mxu1 %v13091_v2 }
  0x80   : > { %1393 = vmatprep.mubr.bf16.mxu1 %v13094_v3 }
  0x87   : > { %1394 = vmatmul.mubr.bf16.gmra.mrb[28].mxu1 %v12490_v8 }
  0x88   : > { %1401 = vmatprep.mubr.bf16.mxu1 %v12491_v9 }
  0x8f   : > { %1402 = vmatmul.mubr.bf16.gmra.mrb[32].mxu1 %v12493_v14 }
  0x90   : > { %1409 = vmatprep.mubr.bf16.mxu1 %v12498_v15 }
  0x97   : > { %1410 = vmatmul.mubr.bf16.gmra.mrb[36].mxu1 %v12500_v20 }
  0x98   : > { %1417 = vmatprep.mubr.bf16.mxu1 %v12505_v21 }
  0x9f   : > { %1418 = vmatmul.mubr.bf16.gmra.mrb[40].mxu1 %v12507_v26 }
  0xa0   : > { %1424 = vmatprep.mubr.bf16.mxu1 %v10796_v27 }
  0xa7   : > { %1425 = vmatmul.mubr.bf16.gmra.mrb[44].mxu1 %v10795_v28 }
 0x122   : > { %v1209_v30 = vpop.f32.mrb[0].mxu0  ;;  %v1299_v31 = vpop.f32.mrb[0].mxu1 }
 0x123   : > { %v1210_v32 = vpop.f32.mrb[1].mxu0  ;;  %v1301_v33 = vpop.f32.mrb[1].mxu1 }
 0x124   : > { %v1212_v34 = vpop.f32.mrb[2].mxu0  ;;  %v1536_v35 = vrot.slane %v1301_v33, 1  ;;  %v1303_v36 = vpop.f32.mrb[2].mxu1  ;;  %v1442_v40 = vrot.slane %v1210_v32, 1 }
 0x125   : > { %v1214_v37 = vpop.f32.mrb[3].mxu0  ;;  %v1696_v38 = vpack.c.bf16 %v1303_v36, %v1299_v31  ;;  %v1305_v39 = vpop.f32.mrb[3].mxu1  ;;  %v1489_v48 = vrot.slane %v1212_v34, 1  ;;  %v1587_v52 = vrot.slane %v1212_v34, 2 }
 0x126   : > { %v1443_v41 = vrot.slane %v1214_v37, 1  ;;  %v1537_v42 = vrot.slane %v1305_v39, 1 }
 0x127   : > { %2335 = vmatpush1.bf16.msra.mxu1 %v1696_v38 }
 0x128   : > { %v1444_v43 = vsel %vm1441_vm0, %v1442_v40, %v1443_v41  ;;  %2336 = vmatprep.subr.bf16.mxu1 %v16672_v29  ;;  %v13162_v44 = vsel %vm1441_vm0, %v1536_v35, %v1537_v42 }
 0x129   : > { %v1470_v45 = vadd.f32 %v1444_v43, %v1299_v31 }
 0x12a   : > { %v1218_v46 = vpop.f32.mrb[4].mxu0  ;;  %v1309_v47 = vpop.f32.mrb[4].mxu1 }
 0x12b   : > { %v1490_v49 = vrot.slane %v1218_v46, 1  ;;  %v1311_v50 = vpop.f32.mrb[5].mxu1  ;;  %1633 = vrot.lane.b32.xlu0 %v1470_v45, %s12784_s30  ;;  %v1220_v51 = vpop.f32.mrb[5].mxu0  ;;  %v1588_v53 = vrot.slane %v1218_v46, 2 }
 0x12c   : > { %v1539_v54 = vrot.slane %v1311_v50, 1  ;;  %v1445_v55 = vrot.slane %v1220_v51, 1  ;;  %v1222_v56 = vpop.f32.mrb[6].mxu0  ;;  %v1313_v57 = vpop.f32.mrb[6].mxu1 }
 0x12d   : > { %v1491_v58 = vsel %vm1441_vm0, %v1489_v48, %v1490_v49  ;;  %v1492_v59 = vrot.slane %v1222_v56, 1  ;;  %v1590_v60 = vrot.slane %v1222_v56, 2  ;;  %v1224_v61 = vpop.f32.mrb[7].mxu0  ;;  %v1697_v62 = vpack.c.bf16 %v1313_v57, %v1309_v47  ;;  %v1315_v63 = vpop.f32.mrb[7].mxu1 }
 0x12e   : > { %v13167_v0 = vsel %vm1441_vm0, %v1443_v41, %v1445_v55  ;;  %v1447_v1 = vrot.slane %v1224_v61, 1  ;;  %v1541_v2 = vrot.slane %v1315_v63, 1  ;;  %v13169_v3 = vadd.f32 %v1491_v58, %v1301_v33 }
 0x12f   : > { %v1493_v4 = vsel %vm1441_vm0, %v1490_v49, %v1492_v59  ;;  %v13173_v5 = vsel %vm1586_vm1, %v1588_v53, %v1590_v60  ;;  %2337 = vmatpush1.bf16.msra.mxu1 %v1697_v62  ;;  %v1471_v6 = vadd.f32 %v13167_v0, %v1303_v36  ;;  %v13177_v7 = vsel %vm1441_vm0, %v1537_v42, %v1539_v54 }
 0x130   : > { %v13180_v8 = vsel %vm1441_vm0, %v1445_v55, %v1447_v1  ;;  %2338 = vmatprep.subr.bf16.mxu1 %v16672_v29  ;;  %v13183_v9 = vadd.f32 %v1493_v4, %v1305_v39  ;;  %v13186_v10 = vsel %vm1441_vm0, %v1539_v54, %v1541_v2  ;;  %v13189_v11 = vsel %vm1586_vm1, %v1587_v52, %v1588_v53 }
 0x131   : > { %v1472_v12 = vadd.f32 %v13180_v8, %v1309_v47 }
 0x132   : > { %v1228_v13 = vpop.f32.mrb[8].mxu0  ;;  %v1319_v14 = vpop.f32.mrb[8].mxu1  ;;  %v12277_v15 = vpack.i.bf16 %v13183_v9, %v13169_v3 }
 0x133   : > { %v1494_v16 = vrot.slane %v1228_v13, 1  ;;  %v1592_v17 = vrot.slane %v1228_v13, 2  ;;  %v1230_v18 = vpop.f32.mrb[9].mxu0  ;;  %v1321_v19 = vpop.f32.mrb[9].mxu1  ;;  %v12257_v20 = vpack.i.bf16 %v1472_v12, %v1471_v6 }
 0x134   : > { %v1449_v21 = vrot.slane %v1230_v18, 1  ;;  %v1543_v22 = vrot.slane %v1321_v19, 1  ;;  %v1232_v23 = vpop.f32.mrb[10].mxu0  ;;  %v1323_v24 = vpop.f32.mrb[10].mxu1 }
 0x135   : > { %v1495_v25 = vsel %vm1441_vm0, %v1492_v59, %v1494_v16  ;;  %v13196_v26 = vsel %vm1586_vm1, %v1590_v60, %v1592_v17  ;;  %v1496_v27 = vrot.slane %v1232_v23, 1  ;;  %v1594_v28 = vrot.slane %v1232_v23, 2  ;;  %12258 = vrot.lane.b32.xlu0 %v12257_v20, %s12784_s30  ;;  %v1234_v30 = vpop.f32.mrb[11].mxu0  ;;  %v1325_v31 = vpop.f32.mrb[11].mxu1 }
 0x136   : > { %v1451_v32 = vrot.slane %v1234_v30, 1  ;;  %v1545_v33 = vrot.slane %v1325_v31, 1  ;;  %v1698_v34 = vpack.c.bf16 %v1323_v24, %v1319_v14  ;;  %v13200_v35 = vsel %vm1441_vm0, %v1447_v1, %v1449_v21 }
 0x137   : > { %v1497_v36 = vsel %vm1441_vm0, %v1494_v16, %v1496_v27  ;;  %v13204_v37 = vsel %vm1586_vm1, %v1592_v17, %v1594_v28  ;;  %v1473_v38 = vadd.f32 %v13200_v35, %v1313_v57  ;;  %v13207_v39 = vadd.f32 %v1495_v25, %v1311_v50 }
 0x138   : > { %2339 = vmatpush1.bf16.msra.mxu1 %v1698_v34  ;;  %v13210_v40 = vsel %vm1441_vm0, %v1449_v21, %v1451_v32  ;;  %v13212_v41 = vadd.f32 %v1497_v36, %v1315_v63  ;;  %v13215_v42 = vsel %vm1441_vm0, %v1541_v2, %v1543_v22  ;;  %v13218_v43 = vsel %vm1441_vm0, %v1543_v22, %v1545_v33 }
 0x139   : > { %v1474_v45 = vadd.f32 %v13210_v40, %v1319_v14  ;;  %2340 = vmatprep.subr.bf16.mxu1 %v16672_v29 }
 0x13a   : > { %v1238_v46 = vpop.f32.mrb[12].mxu0  ;;  %v1329_v47 = vpop.f32.mrb[12].mxu1  ;;  %v12282_v48 = vpack.i.bf16 %v13212_v41, %v13207_v39 }
 0x13b   : > { %v1498_v49 = vrot.slane %v1238_v46, 1  ;;  %v1596_v50 = vrot.slane %v1238_v46, 2  ;;  %v1240_v51 = vpop.f32.mrb[13].mxu0  ;;  %v1331_v52 = vpop.f32.mrb[13].mxu1  ;;  %v12262_v53 = vpack.i.bf16 %v1474_v45, %v1473_v38 }
 0x13c   : > { %v1453_v54 = vrot.slane %v1240_v51, 1  ;;  %v1547_v55 = vrot.slane %v1331_v52, 1  ;;  %v1242_v56 = vpop.f32.mrb[14].mxu0  ;;  %v1333_v57 = vpop.f32.mrb[14].mxu1 }
 0x13d   : > { %v1499_v58 = vsel %vm1441_vm0, %v1496_v27, %v1498_v49  ;;  %v13226_v59 = vsel %vm1586_vm1, %v1594_v28, %v1596_v50  ;;  %v1500_v60 = vrot.slane %v1242_v56, 1  ;;  %v1598_v61 = vrot.slane %v1242_v56, 2  ;;  %12263 = vrot.lane.b32.xlu1 %v12262_v53, %s12784_s30  ;;  %v1244_v62 = vpop.f32.mrb[15].mxu0  ;;  %v1335_v63 = vpop.f32.mrb[15].mxu1 }
 0x13e   : > { %v13230_v1 = vsel %vm1441_vm0, %v1451_v32, %v1453_v54  ;;  %v1455_v2 = vrot.slane %v1244_v62, 1  ;;  %v1549_v4 = vrot.slane %v1335_v63, 1  ;;  %v1699_v6 = vpack.c.bf16 %v1333_v57, %v1329_v47 }
 0x13f   : > { %v1501_v12 = vsel %vm1441_vm0, %v1498_v49, %v1500_v60  ;;  %v13234_v13 = vsel %vm1586_vm1, %v1596_v50, %v1598_v61  ;;  %v1475_v14 = vadd.f32 %v13230_v1, %v1323_v24  ;;  %v1521_v16 = vadd.f32 %v1499_v58, %v1321_v19 }
 0x140   : > { %v13238_v17 = vsel %vm1441_vm0, %v1453_v54, %v1455_v2  ;;  %2341 = vmatpush1.bf16.msra.mxu1 %v1699_v6  ;;  %v1522_v18 = vadd.f32 %v1501_v12, %v1325_v31  ;;  %v13241_v20 = vsel %vm1441_vm0, %v1545_v33, %v1547_v55  ;;  %v13244_v21 = vsel %vm1441_vm0, %v1547_v55, %v1549_v4 }
 0x141   : > { %v1476_v22 = vadd.f32 %v13238_v17, %v1329_v47  ;;  %2342 = vmatprep.subr.bf16.mxu1 %v16672_v29 }
 0x142   : > { %v1248_v23 = vpop.f32.mrb[16].mxu0  ;;  %v13248_v25 = vpop.f32.mrb[16].mxu1  ;;  %v12287_v24 = vpack.i.bf16 %v1522_v18, %v1521_v16 }
 0x143   : > { %v1502_v19 = vrot.slane %v1248_v23, 1  ;;  %v1600_v27 = vrot.slane %v1248_v23, 2  ;;  %v1250_v28 = vpop.f32.mrb[17].mxu0  ;;  %v1341_v30 = vpop.f32.mrb[17].mxu1  ;;  %v12267_v32 = vpack.i.bf16 %v1476_v22, %v1475_v14 }
 0x144   : > { %v1457_v31 = vrot.slane %v1250_v28, 1  ;;  %v1551_v34 = vrot.slane %v1341_v30, 1  ;;  %v1252_v33 = vpop.f32.mrb[18].mxu0  ;;  %v1343_v36 = vpop.f32.mrb[18].mxu1 }
 0x145   : > { %v1503_v38 = vsel %vm1441_vm0, %v1500_v60, %v1502_v19  ;;  %v13252_v45 = vsel %vm1586_vm1, %v1598_v61, %v1600_v27  ;;  %v1504_v46 = vrot.slane %v1252_v33, 1  ;;  %v1602_v47 = vrot.slane %v1252_v33, 2  ;;  %12268 = vrot.lane.b32.xlu1 %v12267_v32, %s12784_s30  ;;  %v1254_v49 = vpop.f32.mrb[19].mxu0  ;;  %v1344_v50 = vpop.f32.mrb[19].mxu1 }
 0x146   : > { %v13256_v51 = vsel %vm1441_vm0, %v1455_v2, %v1457_v31  ;;  %v1459_v53 = vrot.slane %v1254_v49, 1  ;;  %v1553_v54 = vrot.slane %v1344_v50, 1  ;;  %v1523_v55 = vadd.f32 %v1503_v38, %v1331_v52  ;;  %v518_v50 = vld [vmem:[%s16657_s1] sm:$0xff] }
 0x147   : > { %v1505_v56 = vsel %vm1441_vm0, %v1502_v19, %v1504_v46  ;;  %v13260_v58 = vsel %vm1586_vm1, %v1600_v27, %v1602_v47  ;;  %v1477_v60 = vadd.f32 %v13256_v51, %v1333_v57  ;;  %v13264_v61 = vsel %vm1441_vm0, %v1549_v4, %v1551_v34 }
 0x148   : > { %v13267_v62 = vsel %vm1441_vm0, %v1457_v31, %v1459_v53  ;;  %v1524_v6 = vadd.f32 %v1505_v56, %v1335_v63  ;;  %v13270_v2 = vsel %vm1441_vm0, %v1551_v34, %v1553_v54  ;;  %v519_v34 = vld [vmem:[%s16657_s1 + $0x8] sm:$0xff] }
 0x149   : > { %12278 = vrot.lane.b32.xlu1 %v12277_v15, %s12784_s30  ;;  %v1478_v52 = vadd.f32 %v13267_v62, %v13248_v25 }
 0x14a   : > { %v1258_v12 = vpop.f32.mrb[20].mxu0  ;;  %v1348_v57 = vpop.f32.mrb[20].mxu1  ;;  %v12292_v14 = vpack.i.bf16 %v1524_v6, %v1523_v55  ;;  %v521_v6 = vld [vmem:[%s16657_s1 + $0x18] sm:$0xff] }
 0x14b   : > { %v1506_v4 = vrot.slane %v1258_v12, 1  ;;  %v1604_v16 = vrot.slane %v1258_v12, 2  ;;  %v1260_v18 = vpop.f32.mrb[21].mxu0  ;;  %v12272_v22 = vpack.i.bf16 %v1478_v52, %v1477_v60  ;;  %v1349_v63 = vpop.f32.mrb[21].mxu1 }
 0x14c   : > { %v1574_v23 = vrot.slane %v1260_v18, 1  ;;  %v1350_v19 = vpop.f32.mrb[22].mxu1  ;;  %v1262_v27 = vpop.f32.mrb[22].mxu0  ;;  %v523_v18 = vld [vmem:[%s16657_s1 + $0x28] sm:$0xff] }
 0x14d   : > { %v13279_v28 = vsel %vm1586_vm1, %v1602_v47, %v1604_v16  ;;  %12288 = vrot.lane.b32.xlu1 %v12287_v24, %s12784_s30  ;;  %12273 = vrot.lane.b32.xlu0 %v12272_v22, %s12784_s30  ;;  %v1351_v3 = vpop.f32.mrb[23].mxu1  ;;  %v1507_v9 = vsel %vm1441_vm0, %v1504_v46, %v1506_v4  ;;  %v1263_v15 = vpop.f32.mrb[23].mxu0  ;;  %v522_v22 = vld [vmem:[%s16657_s1 + $0x20] sm:$0xff]  ;;  %v12518_v19 = vld [vmem:[%s16656_s0 + $0x8] ss:$12 sps:$4 sm:$0xff]  }
 0x14e   : > { %v13285_v32 = vsel %vm1441_vm0, %v1459_v53, %v1574_v23  ;;  %v1525_v31 = vadd.f32 %v1507_v9, %v1341_v30  ;;  %v11191_v30 = vld [vmem:[%s13291_s25] sm:$0xff]   ;;  %11447 = vmatprep.mubr.msk.bf16.mxu0 %vm2279_vm2, %v12518_v19 }
 0x14f   : > { %v11192_v47 = vunpack.c.l.bf16 %v11191_v30  ;;  %v11193_v49 = vunpack.c.h.bf16 %v11191_v30  ;;  %v12522_v9 = vld [vmem:[%s16656_s0 + $0x4] ss:$12 sps:$4 sm:$0xff]  }
 0x150   : > { %2366 = vmatprep.mubr.bf16.mxu1 %v12522_v9  ;;  %v530_v9 = vld [vmem:[%s16657_s1 + $0x60] sm:$0xff] }
 0x151   : > { %12283 = vrot.lane.b32.xlu0 %v12282_v48, %s12784_s30  ;;  %1685 = vrot.lane.b32.xlu1 %v1525_v31, %s12784_s30  ;;  %v520_v48 = vld [vmem:[%s16657_s1 + $0x10] sm:$0xff]  ;;  %v12299_v55 = vpack.i.bf16 %v11193_v49, %v11192_v47  ;;  %v525_v47 = vld [vmem:[%s16657_s1 + $0x38] sm:$0xff] }
 0x152   : > { %v11295_v24 = vpop.f32.mrb[24].mxu1  ;;  %v11264_v49 = vld [vmem:[%s13291_s25 + $0x18] sm:$0xff]  }
 0x153   : > { %v11296_v33 = vpop.f32.mrb[25].mxu1 }
 0x154   : > { %v11297_v36 = vadd.f32 %v11296_v33, %v11295_v24  ;;  %v11298_v38 = vpop.f32.mrb[26].mxu1 }
 0x155   : > { %v11299_v46 = vpop.f32.mrb[27].mxu1  ;;  %12293 = vrot.lane.b32.xlu0 %v12292_v14, %s12784_s30  ;;  %1794 = vperm.xlu1 %12298, %v519_v34  }
 0x156   : > { %v11300_v39 = vadd.f32 %v11299_v46, %v11298_v38  ;;  %v1564_v41 = vadd.f32 %v11297_v36, %v13162_v44 }
 0x158   : > { %v1565_v53 = vadd.f32 %v11300_v39, %v13177_v7  ;;  %v1577_v54 = vadd.f32 %v1564_v41, %v13167_v0  ;;  %v11262_v0 = vld [vmem:[%s13291_s25 + $0x8] sm:$0xff]  }
 0x159   : > { %1799 = vperm.xlu1 %12298, %v520_v48   ;;  %1789 = vperm.xlu0 %12297, %v518_v50   ;;  %v11197_v4 = vunpack.c.h.bf16 %v11262_v0  ;;  %v11205_v48 = vunpack.c.h.bf16 %v11264_v49 }
 0x15a   : > { %v1578_v56 = vadd.f32 %v1565_v53, %v13180_v8  ;;  %v11301_v60 = vpop.f32.mrb[28].mxu1  ;;  %v13314_v44 = vadd.f32 %v13189_v11, %v1577_v54  ;;  %v11196_v8 = vunpack.c.l.bf16 %v11262_v0  ;;  %v527_v54 = vld [vmem:[%s16657_s1 + $0x48] sm:$0xff] }
 0x15b   : > { %v11302_v52 = vpop.f32.mrb[29].mxu1 }
 0x15c   : > { %v11303_v12 = vadd.f32 %v11302_v52, %v11301_v60  ;;  %v11304_v57 = vpop.f32.mrb[30].mxu1  ;;  %v13320_v7 = vadd.f32 %v13173_v5, %v1578_v56  ;;  %v11263_v5 = vld [vmem:[%s13291_s25 + $0x10] sm:$0xff]  }
 0x15d   : > { %v11305_v14 = vpop.f32.mrb[31].mxu1  ;;  %12300 = vrot.lane.b32.xlu1 %v12299_v55, %s12784_s30  ;;  %1804 = vperm.xlu0 %12297, %v521_v6   ;;  %v11200_v27 = vunpack.c.l.bf16 %v11263_v5  ;;  %v11201_v3 = vunpack.c.h.bf16 %v11263_v5 }
 0x15e   : > { %v1566_v11 = vadd.f32 %v11303_v12, %v13186_v10  ;;  %v11306_v16 = vadd.f32 %v11305_v14, %v11304_v57  ;;  %v12304_v10 = vpack.i.bf16 %v11197_v4, %v11196_v8  ;;  %v528_v8 = vld [vmem:[%s16657_s1 + $0x50] sm:$0xff] }
 0x15f   : > { %v12309_v38 = vpack.i.bf16 %v11201_v3, %v11200_v27  ;;  %v531_v3 = vld [vmem:[%s16657_s1 + $0x68] sm:$0xff] }
 0x160   : > { %v1579_v63 = vadd.f32 %v1566_v11, %v13200_v35  ;;  %v1567_v23 = vadd.f32 %v11306_v16, %v13215_v42  ;;  %v524_v35 = vld [vmem:[%s16657_s1 + $0x30] sm:$0xff] }
 0x161   : > { %1814 = vperm.xlu1 %12298, %v523_v18   ;;  %1809 = vperm.xlu0 %12297, %v522_v22  }
 0x162   : > { %v1580_v15 = vadd.f32 %v1567_v23, %v13210_v40  ;;  %v11307_v31 = vpop.f32.mrb[32].mxu1  ;;  %v13345_v42 = vadd.f32 %v13196_v26, %v1579_v63  ;;  %v11266_v63 = vld [vmem:[%s13291_s25 + $0x28] sm:$0xff]  }
 0x163   : > { %v11308_v24 = vpop.f32.mrb[33].mxu1  ;;  %v11212_v27 = vunpack.c.l.bf16 %v11266_v63 }
 0x164   : > { %v11309_v34 = vadd.f32 %v11308_v24, %v11307_v31  ;;  %v11310_v30 = vpop.f32.mrb[34].mxu1  ;;  %v1710_v33 = vpack.c.bf16 %v13345_v42, %v13320_v7  ;;  %v13351_v40 = vadd.f32 %v13204_v37, %v1580_v15  ;;  %v11204_v37 = vunpack.c.l.bf16 %v11264_v49  ;;  %v11267_v15 = vld [vmem:[%s13291_s25 + $0x30] sm:$0xff]   ;;  %v11268_v49 = vld [vmem:[%s13291_s25 + $0x38] sm:$0xff]  }
 0x165   : > { %v11311_v36 = vpop.f32.mrb[35].mxu1  ;;  %1819 = vperm.xlu1 %12298, %v524_v35   ;;  %12305 = vrot.lane.b32.xlu0 %v12304_v10, %s12784_s30  ;;  %v11216_v35 = vunpack.c.l.bf16 %v11267_v15  ;;  %v11217_v24 = vunpack.c.h.bf16 %v11267_v15  ;;  %v12525_v7 = vld [vmem:[%s16656_s0 + $0x18] ss:$12 sps:$4 sm:$0xff]   ;;  %v12528_v42 = vld [vmem:[%s16656_s0 + $0x34] ss:$12 sps:$4 sm:$0xff]  }
 0x166   : > { %v1568_v26 = vadd.f32 %v11309_v34, %v13218_v43  ;;  %v11312_v46 = vadd.f32 %v11311_v36, %v11310_v30  ;;  %v532_v34 = vld [vmem:[%s16657_s1 + $0x70] sm:$0xff] }
 0x168   : > { %v1581_v39 = vadd.f32 %v1568_v26, %v13230_v1  ;;  %v1569_v41 = vadd.f32 %v11312_v46, %v13241_v20  ;;  %v526_v1 = vld [vmem:[%s16657_s1 + $0x40] sm:$0xff] }
 0x169   : > { %12310 = vrot.lane.b32.xlu1 %v12309_v38, %s12784_s30  ;;  %1824 = vperm.xlu0 %12297, %v525_v47   ;;  %v11265_v20 = vld [vmem:[%s13291_s25 + $0x20] sm:$0xff]  }
 0x16a   : > { %v11313_v50 = vpop.f32.mrb[36].mxu1  ;;  %v1582_v53 = vadd.f32 %v1569_v41, %v13238_v17  ;;  %v13364_v43 = vadd.f32 %v13226_v59, %v1581_v39  ;;  %v12314_v59 = vpack.i.bf16 %v11205_v48, %v11204_v37  ;;  %v11208_v12 = vunpack.c.l.bf16 %v11265_v20  ;;  %v12519_v47 = vld [vmem:[%s16656_s0 + $0x20] ss:$12 sps:$4 sm:$0xff]   ;;  %v12526_v39 = vld [vmem:[%s16656_s0 + $0x38] ss:$12 sps:$4 sm:$0xff]  }
 0x16b   : > { %v11314_v55 = vpop.f32.mrb[37].mxu1  ;;  %v11209_v57 = vunpack.c.h.bf16 %v11265_v20  ;;  %v11220_v41 = vunpack.c.l.bf16 %v11268_v49  ;;  %v11221_v37 = vunpack.c.h.bf16 %v11268_v49  ;;  %v535_v48 = vld [vmem:[%s16657_s1 + $0x88] sm:$0xff] }
 0x16c   : > { %v11315_v56 = vadd.f32 %v11314_v55, %v11313_v50  ;;  %v11316_v60 = vpop.f32.mrb[38].mxu1  ;;  %v1620_v6 = vadd.f32 %v13234_v13, %v1582_v53  ;;  %v1711_v17 = vpack.c.bf16 %v13364_v43, %v13351_v40  ;;  %v534_v50 = vld [vmem:[%s16657_s1 + $0x80] sm:$0xff]  ;;  %v12527_v55 = vld [vmem:[%s16656_s0 + $0x50] ss:$12 sps:$4 sm:$0xff]   ;;  %v12785_v40 = vmov 0.0   ;;  %v12591_v43 = vld [vmem:[%s16661_s5 + $0x8] sm:$0xff]  }
 0x16d   : > { %v11317_v52 = vpop.f32.mrb[39].mxu1  ;;  %1834 = vperm.xlu1 %12298, %v527_v54   ;;  %1829 = vperm.xlu0 %12297, %v526_v1   ;;  %v12319_v11 = vpack.i.bf16 %v11209_v57, %v11208_v12  ;;  %v11269_v53 = vld [vmem:[%s13291_s25 + $0x40] sm:$0xff]   ;;  %v12334_v54 = vpack.i.bf16 %v11221_v37, %v11220_v41  ;;  %v548_v41 = vld [vmem:[%s16657_s1 + $0xf0] sm:$0xff]  ;;  %556 = vst [vmem:[#allocation2 + $0x10] sm:$0xff] %v12785_v40  ;;  %557 = vst [vmem:[#allocation2 + $0x18] sm:$0xff] %v12785_v40 }
 0x16e   : > { %v1570_v0 = vadd.f32 %v11315_v56, %v13244_v21  ;;  %v11318_v14 = vadd.f32 %v11317_v52, %v11316_v60  ;;  %v529_v21 = vld [vmem:[%s16657_s1 + $0x58] sm:$0xff]  ;;  %v11224_v1 = vunpack.c.l.bf16 %v11269_v53  ;;  %v11225_v20 = vunpack.c.h.bf16 %v11269_v53  ;;  %v536_v56 = vld [vmem:[%s16657_s1 + $0x90] sm:$0xff]  ;;  %v12535_v12 = vld [vmem:[%s16656_s0 + $0x80] ss:$12 sps:$4 sm:$0xff]   ;;  %554 = vst [vmem:[#allocation2] sm:$0xff] %v12785_v40 }
 0x16f   : > { %v12534_v60 = vld [vmem:[%s16656_s0 + $0x68] ss:$12 sps:$4 sm:$0xff]   ;;  %v537_v52 = vld [vmem:[%s16657_s1 + $0x98] sm:$0xff]  ;;  %555 = vst [vmem:[#allocation2 + $0x8] sm:$0xff] %v12785_v40  ;;  %558 = vst [vmem:[#allocation2 + $0x20] sm:$0xff] %v12785_v40 }
 0x170   : > { %v1571_v4 = vadd.f32 %v11318_v14, %v13264_v61  ;;  %v1583_v13 = vadd.f32 %v1570_v0, %v13256_v51  ;;  %v539_v14 = vld [vmem:[%s16657_s1 + $0xa8] sm:$0xff]  ;;  %559 = vst [vmem:[#allocation2 + $0x28] sm:$0xff] %v12785_v40  ;;  %560 = vst [vmem:[#allocation2 + $0x30] sm:$0xff] %v12785_v40 }
 0x171   : > { %1839 = vperm.xlu1 %12298, %v528_v8   ;;  %12315 = vrot.lane.b32.xlu0 %v12314_v59, %s12784_s30  ;;  %v11270_v59 = vld [vmem:[%s13291_s25 + $0x48] sm:$0xff]   ;;  %v538_v8 = vld [vmem:[%s16657_s1 + $0xa0] sm:$0xff]  ;;  %561 = vst [vmem:[#allocation2 + $0x38] sm:$0xff] %v12785_v40  ;;  %562 = vst [vmem:[#allocation2 + $0x40] sm:$0xff] %v12785_v40 }
 0x172   : > { %v11319_v16 = vpop.f32.mrb[40].mxu1  ;;  %v1621_v18 = vadd.f32 %v13252_v45, %v1583_v13  ;;  %v1584_v22 = vadd.f32 %v1571_v4, %v13267_v62  ;;  %v11213_v45 = vunpack.c.h.bf16 %v11266_v63  ;;  %v11228_v57 = vunpack.c.l.bf16 %v11270_v59  ;;  %v11271_v4 = vld [vmem:[%s13291_s25 + $0x50] sm:$0xff]   ;;  %v12542_v13 = vld [vmem:[%s16656_s0 + $0x98] ss:$12 sps:$4 sm:$0xff]   ;;  %563 = vst [vmem:[#allocation2 + $0x48] sm:$0xff] %v12785_v40  ;;  %564 = vst [vmem:[#allocation2 + $0x50] sm:$0xff] %v12785_v40 }
 0x173   : > { %v11320_v5 = vpop.f32.mrb[41].mxu1  ;;  %v11229_v0 = vunpack.c.h.bf16 %v11270_v59  ;;  %v541_v63 = vld [vmem:[%s16657_s1 + $0xb8] sm:$0xff]  ;;  %565 = vst [vmem:[#allocation2 + $0x58] sm:$0xff] %v12785_v40  ;;  %566 = vst [vmem:[#allocation2 + $0x60] sm:$0xff] %v12785_v40 }
 0x174   : > { %v11321_v23 = vadd.f32 %v11320_v5, %v11319_v16  ;;  %v1712_v61 = vpack.c.bf16 %v1621_v18, %v1620_v6  ;;  %v1622_v51 = vadd.f32 %v13260_v58, %v1584_v22  ;;  %v11322_v19 = vpop.f32.mrb[42].mxu1  ;;  %v12324_v31 = vpack.i.bf16 %v11213_v45, %v11212_v27  ;;  %v540_v22 = vld [vmem:[%s16657_s1 + $0xb0] sm:$0xff]  ;;  %v11273_v27 = vld [vmem:[%s13291_s25 + $0x60] sm:$0xff]   ;;  %567 = vst [vmem:[#allocation2 + $0x68] sm:$0xff] %v12785_v40 }
 0x175   : > { %v11323_v10 = vpop.f32.mrb[43].mxu1  ;;  %12320 = vrot.lane.b32.xlu1 %v12319_v11, %s12784_s30  ;;  %1844 = vperm.xlu0 %12297, %v529_v21   ;;  %v12339_v6 = vpack.i.bf16 %v11225_v20, %v11224_v1  ;;  %v12344_v11 = vpack.i.bf16 %v11229_v0, %v11228_v57  ;;  %v11232_v16 = vunpack.c.l.bf16 %v11271_v4  ;;  %v11233_v18 = vunpack.c.h.bf16 %v11271_v4  ;;  %v12543_v5 = vld [vmem:[%s16656_s0 + $0xb0] ss:$12 sps:$4 sm:$0xff]   ;;  %v12550_v45 = vld [vmem:[%s16656_s0 + $0xc8] ss:$12 sps:$4 sm:$0xff]   ;;  %568 = vst [vmem:[#allocation2 + $0x70] sm:$0xff] %v12785_v40 }
 0x176   : > { %v1572_v62 = vadd.f32 %v11321_v23, %v13270_v2  ;;  %11443 = vmatprep.subr.bf16.mxu0 %v1712_v61  ;;  %v11272_v23 = vld [vmem:[%s13291_s25 + $0x58] sm:$0xff]   ;;  %569 = vst [vmem:[#allocation2 + $0x78] sm:$0xff] %v12785_v40  ;;  %570 = vst [vmem:[#allocation2 + $0x80] sm:$0xff] %v12785_v40 }
 0x177   : > { %11444 = vmatpush3.bf16.msra.mxu0 %v1712_v61  ;;  %v12349_v21 = vpack.i.bf16 %v11233_v18, %v11232_v16  ;;  %v543_v61 = vld [vmem:[%s16657_s1 + $0xc8] sm:$0xff]  ;;  %v11236_v19 = vunpack.c.l.bf16 %v11272_v23  ;;  %v11237_v10 = vunpack.c.h.bf16 %v11272_v23  ;;  %v549_v20 = vld [vmem:[%s16657_s1 + $0xf8] sm:$0xff]  ;;  %571 = vst [vmem:[#allocation2 + $0x88] sm:$0xff] %v12785_v40  ;;  %572 = vst [vmem:[#allocation2 + $0x90] sm:$0xff] %v12785_v40 }
 0x178   : > { %v1585_v58 = vadd.f32 %v13285_v32, %v1572_v62  ;;  %v12329_v32 = vpack.i.bf16 %v11217_v24, %v11216_v35  ;;  %v12551_v35 = vld [vmem:[%s16656_s0 + $0xe0] ss:$12 sps:$4 sm:$0xff]   ;;  %573 = vst [vmem:[#allocation2 + $0x98] sm:$0xff] %v12785_v40  ;;  %574 = vst [vmem:[#allocation2 + $0xa0] sm:$0xff] %v12785_v40 }
 0x179   : > { %1854 = vperm.xlu1 %12298, %v531_v3   ;;  %1849 = vperm.xlu0 %12297, %v530_v9   ;;  %v11240_v3 = vunpack.c.l.bf16 %v11273_v27  ;;  %v11241_v9 = vunpack.c.h.bf16 %v11273_v27  ;;  %575 = vst [vmem:[#allocation2 + $0xa8] sm:$0xff] %v12785_v40  ;;  %576 = vst [vmem:[#allocation2 + $0xb0] sm:$0xff] %v12785_v40 }
 0x17a   : > { %v1623_v2 = vadd.f32 %v13279_v28, %v1585_v58  ;;  %v11325_v30 = vpop.f32.mrb[44].mxu1  ;;  %v533_v28 = vld [vmem:[%s16657_s1 + $0x78] sm:$0xff]  ;;  %v544_v58 = vld [vmem:[%s16657_s1 + $0xd0] sm:$0xff]  ;;  %577 = vst [vmem:[#allocation2 + $0xb8] sm:$0xff] %v12785_v40  ;;  %578 = vst [vmem:[#allocation2 + $0xc0] sm:$0xff] %v12785_v40 }
 0x17b   : > { %v11326_v36 = vpop.f32.mrb[45].mxu1  ;;  %v12359_v24 = vpack.i.bf16 %v11241_v9, %v11240_v3  ;;  %579 = vst [vmem:[#allocation2 + $0xc8] sm:$0xff] %v12785_v40  ;;  %580 = vst [vmem:[#allocation2 + $0xd0] sm:$0xff] %v12785_v40 }
 0x17c   : > { %v1713_v38 = vpack.c.bf16 %v1623_v2, %v1622_v51  ;;  %v11328_v26 = vpop.f32.mrb[46].mxu1  ;;  %v542_v51 = vld [vmem:[%s16657_s1 + $0xc0] sm:$0xff]  ;;  %v11274_v2 = vld [vmem:[%s13291_s25 + $0x68] sm:$0xff]   ;;  %581 = vst [vmem:[#allocation2 + $0xd8] sm:$0xff] %v12785_v40  ;;  %582 = vst [vmem:[#allocation2 + $0xe0] sm:$0xff] %v12785_v40 }
 0x17d   : > { %1859 = vperm.xlu1 %12298, %v532_v34   ;;  %12325 = vrot.lane.b32.xlu0 %v12324_v31, %s12784_s30  ;;  %v11329_v46 = vpop.f32.mrb[47].mxu1  ;;  %v12354_v31 = vpack.i.bf16 %v11237_v10, %v11236_v19  ;;  %v547_v34 = vld [vmem:[%s16657_s1 + $0xe8] sm:$0xff]  ;;  %v11244_v30 = vunpack.c.l.bf16 %v11274_v2  ;;  %v11245_v36 = vunpack.c.h.bf16 %v11274_v2  ;;  %v12574_v2 = vld [vmem:[%s16656_s0 + $0x158] ss:$12 sps:$4 sm:$0xff]   ;;  %583 = vst [vmem:[#allocation2 + $0xe8] sm:$0xff] %v12785_v40  ;;  %584 = vst [vmem:[#allocation2 + $0xf0] sm:$0xff] %v12785_v40 }
 0x17e   : > { %11445 = vmatprep.subr.bf16.mxu0 %v1713_v38  ;;  %585 = vst [vmem:[#allocation2 + $0xf8] sm:$0xff] %v12785_v40  ;;  %586 = vst [vmem:[#allocation2 + $0x100] sm:$0xff] %v12785_v40 }
 0x17f   : > { %11446 = vmatpush3.bf16.msra.mxu0 %v1713_v38  ;;  %v11275_v38 = vld [vmem:[%s13291_s25 + $0x70] sm:$0xff]   ;;  %v12364_v37 = vpack.i.bf16 %v11245_v36, %v11244_v30  ;;  %587 = vst [vmem:[#allocation2 + $0x108] sm:$0xff] %v12785_v40  ;;  %588 = vst [vmem:[#allocation2 + $0x110] sm:$0xff] %v12785_v40 }
 0x180   : > { %3944 = vmatprep.subr.bf16.mxu0 %v16672_v29  ;;  %v11249_v49 = vunpack.c.h.bf16 %v11275_v38  ;;  %589 = vst [vmem:[#allocation2 + $0x118] sm:$0xff] %v12785_v40  ;;  %590 = vst [vmem:[#allocation2 + $0x120] sm:$0xff] %v12785_v40 }
 0x181   : > { %12330 = vrot.lane.b32.xlu1 %v12329_v32, %s12784_s30  ;;  %1864 = vperm.xlu0 %12297, %v533_v28   ;;  %v546_v32 = vld [vmem:[%s16657_s1 + $0xe0] sm:$0xff]  ;;  %v11248_v28 = vunpack.c.l.bf16 %v11275_v38  ;;  %591 = vst [vmem:[#allocation2 + $0x128] sm:$0xff] %v12785_v40  ;;  %592 = vst [vmem:[#allocation2 + $0x130] sm:$0xff] %v12785_v40 }
 0x182   : > { %11448 = vmatmul.mubr.msk.bf16.vlgmr.msra.gmra.mrb[24].mxu0 %vm2279_vm2, %v12519_v47  ;;  %593 = vst [vmem:[#allocation2 + $0x138] sm:$0xff] %v12785_v40  ;;  %594 = vst [vmem:[#allocation2 + $0x140] sm:$0xff] %v12785_v40  ;;  %v12615_v40 = vld [vmem:[%s16661_s5 + $0x230] sm:$0xff]  }
 0x183   : > { %11451 = vmatprep.mubr.msk.bf16.mxu0 %vm2279_vm2, %v12526_v39  ;;  %v12369_v53 = vpack.i.bf16 %v11249_v49, %v11248_v28  ;;  %v12583_v28 = vld [vmem:[%s16656_s0 + $0x1a0] ss:$12 sps:$4 sm:$0xff]   ;;  %v12523_v49 = vld [vmem:[%s16656_s0 + $0x1c] ss:$12 sps:$4 sm:$0xff]  }
 0x185   : > { %1874 = vperm.xlu1 %12298, %v535_v48   ;;  %1869 = vperm.xlu0 %12297, %v534_v50   ;;  %v12558_v48 = vld [vmem:[%s16656_s0 + $0xf8] ss:$12 sps:$4 sm:$0xff]   ;;  %v12559_v50 = vld [vmem:[%s16656_s0 + $0x110] ss:$12 sps:$4 sm:$0xff]  }
 0x189   : > { %1879 = vperm.xlu1 %12298, %v536_v56   ;;  %12335 = vrot.lane.b32.xlu0 %v12334_v54, %s12784_s30  ;;  %v11277_v54 = vld [vmem:[%s13291_s25 + $0x80] sm:$0xff]  }
 0x18a   : > { %11452 = vmatmul.mubr.msk.bf16.gmra.mrb[28].mxu0 %vm2279_vm2, %v12527_v55  ;;  %v11276_v55 = vld [vmem:[%s13291_s25 + $0x78] sm:$0xff]  }
 0x18b   : > { %11455 = vmatprep.mubr.msk.bf16.mxu0 %vm2279_vm2, %v12534_v60  ;;  %v11252_v57 = vunpack.c.l.bf16 %v11276_v55  ;;  %v11253_v0 = vunpack.c.h.bf16 %v11276_v55  ;;  %v12596_v55 = vld [vmem:[%s16661_s5 + $0x30] sm:$0xff]  }
 0x18d   : > { %12340 = vrot.lane.b32.xlu1 %v12339_v6, %s12784_s30  ;;  %1884 = vperm.xlu0 %12297, %v537_v52   ;;  %v11256_v6 = vunpack.c.l.bf16 %v11277_v54  ;;  %v11257_v52 = vunpack.c.h.bf16 %v11277_v54  ;;  %v12374_v4 = vpack.i.bf16 %v11253_v0, %v11252_v57  ;;  %v12595_v54 = vld [vmem:[%s16661_s5 + $0x28] sm:$0xff]   ;;  %v12600_v0 = vld [vmem:[%s16661_s5 + $0x50] sm:$0xff]  }
 0x18e   : > { %v12547_v57 = vld [vmem:[%s16656_s0 + $0xac] ss:$12 sps:$4 sm:$0xff]  }
 0x191   : > { %1894 = vperm.xlu1 %12298, %v539_v14   ;;  %1889 = vperm.xlu0 %12297, %v538_v8   ;;  %v550_v14 = vld [vmem:[%s16657_s1 + $0x100] sm:$0xff]  ;;  %v12379_v8 = vpack.i.bf16 %v11257_v52, %v11256_v6 }
 0x192   : > { %11456 = vmatmul.mubr.msk.bf16.gmra.mrb[32].mxu0 %vm2279_vm2, %v12535_v12  ;;  %v551_v12 = vld [vmem:[%s16657_s1 + $0x108] sm:$0xff]  ;;  %v12544_v6 = vld [vmem:[%s16656_s0 + $0x94] ss:$12 sps:$4 sm:$0xff]  }
 0x193   : > { %11459 = vmatprep.mubr.msk.bf16.mxu0 %vm2279_vm2, %v12542_v13  ;;  %v12598_v52 = vld [vmem:[%s16661_s5 + $0x40] sm:$0xff]  }
 0x195   : > { %1899 = vperm.xlu1 %12298, %v540_v22   ;;  %12345 = vrot.lane.b32.xlu0 %v12344_v11, %s12784_s30  ;;  %v553_v22 = vld [vmem:[%s16657_s1 + $0x118] sm:$0xff] }
 0x199   : > { %12350 = vrot.lane.b32.xlu1 %v12349_v21, %s12784_s30  ;;  %1904 = vperm.xlu0 %12297, %v541_v63   ;;  %v552_v21 = vld [vmem:[%s16657_s1 + $0x110] sm:$0xff]  ;;  %v12567_v63 = vld [vmem:[%s16656_s0 + $0x140] ss:$12 sps:$4 sm:$0xff]  }
 0x19a   : > { %11460 = vmatmul.mubr.msk.bf16.gmra.mrb[36].mxu0 %vm2279_vm2, %v12543_v5  ;;  %v12566_v5 = vld [vmem:[%s16656_s0 + $0x128] ss:$12 sps:$4 sm:$0xff]  }
 0x19b   : > { %11463 = vmatprep.mubr.msk.bf16.mxu0 %vm2279_vm2, %v12550_v45 }
 0x19d   : > { %v1634_v62 = vpop.permute.xlu0 %1633  ;;  %1914 = vperm.xlu1 %12298, %v543_v61   ;;  %1909 = vperm.xlu0 %12297, %v542_v51  }
 0x19e   : > { %v1700_v15 = vpack.c.bf16 %v1634_v62, %v13248_v25  ;;  %v545_v25 = vld [vmem:[%s16657_s1 + $0xd8] sm:$0xff] }
 0x1a0   : > { %2343 = vmatpush1.bf16.msra.mxu1 %v1700_v15 }
 0x1a1   : > { %2344 = vmatprep.subr.bf16.mxu1 %v16672_v29  ;;  %1919 = vperm.xlu1 %12298, %v544_v58  }
 0x1a2   : > { %12355 = vrot.lane.b32.xlu0 %v12354_v31, %s12784_s30  ;;  %11464 = vmatmul.mubr.msk.bf16.gmra.mrb[40].mxu0 %vm2279_vm2, %v12551_v35 }
 0x1a3   : > { %11467 = vmatprep.mubr.msk.bf16.mxu0 %vm2279_vm2, %v12558_v48  ;;  %v12533_v48 = vld [vmem:[%s16656_s0 + $0x48] ss:$12 sps:$4 sm:$0xff]  }
 0x1a5   : > { %12360 = vrot.lane.b32.xlu1 %v12359_v24, %s12784_s30 }
 0x1a6   : > { %1924 = vperm.xlu0 %12297, %v545_v25  }
 0x1a7   : > { %v12259_v26 = vpop.permute.xlu0 %12258 }
 0x1a8   : > { %v12261_v46 = vunpack.i.h.bf16 %v12259_v26  ;;  %v12260_v47 = vunpack.i.l.bf16 %v12259_v26 }
 0x1a9   : > { %1934 = vperm.xlu1 %12298, %v547_v34   ;;  %v12575_v34 = vld [vmem:[%s16656_s0 + $0x170] ss:$12 sps:$4 sm:$0xff]  }
 0x1aa   : > { %v1701_v39 = vpack.c.bf16 %v12261_v46, %v12260_v47  ;;  %1929 = vperm.xlu0 %12297, %v546_v32   ;;  %11468 = vmatmul.mubr.msk.bf16.gmra.mrb[44].mxu0 %vm2279_vm2, %v12559_v50  ;;  %v12582_v47 = vld [vmem:[%s16656_s0 + $0x188] ss:$12 sps:$4 sm:$0xff]   ;;  %v12536_v50 = vld [vmem:[%s16656_s0 + $0x64] ss:$12 sps:$4 sm:$0xff]  }
 0x1ab   : > { %11471 = vmatprep.mubr.msk.bf16.mxu0 %vm2279_vm2, %v12566_v5  ;;  %v12562_v5 = vld [vmem:[%s16656_s0 + $0xf0] ss:$12 sps:$4 sm:$0xff]  }
 0x1ac   : > { %2345 = vmatpush1.bf16.msra.mxu1 %v1701_v39  ;;  %v12531_v39 = vld [vmem:[%s16656_s0 + $0x4c] ss:$12 sps:$4 sm:$0xff]  }
 0x1ad   : > { %2346 = vmatprep.subr.bf16.mxu1 %v16672_v29  ;;  %1939 = vperm.xlu1 %12298, %v548_v41   ;;  %v12592_v41 = vld [vmem:[%s16661_s5 + $0x10] sm:$0xff]  }
 0x1ae   : > { %12365 = vrot.lane.b32.xlu0 %v12364_v37, %s12784_s30  ;;  %v12593_v37 = vld [vmem:[%s16661_s5 + $0x18] sm:$0xff]  }
 0x1af   : > { %v12264_v1 = vpop.permute.xlu1 %12263 }
 0x1b0   : > { %v12266_v56 = vunpack.i.h.bf16 %v12264_v1  ;;  %v12265_v60 = vunpack.i.l.bf16 %v12264_v1  ;;  %v12538_v1 = vld [vmem:[%s16656_s0 + $0x60] ss:$12 sps:$4 sm:$0xff]  }
 0x1b1   : > { %12370 = vrot.lane.b32.xlu1 %v12369_v53, %s12784_s30  ;;  %v12594_v53 = vld [vmem:[%s16661_s5 + $0x20] sm:$0xff]  }
 0x1b2   : > { %v1702_v59 = vpack.c.bf16 %v12266_v56, %v12265_v60  ;;  %1944 = vperm.xlu0 %12297, %v549_v20   ;;  %11472 = vmatmul.mubr.msk.bf16.gmra.mrb[48].mxu0 %vm2279_vm2, %v12567_v63  ;;  %v12539_v20 = vld [vmem:[%s16656_s0 + $0x7c] ss:$12 sps:$4 sm:$0xff]   ;;  %v12541_v60 = vld [vmem:[%s16656_s0 + $0x78] ss:$12 sps:$4 sm:$0xff]  }
 0x1b3   : > { %11475 = vmatprep.mubr.msk.bf16.mxu0 %vm2279_vm2, %v12574_v2  ;;  %v12597_v56 = vld [vmem:[%s16661_s5 + $0x38] sm:$0xff]  }
 0x1b4   : > { %2347 = vmatpush1.bf16.msra.mxu1 %v1702_v59  ;;  %v12599_v59 = vld [vmem:[%s16661_s5 + $0x48] sm:$0xff]   ;;  %v12611_v2 = vld [vmem:[%s16661_s5 + $0x218] sm:$0xff]  }
 0x1b5   : > { %2348 = vmatprep.subr.bf16.mxu1 %v16672_v29  ;;  %1954 = vperm.xlu1 %12298, %v551_v12   ;;  %v12546_v12 = vld [vmem:[%s16656_s0 + $0x90] ss:$12 sps:$4 sm:$0xff]   ;;  %v12563_v63 = vld [vmem:[%s16656_s0 + $0x10c] ss:$12 sps:$4 sm:$0xff]  }
 0x1b6   : > { %1949 = vperm.xlu0 %12297, %v550_v14   ;;  %v12601_v14 = vld [vmem:[%s16661_s5 + $0x58] sm:$0xff]  }
 0x1b7   : > { %v12269_v13 = vpop.permute.xlu1 %12268 }
 0x1b8   : > { %v12271_v11 = vunpack.i.h.bf16 %v12269_v13  ;;  %v12270_v16 = vunpack.i.l.bf16 %v12269_v13  ;;  %v12602_v13 = vld [vmem:[%s16661_s5 + $0x60] sm:$0xff]  }
 0x1b9   : > { %12380 = vrot.lane.b32.xlu1 %v12379_v8, %s12784_s30  ;;  %v12549_v8 = vld [vmem:[%s16656_s0 + $0xa8] ss:$12 sps:$4 sm:$0xff]  }
 0x1ba   : > { %v1703_v18 = vpack.c.bf16 %v12271_v11, %v12270_v16  ;;  %12375 = vrot.lane.b32.xlu0 %v12374_v4, %s12784_s30  ;;  %11476 = vmatmul.mubr.msk.bf16.gmra.mrb[52].mxu0 %vm2279_vm2, %v12575_v34  ;;  %v12552_v4 = vld [vmem:[%s16656_s0 + $0xc4] ss:$12 sps:$4 sm:$0xff]   ;;  %v12603_v11 = vld [vmem:[%s16661_s5 + $0x68] sm:$0xff]  }
 0x1bb   : > { %v12279_v23 = vpop.permute.xlu1 %12278  ;;  %11479 = vmatprep.mubr.msk.bf16.mxu0 %vm2279_vm2, %v12582_v47  ;;  %v12554_v16 = vld [vmem:[%s16656_s0 + $0xc0] ss:$12 sps:$4 sm:$0xff]  }
 0x1bc   : > { %2349 = vmatpush1.bf16.msra.mxu1 %v1703_v18  ;;  %v12281_v10 = vunpack.i.h.bf16 %v12279_v23  ;;  %v12280_v27 = vunpack.i.l.bf16 %v12279_v23  ;;  %v12555_v18 = vld [vmem:[%s16656_s0 + $0xdc] ss:$12 sps:$4 sm:$0xff]   ;;  %v12579_v47 = vld [vmem:[%s16656_s0 + $0x16c] ss:$12 sps:$4 sm:$0xff]  }
 0x1bd   : > { %2350 = vmatprep.subr.bf16.mxu1 %v16672_v29  ;;  %1964 = vperm.xlu1 %12298, %v553_v22   ;;  %v12557_v22 = vld [vmem:[%s16656_s0 + $0xd8] ss:$12 sps:$4 sm:$0xff]   ;;  %v12565_v23 = vld [vmem:[%s16656_s0 + $0x108] ss:$12 sps:$4 sm:$0xff]  }
 0x1be   : > { %1959 = vperm.xlu0 %12297, %v552_v21   ;;  %v1705_v3 = vpack.c.bf16 %v12281_v10, %v12280_v27  ;;  %v12560_v21 = vld [vmem:[%s16656_s0 + $0xf4] ss:$12 sps:$4 sm:$0xff]   ;;  %v11278_v34 = vld [vmem:[%s13291_s25 + $0x88] sm:$0xff]  }
 0x1bf   : > { %v12274_v61 = vpop.permute.xlu0 %12273  ;;  %v12289_v58 = vpop.permute.xlu1 %12288  ;;  %v12570_v10 = vld [vmem:[%s16656_s0 + $0x120] ss:$12 sps:$4 sm:$0xff]  }
 0x1c0   : > { %v12276_v51 = vunpack.i.h.bf16 %v12274_v61  ;;  %v12275_v19 = vunpack.i.l.bf16 %v12274_v61  ;;  %v12291_v31 = vunpack.i.h.bf16 %v12289_v58  ;;  %v12290_v35 = vunpack.i.l.bf16 %v12289_v58  ;;  %v12568_v61 = vld [vmem:[%s16656_s0 + $0x124] ss:$12 sps:$4 sm:$0xff]  }
 0x1c1   : > { %v12606_v27 = vld [vmem:[%s16661_s5 + $0x200] sm:$0xff]   ;;  %v12786_v58 = vmov 0.0|0.0  }
 0x1c2   : > { %v1704_v45 = vpack.c.bf16 %v12276_v51, %v12275_v19  ;;  %v1707_v30 = vpack.c.bf16 %v12291_v31, %v12290_v35  ;;  %11480 = vmatmul.mubr.msk.bf16.gmra.mrb[56].mxu0 %vm2279_vm2, %v12583_v28  ;;  %v12604_v51 = vld [vmem:[%s16661_s5 + $0x70] sm:$0xff]   ;;  %v12605_v19 = vld [vmem:[%s16661_s5 + $0x78] sm:$0xff]   ;;  %v12607_v31 = vld [vmem:[%s16661_s5 + $0x80] sm:$0xff]  }
 0x1c3   : > { %v12284_v62 = vpop.permute.xlu0 %12283  ;;  %v1686_v32 = vpop.permute.xlu1 %1685  ;;  %v12573_v35 = vld [vmem:[%s16656_s0 + $0x138] ss:$12 sps:$4 sm:$0xff]   ;;  %v12613_v28 = vld [vmem:[%s16661_s5 + $0x228] sm:$0xff]  }
 0x1c4   : > { %2351 = vmatpush1.bf16.msra.mxu1 %v1704_v45  ;;  %v12286_v9 = vunpack.i.h.bf16 %v12284_v62  ;;  %v12285_v15 = vunpack.i.l.bf16 %v12284_v62  ;;  %v1709_v46 = vpack.c.bf16 %v13314_v44, %v1686_v32  ;;  %v12520_v44 = vld [vmem:[%s16656_s0] ss:$12 sps:$4 sm:$0xff]   ;;  %v12571_v45 = vld [vmem:[%s16656_s0 + $0x13c] ss:$12 sps:$4 sm:$0xff]  }
 0x1c5   : > { %2352 = vmatprep.subr.bf16.mxu1 %v16672_v29  ;;  %v3031_v62 = vld [vmem:[#allocation2 + $0x1] sm:$0xff] }
 0x1c6   : > { %v1706_v24 = vpack.c.bf16 %v12286_v9, %v12285_v15  ;;  %v12608_v15 = vld [vmem:[%s16661_s5 + $0x208] sm:$0xff]  }
 0x1c7   : > { %v12294_v25 = vpop.permute.xlu0 %12293 }
 0x1c8   : > { %2353 = vmatpush1.bf16.msra.mxu1 %v1705_v3  ;;  %v12296_v36 = vunpack.i.h.bf16 %v12294_v25  ;;  %v12295_v38 = vunpack.i.l.bf16 %v12294_v25  ;;  %v3032_v3 = vld [vmem:[#allocation2 + $0x9] sm:$0xff]  ;;  %v12576_v25 = vld [vmem:[%s16656_s0 + $0x154] ss:$12 sps:$4 sm:$0xff]  }
 0x1c9   : > { %2354 = vmatprep.subr.bf16.mxu1 %v16672_v29  ;;  %v3067_v9 = vpack.c.bf16 %v3032_v3, %v3031_v62  ;;  %v12624_v3 = vld [vmem:[%s16661_s5 + $0xd0] sm:$0xff]  }
 0x1ca   : > { %v1708_v26 = vpack.c.bf16 %v12296_v36, %v12295_v38  ;;  %v11261_v36 = vunpack.c.h.bf16 %v11278_v34  ;;  %v12610_v38 = vld [vmem:[%s16661_s5 + $0x88] sm:$0xff]  }
 0x1cb   : > { %3976 = vmatprep.mubr.bf16.mxu0 %v3067_v9 }
 0x1cc   : > { %2355 = vmatpush1.bf16.msra.mxu1 %v1706_v24  ;;  %v12609_v24 = vld [vmem:[%s16661_s5 + $0x210] sm:$0xff]  }
 0x1cd   : > { %2356 = vmatprep.subr.bf16.mxu1 %v16672_v29 }
 0x1d0   : > { %2357 = vmatpush1.bf16.msra.mxu1 %v1707_v30  ;;  %v11260_v30 = vunpack.c.l.bf16 %v11278_v34 }
 0x1d1   : > { %2358 = vmatprep.subr.bf16.mxu1 %v16672_v29 }
 0x1d2   : > { %v12384_v32 = vpack.i.bf16 %v11261_v36, %v11260_v30  ;;  %v12626_v30 = vld [vmem:[%s16661_s5 + $0xe0] sm:$0xff]  }
 0x1d4   : > { %2359 = vmatpush1.bf16.msra.mxu1 %v1708_v26  ;;  %v12578_v26 = vld [vmem:[%s16656_s0 + $0x150] ss:$12 sps:$4 sm:$0xff]   ;;  %12385 = vrot.lane.b32.xlu0 %v12384_v32, %s12784_s30 }
 0x1d5   : > { %2360 = vmatprep.subr.bf16.mxu1 %v16672_v29 }
 0x1d8   : > { %2361 = vmatpush1.bf16.msra.mxu1 %v1709_v46  ;;  %v12612_v46 = vld [vmem:[%s16661_s5 + $0x220] sm:$0xff]   ;;  %v13871_v62 = vpop.permute.xlu0 %1789 }
 0x1d9   : > { %2362 = vmatprep.subr.bf16.mxu1 %v16672_v29 }
 0x1dc   : > { %2363 = vmatpush1.bf16.msra.mxu1 %v1710_v33  ;;  %v12590_v33 = vld [vmem:[%s16661_s5] sm:$0xff]  }
 0x1dd   : > { %2364 = vmatprep.subr.bf16.mxu1 %v16672_v29  ;;  %3945 = vmatpush1.bf16.msra.mxu0 %v12590_v33 }
 0x1de   : > { %3946 = vmatprep.subr.bf16.mxu0 %v16672_v29 }
 0x1e0   : > { %2365 = vmatpush1.bf16.msra.mxu1 %v1711_v17  ;;  %v12530_v17 = vld [vmem:[%s16656_s0 + $0x30] ss:$12 sps:$4 sm:$0xff]  }
 0x1e1   : > { %3947 = vmatpush1.bf16.msra.mxu0 %v12591_v43  ;;  %11483 = vmatprep.subr.bf16.mxu1 %v12606_v27  ;;  %v12584_v43 = vld [vmem:[%s16656_s0 + $0x184] ss:$12 sps:$4 sm:$0xff]  }
 0x1e2   : > { %3948 = vmatprep.subr.bf16.mxu0 %v16672_v29 }
 0x1e3   : > { %2367 = vmatmul.mubr.bf16.vlgmr.msra.gmra.mrb[48].mxu1 %v12520_v44 }
 0x1e4   : > { %2374 = vmatprep.mubr.bf16.mxu1 %v12523_v49  ;;  %11484 = vmatpush3.bf16.msra.mxu1 %v12606_v27 }
 0x1e5   : > { %3949 = vmatpush1.bf16.msra.mxu0 %v12592_v41  ;;  %11485 = vmatprep.subr.bf16.mxu1 %v12608_v15 }
 0x1e6   : > { %3950 = vmatprep.subr.bf16.mxu0 %v16672_v29 }
 0x1e8   : > { %11486 = vmatpush3.bf16.msra.mxu1 %v12608_v15  ;;  %v13879_v15 = vpop.permute.xlu0 %1804 }
 0x1e9   : > { %3951 = vmatpush1.bf16.msra.mxu0 %v12593_v37  ;;  %11487 = vmatprep.subr.bf16.mxu1 %v12609_v24 }
 0x1ea   : > { %3952 = vmatprep.subr.bf16.mxu0 %v16672_v29 }
 0x1eb   : > { %2375 = vmatmul.mubr.bf16.gmra.mrb[52].mxu1 %v12525_v7  ;;  %v12614_v7 = vld [vmem:[%s16661_s5 + $0x90] sm:$0xff]  }
 0x1ec   : > { %2382 = vmatprep.mubr.bf16.mxu1 %v12528_v42  ;;  %11488 = vmatpush3.bf16.msra.mxu1 %v12609_v24  ;;  %v12581_v42 = vld [vmem:[%s16656_s0 + $0x168] ss:$12 sps:$4 sm:$0xff]  }
 0x1ed   : > { %3953 = vmatpush1.bf16.msra.mxu0 %v12594_v53  ;;  %11489 = vmatprep.subr.bf16.mxu1 %v12611_v2 }
 0x1ee   : > { %3954 = vmatprep.subr.bf16.mxu0 %v16672_v29 }
 0x1f0   : > { %11490 = vmatpush3.bf16.msra.mxu1 %v12611_v2 }
 0x1f1   : > { %3955 = vmatpush1.bf16.msra.mxu0 %v12595_v54  ;;  %11491 = vmatprep.subr.bf16.mxu1 %v12612_v46  ;;  %v12587_v54 = vld [vmem:[%s16656_s0 + $0x19c] ss:$12 sps:$4 sm:$0xff]  }
 0x1f2   : > { %3956 = vmatprep.subr.bf16.mxu0 %v16672_v29 }
 0x1f3   : > { %2383 = vmatmul.mubr.bf16.gmra.mrb[56].mxu1 %v12530_v17 }
 0x1f4   : > { %2390 = vmatprep.mubr.bf16.mxu1 %v12531_v39  ;;  %11492 = vmatpush3.bf16.msra.mxu1 %v12612_v46  ;;  %v12616_v39 = vld [vmem:[%s16661_s5 + $0x238] sm:$0xff]  }
 0x1f5   : > { %3957 = vmatpush1.bf16.msra.mxu0 %v12596_v55  ;;  %11493 = vmatprep.subr.bf16.mxu1 %v12613_v28 }
 0x1f6   : > { %3958 = vmatprep.subr.bf16.mxu0 %v16672_v29 }
 0x1f8   : > { %11494 = vmatpush3.bf16.msra.mxu1 %v12613_v28 }
 0x1f9   : > { %3959 = vmatpush1.bf16.msra.mxu0 %v12597_v56  ;;  %11495 = vmatprep.subr.bf16.mxu1 %v12615_v40  ;;  %v12618_v56 = vld [vmem:[%s16661_s5 + $0xa0] sm:$0xff]  }
 0x1fa   : > { %3960 = vmatprep.subr.bf16.mxu0 %v16672_v29 }
 0x1fb   : > { %2391 = vmatmul.mubr.bf16.gmra.mrb[60].mxu1 %v12533_v48  ;;  %v12617_v48 = vld [vmem:[%s16661_s5 + $0x98] sm:$0xff]  }
 0x1fc   : > { %2398 = vmatprep.mubr.bf16.mxu1 %v12536_v50  ;;  %11496 = vmatpush3.bf16.msra.mxu1 %v12615_v40  ;;  %v12586_v50 = vld [vmem:[%s16656_s0 + $0x180] ss:$12 sps:$4 sm:$0xff]  }
 0x1fd   : > { %3961 = vmatpush1.bf16.msra.mxu0 %v12598_v52  ;;  %11497 = vmatprep.subr.bf16.mxu1 %v12616_v39 }
 0x1fe   : > { %3962 = vmatprep.subr.bf16.mxu0 %v16672_v29 }
 0x200   : > { %11498 = vmatpush3.bf16.msra.mxu1 %v12616_v39 }
 0x201   : > { %3963 = vmatpush1.bf16.msra.mxu0 %v12599_v59  ;;  %6247 = vmatprep.subr.bf16.mxu1 %v16672_v29 }
 0x202   : > { %3964 = vmatprep.subr.bf16.mxu0 %v16672_v29 }
 0x203   : > { %2399 = vmatmul.mubr.bf16.gmra.mrb[64].mxu1 %v12538_v1 }
 0x204   : > { %2406 = vmatprep.mubr.bf16.mxu1 %v12539_v20 }
 0x205   : > { %3965 = vmatpush1.bf16.msra.mxu0 %v12600_v0 }
 0x206   : > { %3966 = vmatprep.subr.bf16.mxu0 %v16672_v29 }
 0x209   : > { %3967 = vmatpush1.bf16.msra.mxu0 %v12601_v14  ;;  %v12619_v14 = vld [vmem:[%s16661_s5 + $0xa8] sm:$0xff]  }
 0x20a   : > { %3968 = vmatprep.subr.bf16.mxu0 %v16672_v29 }
 0x20b   : > { %2407 = vmatmul.mubr.bf16.gmra.mrb[68].mxu1 %v12541_v60  ;;  %v12589_v60 = vld [vmem:[%s16656_s0 + $0x198] ss:$12 sps:$4 sm:$0xff]  }
 0x20c   : > { %2414 = vmatprep.mubr.bf16.mxu1 %v12544_v6 }
 0x20d   : > { %3969 = vmatpush1.bf16.msra.mxu0 %v12602_v13 }
 0x20e   : > { %3970 = vmatprep.subr.bf16.mxu0 %v16672_v29 }
 0x211   : > { %3971 = vmatpush1.bf16.msra.mxu0 %v12603_v11 }
 0x212   : > { %3972 = vmatprep.subr.bf16.mxu0 %v16672_v29 }
 0x213   : > { %2415 = vmatmul.mubr.bf16.gmra.mrb[72].mxu1 %v12546_v12 }
 0x214   : > { %2422 = vmatprep.mubr.bf16.mxu1 %v12547_v57 }
 0x215   : > { %3973 = vmatpush1.bf16.msra.mxu0 %v12604_v51 }
 0x216   : > { %3974 = vmatprep.subr.bf16.mxu0 %v16672_v29 }
 0x219   : > { %3975 = vmatpush1.bf16.msra.mxu0 %v12605_v19 }
 0x21a   : > { %4121 = vmatprep.subr.bf16.mxu0 %v16672_v29 }
 0x21b   : > { %2423 = vmatmul.mubr.bf16.gmra.mrb[76].mxu1 %v12549_v8 }
 0x21c   : > { %2430 = vmatprep.mubr.bf16.mxu1 %v12552_v4  ;;  %3977 = vmatmul.mubr.bf16.vlgmr.msra.gmra.mrb[60].mxu0 %v12786_v58 }
 0x21d   : > { %4122 = vmatpush1.bf16.msra.mxu0 %v12607_v31  ;;  %v12625_v31 = vld [vmem:[%s16661_s5 + $0xd8] sm:$0xff]  }
 0x21e   : > { %4123 = vmatprep.subr.bf16.mxu0 %v16672_v29 }
 0x221   : > { %4124 = vmatpush1.bf16.msra.mxu0 %v12610_v38 }
 0x222   : > { %4125 = vmatprep.subr.bf16.mxu0 %v16672_v29 }
 0x223   : > { %2431 = vmatmul.mubr.bf16.gmra.mrb[80].mxu1 %v12554_v16  ;;  %v12620_v16 = vld [vmem:[%s16661_s5 + $0xb0] sm:$0xff]  }
 0x224   : > { %2438 = vmatprep.mubr.bf16.mxu1 %v12555_v18  ;;  %v12621_v18 = vld [vmem:[%s16661_s5 + $0xb8] sm:$0xff]  }
 0x225   : > { %4126 = vmatpush1.bf16.msra.mxu0 %v12614_v7 }
 0x226   : > { %4127 = vmatprep.subr.bf16.mxu0 %v16672_v29 }
 0x229   : > { %4128 = vmatpush1.bf16.msra.mxu0 %v12617_v48 }
 0x22a   : > { %4129 = vmatprep.subr.bf16.mxu0 %v16672_v29 }
 0x22b   : > { %2439 = vmatmul.mubr.bf16.gmra.mrb[84].mxu1 %v12557_v22 }
 0x22c   : > { %2446 = vmatprep.mubr.bf16.mxu1 %v12560_v21 }
 0x22d   : > { %4130 = vmatpush1.bf16.msra.mxu0 %v12618_v56 }
 0x22e   : > { %4131 = vmatprep.subr.bf16.mxu0 %v16672_v29 }
 0x231   : > { %4132 = vmatpush1.bf16.msra.mxu0 %v12619_v14 }
 0x232   : > { %4133 = vmatprep.subr.bf16.mxu0 %v16672_v29 }
 0x233   : > { %2447 = vmatmul.mubr.bf16.gmra.mrb[88].mxu1 %v12562_v5 }
 0x234   : > { %2454 = vmatprep.mubr.bf16.mxu1 %v12563_v63 }
 0x235   : > { %4134 = vmatpush1.bf16.msra.mxu0 %v12620_v16 }
 0x236   : > { %4135 = vmatprep.subr.bf16.mxu0 %v16672_v29 }
 0x239   : > { %4136 = vmatpush1.bf16.msra.mxu0 %v12621_v18 }
 0x23a   : > { %4137 = vmatprep.subr.bf16.mxu0 %v16672_v29 }
 0x23b   : > { %2455 = vmatmul.mubr.bf16.gmra.mrb[92].mxu1 %v12565_v23  ;;  %v12622_v23 = vld [vmem:[%s16661_s5 + $0xc0] sm:$0xff]  }
 0x23c   : > { %2462 = vmatprep.mubr.bf16.mxu1 %v12568_v61  ;;  %v12623_v61 = vld [vmem:[%s16661_s5 + $0xc8] sm:$0xff]  }
 0x23d   : > { %4138 = vmatpush1.bf16.msra.mxu0 %v12622_v23 }
 0x23e   : > { %4139 = vmatprep.subr.bf16.mxu0 %v16672_v29 }
 0x241   : > { %4140 = vmatpush1.bf16.msra.mxu0 %v12623_v61 }
 0x242   : > { %4141 = vmatprep.subr.bf16.mxu0 %v16672_v29 }
 0x243   : > { %2463 = vmatmul.mubr.bf16.gmra.mrb[96].mxu1 %v12570_v10 }
 0x244   : > { %2470 = vmatprep.mubr.bf16.mxu1 %v12571_v45  ;;  %v13869_v45 = vpop.permute.xlu1 %1794 }
 0x245   : > { %4142 = vmatpush1.bf16.msra.mxu0 %v12624_v3 }
 0x246   : > { %4143 = vmatprep.subr.bf16.mxu0 %v16672_v29 }
 0x248   : > { %v13877_v9 = vpop.permute.xlu1 %1799 }
 0x249   : > { %4144 = vmatpush1.bf16.msra.mxu0 %v12625_v31 }
 0x24a   : > { %4145 = vmatprep.subr.bf16.mxu0 %v16672_v29 }
 0x24b   : > { %2471 = vmatmul.mubr.bf16.gmra.mrb[100].mxu1 %v12573_v35 }
 0x24c   : > { %2478 = vmatprep.mubr.bf16.mxu1 %v12576_v25  ;;  %v12301_v24 = vpop.permute.xlu1 %12300  ;;  %v13888_v25 = vpop.permute.xlu0 %1809 }
 0x24d   : > { %4146 = vmatpush1.bf16.msra.mxu0 %v12626_v30  ;;  %v12303_v18 = vunpack.i.h.bf16 %v12301_v24  ;;  %v12627_v30 = vld [vmem:[%s16661_s5 + $0xe8] sm:$0xff]  }
 0x24e   : > { %4147 = vmatprep.subr.bf16.mxu0 %v16672_v29 }
 0x250   : > { %v13898_v36 = vpop.permute.xlu1 %1814  ;;  %v12306_v38 = vpop.permute.xlu0 %12305 }
 0x251   : > { %4148 = vmatpush1.bf16.msra.mxu0 %v12627_v30 }
 0x252   : > { %4149 = vmatprep.subr.bf16.mxu0 %v16672_v29 }
 0x253   : > { %2479 = vmatmul.mubr.bf16.gmra.mrb[104].mxu1 %v12578_v26  ;;  %v13904_v26 = vld [vmem:[%s16665_s9] ss:$0 sm:$0xff] }
 0x254   : > { %2486 = vmatprep.mubr.bf16.mxu1 %v12579_v47  ;;  %v1973_v32 = vmul.f32 %v13904_v26, %v13871_v62  ;;  %v13908_v46 = vpop.permute.xlu1 %1819  ;;  %v13910_v47 = vpop.permute.xlu0 %1824 }
 0x255   : > { %v13759_v44 = vpop.f32.mrb[24].mxu0 }
 0x256   : > { %v13761_v49 = vpop.f32.mrb[25].mxu0 }
 0x257   : > { %v13769_v33 = vpop.f32.mrb[26].mxu0 }
 0x258   : > { %v13777_v17 = vpop.f32.mrb[27].mxu0  ;;  %v12311_v23 = vpop.permute.xlu1 %12310 }
 0x259   : > { %v13925_v31 = vpop.permute.xlu0 %1829 }
 0x25b   : > { %2487 = vmatmul.mubr.bf16.gmra.mrb[108].mxu1 %v12581_v42 }
 0x25c   : > { %2494 = vmatprep.mubr.bf16.mxu1 %v12584_v43  ;;  %v1974_v43 = vmul.f32 %v13904_v26, %v13869_v45 }
 0x25d   : > { %v13783_v41 = vpop.f32.mrb[28].mxu0 }
 0x25e   : > { %v13785_v37 = vpop.f32.mrb[29].mxu0 }
 0x25f   : > { %v13793_v53 = vpop.f32.mrb[30].mxu0 }
 0x260   : > { %v13799_v1 = vpop.f32.mrb[31].mxu0 }
 0x263   : > { %2495 = vmatmul.mubr.bf16.gmra.mrb[112].mxu1 %v12586_v50  ;;  %v12302_v50 = vunpack.i.l.bf16 %v12301_v24 }
 0x264   : > { %2502 = vmatprep.mubr.bf16.mxu1 %v12587_v54 }
 0x265   : > { %v13802_v20 = vpop.f32.mrb[32].mxu0 }
 0x266   : > { %v13804_v55 = vpop.f32.mrb[33].mxu0 }
 0x267   : > { %v13812_v6 = vpop.f32.mrb[34].mxu0 }
 0x268   : > { %v13814_v52 = vpop.f32.mrb[35].mxu0 }
 0x26b   : > { %2503 = vmatmul.mubr.bf16.gmra.mrb[116].mxu1 %v12589_v60 }
 0x26d   : > { %v13817_v59 = vpop.f32.mrb[36].mxu0 }
 0x26e   : > { %v13819_v12 = vpop.f32.mrb[37].mxu0 }
 0x26f   : > { %v13821_v57 = vpop.f32.mrb[38].mxu0 }
 0x270   : > { %v13823_v0 = vpop.f32.mrb[39].mxu0 }
 0x275   : > { %v13828_v8 = vpop.f32.mrb[40].mxu0 }
 0x276   : > { %v13830_v4 = vpop.f32.mrb[41].mxu0 }
 0x277   : > { %v13833_v13 = vpop.f32.mrb[42].mxu0 }
 0x278   : > { %v13835_v11 = vpop.f32.mrb[43].mxu0 }
 0x27d   : > { %v13844_v22 = vpop.f32.mrb[44].mxu0 }
 0x27e   : > { %v13846_v21 = vpop.f32.mrb[45].mxu0 }
 0x27f   : > { %v13848_v5 = vpop.f32.mrb[46].mxu0 }
 0x280   : > { %v13851_v63 = vpop.f32.mrb[47].mxu0 }
 0x285   : > { %v13860_v51 = vpop.f32.mrb[48].mxu0 }
 0x286   : > { %v13862_v19 = vpop.f32.mrb[49].mxu0 }
 0x287   : > { %v13864_v10 = vpop.f32.mrb[50].mxu0 }
 0x288   : > { %v13867_v27 = vpop.f32.mrb[51].mxu0 }
 0x28d   : > { %v13881_v58 = vpop.f32.mrb[52].mxu0 }
 0x28e   : > { %v13886_v35 = vpop.f32.mrb[53].mxu0 }
 0x28f   : > { %v13890_v2 = vpop.f32.mrb[54].mxu0 }
 0x290   : > { %v13893_v34 = vpop.f32.mrb[55].mxu0 }
 0x295   : > { %v13912_v7 = vpop.f32.mrb[56].mxu0 }
 0x296   : > { %v13916_v39 = vpop.f32.mrb[57].mxu0 }
 0x297   : > { %v13919_v14 = vpop.f32.mrb[58].mxu0 }
 0x298   : > { %v13921_v16 = vpop.f32.mrb[59].mxu0 }
 0x2b6   : > { %v2368_v28 = vpop.f32.mrb[48].mxu1 }
 0x2b7   : > { %v2369_v42 = vadd.f32 %v2368_v28, %v1973_v32  ;;  %v2370_v40 = vpop.f32.mrb[49].mxu1  ;;  %v1975_v32 = vmul.f32 %v13904_v26, %v13877_v9 }
 0x2b8   : > { %v2371_v48 = vpop.f32.mrb[50].mxu1 }
 0x2b9   : > { %v2546_v54 = vadd.f32 %v13761_v49, %v2369_v42  ;;  %v2372_v56 = vadd.f32 %v2371_v48, %v1974_v43  ;;  %v2373_v60 = vpop.f32.mrb[51].mxu1  ;;  %v12307_v43 = vunpack.i.l.bf16 %v12306_v38  ;;  %v13936_v48 = vpop.permute.xlu1 %1834 }
 0x2ba   : > { %v12628_v60 = vld [vmem:[%s16661_s5 + $0xf0] sm:$0xff]  }
 0x2bb   : > { %v2905_v61 = vsel %vm2904_vm3, %v2546_v54, %v12302_v50  ;;  %v2549_v3 = vadd.f32 %v13777_v17, %v2372_v56  ;;  %v1976_v17 = vmul.f32 %v13904_v26, %v13879_v15  ;;  %4150 = vmatpush1.bf16.msra.mxu0 %v12628_v60 }
 0x2bc   : > { %2941 = vst [vmem:[#allocation2 + $0x13] sm:$0xff] %v2905_v61  ;;  %v12308_v61 = vunpack.i.h.bf16 %v12306_v38  ;;  %4151 = vmatprep.subr.bf16.mxu0 %v16672_v29 }
 0x2bd   : > { %v2906_v49 = vsel %vm2904_vm3, %v2549_v3, %v12303_v18  ;;  %v13942_v18 = vpop.permute.xlu0 %12315 }
 0x2be   : > { %2942 = vst [vmem:[#allocation2 + $0x1b] sm:$0xff] %v2906_v49  ;;  %v2376_v28 = vpop.f32.mrb[52].mxu1 }
 0x2bf   : > { %v2377_v24 = vadd.f32 %v2376_v28, %v1975_v32  ;;  %v2378_v42 = vpop.f32.mrb[53].mxu1  ;;  %v1977_v32 = vmul.f32 %v13904_v26, %v13888_v25 }
 0x2c0   : > { %v2379_v40 = vpop.f32.mrb[54].mxu1 }
 0x2c1   : > { %v2554_v50 = vadd.f32 %v13759_v44, %v2377_v24  ;;  %v2380_v54 = vadd.f32 %v2379_v40, %v1976_v17  ;;  %v2381_v56 = vpop.f32.mrb[55].mxu1 }
 0x2c2   : > { %v13954_v56 = vpop.permute.xlu0 %1844 }
 0x2c3   : > { %v2907_v3 = vsel %vm2904_vm3, %v2554_v50, %v12307_v43  ;;  %v2557_v30 = vadd.f32 %v13769_v33, %v2380_v54  ;;  %v3033_v49 = vld [vmem:[#allocation2 + $0x11] sm:$0xff]  ;;  %v13950_v43 = vpop.permute.xlu1 %1839  ;;  %v1978_v54 = vmul.f32 %v13904_v26, %v13898_v36 }
 0x2c4   : > { %2943 = vst [vmem:[#allocation2 + $0x23] sm:$0xff] %v2907_v3  ;;  %v2979_v24 = vld [vmem:[#allocation2 + $0x10] sm:$0xff]  ;;  %v12312_v3 = vunpack.i.l.bf16 %v12311_v23 }
 0x2c5   : > { %v2908_v44 = vsel %vm2904_vm3, %v2557_v30, %v12308_v61  ;;  %v3034_v28 = vld [vmem:[#allocation2 + $0x19] sm:$0xff] }
 0x2c6   : > { %v2980_v42 = vld [vmem:[#allocation2 + $0x18] sm:$0xff]  ;;  %2944 = vst [vmem:[#allocation2 + $0x2b] sm:$0xff] %v2908_v44  ;;  %v2384_v17 = vpop.f32.mrb[56].mxu1  ;;  %v3068_v38 = vpack.c.bf16 %v3034_v28, %v3033_v49 }
 0x2c7   : > { %v3014_v40 = vpack.c.bf16 %v2980_v42, %v2979_v24  ;;  %v2385_v33 = vadd.f32 %v2384_v17, %v1977_v32  ;;  %v2386_v50 = vpop.f32.mrb[57].mxu1  ;;  %v12629_v61 = vld [vmem:[%s16661_s5 + $0xf8] sm:$0xff]   ;;  %v12313_v32 = vunpack.i.h.bf16 %v12311_v23  ;;  %v13963_v17 = vpop.permute.xlu1 %12320 }
 0x2c8   : > { %v2387_v60 = vpop.f32.mrb[58].mxu1  ;;  %3984 = vmatprep.mubr.bf16.mxu0 %v3068_v38  ;;  %4152 = vmatpush1.bf16.msra.mxu0 %v12629_v61 }
 0x2c9   : > { %v2562_v30 = vadd.f32 %v13785_v37, %v2385_v33  ;;  %v2388_v49 = vadd.f32 %v2387_v60, %v1978_v54  ;;  %v2389_v44 = vpop.f32.mrb[59].mxu1  ;;  %3985 = vmatmul.mubr.bf16.gmra.mrb[64].mxu0 %v3014_v40  ;;  %4298 = vmatprep.subr.bf16.mxu0 %v16672_v29  ;;  %v1979_v37 = vmul.f32 %v13904_v26, %v13908_v46  ;;  %v13968_v54 = vpop.permute.xlu0 %1849  ;;  %v12318_v29 = vunpack.i.h.bf16 %v13942_v18 }
 0x2ca   : > { %16724 = vst [vmem:[#allocation4_spill] sm:$0xff] %v13968_v54  ;;  %v12317_v44 = vunpack.i.l.bf16 %v13942_v18 }
 0x2cb   : > { %v2909_v28 = vsel %vm2904_vm3, %v2562_v30, %v12312_v3  ;;  %v2565_v24 = vadd.f32 %v13799_v1, %v2388_v49  ;;  %v3035_v42 = vld [vmem:[#allocation2 + $0x21] sm:$0xff]  ;;  %v1980_v30 = vmul.f32 %v13904_v26, %v13910_v47 }
 0x2cc   : > { %2945 = vst [vmem:[#allocation2 + $0x33] sm:$0xff] %v2909_v28  ;;  %v2981_v50 = vld [vmem:[#allocation2 + $0x20] sm:$0xff] }
 0x2cd   : > { %v2910_v38 = vsel %vm2904_vm3, %v2565_v24, %v12313_v32  ;;  %v3036_v33 = vld [vmem:[#allocation2 + $0x29] sm:$0xff] }
 0x2ce   : > { %v2982_v40 = vld [vmem:[#allocation2 + $0x28] sm:$0xff]  ;;  %2946 = vst [vmem:[#allocation2 + $0x3b] sm:$0xff] %v2910_v38  ;;  %v2392_v23 = vpop.f32.mrb[60].mxu1  ;;  %v3069_v60 = vpack.c.bf16 %v3036_v33, %v3035_v42  ;;  %v13975_v38 = vpop.permute.xlu1 %1854 }
 0x2cf   : > { %v3015_v1 = vpack.c.bf16 %v2982_v40, %v2981_v50  ;;  %v2393_v61 = vadd.f32 %v2392_v23, %v1979_v37  ;;  %v2394_v3 = vpop.f32.mrb[61].mxu1  ;;  %v3307_v33 = vld [vmem:[#allocation2 + $0x26] sm:$0xff]  ;;  %v13979_v40 = vpop.permute.xlu0 %12325 }
 0x2d0   : > { %v2395_v49 = vpop.f32.mrb[62].mxu1  ;;  %3992 = vmatprep.mubr.bf16.mxu0 %v3069_v60 }
 0x2d1   : > { %v2570_v32 = vadd.f32 %v13783_v41, %v2393_v61  ;;  %v2396_v28 = vadd.f32 %v2395_v49, %v1980_v30  ;;  %v2397_v24 = vpop.f32.mrb[63].mxu1  ;;  %3993 = vmatmul.mubr.bf16.gmra.mrb[68].mxu0 %v3015_v1  ;;  %v1981_v1 = vmul.f32 %v13904_v26, %v13925_v31 }
 0x2d3   : > { %v2911_v42 = vsel %vm2904_vm3, %v2570_v32, %v12317_v44  ;;  %v2573_v37 = vadd.f32 %v13793_v53, %v2396_v28  ;;  %v3308_v50 = vld [vmem:[#allocation2 + $0x2e] sm:$0xff]  ;;  %v1982_v28 = vmul.f32 %v13904_v26, %v13936_v48 }
 0x2d4   : > { %2947 = vst [vmem:[#allocation2 + $0x43] sm:$0xff] %v2911_v42  ;;  %v3343_v23 = vpack.c.bf16 %v3308_v50, %v3307_v33  ;;  %v3037_v60 = vld [vmem:[#allocation2 + $0x31] sm:$0xff]  ;;  %v13987_v42 = vpop.permute.xlu1 %1859 }
 0x2d5   : > { %v2912_v41 = vsel %vm2904_vm3, %v2573_v37, %v12318_v29  ;;  %v3038_v61 = vld [vmem:[#allocation2 + $0x39] sm:$0xff]  ;;  %v2983_v18 = vld [vmem:[#allocation2 + $0x30] sm:$0xff]  ;;  %v12322_v29 = vunpack.i.l.bf16 %v13963_v17  ;;  %16725 = vst [vmem:[#allocation5_spill] sm:$0xff] %v13987_v42 }
 0x2d6   : > { %v2984_v3 = vld [vmem:[#allocation2 + $0x38] sm:$0xff]  ;;  %2948 = vst [vmem:[#allocation2 + $0x4b] sm:$0xff] %v2912_v41  ;;  %v2400_v30 = vpop.f32.mrb[64].mxu1  ;;  %11499 = vmatprep.mubr.bf16.mxu1 %v3343_v23  ;;  %v3070_v49 = vpack.c.bf16 %v3038_v61, %v3037_v60  ;;  %v13990_v41 = vpop.permute.xlu0 %1864  ;;  %v12323_v23 = vunpack.i.h.bf16 %v13963_v17 }
 0x2d7   : > { %v3016_v53 = vpack.c.bf16 %v2984_v3, %v2983_v18  ;;  %v2401_v44 = vadd.f32 %v2400_v30, %v1981_v1  ;;  %v2402_v32 = vpop.f32.mrb[65].mxu1  ;;  %16726 = vst [vmem:[#allocation6_spill] sm:$0xff] %v13990_v41  ;;  %v3309_v61 = vld [vmem:[#allocation2 + $0x36] sm:$0xff] }
 0x2d8   : > { %v2403_v24 = vpop.f32.mrb[66].mxu1  ;;  %4000 = vmatprep.mubr.bf16.mxu0 %v3070_v49 }
 0x2d9   : > { %v2578_v37 = vadd.f32 %v13804_v55, %v2401_v44  ;;  %v2404_v33 = vadd.f32 %v2403_v24, %v1982_v28  ;;  %v2405_v50 = vpop.f32.mrb[67].mxu1  ;;  %4001 = vmatmul.mubr.bf16.gmra.mrb[72].mxu0 %v3016_v53  ;;  %v1983_v55 = vmul.f32 %v13904_v26, %v13950_v43 }
 0x2da   : > { %v14000_v50 = vpop.permute.xlu0 %1869 }
 0x2db   : > { %v2913_v60 = vsel %vm2904_vm3, %v2578_v37, %v12322_v29  ;;  %v2581_v1 = vadd.f32 %v13814_v52, %v2404_v33  ;;  %v3310_v18 = vld [vmem:[#allocation2 + $0x3e] sm:$0xff]  ;;  %v12331_v29 = vpop.permute.xlu1 %12330  ;;  %v1984_v33 = vmul.f32 %v13904_v26, %v13954_v56  ;;  %16727 = vst [vmem:[#allocation7_spill] sm:$0xff] %v14000_v50 }
 0x2dc   : > { %2949 = vst [vmem:[#allocation2 + $0x53] sm:$0xff] %v2913_v60  ;;  %v3344_v3 = vpack.c.bf16 %v3310_v18, %v3309_v61  ;;  %v3039_v30 = vld [vmem:[#allocation2 + $0x41] sm:$0xff]  ;;  %v12327_v60 = vunpack.i.l.bf16 %v13979_v40 }
 0x2dd   : > { %v2914_v49 = vsel %vm2904_vm3, %v2581_v1, %v12323_v23  ;;  %v3040_v44 = vld [vmem:[#allocation2 + $0x49] sm:$0xff]  ;;  %v2985_v53 = vld [vmem:[#allocation2 + $0x40] sm:$0xff] }
 0x2de   : > { %v2986_v32 = vld [vmem:[#allocation2 + $0x48] sm:$0xff]  ;;  %2950 = vst [vmem:[#allocation2 + $0x5b] sm:$0xff] %v2914_v49  ;;  %v2408_v28 = vpop.f32.mrb[68].mxu1  ;;  %11500 = vmatmul.mubr.bf16.vlgmr.msra.gmra.mrb[120].mxu1 %v3344_v3  ;;  %v3071_v17 = vpack.c.bf16 %v3040_v44, %v3039_v30  ;;  %v12328_v3 = vunpack.i.h.bf16 %v13979_v40  ;;  %v12336_v40 = vpop.permute.xlu0 %12335 }
 0x2df   : > { %v3017_v24 = vpack.c.bf16 %v2986_v32, %v2985_v53  ;;  %v2409_v52 = vadd.f32 %v2408_v28, %v1983_v55  ;;  %v2410_v37 = vpop.f32.mrb[69].mxu1  ;;  %v3311_v55 = vld [vmem:[#allocation2 + $0x46] sm:$0xff]  ;;  %v14007_v28 = vpop.permute.xlu1 %1874 }
 0x2e0   : > { %v2411_v23 = vpop.f32.mrb[70].mxu1  ;;  %4008 = vmatprep.mubr.bf16.mxu0 %v3071_v17  ;;  %16728 = vst [vmem:[#allocation8_spill] sm:$0xff] %v14007_v28 }
 0x2e1   : > { %v2586_v1 = vadd.f32 %v13802_v20, %v2409_v52  ;;  %v2412_v61 = vadd.f32 %v2411_v23, %v1984_v33  ;;  %v2413_v18 = vpop.f32.mrb[71].mxu1  ;;  %4009 = vmatmul.mubr.bf16.gmra.mrb[76].mxu0 %v3017_v24  ;;  %v1985_v20 = vmul.f32 %v13904_v26, %v13968_v54 }
 0x2e3   : > { %v2915_v30 = vsel %vm2904_vm3, %v2586_v1, %v12327_v60  ;;  %v2589_v49 = vadd.f32 %v13812_v6, %v2412_v61  ;;  %v3312_v44 = vld [vmem:[#allocation2 + $0x4e] sm:$0xff]  ;;  %v1986_v61 = vmul.f32 %v13904_v26, %v13975_v38  ;;  %v14015_v54 = vpop.permute.xlu1 %1879 }
 0x2e4   : > { %2951 = vst [vmem:[#allocation2 + $0x63] sm:$0xff] %v2915_v30  ;;  %v3345_v53 = vpack.c.bf16 %v3312_v44, %v3311_v55  ;;  %v3041_v32 = vld [vmem:[#allocation2 + $0x51] sm:$0xff]  ;;  %v12333_v44 = vunpack.i.h.bf16 %v12331_v29  ;;  %16729 = vst [vmem:[#allocation9_spill] sm:$0xff] %v14015_v54 }
 0x2e5   : > { %v2916_v17 = vsel %vm2904_vm3, %v2589_v49, %v12328_v3  ;;  %v3042_v52 = vld [vmem:[#allocation2 + $0x59] sm:$0xff]  ;;  %v2987_v24 = vld [vmem:[#allocation2 + $0x50] sm:$0xff]  ;;  %v12332_v3 = vunpack.i.l.bf16 %v12331_v29 }
 0x2e6   : > { %v2988_v37 = vld [vmem:[#allocation2 + $0x58] sm:$0xff]  ;;  %2952 = vst [vmem:[#allocation2 + $0x6b] sm:$0xff] %v2916_v17  ;;  %v2416_v33 = vpop.f32.mrb[72].mxu1  ;;  %11503 = vmatprep.mubr.bf16.mxu1 %v3345_v53  ;;  %v3072_v6 = vpack.c.bf16 %v3042_v52, %v3041_v32  ;;  %v14019_v52 = vpop.permute.xlu0 %1884 }
 0x2e7   : > { %v3018_v23 = vpack.c.bf16 %v2988_v37, %v2987_v24  ;;  %v2417_v60 = vadd.f32 %v2416_v33, %v1985_v20  ;;  %v2418_v1 = vpop.f32.mrb[73].mxu1  ;;  %v3313_v17 = vld [vmem:[#allocation2 + $0x56] sm:$0xff]  ;;  %16730 = vst [vmem:[#allocation10_spill] sm:$0xff] %v14019_v52 }
 0x2e8   : > { %v2419_v18 = vpop.f32.mrb[74].mxu1  ;;  %4016 = vmatprep.mubr.bf16.mxu0 %v3072_v6 }
 0x2e9   : > { %v2594_v30 = vadd.f32 %v13819_v12, %v2417_v60  ;;  %v2420_v49 = vadd.f32 %v2419_v18, %v1986_v61  ;;  %v2421_v55 = vpop.f32.mrb[75].mxu1  ;;  %4017 = vmatmul.mubr.bf16.gmra.mrb[80].mxu0 %v3018_v23  ;;  %v1987_v12 = vmul.f32 %v13904_v26, %v13987_v42 }
 0x2ea   : > { %v12341_v55 = vpop.permute.xlu1 %12340 }
 0x2eb   : > { %v2917_v53 = vsel %vm2904_vm3, %v2594_v30, %v12332_v3  ;;  %v2597_v32 = vadd.f32 %v13823_v0, %v2420_v49  ;;  %v3314_v20 = vld [vmem:[#allocation2 + $0x5e] sm:$0xff]  ;;  %v1988_v3 = vmul.f32 %v13904_v26, %v13990_v41  ;;  %v12337_v49 = vunpack.i.l.bf16 %v12336_v40 }
 0x2ec   : > { %2953 = vst [vmem:[#allocation2 + $0x73] sm:$0xff] %v2917_v53  ;;  %v3346_v24 = vpack.c.bf16 %v3314_v20, %v3313_v17  ;;  %v3043_v37 = vld [vmem:[#allocation2 + $0x61] sm:$0xff]  ;;  %v14027_v17 = vpop.permute.xlu0 %1889  ;;  %v12338_v20 = vunpack.i.h.bf16 %v12336_v40 }
 0x2ed   : > { %v2918_v33 = vsel %vm2904_vm3, %v2597_v32, %v12333_v44  ;;  %v3044_v6 = vld [vmem:[#allocation2 + $0x69] sm:$0xff]  ;;  %v2989_v29 = vld [vmem:[#allocation2 + $0x60] sm:$0xff]  ;;  %16731 = vst [vmem:[#allocation11_spill] sm:$0xff] %v14027_v17 }
 0x2ee   : > { %v2990_v23 = vld [vmem:[#allocation2 + $0x68] sm:$0xff]  ;;  %2954 = vst [vmem:[#allocation2 + $0x7b] sm:$0xff] %v2918_v33  ;;  %v2424_v60 = vpop.f32.mrb[76].mxu1  ;;  %11504 = vmatmul.mubr.bf16.gmra.mrb[124].mxu1 %v3346_v24  ;;  %v3073_v1 = vpack.c.bf16 %v3044_v6, %v3043_v37 }
 0x2ef   : > { %v3019_v0 = vpack.c.bf16 %v2990_v23, %v2989_v29  ;;  %v2425_v61 = vadd.f32 %v2424_v60, %v1987_v12  ;;  %v2426_v18 = vpop.f32.mrb[77].mxu1  ;;  %v3315_v33 = vld [vmem:[#allocation2 + $0x66] sm:$0xff] }
 0x2f0   : > { %v2427_v30 = vpop.f32.mrb[78].mxu1  ;;  %4024 = vmatprep.mubr.bf16.mxu0 %v3073_v1 }
 0x2f1   : > { %v2602_v44 = vadd.f32 %v13817_v59, %v2425_v61  ;;  %v2428_v53 = vadd.f32 %v2427_v30, %v1988_v3  ;;  %v2429_v32 = vpop.f32.mrb[79].mxu1  ;;  %4025 = vmatmul.mubr.bf16.gmra.mrb[84].mxu0 %v3019_v0  ;;  %v1989_v59 = vmul.f32 %v13904_v26, %v14000_v50  ;;  %v14034_v3 = vpop.permute.xlu1 %1894 }
 0x2f2   : > { %16732 = vst [vmem:[#allocation12_spill] sm:$0xff] %v14034_v3  ;;  %v12342_v32 = vunpack.i.l.bf16 %v12341_v55 }
 0x2f3   : > { %v2919_v24 = vsel %vm2904_vm3, %v2602_v44, %v12337_v49  ;;  %v2605_v37 = vadd.f32 %v13821_v57, %v2428_v53  ;;  %v3316_v12 = vld [vmem:[#allocation2 + $0x6e] sm:$0xff]  ;;  %v1990_v49 = vmul.f32 %v13904_v26, %v14007_v28  ;;  %v12346_v44 = vpop.permute.xlu0 %12345 }
 0x2f4   : > { %2955 = vst [vmem:[#allocation2 + $0x83] sm:$0xff] %v2919_v24  ;;  %v3347_v6 = vpack.c.bf16 %v3316_v12, %v3315_v33  ;;  %v3045_v29 = vld [vmem:[#allocation2 + $0x71] sm:$0xff]  ;;  %v12343_v33 = vunpack.i.h.bf16 %v12341_v55 }
 0x2f5   : > { %v2920_v23 = vsel %vm2904_vm3, %v2605_v37, %v12338_v20  ;;  %v3046_v60 = vld [vmem:[#allocation2 + $0x79] sm:$0xff]  ;;  %v2991_v1 = vld [vmem:[#allocation2 + $0x70] sm:$0xff] }
 0x2f6   : > { %v2992_v0 = vld [vmem:[#allocation2 + $0x78] sm:$0xff]  ;;  %2956 = vst [vmem:[#allocation2 + $0x8b] sm:$0xff] %v2920_v23  ;;  %v2432_v61 = vpop.f32.mrb[80].mxu1  ;;  %11507 = vmatprep.mubr.bf16.mxu1 %v3347_v6  ;;  %v3074_v40 = vpack.c.bf16 %v3046_v60, %v3045_v29 }
 0x2f7   : > { %v3020_v18 = vpack.c.bf16 %v2992_v0, %v2991_v1  ;;  %v2433_v57 = vadd.f32 %v2432_v61, %v1989_v59  ;;  %v2434_v30 = vpop.f32.mrb[81].mxu1  ;;  %v3317_v29 = vld [vmem:[#allocation2 + $0x76] sm:$0xff]  ;;  %v14041_v1 = vpop.permute.xlu1 %1899 }
 0x2f8   : > { %v2435_v53 = vpop.f32.mrb[82].mxu1  ;;  %4032 = vmatprep.mubr.bf16.mxu0 %v3074_v40  ;;  %16733 = vst [vmem:[#allocation13_spill] sm:$0xff] %v14041_v1  ;;  %v14046_v55 = vpop.permute.xlu0 %1904 }
 0x2f9   : > { %v2610_v20 = vadd.f32 %v13830_v4, %v2433_v57  ;;  %v2436_v24 = vadd.f32 %v2435_v53, %v1990_v49  ;;  %v2437_v37 = vpop.f32.mrb[83].mxu1  ;;  %4033 = vmatmul.mubr.bf16.gmra.mrb[88].mxu0 %v3020_v18  ;;  %v1991_v4 = vmul.f32 %v13904_v26, %v14015_v54  ;;  %16734 = vst [vmem:[#allocation14_spill] sm:$0xff] %v14046_v55 }
 0x2fb   : > { %v2921_v12 = vsel %vm2904_vm3, %v2610_v20, %v12342_v32  ;;  %v2613_v6 = vadd.f32 %v13835_v11, %v2436_v24  ;;  %v3318_v23 = vld [vmem:[#allocation2 + $0x7e] sm:$0xff]  ;;  %v1992_v32 = vmul.f32 %v13904_v26, %v14019_v52  ;;  %v12347_v24 = vunpack.i.l.bf16 %v12346_v44 }
 0x2fc   : > { %2957 = vst [vmem:[#allocation2 + $0x93] sm:$0xff] %v2921_v12  ;;  %v3348_v59 = vpack.c.bf16 %v3318_v23, %v3317_v29  ;;  %v3047_v60 = vld [vmem:[#allocation2 + $0x81] sm:$0xff]  ;;  %v12351_v29 = vpop.permute.xlu1 %12350 }
 0x2fd   : > { %v2922_v0 = vsel %vm2904_vm3, %v2613_v6, %v12343_v33  ;;  %v3048_v61 = vld [vmem:[#allocation2 + $0x89] sm:$0xff]  ;;  %v2993_v40 = vld [vmem:[#allocation2 + $0x80] sm:$0xff]  ;;  %v12348_v6 = vunpack.i.h.bf16 %v12346_v44 }
 0x2fe   : > { %v2994_v18 = vld [vmem:[#allocation2 + $0x88] sm:$0xff]  ;;  %2958 = vst [vmem:[#allocation2 + $0x9b] sm:$0xff] %v2922_v0  ;;  %v2440_v57 = vpop.f32.mrb[84].mxu1  ;;  %11508 = vmatmul.mubr.bf16.gmra.mrb[128].mxu1 %v3348_v59  ;;  %v3075_v11 = vpack.c.bf16 %v3048_v61, %v3047_v60 }
 0x2ff   : > { %v3021_v30 = vpack.c.bf16 %v2994_v18, %v2993_v40  ;;  %v2441_v49 = vadd.f32 %v2440_v57, %v1991_v4  ;;  %v2442_v53 = vpop.f32.mrb[85].mxu1  ;;  %v3319_v60 = vld [vmem:[#allocation2 + $0x86] sm:$0xff]  ;;  %v14053_v4 = vpop.permute.xlu0 %1909 }
 0x300   : > { %v2443_v20 = vpop.f32.mrb[86].mxu1  ;;  %4040 = vmatprep.mubr.bf16.mxu0 %v3075_v11  ;;  %16735 = vst [vmem:[#allocation15_spill] sm:$0xff] %v14053_v4 }
 0x301   : > { %v2618_v37 = vadd.f32 %v13828_v8, %v2441_v49  ;;  %v2444_v33 = vadd.f32 %v2443_v20, %v1992_v32  ;;  %v2445_v12 = vpop.f32.mrb[87].mxu1  ;;  %4041 = vmatmul.mubr.bf16.gmra.mrb[92].mxu0 %v3021_v30  ;;  %v1993_v8 = vmul.f32 %v13904_v26, %v14027_v17  ;;  %v1994_v20 = vmul.f32 %v13904_v26, %v14034_v3  ;;  %v3154_v3 = vld [vmem:[#allocation2 + $0x73] sm:$0xff] }
 0x303   : > { %v2923_v23 = vsel %vm2904_vm3, %v2618_v37, %v12347_v24  ;;  %v2621_v59 = vadd.f32 %v13833_v13, %v2444_v33  ;;  %v3320_v0 = vld [vmem:[#allocation2 + $0x8e] sm:$0xff]  ;;  %v12352_v37 = vunpack.i.l.bf16 %v12351_v29  ;;  %v14060_v33 = vpop.permute.xlu1 %1914 }
 0x304   : > { %2959 = vst [vmem:[#allocation2 + $0xa3] sm:$0xff] %v2923_v23  ;;  %v3349_v61 = vpack.c.bf16 %v3320_v0, %v3319_v60  ;;  %v3049_v40 = vld [vmem:[#allocation2 + $0x91] sm:$0xff]  ;;  %16736 = vst [vmem:[#allocation16_spill] sm:$0xff] %v14060_v33  ;;  %v12353_v60 = vunpack.i.h.bf16 %v12351_v29 }
 0x305   : > { %v2924_v18 = vsel %vm2904_vm3, %v2621_v59, %v12348_v6  ;;  %v3050_v57 = vld [vmem:[#allocation2 + $0x99] sm:$0xff]  ;;  %v2995_v11 = vld [vmem:[#allocation2 + $0x90] sm:$0xff]  ;;  %v12356_v59 = vpop.permute.xlu0 %12355 }
 0x306   : > { %v2996_v44 = vld [vmem:[#allocation2 + $0x98] sm:$0xff]  ;;  %2960 = vst [vmem:[#allocation2 + $0xab] sm:$0xff] %v2924_v18  ;;  %v2448_v30 = vpop.f32.mrb[88].mxu1  ;;  %11511 = vmatprep.mubr.bf16.mxu1 %v3349_v61  ;;  %v3076_v49 = vpack.c.bf16 %v3050_v57, %v3049_v40 }
 0x307   : > { %v3022_v13 = vpack.c.bf16 %v2996_v44, %v2995_v11  ;;  %v2449_v53 = vadd.f32 %v2448_v30, %v1993_v8  ;;  %v2450_v32 = vpop.f32.mrb[89].mxu1  ;;  %v3321_v40 = vld [vmem:[#allocation2 + $0x96] sm:$0xff]  ;;  %v1995_v44 = vmul.f32 %v13904_v26, %v14041_v1 }
 0x308   : > { %v2451_v24 = vpop.f32.mrb[90].mxu1  ;;  %4048 = vmatprep.mubr.bf16.mxu0 %v3076_v49  ;;  %v14068_v32 = vpop.permute.xlu1 %1919 }
 0x309   : > { %v2626_v12 = vadd.f32 %v13846_v21, %v2449_v53  ;;  %v2452_v6 = vadd.f32 %v2451_v24, %v1994_v20  ;;  %v2453_v23 = vpop.f32.mrb[91].mxu1  ;;  %4049 = vmatmul.mubr.bf16.gmra.mrb[96].mxu0 %v3022_v13  ;;  %16737 = vst [vmem:[#allocation17_spill] sm:$0xff] %v14068_v32  ;;  %v1996_v24 = vmul.f32 %v13904_v26, %v14046_v55 }
 0x30b   : > { %v2925_v0 = vsel %vm2904_vm3, %v2626_v12, %v12352_v37  ;;  %v2629_v61 = vadd.f32 %v13851_v63, %v2452_v6  ;;  %v3322_v18 = vld [vmem:[#allocation2 + $0x9e] sm:$0xff]  ;;  %v14072_v37 = vpop.permute.xlu0 %1924  ;;  %v12357_v6 = vunpack.i.l.bf16 %v12356_v59 }
 0x30c   : > { %2961 = vst [vmem:[#allocation2 + $0xb3] sm:$0xff] %v2925_v0  ;;  %v3350_v8 = vpack.c.bf16 %v3322_v18, %v3321_v40  ;;  %v3051_v57 = vld [vmem:[#allocation2 + $0xa1] sm:$0xff]  ;;  %16738 = vst [vmem:[#allocation18_spill] sm:$0xff] %v14072_v37 }
 0x30d   : > { %v2926_v11 = vsel %vm2904_vm3, %v2629_v61, %v12353_v60  ;;  %v3052_v21 = vld [vmem:[#allocation2 + $0xa9] sm:$0xff]  ;;  %v2997_v30 = vld [vmem:[#allocation2 + $0xa0] sm:$0xff]  ;;  %v12358_v61 = vunpack.i.h.bf16 %v12356_v59 }
 0x30e   : > { %v2998_v49 = vld [vmem:[#allocation2 + $0xa8] sm:$0xff]  ;;  %2962 = vst [vmem:[#allocation2 + $0xbb] sm:$0xff] %v2926_v11  ;;  %v2456_v13 = vpop.f32.mrb[92].mxu1  ;;  %11512 = vmatmul.mubr.bf16.gmra.mrb[132].mxu1 %v3350_v8  ;;  %v3077_v29 = vpack.c.bf16 %v3052_v21, %v3051_v57  ;;  %v12361_v21 = vpop.permute.xlu1 %12360 }
 0x30f   : > { %v3023_v53 = vpack.c.bf16 %v2998_v49, %v2997_v30  ;;  %v2457_v63 = vadd.f32 %v2456_v13, %v1995_v44  ;;  %v2458_v20 = vpop.f32.mrb[93].mxu1  ;;  %v3323_v8 = vld [vmem:[#allocation2 + $0xa6] sm:$0xff]  ;;  %v1997_v49 = vmul.f32 %v13904_v26, %v14053_v4 }
 0x310   : > { %v2459_v12 = vpop.f32.mrb[94].mxu1  ;;  %4056 = vmatprep.mubr.bf16.mxu0 %v3077_v29  ;;  %v3161_v52 = vld [vmem:[#allocation2 + $0xab] sm:$0xff] }
 0x311   : > { %v2634_v23 = vadd.f32 %v13844_v22, %v2457_v63  ;;  %v2460_v60 = vadd.f32 %v2459_v12, %v1996_v24  ;;  %v2461_v0 = vpop.f32.mrb[95].mxu1  ;;  %4057 = vmatmul.mubr.bf16.gmra.mrb[100].mxu0 %v3023_v53  ;;  %v14080_v53 = vpop.permute.xlu0 %1929  ;;  %v1998_v12 = vmul.f32 %v13904_v26, %v14060_v33  ;;  %v3150_v33 = vld [vmem:[#allocation2 + $0x53] sm:$0xff] }
 0x312   : > { %16739 = vst [vmem:[#allocation19_spill] sm:$0xff] %v14080_v53 }
 0x313   : > { %v2927_v40 = vsel %vm2904_vm3, %v2634_v23, %v12357_v6  ;;  %v2637_v18 = vadd.f32 %v13848_v5, %v2460_v60  ;;  %v3324_v57 = vld [vmem:[#allocation2 + $0xae] sm:$0xff]  ;;  %v12362_v23 = vunpack.i.l.bf16 %v12361_v21 }
 0x314   : > { %2963 = vst [vmem:[#allocation2 + $0xc3] sm:$0xff] %v2927_v40  ;;  %v3351_v11 = vpack.c.bf16 %v3324_v57, %v3323_v8  ;;  %v3053_v44 = vld [vmem:[#allocation2 + $0xb1] sm:$0xff]  ;;  %v12363_v40 = vunpack.i.h.bf16 %v12361_v21 }
 0x315   : > { %v2928_v30 = vsel %vm2904_vm3, %v2637_v18, %v12358_v61  ;;  %v3054_v22 = vld [vmem:[#allocation2 + $0xb9] sm:$0xff]  ;;  %v2999_v13 = vld [vmem:[#allocation2 + $0xb0] sm:$0xff]  ;;  %v14085_v18 = vpop.permute.xlu1 %1934 }
 0x316   : > { %v3000_v29 = vld [vmem:[#allocation2 + $0xb8] sm:$0xff]  ;;  %2964 = vst [vmem:[#allocation2 + $0xcb] sm:$0xff] %v2928_v30  ;;  %v2464_v59 = vpop.f32.mrb[96].mxu1  ;;  %11515 = vmatprep.mubr.bf16.mxu1 %v3351_v11  ;;  %v3078_v5 = vpack.c.bf16 %v3054_v22, %v3053_v44  ;;  %16740 = vst [vmem:[#allocation20_spill] sm:$0xff] %v14085_v18  ;;  %v12366_v30 = vpop.permute.xlu0 %12365 }
 0x317   : > { %v3024_v63 = vpack.c.bf16 %v3000_v29, %v2999_v13  ;;  %v2465_v20 = vadd.f32 %v2464_v59, %v1997_v49  ;;  %v2466_v24 = vpop.f32.mrb[97].mxu1  ;;  %v3325_v11 = vld [vmem:[#allocation2 + $0xb6] sm:$0xff] }
 0x318   : > { %v2467_v6 = vpop.f32.mrb[98].mxu1  ;;  %4064 = vmatprep.mubr.bf16.mxu0 %v3078_v5 }
 0x319   : > { %v2642_v60 = vadd.f32 %v13862_v19, %v2465_v20  ;;  %v2468_v0 = vadd.f32 %v2467_v6, %v1998_v12  ;;  %v2469_v61 = vpop.f32.mrb[99].mxu1  ;;  %4065 = vmatmul.mubr.bf16.gmra.mrb[104].mxu0 %v3024_v63  ;;  %v1999_v19 = vmul.f32 %v13904_v26, %v14068_v32  ;;  %v2000_v12 = vmul.f32 %v13904_v26, %v14072_v37  ;;  %v12653_v37 = vld [vmem:[%s16661_s5 + $0x1b8] sm:$0xff]   ;;  %v3207_v32 = vld [vmem:[#allocation2 + $0x6c] sm:$0xff] }
 0x31b   : > { %v2929_v8 = vsel %vm2904_vm3, %v2642_v60, %v12362_v23  ;;  %v2645_v57 = vadd.f32 %v13867_v27, %v2468_v0  ;;  %v3326_v44 = vld [vmem:[#allocation2 + $0xbe] sm:$0xff]  ;;  %v14094_v23 = vpop.permute.xlu1 %1939  ;;  %v12367_v60 = vunpack.i.l.bf16 %v12366_v30 }
 0x31c   : > { %2965 = vst [vmem:[#allocation2 + $0xd3] sm:$0xff] %v2929_v8  ;;  %v3352_v49 = vpack.c.bf16 %v3326_v44, %v3325_v11  ;;  %v3055_v22 = vld [vmem:[#allocation2 + $0xc1] sm:$0xff]  ;;  %16741 = vst [vmem:[#allocation21_spill] sm:$0xff] %v14094_v23  ;;  %v14097_v8 = vpop.permute.xlu0 %1944 }
 0x31d   : > { %v2930_v13 = vsel %vm2904_vm3, %v2645_v57, %v12363_v40  ;;  %v3056_v29 = vld [vmem:[#allocation2 + $0xc9] sm:$0xff]  ;;  %v3001_v59 = vld [vmem:[#allocation2 + $0xc0] sm:$0xff]  ;;  %16742 = vst [vmem:[#allocation22_spill] sm:$0xff] %v14097_v8  ;;  %v12368_v57 = vunpack.i.h.bf16 %v12366_v30 }
 0x31e   : > { %v3002_v21 = vld [vmem:[#allocation2 + $0xc8] sm:$0xff]  ;;  %2966 = vst [vmem:[#allocation2 + $0xdb] sm:$0xff] %v2930_v13  ;;  %v2472_v5 = vpop.f32.mrb[100].mxu1  ;;  %11516 = vmatmul.mubr.bf16.gmra.mrb[136].mxu1 %v3352_v49  ;;  %v3079_v63 = vpack.c.bf16 %v3056_v29, %v3055_v22  ;;  %v3217_v54 = vld [vmem:[#allocation2 + $0xbc] sm:$0xff] }
 0x31f   : > { %v3025_v20 = vpack.c.bf16 %v3002_v21, %v3001_v59  ;;  %v2473_v27 = vadd.f32 %v2472_v5, %v1999_v19  ;;  %v2474_v24 = vpop.f32.mrb[101].mxu1  ;;  %v3327_v49 = vld [vmem:[#allocation2 + $0xc6] sm:$0xff] }
 0x320   : > { %v2475_v6 = vpop.f32.mrb[102].mxu1  ;;  %4072 = vmatprep.mubr.bf16.mxu0 %v3079_v63  ;;  %v3164_v28 = vld [vmem:[#allocation2 + $0xc3] sm:$0xff] }
 0x321   : > { %v2650_v0 = vadd.f32 %v13860_v51, %v2473_v27  ;;  %v2476_v61 = vadd.f32 %v2475_v6, %v2000_v12  ;;  %v2477_v40 = vpop.f32.mrb[103].mxu1  ;;  %4073 = vmatmul.mubr.bf16.gmra.mrb[108].mxu0 %v3025_v20  ;;  %v2001_v51 = vmul.f32 %v13904_v26, %v14080_v53  ;;  %v12371_v27 = vpop.permute.xlu1 %12370  ;;  %v2002_v12 = vmul.f32 %v13904_v26, %v14085_v18 }
 0x322   : > { %v14106_v6 = vpop.permute.xlu0 %1949 }
 0x323   : > { %v2931_v11 = vsel %vm2904_vm3, %v2650_v0, %v12367_v60  ;;  %v2653_v44 = vadd.f32 %v13864_v10, %v2476_v61  ;;  %v3328_v22 = vld [vmem:[#allocation2 + $0xce] sm:$0xff]  ;;  %16743 = vst [vmem:[#allocation23_spill] sm:$0xff] %v14106_v6  ;;  %v12372_v0 = vunpack.i.l.bf16 %v12371_v27 }
 0x324   : > { %2967 = vst [vmem:[#allocation2 + $0xe3] sm:$0xff] %v2931_v11  ;;  %v3353_v13 = vpack.c.bf16 %v3328_v22, %v3327_v49  ;;  %v3057_v19 = vld [vmem:[#allocation2 + $0xd1] sm:$0xff]  ;;  %v12373_v11 = vunpack.i.h.bf16 %v12371_v27 }
 0x325   : > { %v2932_v29 = vsel %vm2904_vm3, %v2653_v44, %v12368_v57  ;;  %v3058_v59 = vld [vmem:[#allocation2 + $0xd9] sm:$0xff]  ;;  %v3003_v21 = vld [vmem:[#allocation2 + $0xd0] sm:$0xff] }
 0x326   : > { %v3004_v5 = vld [vmem:[#allocation2 + $0xd8] sm:$0xff]  ;;  %2968 = vst [vmem:[#allocation2 + $0xeb] sm:$0xff] %v2932_v29  ;;  %v2480_v63 = vpop.f32.mrb[104].mxu1  ;;  %11519 = vmatprep.mubr.bf16.mxu1 %v3353_v13  ;;  %v3080_v30 = vpack.c.bf16 %v3058_v59, %v3057_v19  ;;  %v2003_v59 = vmul.f32 %v13904_v26, %v14094_v23 }
 0x327   : > { %v3026_v20 = vpack.c.bf16 %v3004_v5, %v3003_v21  ;;  %v2481_v10 = vadd.f32 %v2480_v63, %v2001_v51  ;;  %v2482_v24 = vpop.f32.mrb[105].mxu1  ;;  %v3329_v22 = vld [vmem:[#allocation2 + $0xd6] sm:$0xff]  ;;  %v12376_v63 = vpop.permute.xlu0 %12375 }
 0x328   : > { %v2483_v60 = vpop.f32.mrb[106].mxu1  ;;  %4080 = vmatprep.mubr.bf16.mxu0 %v3080_v30  ;;  %v3166_v50 = vld [vmem:[#allocation2 + $0xd3] sm:$0xff] }
 0x329   : > { %v2658_v61 = vadd.f32 %v13886_v35, %v2481_v10  ;;  %v2484_v40 = vadd.f32 %v2483_v60, %v2002_v12  ;;  %v2485_v57 = vpop.f32.mrb[107].mxu1  ;;  %4081 = vmatmul.mubr.bf16.gmra.mrb[112].mxu0 %v3026_v20  ;;  %v2004_v12 = vmul.f32 %v13904_v26, %v14097_v8  ;;  %v14116_v60 = vpop.permute.xlu1 %1954  ;;  %v3146_v8 = vld [vmem:[#allocation2 + $0x33] sm:$0xff] }
 0x32a   : > { %16744 = vst [vmem:[#allocation24_spill] sm:$0xff] %v14116_v60 }
 0x32b   : > { %v2933_v44 = vsel %vm2904_vm3, %v2658_v61, %v12372_v0  ;;  %v2661_v49 = vadd.f32 %v13893_v34, %v2484_v40  ;;  %v3330_v13 = vld [vmem:[#allocation2 + $0xde] sm:$0xff]  ;;  %v12377_v34 = vunpack.i.l.bf16 %v12376_v63  ;;  %v12378_v61 = vunpack.i.h.bf16 %v12376_v63 }
 0x32c   : > { %2969 = vst [vmem:[#allocation2 + $0xf3] sm:$0xff] %v2933_v44  ;;  %v3354_v19 = vpack.c.bf16 %v3330_v13, %v3329_v22  ;;  %v3059_v29 = vld [vmem:[#allocation2 + $0xe1] sm:$0xff] }
 0x32d   : > { %v2934_v51 = vsel %vm2904_vm3, %v2661_v49, %v12373_v11  ;;  %v3060_v21 = vld [vmem:[#allocation2 + $0xe9] sm:$0xff]  ;;  %v3005_v35 = vld [vmem:[#allocation2 + $0xe0] sm:$0xff] }
 0x32e   : > { %v3006_v5 = vld [vmem:[#allocation2 + $0xe8] sm:$0xff]  ;;  %2970 = vst [vmem:[#allocation2 + $0xfb] sm:$0xff] %v2934_v51  ;;  %v2488_v30 = vpop.f32.mrb[108].mxu1  ;;  %11520 = vmatmul.mubr.bf16.gmra.mrb[140].mxu1 %v3354_v19  ;;  %v3081_v20 = vpack.c.bf16 %v3060_v21, %v3059_v29 }
 0x32f   : > { %v3027_v27 = vpack.c.bf16 %v3006_v5, %v3005_v35  ;;  %v2489_v10 = vadd.f32 %v2488_v30, %v2003_v59  ;;  %v2490_v24 = vpop.f32.mrb[109].mxu1  ;;  %v3331_v22 = vld [vmem:[#allocation2 + $0xe6] sm:$0xff]  ;;  %v2005_v59 = vmul.f32 %v13904_v26, %v14106_v6  ;;  %v12381_v5 = vpop.permute.xlu1 %12380 }
 0x330   : > { %v2491_v0 = vpop.f32.mrb[110].mxu1  ;;  %4088 = vmatprep.mubr.bf16.mxu0 %v3081_v20  ;;  %v12382_v20 = vunpack.i.l.bf16 %v12381_v5  ;;  %v14129_v24 = vpop.permute.xlu0 %1959  ;;  %v3203_v6 = vld [vmem:[#allocation2 + $0x4c] sm:$0xff] }
 0x331   : > { %v2666_v40 = vadd.f32 %v13881_v58, %v2489_v10  ;;  %v2492_v57 = vadd.f32 %v2491_v0, %v2004_v12  ;;  %v2493_v11 = vpop.f32.mrb[111].mxu1  ;;  %4089 = vmatmul.mubr.bf16.gmra.mrb[116].mxu0 %v3027_v27  ;;  %v2006_v10 = vmul.f32 %v13904_v26, %v14116_v60  ;;  %16745 = vst [vmem:[#allocation25_spill] sm:$0xff] %v14129_v24  ;;  %v12383_v0 = vunpack.i.h.bf16 %v12381_v5  ;;  %v12649_v60 = vld [vmem:[%s16661_s5 + $0x198] sm:$0xff]  }
 0x333   : > { %v2935_v44 = vsel %vm2904_vm3, %v2666_v40, %v12377_v34  ;;  %v2669_v49 = vadd.f32 %v13890_v2, %v2492_v57  ;;  %v3332_v13 = vld [vmem:[#allocation2 + $0xee] sm:$0xff] }
 0x334   : > { %2971 = vst [vmem:[#allocation2 + $0x103] sm:$0xff] %v2935_v44  ;;  %v3355_v19 = vpack.c.bf16 %v3332_v13, %v3331_v22  ;;  %v3061_v29 = vld [vmem:[#allocation2 + $0xf1] sm:$0xff]  ;;  %v14136_v13 = vpop.permute.xlu1 %1964 }
 0x335   : > { %v14122_v51 = vsel %vm2904_vm3, %v2669_v49, %v12378_v61  ;;  %v3062_v21 = vld [vmem:[#allocation2 + $0xf9] sm:$0xff]  ;;  %v3007_v58 = vld [vmem:[#allocation2 + $0xf0] sm:$0xff]  ;;  %16746 = vst [vmem:[#allocation26_spill] sm:$0xff] %v14136_v13 }
 0x336   : > { %v3008_v35 = vld [vmem:[#allocation2 + $0xf8] sm:$0xff]  ;;  %2972 = vst [vmem:[#allocation2 + $0x10b] sm:$0xff] %v14122_v51  ;;  %v2496_v63 = vpop.f32.mrb[112].mxu1  ;;  %11523 = vmatprep.mubr.bf16.mxu1 %v3355_v19  ;;  %v3082_v2 = vpack.c.bf16 %v3062_v21, %v3061_v29  ;;  %v12386_v29 = vpop.permute.xlu0 %12385 }
 0x337   : > { %v3028_v30 = vpack.c.bf16 %v3008_v35, %v3007_v58  ;;  %v2497_v27 = vadd.f32 %v2496_v63, %v2005_v59  ;;  %v2498_v34 = vpop.f32.mrb[113].mxu1  ;;  %v3333_v49 = vld [vmem:[#allocation2 + $0xf6] sm:$0xff] }
 0x338   : > { %v2499_v12 = vpop.f32.mrb[114].mxu1  ;;  %4096 = vmatprep.mubr.bf16.mxu0 %v3082_v2  ;;  %v12387_v34 = vunpack.i.l.bf16 %v12386_v29 }
 0x339   : > { %v2674_v61 = vadd.f32 %v13916_v39, %v2497_v27  ;;  %v2500_v40 = vadd.f32 %v2499_v12, %v2006_v10  ;;  %v2501_v57 = vpop.f32.mrb[115].mxu1  ;;  %4097 = vmatmul.mubr.bf16.gmra.mrb[120].mxu0 %v3028_v30  ;;  %v2007_v39 = vmul.f32 %v13904_v26, %v14129_v24  ;;  %v12770_v10 = vld [vmem:[%s16665_s9] ss:$0 sm:$0xff] }
 0x33a   : > { %v2008_v26 = vmul.f32 %v12770_v10, %v14136_v13 }
 0x33b   : > { %v14133_v11 = vsel %vm2904_vm3, %v2674_v61, %v12382_v20  ;;  %v2677_v44 = vadd.f32 %v13921_v16, %v2500_v40  ;;  %v3334_v22 = vld [vmem:[#allocation2 + $0xfe] sm:$0xff]  ;;  %v12388_v61 = vunpack.i.h.bf16 %v12386_v29 }
 0x33c   : > { %2973 = vst [vmem:[#allocation2 + $0x113] sm:$0xff] %v14133_v11  ;;  %v3356_v19 = vpack.c.bf16 %v3334_v22, %v3333_v49  ;;  %v3063_v59 = vld [vmem:[#allocation2 + $0x101] sm:$0xff] }
 0x33d   : > { %v14140_v21 = vsel %vm2904_vm3, %v2677_v44, %v12383_v0  ;;  %v3064_v58 = vld [vmem:[#allocation2 + $0x109] sm:$0xff]  ;;  %v3009_v35 = vld [vmem:[#allocation2 + $0x100] sm:$0xff] }
 0x33e   : > { %v3010_v5 = vld [vmem:[#allocation2 + $0x108] sm:$0xff]  ;;  %2974 = vst [vmem:[#allocation2 + $0x11b] sm:$0xff] %v14140_v21  ;;  %v2504_v16 = vpop.f32.mrb[116].mxu1  ;;  %11524 = vmatmul.mubr.bf16.gmra.mrb[144].mxu1 %v3356_v19  ;;  %v3083_v63 = vpack.c.bf16 %v3064_v58, %v3063_v59  ;;  %v3088_v58 = vld [vmem:[#allocation2 + $0x1a] sm:$0xff] }
 0x33f   : > { %v3029_v2 = vpack.c.bf16 %v3010_v5, %v3009_v35  ;;  %v2505_v20 = vadd.f32 %v2504_v16, %v2007_v39  ;;  %v2506_v27 = vpop.f32.mrb[117].mxu1  ;;  %v3335_v22 = vld [vmem:[#allocation2 + $0x106] sm:$0xff] }
 0x340   : > { %v2507_v12 = vpop.f32.mrb[118].mxu1  ;;  %4104 = vmatprep.mubr.bf16.mxu0 %v3083_v63  ;;  %v3085_v27 = vld [vmem:[#allocation2 + $0x2] sm:$0xff] }
 0x341   : > { %v2682_v0 = vadd.f32 %v13912_v7, %v2505_v20  ;;  %v2508_v40 = vadd.f32 %v2507_v12, %v2008_v26  ;;  %4105 = vmatmul.mubr.bf16.gmra.mrb[124].mxu0 %v3029_v2  ;;  %v2509_v57 = vpop.f32.mrb[119].mxu1  ;;  %v3087_v2 = vld [vmem:[#allocation2 + $0x12] sm:$0xff] }
 0x342   : > { %v3122_v20 = vpack.c.bf16 %v3088_v58, %v3087_v2  ;;  %v3090_v57 = vld [vmem:[#allocation2 + $0x2a] sm:$0xff]  ;;  %v16747_v58 = vmov 0  }
 0x343   : > { %v14153_v44 = vsel %vm2904_vm3, %v2682_v0, %v12387_v34  ;;  %v2685_v49 = vadd.f32 %v13919_v14, %v2508_v40  ;;  %v3336_v19 = vld [vmem:[#allocation2 + $0x10e] sm:$0xff] }
 0x344   : > { %2975 = vst [vmem:[#allocation2 + $0x123] sm:$0xff] %v14153_v44  ;;  %v3357_v59 = vpack.c.bf16 %v3336_v19, %v3335_v22  ;;  %v3065_v39 = vld [vmem:[#allocation2 + $0x111] sm:$0xff]  ;;  %v12630_v22 = vld [vmem:[%s16661_s5 + $0x100] sm:$0xff]  }
 0x345   : > { %v14158_v35 = vsel %vm2904_vm3, %v2685_v49, %v12388_v61  ;;  %v3066_v7 = vld [vmem:[#allocation2 + $0x119] sm:$0xff]  ;;  %v3011_v29 = vld [vmem:[#allocation2 + $0x110] sm:$0xff]  ;;  %v3089_v19 = vld [vmem:[#allocation2 + $0x22] sm:$0xff] }
 0x346   : > { %v3012_v5 = vld [vmem:[#allocation2 + $0x118] sm:$0xff]  ;;  %2976 = vst [vmem:[#allocation2 + $0x12b] sm:$0xff] %v14158_v35  ;;  %11527 = vmatprep.mubr.bf16.mxu1 %v3357_v59  ;;  %v3084_v16 = vpack.c.bf16 %v3066_v7, %v3065_v39  ;;  %v3086_v34 = vld [vmem:[#allocation2 + $0xa] sm:$0xff]  ;;  %v3123_v59 = vpack.c.bf16 %v3090_v57, %v3089_v19 }
 0x347   : > { %v3030_v63 = vpack.c.bf16 %v3012_v5, %v3011_v29  ;;  %v3337_v10 = vld [vmem:[#allocation2 + $0x116] sm:$0xff]  ;;  %v3121_v40 = vpack.c.bf16 %v3086_v34, %v3085_v27  ;;  %v12631_v39 = vld [vmem:[%s16661_s5 + $0x108] sm:$0xff]   ;;  %v12634_v27 = vld [vmem:[%s16661_s5 + $0x120] sm:$0xff]  }
 0x348   : > { %4112 = vmatprep.mubr.bf16.mxu0 %v3084_v16  ;;  %v3092_v7 = vld [vmem:[#allocation2 + $0x3a] sm:$0xff]  ;;  %v12632_v29 = vld [vmem:[%s16661_s5 + $0x110] sm:$0xff]   ;;  %v3093_v34 = vld [vmem:[#allocation2 + $0x42] sm:$0xff] }
 0x349   : > { %4113 = vmatmul.mubr.bf16.gmra.mrb[128].mxu0 %v3030_v63  ;;  %v3091_v5 = vld [vmem:[#allocation2 + $0x32] sm:$0xff]  ;;  %v3094_v2 = vld [vmem:[#allocation2 + $0x4a] sm:$0xff] }
 0x34a   : > { %4153 = vmatprep.mubr.bf16.mxu0 %v3122_v20  ;;  %v3124_v16 = vpack.c.bf16 %v3092_v7, %v3091_v5  ;;  %v12633_v63 = vld [vmem:[%s16661_s5 + $0x118] sm:$0xff]   ;;  %v3098_v57 = vld [vmem:[#allocation2 + $0x6a] sm:$0xff] }
 0x34b   : > { %v3338_v26 = vld [vmem:[#allocation2 + $0x11e] sm:$0xff]  ;;  %v12640_v7 = vld [vmem:[%s16661_s5 + $0x150] sm:$0xff]  }
 0x34c   : > { %v3358_v12 = vpack.c.bf16 %v3338_v26, %v3337_v10  ;;  %v3125_v10 = vpack.c.bf16 %v3094_v2, %v3093_v34  ;;  %v3096_v26 = vld [vmem:[#allocation2 + $0x5a] sm:$0xff] }
 0x34d   : > { %v3339_v0 = vld [vmem:[#allocation2 + $0x126] sm:$0xff]  ;;  %v3340_v61 = vld [vmem:[#allocation2 + $0x12e] sm:$0xff] }
 0x34e   : > { %11528 = vmatmul.mubr.bf16.gmra.mrb[148].mxu1 %v3358_v12  ;;  %v3359_v49 = vpack.c.bf16 %v3340_v61, %v3339_v0  ;;  %v12636_v12 = vld [vmem:[%s16661_s5 + $0x130] sm:$0xff]   ;;  %v12642_v2 = vld [vmem:[%s16661_s5 + $0x160] sm:$0xff]  }
 0x34f   : > { %v3095_v0 = vld [vmem:[#allocation2 + $0x52] sm:$0xff] }
 0x350   : > { %11531 = vmatprep.mubr.bf16.mxu1 %v3359_v49  ;;  %v3126_v61 = vpack.c.bf16 %v3096_v26, %v3095_v0  ;;  %v12638_v49 = vld [vmem:[%s16661_s5 + $0x140] sm:$0xff]   ;;  %v12644_v26 = vld [vmem:[%s16661_s5 + $0x170] sm:$0xff]  }
 0x351   : > { %4154 = vmatmul.mubr.bf16.vlgmr.msra.gmra.mrb[60].mxu0 %v3121_v40  ;;  %v12637_v40 = vld [vmem:[%s16661_s5 + $0x138] sm:$0xff]  }
 0x352   : > { %4299 = vmatpush1.bf16.msra.mxu0 %v12630_v22  ;;  %4161 = vmatprep.mubr.bf16.mxu0 %v3123_v59  ;;  %v3097_v22 = vld [vmem:[#allocation2 + $0x62] sm:$0xff]  ;;  %v3196_v14 = vld [vmem:[#allocation2 + $0x14] sm:$0xff] }
 0x353   : > { %4300 = vmatprep.subr.bf16.mxu0 %v16747_v58  ;;  %v3127_v19 = vpack.c.bf16 %v3098_v57, %v3097_v22  ;;  %v3105_v57 = vld [vmem:[#allocation2 + $0xa2] sm:$0xff]  ;;  %v3108_v22 = vld [vmem:[#allocation2 + $0xba] sm:$0xff] }
 0x356   : > { %4301 = vmatpush1.bf16.msra.mxu0 %v12631_v39  ;;  %v3100_v39 = vld [vmem:[#allocation2 + $0x7a] sm:$0xff] }
 0x357   : > { %4302 = vmatprep.subr.bf16.mxu0 %v16747_v58 }
 0x359   : > { %4162 = vmatmul.mubr.bf16.gmra.mrb[64].mxu0 %v3122_v20  ;;  %v12635_v20 = vld [vmem:[%s16661_s5 + $0x128] sm:$0xff]  }
 0x35a   : > { %4169 = vmatprep.mubr.bf16.mxu0 %v3124_v16  ;;  %4303 = vmatpush1.bf16.msra.mxu0 %v12632_v29  ;;  %v3099_v29 = vld [vmem:[#allocation2 + $0x72] sm:$0xff] }
 0x35b   : > { %4304 = vmatprep.subr.bf16.mxu0 %v16747_v58  ;;  %v3128_v5 = vpack.c.bf16 %v3100_v39, %v3099_v29  ;;  %v3110_v39 = vld [vmem:[#allocation2 + $0xca] sm:$0xff] }
 0x35e   : > { %4305 = vmatpush1.bf16.msra.mxu0 %v12633_v63  ;;  %v3102_v63 = vld [vmem:[#allocation2 + $0x8a] sm:$0xff] }
 0x35f   : > { %4306 = vmatprep.subr.bf16.mxu0 %v16747_v58 }
 0x361   : > { %4170 = vmatmul.mubr.bf16.gmra.mrb[68].mxu0 %v3123_v59  ;;  %v12639_v59 = vld [vmem:[%s16661_s5 + $0x148] sm:$0xff]  }
 0x362   : > { %4177 = vmatprep.mubr.bf16.mxu0 %v3125_v10  ;;  %4307 = vmatpush1.bf16.msra.mxu0 %v12634_v27  ;;  %v3101_v27 = vld [vmem:[#allocation2 + $0x82] sm:$0xff] }
 0x363   : > { %4308 = vmatprep.subr.bf16.mxu0 %v16747_v58  ;;  %v3129_v34 = vpack.c.bf16 %v3102_v63, %v3101_v27  ;;  %v3113_v27 = vld [vmem:[#allocation2 + $0xe2] sm:$0xff] }
 0x366   : > { %4309 = vmatpush1.bf16.msra.mxu0 %v12635_v20  ;;  %v3104_v20 = vld [vmem:[#allocation2 + $0x9a] sm:$0xff] }
 0x367   : > { %4310 = vmatprep.subr.bf16.mxu0 %v16747_v58 }
 0x369   : > { %4178 = vmatmul.mubr.bf16.gmra.mrb[72].mxu0 %v3124_v16  ;;  %v12641_v16 = vld [vmem:[%s16661_s5 + $0x158] sm:$0xff]  }
 0x36a   : > { %4185 = vmatprep.mubr.bf16.mxu0 %v3126_v61  ;;  %4311 = vmatpush1.bf16.msra.mxu0 %v12636_v12  ;;  %v3103_v12 = vld [vmem:[#allocation2 + $0x92] sm:$0xff] }
 0x36b   : > { %4312 = vmatprep.subr.bf16.mxu0 %v16747_v58  ;;  %v3130_v0 = vpack.c.bf16 %v3104_v20, %v3103_v12 }
 0x36e   : > { %4313 = vmatpush1.bf16.msra.mxu0 %v12637_v40  ;;  %v3106_v40 = vld [vmem:[#allocation2 + $0xaa] sm:$0xff] }
 0x36f   : > { %4314 = vmatprep.subr.bf16.mxu0 %v16747_v58 }
 0x371   : > { %4186 = vmatmul.mubr.bf16.gmra.mrb[76].mxu0 %v3125_v10  ;;  %v12643_v10 = vld [vmem:[%s16661_s5 + $0x168] sm:$0xff]  }
 0x372   : > { %4193 = vmatprep.mubr.bf16.mxu0 %v3127_v19  ;;  %4315 = vmatpush1.bf16.msra.mxu0 %v12638_v49  ;;  %v3131_v49 = vpack.c.bf16 %v3106_v40, %v3105_v57  ;;  %v3118_v57 = vld [vmem:[#allocation2 + $0x10a] sm:$0xff] }
 0x373   : > { %4316 = vmatprep.subr.bf16.mxu0 %v16747_v58 }
 0x376   : > { %4317 = vmatpush1.bf16.msra.mxu0 %v12639_v59 }
 0x377   : > { %4318 = vmatprep.subr.bf16.mxu0 %v16747_v58 }
 0x379   : > { %4194 = vmatmul.mubr.bf16.gmra.mrb[80].mxu0 %v3126_v61  ;;  %v12645_v61 = vld [vmem:[%s16661_s5 + $0x178] sm:$0xff]  }
 0x37a   : > { %4201 = vmatprep.mubr.bf16.mxu0 %v3128_v5  ;;  %4319 = vmatpush1.bf16.msra.mxu0 %v12640_v7  ;;  %v3109_v7 = vld [vmem:[#allocation2 + $0xc2] sm:$0xff] }
 0x37b   : > { %4320 = vmatprep.subr.bf16.mxu0 %v16747_v58  ;;  %v3133_v29 = vpack.c.bf16 %v3110_v39, %v3109_v7 }
 0x37e   : > { %4321 = vmatpush1.bf16.msra.mxu0 %v12641_v16  ;;  %v3111_v16 = vld [vmem:[#allocation2 + $0xd2] sm:$0xff] }
 0x37f   : > { %4322 = vmatprep.subr.bf16.mxu0 %v16747_v58 }
 0x381   : > { %4202 = vmatmul.mubr.bf16.gmra.mrb[84].mxu0 %v3127_v19  ;;  %v3107_v19 = vld [vmem:[#allocation2 + $0xb2] sm:$0xff] }
 0x382   : > { %4209 = vmatprep.mubr.bf16.mxu0 %v3129_v34  ;;  %4323 = vmatpush1.bf16.msra.mxu0 %v12642_v2  ;;  %v3132_v59 = vpack.c.bf16 %v3108_v22, %v3107_v19  ;;  %v3114_v2 = vld [vmem:[#allocation2 + $0xea] sm:$0xff] }
 0x383   : > { %4324 = vmatprep.subr.bf16.mxu0 %v16747_v58 }
 0x386   : > { %4325 = vmatpush1.bf16.msra.mxu0 %v12643_v10  ;;  %v3135_v10 = vpack.c.bf16 %v3114_v2, %v3113_v27  ;;  %v3139_v2 = vld [vmem:[#allocation2 + $0x122] sm:$0xff] }
 0x387   : > { %4326 = vmatprep.subr.bf16.mxu0 %v16747_v58 }
 0x389   : > { %4210 = vmatmul.mubr.bf16.gmra.mrb[88].mxu0 %v3128_v5  ;;  %v3112_v5 = vld [vmem:[#allocation2 + $0xda] sm:$0xff] }
 0x38a   : > { %4217 = vmatprep.mubr.bf16.mxu0 %v3130_v0  ;;  %4327 = vmatpush1.bf16.msra.mxu0 %v12644_v26  ;;  %v3134_v63 = vpack.c.bf16 %v3112_v5, %v3111_v16  ;;  %v3119_v5 = vld [vmem:[#allocation2 + $0x112] sm:$0xff] }
 0x38b   : > { %4328 = vmatprep.subr.bf16.mxu0 %v16747_v58 }
 0x38e   : > { %4329 = vmatpush1.bf16.msra.mxu0 %v12645_v61  ;;  %v3115_v61 = vld [vmem:[#allocation2 + $0xf2] sm:$0xff] }
 0x38f   : > { %4475 = vmatprep.subr.bf16.mxu0 %v16747_v58 }
 0x391   : > { %4218 = vmatmul.mubr.bf16.gmra.mrb[92].mxu0 %v3129_v34 }
 0x392   : > { %4225 = vmatprep.mubr.bf16.mxu0 %v3131_v49 }
 0x399   : > { %4226 = vmatmul.mubr.bf16.gmra.mrb[96].mxu0 %v3130_v0  ;;  %v3116_v0 = vld [vmem:[#allocation2 + $0xfa] sm:$0xff] }
 0x39a   : > { %4233 = vmatprep.mubr.bf16.mxu0 %v3132_v59  ;;  %v3136_v40 = vpack.c.bf16 %v3116_v0, %v3115_v61 }
 0x3a1   : > { %4234 = vmatmul.mubr.bf16.gmra.mrb[100].mxu0 %v3131_v49  ;;  %v3117_v49 = vld [vmem:[#allocation2 + $0x102] sm:$0xff] }
 0x3a2   : > { %4241 = vmatprep.mubr.bf16.mxu0 %v3133_v29  ;;  %v3137_v22 = vpack.c.bf16 %v3118_v57, %v3117_v49  ;;  %v3197_v49 = vld [vmem:[#allocation2 + $0x1c] sm:$0xff] }
 0x3a3   : > { %v3232_v30 = vpack.c.bf16 %v3197_v49, %v3196_v14 }
 0x3a9   : > { %4242 = vmatmul.mubr.bf16.gmra.mrb[104].mxu0 %v3132_v59 }
 0x3aa   : > { %4249 = vmatprep.mubr.bf16.mxu0 %v3134_v63 }
 0x3b1   : > { %4250 = vmatmul.mubr.bf16.gmra.mrb[108].mxu0 %v3133_v29  ;;  %v14227_v34 = vpop.f32.mrb[120].mxu1  ;;  %v3120_v29 = vld [vmem:[#allocation2 + $0x11a] sm:$0xff] }
 0x3b2   : > { %4257 = vmatprep.mubr.bf16.mxu0 %v3135_v10  ;;  %v14229_v20 = vpop.f32.mrb[121].mxu1  ;;  %v3138_v16 = vpack.c.bf16 %v3120_v29, %v3119_v5  ;;  %v3199_v29 = vld [vmem:[#allocation2 + $0x2c] sm:$0xff] }
 0x3b3   : > { %v14231_v26 = vpop.f32.mrb[122].mxu1  ;;  %v3142_v5 = vld [vmem:[#allocation2 + $0x13] sm:$0xff] }
 0x3b4   : > { %v14233_v12 = vpop.f32.mrb[123].mxu1 }
 0x3b9   : > { %4258 = vmatmul.mubr.bf16.gmra.mrb[112].mxu0 %v3134_v63  ;;  %v3140_v63 = vld [vmem:[#allocation2 + $0x12a] sm:$0xff] }
 0x3ba   : > { %4265 = vmatprep.mubr.bf16.mxu0 %v3136_v40  ;;  %v3141_v27 = vpack.c.bf16 %v3140_v63, %v3139_v2  ;;  %v3198_v2 = vld [vmem:[#allocation2 + $0x24] sm:$0xff] }
 0x3c1   : > { %4266 = vmatmul.mubr.bf16.gmra.mrb[116].mxu0 %v3135_v10  ;;  %v14235_v19 = vpop.f32.mrb[124].mxu1 }
 0x3c2   : > { %4273 = vmatprep.mubr.bf16.mxu0 %v3137_v22  ;;  %v14237_v59 = vpop.f32.mrb[125].mxu1 }
 0x3c3   : > { %v14239_v39 = vpop.f32.mrb[126].mxu1 }
 0x3c4   : > { %v14241_v7 = vpop.f32.mrb[127].mxu1 }
 0x3c9   : > { %4274 = vmatmul.mubr.bf16.gmra.mrb[120].mxu0 %v3136_v40  ;;  %v3143_v40 = vld [vmem:[#allocation2 + $0x1b] sm:$0xff] }
 0x3ca   : > { %4281 = vmatprep.mubr.bf16.mxu0 %v3138_v16  ;;  %v3178_v63 = vpack.c.bf16 %v3143_v40, %v3142_v5  ;;  %v3145_v40 = vld [vmem:[#allocation2 + $0x2b] sm:$0xff]  ;;  %v3144_v5 = vld [vmem:[#allocation2 + $0x23] sm:$0xff] }
 0x3d1   : > { %4282 = vmatmul.mubr.bf16.gmra.mrb[124].mxu0 %v3137_v22  ;;  %v14243_v0 = vpop.f32.mrb[128].mxu1  ;;  %v12646_v22 = vld [vmem:[%s16661_s5 + $0x180] sm:$0xff]  }
 0x3d2   : > { %4289 = vmatprep.mubr.bf16.mxu0 %v3141_v27  ;;  %v14245_v10 = vpop.f32.mrb[129].mxu1  ;;  %v14254_v27 = vpack.c.bf16 %v3199_v29, %v3198_v2  ;;  %v3201_v29 = vld [vmem:[#allocation2 + $0x3c] sm:$0xff]  ;;  %v3200_v2 = vld [vmem:[#allocation2 + $0x34] sm:$0xff] }
 0x3d3   : > { %v14247_v61 = vpop.f32.mrb[130].mxu1  ;;  %v14273_v24 = vpack.c.bf16 %v3201_v29, %v3200_v2 }
 0x3d4   : > { %v14249_v57 = vpop.f32.mrb[131].mxu1 }
 0x3d9   : > { %4290 = vmatmul.mubr.bf16.gmra.mrb[128].mxu0 %v3138_v16 }
 0x3da   : > { %4330 = vmatprep.mubr.bf16.mxu0 %v3232_v30  ;;  %v12647_v30 = vld [vmem:[%s16661_s5 + $0x188] sm:$0xff]  }
 0x3e1   : > { %4331 = vmatmul.mubr.bf16.vlgmr.msra.gmra.mrb[60].mxu0 %v3178_v63  ;;  %v14256_v13 = vpop.f32.mrb[132].mxu1  ;;  %v3179_v63 = vpack.c.bf16 %v3145_v40, %v3144_v5  ;;  %v12650_v40 = vld [vmem:[%s16661_s5 + $0x1a0] sm:$0xff]  }
 0x3e2   : > { %4476 = vmatpush1.bf16.msra.mxu0 %v12646_v22  ;;  %4338 = vmatprep.mubr.bf16.mxu0 %v14254_v27  ;;  %v14259_v14 = vpop.f32.mrb[133].mxu1  ;;  %v12648_v22 = vld [vmem:[%s16661_s5 + $0x190] sm:$0xff]   ;;  %v3202_v5 = vld [vmem:[#allocation2 + $0x44] sm:$0xff] }
 0x3e3   : > { %v14264_v16 = vpop.f32.mrb[134].mxu1  ;;  %4477 = vmatprep.subr.bf16.mxu0 %v16747_v58 }
 0x3e4   : > { %v14267_v49 = vpop.f32.mrb[135].mxu1 }
 0x3e6   : > { %4478 = vmatpush1.bf16.msra.mxu0 %v12647_v30  ;;  %v3147_v30 = vld [vmem:[#allocation2 + $0x3b] sm:$0xff] }
 0x3e7   : > { %4479 = vmatprep.subr.bf16.mxu0 %v16747_v58  ;;  %v3180_v29 = vpack.c.bf16 %v3147_v30, %v3146_v8  ;;  %v3205_v30 = vld [vmem:[#allocation2 + $0x5c] sm:$0xff] }
 0x3e9   : > { %4339 = vmatmul.mubr.bf16.gmra.mrb[64].mxu0 %v3179_v63  ;;  %v14284_v63 = vpack.c.bf16 %v3203_v6, %v3202_v5  ;;  %v3149_v6 = vld [vmem:[#allocation2 + $0x4b] sm:$0xff] }
 0x3ea   : > { %4346 = vmatprep.mubr.bf16.mxu0 %v14273_v24  ;;  %4480 = vmatpush1.bf16.msra.mxu0 %v12648_v22  ;;  %v12652_v5 = vld [vmem:[%s16661_s5 + $0x1b0] sm:$0xff]  }
 0x3eb   : > { %4481 = vmatprep.subr.bf16.mxu0 %v16747_v58 }
 0x3ee   : > { %4482 = vmatpush1.bf16.msra.mxu0 %v12649_v60  ;;  %v12651_v60 = vld [vmem:[%s16661_s5 + $0x1a8] sm:$0xff]  }
 0x3ef   : > { %4483 = vmatprep.subr.bf16.mxu0 %v16747_v58 }
 0x3f1   : > { %4347 = vmatmul.mubr.bf16.gmra.mrb[68].mxu0 %v3180_v29  ;;  %v14286_v22 = vpop.f32.mrb[136].mxu1  ;;  %v3148_v29 = vld [vmem:[#allocation2 + $0x43] sm:$0xff] }
 0x3f2   : > { %16748 = vst [vmem:[#allocation27_spill] sm:$0xff] %v14286_v22  ;;  %4354 = vmatprep.mubr.bf16.mxu0 %v14284_v63  ;;  %v14289_v2 = vpop.f32.mrb[137].mxu1  ;;  %4484 = vmatpush1.bf16.msra.mxu0 %v12650_v40  ;;  %v3181_v18 = vpack.c.bf16 %v3149_v6, %v3148_v29  ;;  %v3204_v40 = vld [vmem:[#allocation2 + $0x54] sm:$0xff]  ;;  %v12654_v6 = vld [vmem:[%s16661_s5 + $0x1c0] sm:$0xff]  }
 0x3f3   : > { %16749 = vst [vmem:[#allocation28_spill] sm:$0xff] %v14289_v2  ;;  %v14294_v23 = vpop.f32.mrb[138].mxu1  ;;  %4485 = vmatprep.subr.bf16.mxu0 %v16747_v58  ;;  %v14303_v53 = vpack.c.bf16 %v3205_v30, %v3204_v40  ;;  %v3206_v29 = vld [vmem:[#allocation2 + $0x64] sm:$0xff]  ;;  %v3170_v2 = vld [vmem:[#allocation2 + $0xf3] sm:$0xff] }
 0x3f4   : > { %16750 = vst [vmem:[#allocation29_spill] sm:$0xff] %v14294_v23  ;;  %v14297_v8 = vpop.f32.mrb[139].mxu1  ;;  %v3160_v23 = vld [vmem:[#allocation2 + $0xa3] sm:$0xff] }
 0x3f5   : > { %16751 = vst [vmem:[#allocation30_spill] sm:$0xff] %v14297_v8  ;;  %v3187_v22 = vpack.c.bf16 %v3161_v52, %v3160_v23  ;;  %v3220_v23 = vld [vmem:[#allocation2 + $0xd4] sm:$0xff]  ;;  %v3168_v8 = vld [vmem:[#allocation2 + $0xe3] sm:$0xff] }
 0x3f6   : > { %4486 = vmatpush1.bf16.msra.mxu0 %v12651_v60  ;;  %v3151_v60 = vld [vmem:[#allocation2 + $0x5b] sm:$0xff] }
 0x3f7   : > { %4487 = vmatprep.subr.bf16.mxu0 %v16747_v58  ;;  %v3182_v30 = vpack.c.bf16 %v3151_v60, %v3150_v33  ;;  %v3209_v60 = vld [vmem:[#allocation2 + $0x7c] sm:$0xff] }
 0x3f9   : > { %4355 = vmatmul.mubr.bf16.gmra.mrb[72].mxu0 %v3181_v18  ;;  %v14314_v18 = vpack.c.bf16 %v3207_v32, %v3206_v29  ;;  %v3153_v32 = vld [vmem:[#allocation2 + $0x6b] sm:$0xff] }
 0x3fa   : > { %4362 = vmatprep.mubr.bf16.mxu0 %v14303_v53  ;;  %4488 = vmatpush1.bf16.msra.mxu0 %v12652_v5  ;;  %v12656_v29 = vld [vmem:[%s16661_s5 + $0x1d0] sm:$0xff]  }
 0x3fb   : > { %4489 = vmatprep.subr.bf16.mxu0 %v16747_v58 }
 0x3fe   : > { %4490 = vmatpush1.bf16.msra.mxu0 %v12653_v37  ;;  %v12655_v37 = vld [vmem:[%s16661_s5 + $0x1c8] sm:$0xff]  }
 0x3ff   : > { %4491 = vmatprep.subr.bf16.mxu0 %v16747_v58 }
 0x401   : > { %4363 = vmatmul.mubr.bf16.gmra.mrb[76].mxu0 %v3182_v30  ;;  %v14316_v5 = vpop.f32.mrb[140].mxu1  ;;  %v3152_v30 = vld [vmem:[#allocation2 + $0x63] sm:$0xff] }
 0x402   : > { %16752 = vst [vmem:[#allocation31_spill] sm:$0xff] %v14316_v5  ;;  %4370 = vmatprep.mubr.bf16.mxu0 %v14314_v18  ;;  %v14319_v40 = vpop.f32.mrb[141].mxu1  ;;  %4492 = vmatpush1.bf16.msra.mxu0 %v12654_v6  ;;  %v3183_v55 = vpack.c.bf16 %v3153_v32, %v3152_v30  ;;  %v3208_v6 = vld [vmem:[#allocation2 + $0x74] sm:$0xff]  ;;  %v3211_v5 = vld [vmem:[#allocation2 + $0x8c] sm:$0xff]  ;;  %v12658_v32 = vld [vmem:[%s16661_s5 + $0x1e0] sm:$0xff]  }
 0x403   : > { %16753 = vst [vmem:[#allocation32_spill] sm:$0xff] %v14319_v40  ;;  %v14324_v4 = vpop.f32.mrb[142].mxu1  ;;  %4493 = vmatprep.subr.bf16.mxu0 %v16747_v58  ;;  %v14333_v1 = vpack.c.bf16 %v3209_v60, %v3208_v6  ;;  %v3210_v30 = vld [vmem:[#allocation2 + $0x84] sm:$0xff] }
 0x404   : > { %16754 = vst [vmem:[#allocation33_spill] sm:$0xff] %v14324_v4  ;;  %v14327_v33 = vpop.f32.mrb[143].mxu1  ;;  %v12657_v4 = vld [vmem:[%s16661_s5 + $0x1d8] sm:$0xff]  }
 0x405   : > { %16755 = vst [vmem:[#allocation34_spill] sm:$0xff] %v14327_v33  ;;  %v3158_v33 = vld [vmem:[#allocation2 + $0x93] sm:$0xff] }
 0x406   : > { %4494 = vmatpush1.bf16.msra.mxu0 %v12655_v37  ;;  %v3155_v37 = vld [vmem:[#allocation2 + $0x7b] sm:$0xff] }
 0x407   : > { %4495 = vmatprep.subr.bf16.mxu0 %v16747_v58  ;;  %v3184_v60 = vpack.c.bf16 %v3155_v37, %v3154_v3  ;;  %v3213_v37 = vld [vmem:[#allocation2 + $0x9c] sm:$0xff] }
 0x409   : > { %4371 = vmatmul.mubr.bf16.gmra.mrb[80].mxu0 %v3183_v55  ;;  %v14344_v55 = vpack.c.bf16 %v3211_v5, %v3210_v30  ;;  %v3157_v5 = vld [vmem:[#allocation2 + $0x8b] sm:$0xff] }
 0x40a   : > { %4378 = vmatprep.mubr.bf16.mxu0 %v14333_v1  ;;  %4496 = vmatpush1.bf16.msra.mxu0 %v12656_v29  ;;  %v12660_v30 = vld [vmem:[%s16661_s5 + $0x1f0] sm:$0xff]  }
 0x40b   : > { %4497 = vmatprep.subr.bf16.mxu0 %v16747_v58 }
 0x40e   : > { %4498 = vmatpush1.bf16.msra.mxu0 %v12657_v4  ;;  %v12659_v4 = vld [vmem:[%s16661_s5 + $0x1e8] sm:$0xff]  }
 0x40f   : > { %4499 = vmatprep.subr.bf16.mxu0 %v16747_v58 }
 0x411   : > { %4379 = vmatmul.mubr.bf16.gmra.mrb[84].mxu0 %v3184_v60  ;;  %v14346_v29 = vpop.f32.mrb[144].mxu1  ;;  %v3156_v60 = vld [vmem:[#allocation2 + $0x83] sm:$0xff] }
 0x412   : > { %16756 = vst [vmem:[#allocation35_spill] sm:$0xff] %v14346_v29  ;;  %4386 = vmatprep.mubr.bf16.mxu0 %v14344_v55  ;;  %v14349_v6 = vpop.f32.mrb[145].mxu1  ;;  %4500 = vmatpush1.bf16.msra.mxu0 %v12658_v32  ;;  %v3185_v29 = vpack.c.bf16 %v3157_v5, %v3156_v60  ;;  %v3212_v32 = vld [vmem:[#allocation2 + $0x94] sm:$0xff]  ;;  %v3214_v60 = vld [vmem:[#allocation2 + $0xa4] sm:$0xff] }
 0x413   : > { %16757 = vst [vmem:[#allocation36_spill] sm:$0xff] %v14349_v6  ;;  %v14354_v17 = vpop.f32.mrb[146].mxu1  ;;  %4501 = vmatprep.subr.bf16.mxu0 %v16747_v58  ;;  %v14363_v6 = vpack.c.bf16 %v3213_v37, %v3212_v32 }
 0x414   : > { %16758 = vst [vmem:[#allocation37_spill] sm:$0xff] %v14354_v17  ;;  %v14357_v3 = vpop.f32.mrb[147].mxu1  ;;  %v12661_v17 = vld [vmem:[%s16661_s5 + $0x1f8] sm:$0xff]  }
 0x415   : > { %16759 = vst [vmem:[#allocation38_spill] sm:$0xff] %v14357_v3  ;;  %v3215_v3 = vld [vmem:[#allocation2 + $0xac] sm:$0xff] }
 0x416   : > { %4502 = vmatpush1.bf16.msra.mxu0 %v12659_v4  ;;  %v3159_v4 = vld [vmem:[#allocation2 + $0x9b] sm:$0xff]  ;;  %v14370_v40 = vpack.c.bf16 %v3215_v3, %v3214_v60 }
 0x417   : > { %4503 = vmatprep.subr.bf16.mxu0 %v16747_v58  ;;  %v3186_v5 = vpack.c.bf16 %v3159_v4, %v3158_v33  ;;  %v3163_v3 = vld [vmem:[#allocation2 + $0xbb] sm:$0xff]  ;;  %v3219_v4 = vld [vmem:[#allocation2 + $0xcc] sm:$0xff] }
 0x419   : > { %4387 = vmatmul.mubr.bf16.gmra.mrb[88].mxu0 %v3185_v29 }
 0x41a   : > { %4394 = vmatprep.mubr.bf16.mxu0 %v14363_v6  ;;  %4504 = vmatpush1.bf16.msra.mxu0 %v12660_v30 }
 0x41b   : > { %4505 = vmatprep.subr.bf16.mxu0 %v16747_v58 }
 0x41e   : > { %4506 = vmatpush1.bf16.msra.mxu0 %v12661_v17  ;;  %v3216_v17 = vld [vmem:[#allocation2 + $0xb4] sm:$0xff] }
 0x41f   : > { %v14381_v33 = vpack.c.bf16 %v3217_v54, %v3216_v17  ;;  %v3223_v17 = vld [vmem:[#allocation2 + $0xec] sm:$0xff] }
 0x421   : > { %4395 = vmatmul.mubr.bf16.gmra.mrb[92].mxu0 %v3186_v5  ;;  %v14372_v37 = vpop.f32.mrb[148].mxu1  ;;  %v3162_v5 = vld [vmem:[#allocation2 + $0xb3] sm:$0xff] }
 0x422   : > { %16760 = vst [vmem:[#allocation39_spill] sm:$0xff] %v14372_v37  ;;  %4402 = vmatprep.mubr.bf16.mxu0 %v14370_v40  ;;  %v14375_v29 = vpop.f32.mrb[149].mxu1  ;;  %v3188_v60 = vpack.c.bf16 %v3163_v3, %v3162_v5  ;;  %v3218_v37 = vld [vmem:[#allocation2 + $0xc4] sm:$0xff] }
 0x423   : > { %16761 = vst [vmem:[#allocation40_spill] sm:$0xff] %v14375_v29  ;;  %v14377_v30 = vpop.f32.mrb[150].mxu1  ;;  %v14384_v29 = vpack.c.bf16 %v3219_v4, %v3218_v37  ;;  %v3222_v5 = vld [vmem:[#allocation2 + $0xe4] sm:$0xff] }
 0x424   : > { %16762 = vst [vmem:[#allocation41_spill] sm:$0xff] %v14377_v30  ;;  %v14379_v32 = vpop.f32.mrb[151].mxu1  ;;  %v3165_v30 = vld [vmem:[#allocation2 + $0xcb] sm:$0xff]  ;;  %v14390_v37 = vpack.c.bf16 %v3223_v17, %v3222_v5  ;;  %v3229_v5 = vld [vmem:[#allocation2 + $0x11c] sm:$0xff] }
 0x425   : > { %16763 = vst [vmem:[#allocation42_spill] sm:$0xff] %v14379_v32  ;;  %v3221_v32 = vld [vmem:[#allocation2 + $0xdc] sm:$0xff]  ;;  %v3189_v52 = vpack.c.bf16 %v3165_v30, %v3164_v28  ;;  %v3169_v4 = vld [vmem:[#allocation2 + $0xeb] sm:$0xff]  ;;  %v3224_v30 = vld [vmem:[#allocation2 + $0xf4] sm:$0xff] }
 0x426   : > { %v14387_v54 = vpack.c.bf16 %v3221_v32, %v3220_v23  ;;  %v3191_v28 = vpack.c.bf16 %v3169_v4, %v3168_v8  ;;  %v3227_v23 = vld [vmem:[#allocation2 + $0x10c] sm:$0xff]  ;;  %v3228_v4 = vld [vmem:[#allocation2 + $0x114] sm:$0xff] }
 0x429   : > { %4403 = vmatmul.mubr.bf16.gmra.mrb[96].mxu0 %v3187_v22  ;;  %v3167_v22 = vld [vmem:[#allocation2 + $0xdb] sm:$0xff] }
 0x42a   : > { %4410 = vmatprep.mubr.bf16.mxu0 %v14381_v33  ;;  %v3190_v3 = vpack.c.bf16 %v3167_v22, %v3166_v50  ;;  %v3226_v22 = vld [vmem:[#allocation2 + $0x104] sm:$0xff] }
 0x42b   : > { %v14396_v17 = vpack.c.bf16 %v3227_v23, %v3226_v22  ;;  %v3253_v23 = vld [vmem:[#allocation2 + $0x25] sm:$0xff]  ;;  %v3341_v22 = vld [vmem:[#allocation2 + $0x136] sm:$0xff] }
 0x431   : > { %4411 = vmatmul.mubr.bf16.gmra.mrb[100].mxu0 %v3188_v60  ;;  %v3225_v60 = vld [vmem:[#allocation2 + $0xfc] sm:$0xff] }
 0x432   : > { %4418 = vmatprep.mubr.bf16.mxu0 %v14384_v29  ;;  %v14393_v32 = vpack.c.bf16 %v3225_v60, %v3224_v30  ;;  %v14400_v60 = vpack.c.bf16 %v3229_v5, %v3228_v4  ;;  %v3231_v30 = vld [vmem:[#allocation2 + $0x12c] sm:$0xff]  ;;  %v3255_v4 = vld [vmem:[#allocation2 + $0x35] sm:$0xff] }
 0x439   : > { %4419 = vmatmul.mubr.bf16.gmra.mrb[104].mxu0 %v3189_v52  ;;  %v3171_v52 = vld [vmem:[#allocation2 + $0xfb] sm:$0xff] }
 0x43a   : > { %4426 = vmatprep.mubr.bf16.mxu0 %v14387_v54  ;;  %v3192_v50 = vpack.c.bf16 %v3171_v52, %v3170_v2  ;;  %v16764_v2 = vpack.c.bf16 %v14140_v21, %v14133_v11  ;;  %v3254_v52 = vld [vmem:[#allocation2 + $0x2d] sm:$0xff]  ;;  %v3257_v21 = vld [vmem:[#allocation2 + $0x45] sm:$0xff] }
 0x43b   : > { %v3258_v11 = vld [vmem:[#allocation2 + $0x4d] sm:$0xff] }
 0x441   : > { %4427 = vmatmul.mubr.bf16.gmra.mrb[108].mxu0 %v3190_v3  ;;  %v3172_v3 = vld [vmem:[#allocation2 + $0x103] sm:$0xff] }
 0x442   : > { %4434 = vmatprep.mubr.bf16.mxu0 %v14390_v37  ;;  %v3193_v8 = vpack.c.bf16 %v14122_v51, %v3172_v3  ;;  %v16765_v51 = vpack.c.bf16 %v14158_v35, %v14153_v44  ;;  %v3342_v3 = vld [vmem:[#allocation2 + $0x13e] sm:$0xff]  ;;  %v3259_v44 = vld [vmem:[#allocation2 + $0x55] sm:$0xff] }
 0x443   : > { %v3360_v5 = vpack.c.bf16 %v3342_v3, %v3341_v22  ;;  %v3265_v3 = vld [vmem:[#allocation2 + $0x85] sm:$0xff] }
 0x445   : > { %11532 = vmatmul.mubr.bf16.gmra.mrb[152].mxu1 %v3360_v5 }
 0x449   : > { %4435 = vmatmul.mubr.bf16.gmra.mrb[112].mxu0 %v3191_v28  ;;  %v3230_v28 = vld [vmem:[#allocation2 + $0x124] sm:$0xff] }
 0x44a   : > { %4442 = vmatprep.mubr.bf16.mxu0 %v14393_v32  ;;  %v14403_v41 = vpack.c.bf16 %v3231_v30, %v3230_v28  ;;  %v3291_v30 = vpack.c.bf16 %v3258_v11, %v3257_v21  ;;  %v3271_v21 = vld [vmem:[#allocation2 + $0xb5] sm:$0xff] }
 0x451   : > { %4443 = vmatmul.mubr.bf16.gmra.mrb[116].mxu0 %v3192_v50  ;;  %v3289_v50 = vpack.c.bf16 %v3254_v52, %v3253_v23  ;;  %v3262_v52 = vld [vmem:[#allocation2 + $0x6d] sm:$0xff]  ;;  %v3261_v23 = vld [vmem:[#allocation2 + $0x65] sm:$0xff] }
 0x452   : > { %4450 = vmatprep.mubr.bf16.mxu0 %v14396_v17 }
 0x459   : > { %4451 = vmatmul.mubr.bf16.gmra.mrb[120].mxu0 %v3193_v8  ;;  %v3256_v8 = vld [vmem:[#allocation2 + $0x3d] sm:$0xff] }
 0x45a   : > { %4458 = vmatprep.mubr.bf16.mxu0 %v14400_v60  ;;  %v3290_v28 = vpack.c.bf16 %v3256_v8, %v3255_v4  ;;  %v3267_v8 = vld [vmem:[#allocation2 + $0x95] sm:$0xff] }
 0x461   : > { %4459 = vmatmul.mubr.bf16.gmra.mrb[124].mxu0 %v16764_v2  ;;  %v3260_v2 = vld [vmem:[#allocation2 + $0x5d] sm:$0xff] }
 0x462   : > { %4466 = vmatprep.mubr.bf16.mxu0 %v14403_v41  ;;  %v3292_v35 = vpack.c.bf16 %v3260_v2, %v3259_v44  ;;  %v3273_v2 = vld [vmem:[#allocation2 + $0xc5] sm:$0xff] }
 0x469   : > { %4467 = vmatmul.mubr.bf16.gmra.mrb[128].mxu0 %v16765_v51  ;;  %v3263_v51 = vld [vmem:[#allocation2 + $0x75] sm:$0xff] }
 0x46a   : > { %4507 = vmatprep.mubr.bf16.mxu0 %v3289_v50  ;;  %v3293_v50 = vpack.c.bf16 %v3262_v52, %v3261_v23  ;;  %v3277_v23 = vld [vmem:[#allocation2 + $0xe5] sm:$0xff] }
 0x471   : > { %4508 = vmatmul.mubr.bf16.vlgmr.msra.gmra.mrb[60].mxu0 %v14254_v27  ;;  %v3264_v27 = vld [vmem:[#allocation2 + $0x7d] sm:$0xff] }
 0x472   : > { %4515 = vmatprep.mubr.bf16.mxu0 %v3290_v28  ;;  %v3294_v22 = vpack.c.bf16 %v3264_v27, %v3263_v51  ;;  %v3269_v28 = vld [vmem:[#allocation2 + $0xa5] sm:$0xff]  ;;  %v3279_v27 = vld [vmem:[#allocation2 + $0xf5] sm:$0xff] }
 0x479   : > { %4516 = vmatmul.mubr.bf16.gmra.mrb[64].mxu0 %v14273_v24  ;;  %v3266_v24 = vld [vmem:[#allocation2 + $0x8d] sm:$0xff] }
 0x47a   : > { %4523 = vmatprep.mubr.bf16.mxu0 %v3291_v30  ;;  %v3295_v5 = vpack.c.bf16 %v3266_v24, %v3265_v3  ;;  %v5064_v24 = vld [vmem:[#allocation2 + $0x1] sm:$0xff]  ;;  %v5065_v3 = vld [vmem:[#allocation2 + $0x9] sm:$0xff] }
 0x481   : > { %4524 = vmatmul.mubr.bf16.gmra.mrb[68].mxu0 %v14284_v63  ;;  %v3268_v63 = vld [vmem:[#allocation2 + $0x9d] sm:$0xff] }
 0x482   : > { %4531 = vmatprep.mubr.bf16.mxu0 %v3292_v35  ;;  %v3296_v4 = vpack.c.bf16 %v3268_v63, %v3267_v8  ;;  %v3275_v35 = vld [vmem:[#allocation2 + $0xd5] sm:$0xff]  ;;  %v5100_v63 = vpack.c.bf16 %v5065_v3, %v5064_v24  ;;  %v14488_v24 = vstv %s517_s29 }
 0x484   : > { %5412 = vrot.lane.b32.xlu0 %v5100_v63, %s12784_s30  ;;  %v12675_v63 = vld [vmem:[%s16662_s6 + $0x68] sm:$0xff]  }
 0x489   : > { %4532 = vmatmul.mubr.bf16.gmra.mrb[72].mxu0 %v14303_v53  ;;  %v3270_v53 = vld [vmem:[#allocation2 + $0xad] sm:$0xff] }
 0x48a   : > { %4539 = vmatprep.mubr.bf16.mxu0 %v3293_v50  ;;  %v3297_v11 = vpack.c.bf16 %v3270_v53, %v3269_v28  ;;  %v3287_v28 = vld [vmem:[#allocation2 + $0x135] sm:$0xff] }
 0x491   : > { %4540 = vmatmul.mubr.bf16.gmra.mrb[76].mxu0 %v14314_v18  ;;  %v3272_v18 = vld [vmem:[#allocation2 + $0xbd] sm:$0xff] }
 0x492   : > { %4547 = vmatprep.mubr.bf16.mxu0 %v3294_v22  ;;  %v3298_v30 = vpack.c.bf16 %v3272_v18, %v3271_v21  ;;  %v3281_v22 = vld [vmem:[#allocation2 + $0x105] sm:$0xff]  ;;  %v3251_v21 = vld [vmem:[#allocation2 + $0x13c] sm:$0xff] }
 0x499   : > { %4548 = vmatmul.mubr.bf16.gmra.mrb[80].mxu0 %v14333_v1  ;;  %v3274_v1 = vld [vmem:[#allocation2 + $0xcd] sm:$0xff] }
 0x49a   : > { %4555 = vmatprep.mubr.bf16.mxu0 %v3295_v5  ;;  %v3299_v44 = vpack.c.bf16 %v3274_v1, %v3273_v2  ;;  %v12665_v1 = vld [vmem:[%s16662_s6 + $0x18] sm:$0xff]   ;;  %v12666_v2 = vld [vmem:[%s16662_s6 + $0x20] sm:$0xff]  }
 0x4a1   : > { %4556 = vmatmul.mubr.bf16.gmra.mrb[84].mxu0 %v14344_v55  ;;  %v3276_v55 = vld [vmem:[#allocation2 + $0xdd] sm:$0xff] }
 0x4a2   : > { %4563 = vmatprep.mubr.bf16.mxu0 %v3296_v4  ;;  %v3300_v52 = vpack.c.bf16 %v3276_v55, %v3275_v35  ;;  %v3285_v4 = vld [vmem:[#allocation2 + $0x125] sm:$0xff]  ;;  %v12668_v55 = vld [vmem:[%s16662_s6 + $0x30] sm:$0xff]   ;;  %v12669_v35 = vld [vmem:[%s16662_s6 + $0x38] sm:$0xff]  }
 0x4a9   : > { %4564 = vmatmul.mubr.bf16.gmra.mrb[88].mxu0 %v14363_v6  ;;  %v3278_v6 = vld [vmem:[#allocation2 + $0xed] sm:$0xff] }
 0x4aa   : > { %4571 = vmatprep.mubr.bf16.mxu0 %v3297_v11  ;;  %v3301_v50 = vpack.c.bf16 %v3278_v6, %v3277_v23  ;;  %v3288_v11 = vld [vmem:[#allocation2 + $0x13d] sm:$0xff]  ;;  %v12671_v6 = vld [vmem:[%s16662_s6 + $0x48] sm:$0xff]   ;;  %v12672_v23 = vld [vmem:[%s16662_s6 + $0x50] sm:$0xff]  }
 0x4ab   : > { %v3306_v18 = vpack.c.bf16 %v3288_v11, %v3287_v28 }
 0x4b1   : > { %4572 = vmatmul.mubr.bf16.gmra.mrb[92].mxu0 %v14370_v40  ;;  %v3280_v40 = vld [vmem:[#allocation2 + $0xfd] sm:$0xff] }
 0x4b2   : > { %4579 = vmatprep.mubr.bf16.mxu0 %v3298_v30  ;;  %v3302_v51 = vpack.c.bf16 %v3280_v40, %v3279_v27  ;;  %v14481_v40 = vld [vmem:[%s16666_s10] ss:$0 sm:$0xff] }
 0x4b3   : > { %v12674_v27 = vld [vmem:[%s16662_s6 + $0x60] sm:$0xff]  }
 0x4b9   : > { %4580 = vmatmul.mubr.bf16.gmra.mrb[96].mxu0 %v14381_v33  ;;  %v3282_v33 = vld [vmem:[#allocation2 + $0x10d] sm:$0xff] }
 0x4ba   : > { %4587 = vmatprep.mubr.bf16.mxu0 %v3299_v44  ;;  %v3303_v5 = vpack.c.bf16 %v3282_v33, %v3281_v22  ;;  %v12667_v44 = vld [vmem:[%s16662_s6 + $0x28] sm:$0xff]  }
 0x4c1   : > { %4588 = vmatmul.mubr.bf16.gmra.mrb[100].mxu0 %v14384_v29  ;;  %v3284_v29 = vld [vmem:[#allocation2 + $0x11d] sm:$0xff] }
 0x4c2   : > { %4595 = vmatprep.mubr.bf16.mxu0 %v3300_v52  ;;  %v12670_v52 = vld [vmem:[%s16662_s6 + $0x40] sm:$0xff]  }
 0x4c9   : > { %4596 = vmatmul.mubr.bf16.gmra.mrb[104].mxu0 %v14387_v54  ;;  %v3283_v54 = vld [vmem:[#allocation2 + $0x115] sm:$0xff] }
 0x4ca   : > { %4603 = vmatprep.mubr.bf16.mxu0 %v3301_v50  ;;  %v3304_v8 = vpack.c.bf16 %v3284_v29, %v3283_v54  ;;  %v12673_v50 = vld [vmem:[%s16662_s6 + $0x58] sm:$0xff]  }
 0x4d1   : > { %4604 = vmatmul.mubr.bf16.gmra.mrb[108].mxu0 %v14390_v37  ;;  %v3286_v37 = vld [vmem:[#allocation2 + $0x12d] sm:$0xff] }
 0x4d2   : > { %4611 = vmatprep.mubr.bf16.mxu0 %v3302_v51  ;;  %v3305_v53 = vpack.c.bf16 %v3286_v37, %v3285_v4 }
 0x4d9   : > { %4612 = vmatmul.mubr.bf16.gmra.mrb[112].mxu0 %v14393_v32  ;;  %v3250_v32 = vld [vmem:[#allocation2 + $0x134] sm:$0xff] }
 0x4da   : > { %4619 = vmatprep.mubr.bf16.mxu0 %v3303_v5  ;;  %v3252_v30 = vpack.c.bf16 %v3251_v21, %v3250_v32 }
 0x4e1   : > { %4620 = vmatmul.mubr.bf16.gmra.mrb[116].mxu0 %v14396_v17  ;;  %v12662_v17 = vld [vmem:[%s16662_s6] sm:$0xff]  }
 0x4e2   : > { %4627 = vmatprep.mubr.bf16.mxu0 %v3304_v8  ;;  %6248 = vmatpush1.bf16.msra.mxu1 %v12662_v17 }
 0x4e3   : > { %6249 = vmatprep.subr.bf16.mxu1 %v16747_v58 }
 0x4e9   : > { %4628 = vmatmul.mubr.bf16.gmra.mrb[120].mxu0 %v14400_v60  ;;  %v12663_v60 = vld [vmem:[%s16662_s6 + $0x8] sm:$0xff]  }
 0x4ea   : > { %4635 = vmatprep.mubr.bf16.mxu0 %v3305_v53  ;;  %6250 = vmatpush1.bf16.msra.mxu1 %v12663_v60 }
 0x4eb   : > { %6251 = vmatprep.subr.bf16.mxu1 %v16747_v58 }
 0x4f1   : > { %4636 = vmatmul.mubr.bf16.gmra.mrb[124].mxu0 %v14403_v41  ;;  %v12664_v41 = vld [vmem:[%s16662_s6 + $0x10] sm:$0xff]  }
 0x4f2   : > { %4643 = vmatprep.mubr.bf16.mxu0 %v3306_v18  ;;  %6252 = vmatpush1.bf16.msra.mxu1 %v12664_v41 }
 0x4f3   : > { %6253 = vmatprep.subr.bf16.mxu1 %v16747_v58 }
 0x4f6   : > { %6254 = vmatpush1.bf16.msra.mxu1 %v12665_v1 }
 0x4f7   : > { %6255 = vmatprep.subr.bf16.mxu1 %v16747_v58 }
 0x4f9   : > { %4644 = vmatmul.mubr.bf16.gmra.mrb[128].mxu0 %v3252_v30 }
 0x4fa   : > { %6256 = vmatpush1.bf16.msra.mxu1 %v12666_v2  ;;  %v12677_v2 = vld [vmem:[%s16662_s6 + $0x78] sm:$0xff]  }
 0x4fb   : > { %6257 = vmatprep.subr.bf16.mxu1 %v16747_v58 }
 0x4fe   : > { %6258 = vmatpush1.bf16.msra.mxu1 %v12667_v44 }
 0x4ff   : > { %6259 = vmatprep.subr.bf16.mxu1 %v16747_v58 }
 0x502   : > { %6260 = vmatpush1.bf16.msra.mxu1 %v12668_v55 }
 0x503   : > { %6261 = vmatprep.subr.bf16.mxu1 %v16747_v58 }
 0x506   : > { %6262 = vmatpush1.bf16.msra.mxu1 %v12669_v35 }
 0x507   : > { %6263 = vmatprep.subr.bf16.mxu1 %v16747_v58 }
 0x50a   : > { %6264 = vmatpush1.bf16.msra.mxu1 %v12670_v52 }
 0x50b   : > { %6265 = vmatprep.subr.bf16.mxu1 %v16747_v58 }
 0x50e   : > { %6266 = vmatpush1.bf16.msra.mxu1 %v12671_v6 }
 0x50f   : > { %6267 = vmatprep.subr.bf16.mxu1 %v16747_v58 }
 0x512   : > { %6268 = vmatpush1.bf16.msra.mxu1 %v12672_v23 }
 0x513   : > { %6269 = vmatprep.subr.bf16.mxu1 %v16747_v58 }
 0x516   : > { %6270 = vmatpush1.bf16.msra.mxu1 %v12673_v50 }
 0x517   : > { %6271 = vmatprep.subr.bf16.mxu1 %v16747_v58 }
 0x518   : > { %v14490_v5 = vpop.f32.mrb[152].mxu1 }
 0x519   : > { %v14497_v4 = vpop.f32.mrb[153].mxu1 }
 0x51a   : > { %6272 = vmatpush1.bf16.msra.mxu1 %v12674_v27  ;;  %v14499_v37 = vpop.f32.mrb[154].mxu1 }
 0x51b   : > { %6273 = vmatprep.subr.bf16.mxu1 %v16747_v58  ;;  %v14503_v11 = vpop.f32.mrb[155].mxu1 }
 0x51e   : > { %6274 = vmatpush1.bf16.msra.mxu1 %v12675_v63 }
 0x51f   : > { %6275 = vmatprep.subr.bf16.mxu1 %v16747_v58 }
 0x544   : > { %v4509_v51 = vpop.f32.mrb[60].mxu0 }
 0x545   : > { %v11667_v33 = vadd.f32 %v14481_v40, %v4509_v51  ;;  %v4511_v22 = vpop.f32.mrb[61].mxu0 }
 0x546   : > { %v4512_v3 = vpop.f32.mrb[62].mxu0 }
 0x547   : > { %v4687_v29 = vadd.f32 %v11667_v33, %v14229_v20  ;;  %v11668_v54 = vadd.f32 %v14481_v40, %v4512_v3  ;;  %v4514_v8 = vpop.f32.mrb[63].mxu0  ;;  %v12676_v20 = vld [vmem:[%s16662_s6 + $0x70] sm:$0xff]  }
 0x548   : > { %6276 = vmatpush1.bf16.msra.mxu1 %v12676_v20 }
 0x549   : > { %vm4829_vm4 = vcmp.ge.f32.partialorder %v4687_v29, 0.0  ;;  %v4866_v53 = vmul.f32 %v14488_v24, %v4687_v29  ;;  %v4690_v28 = vadd.f32 %v11668_v54, %v14233_v12  ;;  %6277 = vmatprep.subr.bf16.mxu1 %v16747_v58 }
 0x54b   : > { %v4902_v18 = vsel %vm4829_vm4, %v4687_v29, %v4866_v53  ;;  %vm4830_vm5 = vcmp.ge.f32.partialorder %v4690_v28, 0.0  ;;  %v4867_v32 = vmul.f32 %v14488_v24, %v4690_v28 }
 0x54c   : > { %v4938_v21 = vmul.f32 %v4902_v18, %v13871_v62  ;;  %v4517_v30 = vpop.f32.mrb[64].mxu0  ;;  %6278 = vmatpush1.bf16.msra.mxu1 %v12677_v2 }
 0x54d   : > { %v4903_v17 = vsel %vm4830_vm5, %v4690_v28, %v4867_v32  ;;  %v11669_v60 = vadd.f32 %v14481_v40, %v4517_v30  ;;  %v4519_v12 = vpop.f32.mrb[65].mxu0  ;;  %6424 = vmatprep.subr.bf16.mxu1 %v16747_v58 }
 0x54e   : > { %4974 = vst.msk [vmem:[#allocation2 + $0x13] sm:$0xff] %vm2904_vm3, %v4938_v21  ;;  %v4939_v41 = vmul.f32 %v4903_v17, %v13869_v45  ;;  %v4520_v1 = vpop.f32.mrb[66].mxu0 }
 0x54f   : > { %v4695_v44 = vadd.f32 %v11669_v60, %v14227_v34  ;;  %v11670_v55 = vadd.f32 %v14481_v40, %v4520_v1  ;;  %v4522_v35 = vpop.f32.mrb[67].mxu0 }
 0x550   : > { %4975 = vst.msk [vmem:[#allocation2 + $0x1b] sm:$0xff] %vm2904_vm3, %v4939_v41 }
 0x551   : > { %vm4831_vm6 = vcmp.ge.f32.partialorder %v4695_v44, 0.0  ;;  %v4868_v52 = vmul.f32 %v14488_v24, %v4695_v44  ;;  %v4698_v6 = vadd.f32 %v11670_v55, %v14231_v26 }
 0x553   : > { %v4904_v23 = vsel %vm4831_vm6, %v4695_v44, %v4868_v52  ;;  %vm4832_vm7 = vcmp.ge.f32.partialorder %v4698_v6, 0.0  ;;  %v4869_v50 = vmul.f32 %v14488_v24, %v4698_v6 }
 0x554   : > { %v4940_v27 = vmul.f32 %v4904_v23, %v13877_v9  ;;  %v4525_v34 = vpop.f32.mrb[68].mxu0 }
 0x555   : > { %v4905_v51 = vsel %vm4832_vm7, %v4698_v6, %v4869_v50  ;;  %v11671_v33 = vadd.f32 %v14481_v40, %v4525_v34  ;;  %v4527_v22 = vpop.f32.mrb[69].mxu0  ;;  %v5120_v29 = vld [vmem:[#allocation2 + $0x12] sm:$0xff] }
 0x556   : > { %4976 = vst.msk [vmem:[#allocation2 + $0x23] sm:$0xff] %vm2904_vm3, %v4940_v27  ;;  %v4941_v3 = vmul.f32 %v4905_v51, %v13879_v15  ;;  %v4528_v63 = vpop.f32.mrb[70].mxu0  ;;  %v5066_v28 = vld [vmem:[#allocation2 + $0x11] sm:$0xff] }
 0x557   : > { %v4703_v26 = vadd.f32 %v11671_v33, %v14237_v59  ;;  %v11672_v54 = vadd.f32 %v14481_v40, %v4528_v63  ;;  %v4530_v8 = vpop.f32.mrb[71].mxu0  ;;  %v5121_v53 = vld [vmem:[#allocation2 + $0x1a] sm:$0xff] }
 0x558   : > { %v5067_v20 = vld [vmem:[#allocation2 + $0x19] sm:$0xff]  ;;  %4977 = vst.msk [vmem:[#allocation2 + $0x2b] sm:$0xff] %vm2904_vm3, %v4941_v3  ;;  %v14532_v18 = vpack.c.bf16 %v5121_v53, %v5120_v29 }
 0x559   : > { %v5101_v32 = vpack.c.bf16 %v5067_v20, %v5066_v28  ;;  %vm4833_vm8 = vcmp.ge.f32.partialorder %v4703_v26, 0.0  ;;  %v4870_v21 = vmul.f32 %v14488_v24, %v4703_v26  ;;  %v4706_v30 = vadd.f32 %v11672_v54, %v14241_v7 }
 0x55a   : > { %5466 = vrot.lane.b32.xlu1 %v14532_v18, %s12784_s30 }
 0x55b   : > { %5414 = vrot.lane.b32.xlu0 %v5101_v32, %s12784_s30  ;;  %v4906_v59 = vsel %vm4833_vm8, %v4703_v26, %v4870_v21  ;;  %vm4834_vm9 = vcmp.ge.f32.partialorder %v4706_v30, 0.0  ;;  %v4871_v17 = vmul.f32 %v14488_v24, %v4706_v30 }
 0x55c   : > { %v4942_v60 = vmul.f32 %v4906_v59, %v13888_v25  ;;  %v4533_v12 = vpop.f32.mrb[72].mxu0 }
 0x55d   : > { %v4907_v41 = vsel %vm4834_vm9, %v4706_v30, %v4871_v17  ;;  %v11673_v1 = vadd.f32 %v14481_v40, %v4533_v12  ;;  %v4535_v2 = vpop.f32.mrb[73].mxu0  ;;  %v5122_v55 = vld [vmem:[#allocation2 + $0x22] sm:$0xff] }
 0x55e   : > { %4978 = vst.msk [vmem:[#allocation2 + $0x33] sm:$0xff] %vm2904_vm3, %v4942_v60  ;;  %v4943_v7 = vmul.f32 %v4907_v41, %v13898_v36  ;;  %v4536_v44 = vpop.f32.mrb[74].mxu0  ;;  %v5068_v50 = vld [vmem:[#allocation2 + $0x21] sm:$0xff] }
 0x55f   : > { %v4711_v35 = vadd.f32 %v11673_v1, %v14235_v19  ;;  %v11674_v52 = vadd.f32 %v14481_v40, %v4536_v44  ;;  %v4538_v6 = vpop.f32.mrb[75].mxu0  ;;  %v5123_v23 = vld [vmem:[#allocation2 + $0x2a] sm:$0xff] }
 0x560   : > { %v5069_v27 = vld [vmem:[#allocation2 + $0x29] sm:$0xff]  ;;  %4979 = vst.msk [vmem:[#allocation2 + $0x3b] sm:$0xff] %vm2904_vm3, %v4943_v7  ;;  %v14547_v34 = vpack.c.bf16 %v5123_v23, %v5122_v55 }
 0x561   : > { %v5102_v51 = vpack.c.bf16 %v5069_v27, %v5068_v50  ;;  %vm4835_vm10 = vcmp.ge.f32.partialorder %v4711_v35, 0.0  ;;  %v4872_v33 = vmul.f32 %v14488_v24, %v4711_v35  ;;  %v4714_v22 = vadd.f32 %v11674_v52, %v14239_v39 }
 0x562   : > { %5468 = vrot.lane.b32.xlu1 %v14547_v34, %s12784_s30 }
 0x563   : > { %5416 = vrot.lane.b32.xlu0 %v5102_v51, %s12784_s30  ;;  %v4908_v19 = vsel %vm4835_vm10, %v4711_v35, %v4872_v33  ;;  %vm4836_vm11 = vcmp.ge.f32.partialorder %v4714_v22, 0.0  ;;  %v4873_v3 = vmul.f32 %v14488_v24, %v4714_v22 }
 0x564   : > { %v4944_v63 = vmul.f32 %v4908_v19, %v13908_v46  ;;  %v4541_v29 = vpop.f32.mrb[76].mxu0 }
 0x565   : > { %v4909_v26 = vsel %vm4836_vm11, %v4714_v22, %v4873_v3  ;;  %v11675_v54 = vadd.f32 %v14481_v40, %v4541_v29  ;;  %v4543_v8 = vpop.f32.mrb[77].mxu0  ;;  %v5124_v28 = vld [vmem:[#allocation2 + $0x32] sm:$0xff] }
 0x566   : > { %4980 = vst.msk [vmem:[#allocation2 + $0x43] sm:$0xff] %vm2904_vm3, %v4944_v63  ;;  %v4945_v39 = vmul.f32 %v4909_v26, %v13910_v47  ;;  %v4544_v53 = vpop.f32.mrb[78].mxu0  ;;  %v5070_v59 = vld [vmem:[#allocation2 + $0x31] sm:$0xff] }
 0x567   : > { %v4719_v20 = vadd.f32 %v11675_v54, %v14245_v10  ;;  %v11676_v32 = vadd.f32 %v14481_v40, %v4544_v53  ;;  %v4546_v21 = vpop.f32.mrb[79].mxu0  ;;  %v5125_v30 = vld [vmem:[#allocation2 + $0x3a] sm:$0xff] }
 0x568   : > { %v5071_v17 = vld [vmem:[#allocation2 + $0x39] sm:$0xff]  ;;  %4981 = vst.msk [vmem:[#allocation2 + $0x4b] sm:$0xff] %vm2904_vm3, %v4945_v39  ;;  %v14562_v60 = vpack.c.bf16 %v5125_v30, %v5124_v28 }
 0x569   : > { %v5103_v12 = vpack.c.bf16 %v5071_v17, %v5070_v59  ;;  %vm4837_vm12 = vcmp.ge.f32.partialorder %v4719_v20, 0.0  ;;  %v4874_v41 = vmul.f32 %v14488_v24, %v4719_v20  ;;  %v4722_v1 = vadd.f32 %v11676_v32, %v14249_v57 }
 0x56a   : > { %5470 = vrot.lane.b32.xlu1 %v14562_v60, %s12784_s30 }
 0x56b   : > { %5418 = vrot.lane.b32.xlu0 %v5103_v12, %s12784_s30  ;;  %v4910_v10 = vsel %vm4837_vm12, %v4719_v20, %v4874_v41  ;;  %vm4838_vm13 = vcmp.ge.f32.partialorder %v4722_v1, 0.0  ;;  %v4875_v2 = vmul.f32 %v14488_v24, %v4722_v1 }
 0x56c   : > { %v4946_v7 = vmul.f32 %v4910_v10, %v13925_v31  ;;  %v4549_v44 = vpop.f32.mrb[80].mxu0 }
 0x56d   : > { %v4911_v55 = vsel %vm4838_vm13, %v4722_v1, %v4875_v2  ;;  %v11677_v35 = vadd.f32 %v14481_v40, %v4549_v44  ;;  %v4551_v52 = vpop.f32.mrb[81].mxu0  ;;  %v5126_v23 = vld [vmem:[#allocation2 + $0x42] sm:$0xff] }
 0x56e   : > { %4982 = vst.msk [vmem:[#allocation2 + $0x53] sm:$0xff] %vm2904_vm3, %v4946_v7  ;;  %v4947_v57 = vmul.f32 %v4911_v55, %v13936_v48  ;;  %v4552_v6 = vpop.f32.mrb[82].mxu0  ;;  %v5072_v22 = vld [vmem:[#allocation2 + $0x41] sm:$0xff] }
 0x56f   : > { %v4727_v50 = vadd.f32 %v11677_v35, %v14243_v0  ;;  %v11678_v27 = vadd.f32 %v14481_v40, %v4552_v6  ;;  %v4554_v51 = vpop.f32.mrb[83].mxu0  ;;  %v5127_v33 = vld [vmem:[#allocation2 + $0x4a] sm:$0xff] }
 0x570   : > { %v5073_v19 = vld [vmem:[#allocation2 + $0x49] sm:$0xff]  ;;  %4983 = vst.msk [vmem:[#allocation2 + $0x5b] sm:$0xff] %vm2904_vm3, %v4947_v57  ;;  %v14577_v3 = vpack.c.bf16 %v5127_v33, %v5126_v23 }
 0x571   : > { %v5104_v63 = vpack.c.bf16 %v5073_v19, %v5072_v22  ;;  %vm4839_vm14 = vcmp.ge.f32.partialorder %v4727_v50, 0.0  ;;  %v4876_v29 = vmul.f32 %v14488_v24, %v4727_v50  ;;  %v4730_v26 = vadd.f32 %v11678_v27, %v14247_v61  ;;  %v16766_v35 = vld [vmem:[#allocation4_spill] sm:$0xff] }
 0x572   : > { %5472 = vrot.lane.b32.xlu1 %v14577_v3, %s12784_s30 }
 0x573   : > { %5420 = vrot.lane.b32.xlu0 %v5104_v63, %s12784_s30  ;;  %v4912_v0 = vsel %vm4839_vm14, %v4727_v50, %v4876_v29  ;;  %vm4840_vm15 = vcmp.ge.f32.partialorder %v4730_v26, 0.0  ;;  %v4877_v54 = vmul.f32 %v14488_v24, %v4730_v26 }
 0x574   : > { %v4948_v8 = vmul.f32 %v4912_v0, %v13950_v43  ;;  %v4557_v39 = vpop.f32.mrb[84].mxu0 }
 0x575   : > { %v4913_v53 = vsel %vm4840_vm15, %v4730_v26, %v4877_v54  ;;  %v11679_v28 = vadd.f32 %v14481_v40, %v4557_v39  ;;  %v4559_v20 = vpop.f32.mrb[85].mxu0  ;;  %v5128_v21 = vld [vmem:[#allocation2 + $0x52] sm:$0xff] }
 0x576   : > { %4984 = vst.msk [vmem:[#allocation2 + $0x63] sm:$0xff] %vm2904_vm3, %v4948_v8  ;;  %v4949_v61 = vmul.f32 %v4913_v53, %v13954_v56  ;;  %v4560_v32 = vpop.f32.mrb[86].mxu0  ;;  %v5074_v41 = vld [vmem:[#allocation2 + $0x51] sm:$0xff] }
 0x577   : > { %v4735_v30 = vadd.f32 %v11679_v28, %v14259_v14  ;;  %v11680_v59 = vadd.f32 %v14481_v40, %v4560_v32  ;;  %v4562_v17 = vpop.f32.mrb[87].mxu0  ;;  %v5129_v12 = vld [vmem:[#allocation2 + $0x5a] sm:$0xff] }
 0x578   : > { %v5075_v1 = vld [vmem:[#allocation2 + $0x59] sm:$0xff]  ;;  %4985 = vst.msk [vmem:[#allocation2 + $0x6b] sm:$0xff] %vm2904_vm3, %v4949_v61  ;;  %v14592_v10 = vpack.c.bf16 %v5129_v12, %v5128_v21  ;;  %v16768_v12 = vld [vmem:[#allocation28_spill] sm:$0xff] }
 0x579   : > { %v5105_v2 = vpack.c.bf16 %v5075_v1, %v5074_v41  ;;  %vm4841_vm0 = vcmp.ge.f32.partialorder %v4735_v30, 0.0  ;;  %v4878_v7 = vmul.f32 %v14488_v24, %v4735_v30  ;;  %v4738_v44 = vadd.f32 %v11680_v59, %v14267_v49 }
 0x57a   : > { %5474 = vrot.lane.b32.xlu1 %v14592_v10, %s12784_s30 }
 0x57b   : > { %5422 = vrot.lane.b32.xlu0 %v5105_v2, %s12784_s30  ;;  %v4914_v14 = vsel %vm4841_vm0, %v4735_v30, %v4878_v7  ;;  %vm4842_vm1 = vcmp.ge.f32.partialorder %v4738_v44, 0.0  ;;  %v4879_v55 = vmul.f32 %v14488_v24, %v4738_v44  ;;  %v16767_v30 = vld [vmem:[#allocation6_spill] sm:$0xff] }
 0x57c   : > { %v4950_v52 = vmul.f32 %v4914_v14, %v16766_v35  ;;  %v4565_v57 = vpop.f32.mrb[88].mxu0 }
 0x57d   : > { %v4915_v6 = vsel %vm4842_vm1, %v4738_v44, %v4879_v55  ;;  %v11681_v23 = vadd.f32 %v14481_v40, %v4565_v57  ;;  %v4567_v50 = vpop.f32.mrb[89].mxu0  ;;  %v5130_v51 = vld [vmem:[#allocation2 + $0x62] sm:$0xff] }
 0x57e   : > { %4986 = vst.msk [vmem:[#allocation2 + $0x73] sm:$0xff] %vm2904_vm3, %v4950_v52  ;;  %v4951_v49 = vmul.f32 %v4915_v6, %v13975_v38  ;;  %v4568_v27 = vpop.f32.mrb[90].mxu0  ;;  %v5076_v29 = vld [vmem:[#allocation2 + $0x61] sm:$0xff]  ;;  %v16769_v6 = vld [vmem:[#allocation30_spill] sm:$0xff] }
 0x57f   : > { %v4743_v33 = vadd.f32 %v11681_v23, %v14256_v13  ;;  %v11682_v22 = vadd.f32 %v14481_v40, %v4568_v27  ;;  %v4570_v19 = vpop.f32.mrb[91].mxu0  ;;  %v5131_v63 = vld [vmem:[#allocation2 + $0x6a] sm:$0xff]  ;;  %v16770_v27 = vld [vmem:[#allocation7_spill] sm:$0xff] }
 0x580   : > { %v5077_v26 = vld [vmem:[#allocation2 + $0x69] sm:$0xff]  ;;  %4987 = vst.msk [vmem:[#allocation2 + $0x7b] sm:$0xff] %vm2904_vm3, %v4951_v49  ;;  %v14607_v0 = vpack.c.bf16 %v5131_v63, %v5130_v51 }
 0x581   : > { %v5106_v54 = vpack.c.bf16 %v5077_v26, %v5076_v29  ;;  %vm4843_vm2 = vcmp.ge.f32.partialorder %v4743_v33, 0.0  ;;  %v4880_v8 = vmul.f32 %v14488_v24, %v4743_v33  ;;  %v4746_v39 = vadd.f32 %v11682_v22, %v14264_v16  ;;  %v16771_v29 = vld [vmem:[#allocation8_spill] sm:$0xff] }
 0x582   : > { %5476 = vrot.lane.b32.xlu1 %v14607_v0, %s12784_s30 }
 0x583   : > { %5424 = vrot.lane.b32.xlu0 %v5106_v54, %s12784_s30  ;;  %v4916_v13 = vsel %vm4843_vm2, %v4743_v33, %v4880_v8  ;;  %vm4844_vm4 = vcmp.ge.f32.partialorder %v4746_v39, 0.0  ;;  %v4881_v53 = vmul.f32 %v14488_v24, %v4746_v39 }
 0x584   : > { %v4952_v28 = vmul.f32 %v4916_v13, %v13987_v42  ;;  %v4573_v20 = vpop.f32.mrb[92].mxu0 }
 0x585   : > { %v4917_v61 = vsel %vm4844_vm4, %v4746_v39, %v4881_v53  ;;  %v11683_v32 = vadd.f32 %v14481_v40, %v4573_v20  ;;  %v4575_v21 = vpop.f32.mrb[93].mxu0  ;;  %v5132_v17 = vld [vmem:[#allocation2 + $0x72] sm:$0xff]  ;;  %v16772_v39 = vld [vmem:[#allocation27_spill] sm:$0xff] }
 0x586   : > { %4988 = vst.msk [vmem:[#allocation2 + $0x83] sm:$0xff] %vm2904_vm3, %v4952_v28  ;;  %v4953_v16 = vmul.f32 %v4917_v61, %v16767_v30  ;;  %v4576_v59 = vpop.f32.mrb[94].mxu0  ;;  %v5078_v44 = vld [vmem:[#allocation2 + $0x71] sm:$0xff] }
 0x587   : > { %v4751_v41 = vadd.f32 %v11683_v32, %v16768_v12  ;;  %v11684_v1 = vadd.f32 %v14481_v40, %v4576_v59  ;;  %v4578_v2 = vpop.f32.mrb[95].mxu0  ;;  %v5133_v7 = vld [vmem:[#allocation2 + $0x7a] sm:$0xff] }
 0x588   : > { %v5079_v14 = vld [vmem:[#allocation2 + $0x79] sm:$0xff]  ;;  %4989 = vst.msk [vmem:[#allocation2 + $0x8b] sm:$0xff] %vm2904_vm3, %v4953_v16  ;;  %v14622_v55 = vpack.c.bf16 %v5133_v7, %v5132_v17  ;;  %v16773_v17 = vld [vmem:[#allocation29_spill] sm:$0xff] }
 0x589   : > { %v5107_v52 = vpack.c.bf16 %v5079_v14, %v5078_v44  ;;  %vm4845_vm5 = vcmp.ge.f32.partialorder %v4751_v41, 0.0  ;;  %v4882_v57 = vmul.f32 %v14488_v24, %v4751_v41  ;;  %v4754_v23 = vadd.f32 %v11684_v1, %v16769_v6  ;;  %v16774_v2 = vld [vmem:[#allocation9_spill] sm:$0xff]  ;;  %v16775_v6 = vld [vmem:[#allocation10_spill] sm:$0xff] }
 0x58a   : > { %5478 = vrot.lane.b32.xlu1 %v14622_v55, %s12784_s30 }
 0x58b   : > { %5426 = vrot.lane.b32.xlu0 %v5107_v52, %s12784_s30  ;;  %v4918_v50 = vsel %vm4845_vm5, %v4751_v41, %v4882_v57  ;;  %vm4846_vm6 = vcmp.ge.f32.partialorder %v4754_v23, 0.0  ;;  %v4883_v49 = vmul.f32 %v14488_v24, %v4754_v23 }
 0x58c   : > { %v4954_v51 = vmul.f32 %v4918_v50, %v16770_v27  ;;  %v4581_v33 = vpop.f32.mrb[96].mxu0 }
 0x58d   : > { %v4919_v22 = vsel %vm4846_vm6, %v4754_v23, %v4883_v49  ;;  %v11685_v19 = vadd.f32 %v14481_v40, %v4581_v33  ;;  %v4583_v63 = vpop.f32.mrb[97].mxu0  ;;  %v5134_v8 = vld [vmem:[#allocation2 + $0x82] sm:$0xff] }
 0x58e   : > { %4990 = vst.msk [vmem:[#allocation2 + $0x93] sm:$0xff] %vm2904_vm3, %v4954_v51  ;;  %v4955_v26 = vmul.f32 %v4919_v22, %v16771_v29  ;;  %v4584_v54 = vpop.f32.mrb[98].mxu0  ;;  %v5080_v61 = vld [vmem:[#allocation2 + $0x81] sm:$0xff] }
 0x58f   : > { %v4759_v13 = vadd.f32 %v11685_v19, %v16772_v39  ;;  %v11686_v53 = vadd.f32 %v14481_v40, %v4584_v54  ;;  %v4586_v28 = vpop.f32.mrb[99].mxu0  ;;  %v5135_v20 = vld [vmem:[#allocation2 + $0x8a] sm:$0xff] }
 0x590   : > { %v5081_v32 = vld [vmem:[#allocation2 + $0x89] sm:$0xff]  ;;  %4991 = vst.msk [vmem:[#allocation2 + $0x9b] sm:$0xff] %vm2904_vm3, %v4955_v26  ;;  %v14637_v21 = vpack.c.bf16 %v5135_v20, %v5134_v8 }
 0x591   : > { %v5108_v16 = vpack.c.bf16 %v5081_v32, %v5080_v61  ;;  %vm4847_vm7 = vcmp.ge.f32.partialorder %v4759_v13, 0.0  ;;  %v4884_v59 = vmul.f32 %v14488_v24, %v4759_v13  ;;  %v4762_v12 = vadd.f32 %v11686_v53, %v16773_v17  ;;  %v16776_v51 = vld [vmem:[#allocation32_spill] sm:$0xff]  ;;  %v16777_v53 = vld [vmem:[#allocation34_spill] sm:$0xff]  ;;  %v16778_v32 = vld [vmem:[#allocation11_spill] sm:$0xff] }
 0x592   : > { %5480 = vrot.lane.b32.xlu1 %v14637_v21, %s12784_s30 }
 0x593   : > { %5428 = vrot.lane.b32.xlu0 %v5108_v16, %s12784_s30  ;;  %v4920_v41 = vsel %vm4847_vm7, %v4759_v13, %v4884_v59  ;;  %vm4848_vm8 = vcmp.ge.f32.partialorder %v4762_v12, 0.0  ;;  %v4885_v1 = vmul.f32 %v14488_v24, %v4762_v12 }
 0x594   : > { %v4956_v7 = vmul.f32 %v4920_v41, %v16774_v2  ;;  %v4589_v44 = vpop.f32.mrb[100].mxu0 }
 0x595   : > { %v4921_v14 = vsel %vm4848_vm8, %v4762_v12, %v4885_v1  ;;  %v11687_v52 = vadd.f32 %v14481_v40, %v4589_v44  ;;  %v4591_v57 = vpop.f32.mrb[101].mxu0  ;;  %v5136_v49 = vld [vmem:[#allocation2 + $0x92] sm:$0xff]  ;;  %v16779_v1 = vld [vmem:[#allocation12_spill] sm:$0xff] }
 0x596   : > { %4992 = vst.msk [vmem:[#allocation2 + $0xa3] sm:$0xff] %vm2904_vm3, %v4956_v7  ;;  %v4957_v23 = vmul.f32 %v4921_v14, %v16775_v6  ;;  %v4592_v50 = vpop.f32.mrb[102].mxu0  ;;  %v5082_v26 = vld [vmem:[#allocation2 + $0x91] sm:$0xff] }
 0x597   : > { %v4767_v33 = vadd.f32 %v11687_v52, %v16776_v51  ;;  %v11688_v22 = vadd.f32 %v14481_v40, %v4592_v50  ;;  %v4594_v19 = vpop.f32.mrb[103].mxu0  ;;  %v5137_v63 = vld [vmem:[#allocation2 + $0x9a] sm:$0xff] }
 0x598   : > { %v5083_v54 = vld [vmem:[#allocation2 + $0x99] sm:$0xff]  ;;  %4993 = vst.msk [vmem:[#allocation2 + $0xab] sm:$0xff] %vm2904_vm3, %v4957_v23  ;;  %v14652_v8 = vpack.c.bf16 %v5137_v63, %v5136_v49 }
 0x599   : > { %v5109_v39 = vpack.c.bf16 %v5083_v54, %v5082_v26  ;;  %vm4849_vm9 = vcmp.ge.f32.partialorder %v4767_v33, 0.0  ;;  %v4886_v13 = vmul.f32 %v14488_v24, %v4767_v33  ;;  %v4770_v28 = vadd.f32 %v11688_v22, %v16777_v53  ;;  %v16780_v52 = vld [vmem:[#allocation31_spill] sm:$0xff]  ;;  %v16781_v26 = vld [vmem:[#allocation33_spill] sm:$0xff] }
 0x59a   : > { %5482 = vrot.lane.b32.xlu1 %v14652_v8, %s12784_s30  ;;  %v16782_v53 = vld [vmem:[#allocation13_spill] sm:$0xff] }
 0x59b   : > { %5430 = vrot.lane.b32.xlu0 %v5109_v39, %s12784_s30  ;;  %v4922_v20 = vsel %vm4849_vm9, %v4767_v33, %v4886_v13  ;;  %vm4850_vm10 = vcmp.ge.f32.partialorder %v4770_v28, 0.0  ;;  %v4887_v61 = vmul.f32 %v14488_v24, %v4770_v28 }
 0x59c   : > { %v4958_v16 = vmul.f32 %v4922_v20, %v16778_v32  ;;  %v4597_v59 = vpop.f32.mrb[104].mxu0 }
 0x59d   : > { %v4923_v17 = vsel %vm4850_vm10, %v4770_v28, %v4887_v61  ;;  %v11689_v12 = vadd.f32 %v14481_v40, %v4597_v59  ;;  %v4599_v41 = vpop.f32.mrb[105].mxu0  ;;  %v5138_v14 = vld [vmem:[#allocation2 + $0xa2] sm:$0xff] }
 0x59e   : > { %4994 = vst.msk [vmem:[#allocation2 + $0xb3] sm:$0xff] %vm2904_vm3, %v4958_v16  ;;  %v4959_v7 = vmul.f32 %v4923_v17, %v16779_v1  ;;  %v4600_v44 = vpop.f32.mrb[106].mxu0  ;;  %v5084_v51 = vld [vmem:[#allocation2 + $0xa1] sm:$0xff]  ;;  %v16783_v17 = vld [vmem:[#allocation14_spill] sm:$0xff] }
 0x59f   : > { %v4775_v57 = vadd.f32 %v11689_v12, %v16780_v52  ;;  %v11690_v23 = vadd.f32 %v14481_v40, %v4600_v44  ;;  %v4602_v50 = vpop.f32.mrb[107].mxu0  ;;  %v5139_v49 = vld [vmem:[#allocation2 + $0xaa] sm:$0xff] }
 0x5a0   : > { %v5085_v33 = vld [vmem:[#allocation2 + $0xa9] sm:$0xff]  ;;  %4995 = vst.msk [vmem:[#allocation2 + $0xbb] sm:$0xff] %vm2904_vm3, %v4959_v7  ;;  %v14667_v22 = vpack.c.bf16 %v5139_v49, %v5138_v14 }
 0x5a1   : > { %v5110_v19 = vpack.c.bf16 %v5085_v33, %v5084_v51  ;;  %vm4851_vm11 = vcmp.ge.f32.partialorder %v4775_v57, 0.0  ;;  %v4888_v63 = vmul.f32 %v14488_v24, %v4775_v57  ;;  %v4778_v54 = vadd.f32 %v11690_v23, %v16781_v26  ;;  %v16784_v44 = vld [vmem:[#allocation36_spill] sm:$0xff] }
 0x5a2   : > { %5484 = vrot.lane.b32.xlu1 %v14667_v22, %s12784_s30 }
 0x5a3   : > { %5432 = vrot.lane.b32.xlu0 %v5110_v19, %s12784_s30  ;;  %v4924_v39 = vsel %vm4851_vm11, %v4775_v57, %v4888_v63  ;;  %vm4852_vm12 = vcmp.ge.f32.partialorder %v4778_v54, 0.0  ;;  %v4889_v13 = vmul.f32 %v14488_v24, %v4778_v54  ;;  %v16785_v63 = vld [vmem:[#allocation38_spill] sm:$0xff] }
 0x5a4   : > { %v4960_v28 = vmul.f32 %v4924_v39, %v16782_v53  ;;  %v4605_v20 = vpop.f32.mrb[108].mxu0 }
 0x5a5   : > { %v4925_v61 = vsel %vm4852_vm12, %v4778_v54, %v4889_v13  ;;  %v11691_v16 = vadd.f32 %v14481_v40, %v4605_v20  ;;  %v4607_v59 = vpop.f32.mrb[109].mxu0  ;;  %v5140_v7 = vld [vmem:[#allocation2 + $0xb2] sm:$0xff]  ;;  %v16786_v13 = vld [vmem:[#allocation15_spill] sm:$0xff] }
 0x5a6   : > { %4996 = vst.msk [vmem:[#allocation2 + $0xc3] sm:$0xff] %vm2904_vm3, %v4960_v28  ;;  %v4961_v12 = vmul.f32 %v4925_v61, %v16783_v17  ;;  %v4608_v41 = vpop.f32.mrb[110].mxu0  ;;  %v5086_v50 = vld [vmem:[#allocation2 + $0xb1] sm:$0xff] }
 0x5a7   : > { %v4783_v14 = vadd.f32 %v11691_v16, %v16784_v44  ;;  %v11692_v52 = vadd.f32 %v14481_v40, %v4608_v41  ;;  %v4610_v57 = vpop.f32.mrb[111].mxu0  ;;  %v5141_v23 = vld [vmem:[#allocation2 + $0xba] sm:$0xff]  ;;  %v5032_v53 = vld [vmem:[#allocation2 + $0xb0] sm:$0xff] }
 0x5a8   : > { %v5087_v49 = vld [vmem:[#allocation2 + $0xb9] sm:$0xff]  ;;  %4997 = vst.msk [vmem:[#allocation2 + $0xcb] sm:$0xff] %vm2904_vm3, %v4961_v12  ;;  %v14682_v51 = vpack.c.bf16 %v5141_v23, %v5140_v7  ;;  %v16787_v12 = vld [vmem:[#allocation16_spill] sm:$0xff] }
 0x5a9   : > { %v5111_v33 = vpack.c.bf16 %v5087_v49, %v5086_v50  ;;  %vm4853_vm13 = vcmp.ge.f32.partialorder %v4783_v14, 0.0  ;;  %v4890_v19 = vmul.f32 %v14488_v24, %v4783_v14  ;;  %v4786_v26 = vadd.f32 %v11692_v52, %v16785_v63  ;;  %v16788_v52 = vld [vmem:[#allocation35_spill] sm:$0xff] }
 0x5aa   : > { %5486 = vrot.lane.b32.xlu1 %v14682_v51, %s12784_s30 }
 0x5ab   : > { %5434 = vrot.lane.b32.xlu0 %v5111_v33, %s12784_s30  ;;  %v4926_v54 = vsel %vm4853_vm13, %v4783_v14, %v4890_v19  ;;  %vm4854_vm14 = vcmp.ge.f32.partialorder %v4786_v26, 0.0  ;;  %v4891_v39 = vmul.f32 %v14488_v24, %v4786_v26 }
 0x5ac   : > { %v4962_v28 = vmul.f32 %v4926_v54, %v16786_v13  ;;  %v4613_v20 = vpop.f32.mrb[112].mxu0  ;;  %v16789_v54 = vld [vmem:[#allocation37_spill] sm:$0xff] }
 0x5ad   : > { %v4927_v61 = vsel %vm4854_vm14, %v4786_v26, %v4891_v39  ;;  %v11693_v16 = vadd.f32 %v14481_v40, %v4613_v20  ;;  %v4615_v59 = vpop.f32.mrb[113].mxu0  ;;  %v5142_v44 = vld [vmem:[#allocation2 + $0xc2] sm:$0xff] }
 0x5ae   : > { %4998 = vst.msk [vmem:[#allocation2 + $0xd3] sm:$0xff] %vm2904_vm3, %v4962_v28  ;;  %v4963_v41 = vmul.f32 %v4927_v61, %v16787_v12  ;;  %v4616_v7 = vpop.f32.mrb[114].mxu0  ;;  %v5088_v49 = vld [vmem:[#allocation2 + $0xc1] sm:$0xff]  ;;  %v16790_v61 = vld [vmem:[#allocation17_spill] sm:$0xff] }
 0x5af   : > { %v4791_v57 = vadd.f32 %v11693_v16, %v16788_v52  ;;  %v11694_v14 = vadd.f32 %v14481_v40, %v4616_v7  ;;  %v4618_v23 = vpop.f32.mrb[115].mxu0  ;;  %v5143_v50 = vld [vmem:[#allocation2 + $0xca] sm:$0xff]  ;;  %v16791_v52 = vld [vmem:[#allocation18_spill] sm:$0xff] }
 0x5b0   : > { %v5089_v33 = vld [vmem:[#allocation2 + $0xc9] sm:$0xff]  ;;  %4999 = vst.msk [vmem:[#allocation2 + $0xdb] sm:$0xff] %vm2904_vm3, %v4963_v41  ;;  %v14697_v19 = vpack.c.bf16 %v5143_v50, %v5142_v44 }
 0x5b1   : > { %v5112_v63 = vpack.c.bf16 %v5089_v33, %v5088_v49  ;;  %vm4855_vm15 = vcmp.ge.f32.partialorder %v4791_v57, 0.0  ;;  %v4892_v26 = vmul.f32 %v14488_v24, %v4791_v57  ;;  %v4794_v39 = vadd.f32 %v11694_v14, %v16789_v54  ;;  %v16792_v49 = vld [vmem:[#allocation40_spill] sm:$0xff] }
 0x5b2   : > { %5488 = vrot.lane.b32.xlu1 %v14697_v19, %s12784_s30 }
 0x5b3   : > { %5436 = vrot.lane.b32.xlu0 %v5112_v63, %s12784_s30  ;;  %v4928_v28 = vsel %vm4855_vm15, %v4791_v57, %v4892_v26  ;;  %vm4856_vm0 = vcmp.ge.f32.partialorder %v4794_v39, 0.0  ;;  %v4893_v20 = vmul.f32 %v14488_v24, %v4794_v39 }
 0x5b4   : > { %v4964_v16 = vmul.f32 %v4928_v28, %v16790_v61  ;;  %v4621_v59 = vpop.f32.mrb[116].mxu0 }
 0x5b5   : > { %v4929_v41 = vsel %vm4856_vm0, %v4794_v39, %v4893_v20  ;;  %v11695_v7 = vadd.f32 %v14481_v40, %v4621_v59  ;;  %v4623_v44 = vpop.f32.mrb[117].mxu0  ;;  %v5144_v50 = vld [vmem:[#allocation2 + $0xd2] sm:$0xff] }
 0x5b6   : > { %5000 = vst.msk [vmem:[#allocation2 + $0xe3] sm:$0xff] %vm2904_vm3, %v4964_v16  ;;  %v4965_v14 = vmul.f32 %v4929_v41, %v16791_v52  ;;  %v4624_v23 = vpop.f32.mrb[118].mxu0  ;;  %v5090_v54 = vld [vmem:[#allocation2 + $0xd1] sm:$0xff]  ;;  %v16794_v44 = vld [vmem:[#allocation19_spill] sm:$0xff] }
 0x5b7   : > { %v4799_v33 = vadd.f32 %v11695_v7, %v16792_v49  ;;  %v11696_v57 = vadd.f32 %v14481_v40, %v4624_v23  ;;  %v4626_v63 = vpop.f32.mrb[119].mxu0  ;;  %v5145_v26 = vld [vmem:[#allocation2 + $0xda] sm:$0xff] }
 0x5b8   : > { %v5091_v12 = vld [vmem:[#allocation2 + $0xd9] sm:$0xff]  ;;  %5001 = vst.msk [vmem:[#allocation2 + $0xeb] sm:$0xff] %vm2904_vm3, %v4965_v14  ;;  %v14712_v39 = vpack.c.bf16 %v5145_v26, %v5144_v50  ;;  %v16795_v63 = vld [vmem:[#allocation20_spill] sm:$0xff] }
 0x5b9   : > { %v5113_v28 = vpack.c.bf16 %v5091_v12, %v5090_v54  ;;  %vm4857_vm1 = vcmp.ge.f32.partialorder %v4799_v33, 0.0  ;;  %v4894_v20 = vmul.f32 %v14488_v24, %v4799_v33  ;;  %v16793_v16 = vld [vmem:[#allocation42_spill] sm:$0xff] }
 0x5ba   : > { %v4802_v59 = vadd.f32 %v11696_v57, %v16793_v16  ;;  %5490 = vrot.lane.b32.xlu1 %v14712_v39, %s12784_s30  ;;  %v16796_v16 = vld [vmem:[#allocation39_spill] sm:$0xff]  ;;  %v5308_v1 = vld [vmem:[#allocation2 + $0xd5] sm:$0xff] }
 0x5bb   : > { %5438 = vrot.lane.b32.xlu0 %v5113_v28, %s12784_s30  ;;  %v4930_v41 = vsel %vm4857_vm1, %v4799_v33, %v4894_v20 }
 0x5bc   : > { %vm4858_vm2 = vcmp.ge.f32.partialorder %v4802_v59, 0.0  ;;  %v4895_v7 = vmul.f32 %v14488_v24, %v4802_v59  ;;  %v4966_v23 = vmul.f32 %v4930_v41, %v16794_v44  ;;  %v4629_v14 = vpop.f32.mrb[120].mxu0 }
 0x5bd   : > { %v11697_v12 = vadd.f32 %v14481_v40, %v4629_v14  ;;  %v4631_v49 = vpop.f32.mrb[121].mxu0  ;;  %v5146_v54 = vld [vmem:[#allocation2 + $0xe2] sm:$0xff] }
 0x5be   : > { %v4931_v50 = vsel %vm4858_vm2, %v4802_v59, %v4895_v7  ;;  %5002 = vst.msk [vmem:[#allocation2 + $0xf3] sm:$0xff] %vm2904_vm3, %v4966_v23  ;;  %v4632_v26 = vpop.f32.mrb[122].mxu0  ;;  %v5092_v13 = vld [vmem:[#allocation2 + $0xe1] sm:$0xff]  ;;  %v16797_v23 = vld [vmem:[#allocation41_spill] sm:$0xff] }
 0x5bf   : > { %v4967_v57 = vmul.f32 %v4931_v50, %v16795_v63  ;;  %v4807_v52 = vadd.f32 %v11697_v12, %v16796_v16  ;;  %v11698_v33 = vadd.f32 %v14481_v40, %v4632_v26  ;;  %v4634_v28 = vpop.f32.mrb[123].mxu0  ;;  %v5147_v20 = vld [vmem:[#allocation2 + $0xea] sm:$0xff]  ;;  %v16799_v16 = vld [vmem:[#allocation22_spill] sm:$0xff] }
 0x5c0   : > { %v5093_v61 = vld [vmem:[#allocation2 + $0xe9] sm:$0xff]  ;;  %v14727_v59 = vpack.c.bf16 %v5147_v20, %v5146_v54 }
 0x5c1   : > { %5003 = vst.msk [vmem:[#allocation2 + $0xfb] sm:$0xff] %vm2904_vm3, %v4967_v57  ;;  %v5114_v41 = vpack.c.bf16 %v5093_v61, %v5092_v13  ;;  %vm4859_vm4 = vcmp.ge.f32.partialorder %v4807_v52, 0.0  ;;  %v4896_v7 = vmul.f32 %v14488_v24, %v4807_v52  ;;  %v4810_v14 = vadd.f32 %v11698_v33, %v16797_v23  ;;  %v16798_v49 = vld [vmem:[#allocation21_spill] sm:$0xff]  ;;  %v5118_v23 = vld [vmem:[#allocation2 + $0x2] sm:$0xff] }
 0x5c2   : > { %5492 = vrot.lane.b32.xlu1 %v14727_v59, %s12784_s30  ;;  %v5119_v63 = vld [vmem:[#allocation2 + $0xa] sm:$0xff] }
 0x5c3   : > { %5440 = vrot.lane.b32.xlu0 %v5114_v41, %s12784_s30  ;;  %v4932_v50 = vsel %vm4859_vm4, %v4807_v52, %v4896_v7  ;;  %vm4860_vm5 = vcmp.ge.f32.partialorder %v4810_v14, 0.0  ;;  %v4897_v12 = vmul.f32 %v14488_v24, %v4810_v14 }
 0x5c4   : > { %v4968_v26 = vmul.f32 %v4932_v50, %v16798_v49  ;;  %v4637_v57 = vpop.f32.mrb[124].mxu0 }
 0x5c5   : > { %v4933_v54 = vsel %vm4860_vm5, %v4810_v14, %v4897_v12  ;;  %v11699_v13 = vadd.f32 %v14481_v40, %v4637_v57  ;;  %v4639_v61 = vpop.f32.mrb[125].mxu0  ;;  %v5148_v20 = vld [vmem:[#allocation2 + $0xf2] sm:$0xff]  ;;  %v12771_v14 = vld [vmem:[#allocation2] sm:$0xff] }
 0x5c6   : > { %5004 = vst.msk [vmem:[#allocation2 + $0x103] sm:$0xff] %vm2904_vm3, %v4968_v26  ;;  %v4969_v33 = vmul.f32 %v4933_v54, %v16799_v16  ;;  %v4640_v28 = vpop.f32.mrb[126].mxu0  ;;  %v5094_v50 = vld [vmem:[#allocation2 + $0xf1] sm:$0xff]  ;;  %v5046_v12 = vpack.c.bf16 %v12771_v14, %v12771_v14  ;;  %v5154_v16 = vpack.c.bf16 %v5119_v63, %v5118_v23 }
 0x5c7   : > { %v4815_v52 = vadd.f32 %v11699_v13, %v14497_v4  ;;  %v11700_v41 = vadd.f32 %v14481_v40, %v4640_v28  ;;  %v4642_v7 = vpop.f32.mrb[127].mxu0  ;;  %v16800_v28 = vld [vmem:[#allocation23_spill] sm:$0xff] }
 0x5c8   : > { %v5149_v44 = vld [vmem:[#allocation2 + $0xfa] sm:$0xff]  ;;  %5005 = vst.msk [vmem:[#allocation2 + $0x10b] sm:$0xff] %vm2904_vm3, %v4969_v33  ;;  %v5413_v33 = vpop.permute.xlu0 %5412 }
 0x5c9   : > { %v5095_v49 = vld [vmem:[#allocation2 + $0xf9] sm:$0xff]  ;;  %v14742_v57 = vpack.c.bf16 %v5149_v44, %v5148_v20  ;;  %vm4861_vm6 = vcmp.ge.f32.partialorder %v4815_v52, 0.0  ;;  %v4898_v54 = vmul.f32 %v14488_v24, %v4815_v52  ;;  %v4818_v61 = vadd.f32 %v11700_v41, %v14503_v11 }
 0x5ca   : > { %v5115_v26 = vpack.c.bf16 %v5095_v49, %v5094_v50  ;;  %v5612_v49 = vsel %vm2904_vm3, %v5046_v12, %v5413_v33  ;;  %v12678_v11 = vld [vmem:[%s16662_s6 + $0x80] sm:$0xff]   ;;  %v16801_v50 = vld [vmem:[#allocation24_spill] sm:$0xff] }
 0x5cb   : > { %5494 = vrot.lane.b32.xlu1 %v14742_v57, %s12784_s30  ;;  %v4934_v4 = vsel %vm4861_vm6, %v4815_v52, %v4898_v54  ;;  %vm4862_vm7 = vcmp.ge.f32.partialorder %v4818_v61, 0.0  ;;  %v4899_v13 = vmul.f32 %v14488_v24, %v4818_v61 }
 0x5cc   : > { %5442 = vrot.lane.b32.xlu0 %v5115_v26, %s12784_s30  ;;  %v4970_v44 = vmul.f32 %v4934_v4, %v16800_v28  ;;  %v4645_v20 = vpop.f32.mrb[128].mxu0  ;;  %v5467_v7 = vpop.permute.xlu1 %5466 }
 0x5cd   : > { %v4935_v63 = vsel %vm4862_vm7, %v4818_v61, %v4899_v13  ;;  %v11701_v23 = vadd.f32 %v14481_v40, %v4645_v20  ;;  %v4647_v41 = vpop.f32.mrb[129].mxu0  ;;  %v5684_v52 = vsel %vm2904_vm3, %v5154_v16, %v5467_v7  ;;  %v5150_v54 = vld [vmem:[#allocation2 + $0x102] sm:$0xff]  ;;  %v5013_v7 = vld [vmem:[#allocation2 + $0x18] sm:$0xff] }
 0x5ce   : > { %5006 = vst.msk [vmem:[#allocation2 + $0x113] sm:$0xff] %vm2904_vm3, %v4970_v44  ;;  %v4971_v14 = vmul.f32 %v4935_v63, %v16801_v50  ;;  %v4648_v26 = vpop.f32.mrb[130].mxu0  ;;  %6279 = vmatprep.mubr.bf16.mxu1 %v5684_v52  ;;  %v5096_v61 = vld [vmem:[#allocation2 + $0x101] sm:$0xff]  ;;  %v5012_v63 = vld [vmem:[#allocation2 + $0x10] sm:$0xff] }
 0x5cf   : > { %v4823_v12 = vadd.f32 %v11701_v23, %v14490_v5  ;;  %v11702_v4 = vadd.f32 %v14481_v40, %v4648_v26  ;;  %v4650_v33 = vpop.f32.mrb[131].mxu0  ;;  %6280 = vmatmul.mubr.bf16.vlgmr.msra.gmra.mrb[156].mxu1 %v5612_v49  ;;  %v5151_v28 = vld [vmem:[#allocation2 + $0x10a] sm:$0xff]  ;;  %v5415_v49 = vpop.permute.xlu0 %5414 }
 0x5d0   : > { %v5097_v13 = vld [vmem:[#allocation2 + $0x109] sm:$0xff]  ;;  %5007 = vst.msk [vmem:[#allocation2 + $0x11b] sm:$0xff] %vm2904_vm3, %v4971_v14  ;;  %6425 = vmatpush1.bf16.msra.mxu1 %v12678_v11  ;;  %v14762_v16 = vpack.c.bf16 %v5151_v28, %v5150_v54  ;;  %v5047_v14 = vpack.c.bf16 %v5013_v7, %v5012_v63  ;;  %v5230_v7 = vld [vmem:[#allocation2 + $0x1c] sm:$0xff] }
 0x5d1   : > { %v5116_v44 = vpack.c.bf16 %v5097_v13, %v5096_v61  ;;  %v12679_v20 = vld [vmem:[%s16662_s6 + $0x88] sm:$0xff]   ;;  %vm4863_vm8 = vcmp.ge.f32.partialorder %v4823_v12, 0.0  ;;  %v4900_v5 = vmul.f32 %v14488_v24, %v4823_v12  ;;  %v4826_v40 = vadd.f32 %v11702_v4, %v14499_v37  ;;  %6426 = vmatprep.subr.bf16.mxu1 %v16747_v58  ;;  %v16802_v23 = vld [vmem:[#allocation25_spill] sm:$0xff]  ;;  %v5014_v63 = vld [vmem:[#allocation2 + $0x20] sm:$0xff] }
 0x5d2   : > { %5496 = vrot.lane.b32.xlu1 %v14762_v16, %s12784_s30  ;;  %v12680_v37 = vld [vmem:[%s16662_s6 + $0x90] sm:$0xff]   ;;  %v5616_v33 = vsel %vm2904_vm3, %v5047_v14, %v5415_v49  ;;  %v5259_v17 = vld [vmem:[#allocation2 + $0x104] sm:$0xff] }
 0x5d3   : > { %5444 = vrot.lane.b32.xlu0 %v5116_v44, %s12784_s30  ;;  %v4936_v28 = vsel %vm4863_vm8, %v4823_v12, %v4900_v5  ;;  %vm4864_vm9 = vcmp.ge.f32.partialorder %v4826_v40, 0.0  ;;  %v4901_v11 = vmul.f32 %v14488_v24, %v4826_v40  ;;  %v16803_v12 = vld [vmem:[#allocation26_spill] sm:$0xff]  ;;  %v12692_v50 = vld [vmem:[%s16662_s6 + $0xf0] sm:$0xff]  }
 0x5d4   : > { %v4972_v41 = vmul.f32 %v4936_v28, %v16802_v23  ;;  %v5469_v52 = vpop.permute.xlu1 %5468  ;;  %6427 = vmatpush1.bf16.msra.mxu1 %v12679_v20  ;;  %v5015_v28 = vld [vmem:[#allocation2 + $0x28] sm:$0xff] }
 0x5d5   : > { %v4937_v26 = vsel %vm4864_vm9, %v4826_v40, %v4901_v11  ;;  %v5688_v54 = vsel %vm2904_vm3, %v14532_v18, %v5469_v52  ;;  %6428 = vmatprep.subr.bf16.mxu1 %v16747_v58  ;;  %v5152_v61 = vld [vmem:[#allocation2 + $0x112] sm:$0xff]  ;;  %v5417_v49 = vpop.permute.xlu0 %5416  ;;  %v5048_v14 = vpack.c.bf16 %v5015_v28, %v5014_v63  ;;  %v5286_v28 = vld [vmem:[#allocation2 + $0x25] sm:$0xff] }
 0x5d6   : > { %5008 = vst.msk [vmem:[#allocation2 + $0x123] sm:$0xff] %vm2904_vm3, %v4972_v41  ;;  %v4973_v4 = vmul.f32 %v4937_v26, %v16803_v12  ;;  %6287 = vmatprep.mubr.bf16.mxu1 %v5688_v54  ;;  %v5098_v44 = vld [vmem:[#allocation2 + $0x111] sm:$0xff] }
 0x5d7   : > { %6288 = vmatmul.mubr.bf16.gmra.mrb[160].mxu1 %v5616_v33  ;;  %v5153_v13 = vld [vmem:[#allocation2 + $0x11a] sm:$0xff]  ;;  %v5232_v54 = vld [vmem:[#allocation2 + $0x2c] sm:$0xff] }
 0x5d8   : > { %v5099_v20 = vld [vmem:[#allocation2 + $0x119] sm:$0xff]  ;;  %5009 = vst.msk [vmem:[#allocation2 + $0x12b] sm:$0xff] %vm2904_vm3, %v4973_v4  ;;  %v14785_v5 = vpack.c.bf16 %v5153_v13, %v5152_v61  ;;  %6429 = vmatpush1.bf16.msra.mxu1 %v12680_v37  ;;  %v5620_v4 = vsel %vm2904_vm3, %v5048_v14, %v5417_v49  ;;  %v5231_v13 = vld [vmem:[#allocation2 + $0x24] sm:$0xff]  ;;  %v5016_v14 = vld [vmem:[#allocation2 + $0x30] sm:$0xff] }
 0x5d9   : > { %v5117_v40 = vpack.c.bf16 %v5099_v20, %v5098_v44  ;;  %v12681_v18 = vld [vmem:[%s16662_s6 + $0x98] sm:$0xff]   ;;  %6430 = vmatprep.subr.bf16.mxu1 %v16747_v58  ;;  %v12682_v37 = vld [vmem:[%s16662_s6 + $0xa0] sm:$0xff]   ;;  %v14802_v20 = vpack.c.bf16 %v5232_v54, %v5231_v13  ;;  %v5256_v12 = vld [vmem:[#allocation2 + $0xec] sm:$0xff] }
 0x5da   : > { %5498 = vrot.lane.b32.xlu1 %v14785_v5, %s12784_s30  ;;  %v5229_v11 = vld [vmem:[#allocation2 + $0x14] sm:$0xff]  ;;  %v5289_v54 = vld [vmem:[#allocation2 + $0x3d] sm:$0xff] }
 0x5db   : > { %5446 = vrot.lane.b32.xlu0 %v5117_v40, %s12784_s30  ;;  %v5265_v52 = vpack.c.bf16 %v5230_v7, %v5229_v11  ;;  %v5287_v40 = vld [vmem:[#allocation2 + $0x2d] sm:$0xff]  ;;  %v5017_v7 = vld [vmem:[#allocation2 + $0x38] sm:$0xff] }
 0x5dc   : > { %v5471_v41 = vpop.permute.xlu1 %5470  ;;  %6431 = vmatpush1.bf16.msra.mxu1 %v12681_v18  ;;  %v5234_v18 = vld [vmem:[#allocation2 + $0x3c] sm:$0xff]  ;;  %v5233_v49 = vld [vmem:[#allocation2 + $0x34] sm:$0xff] }
 0x5dd   : > { %v5692_v26 = vsel %vm2904_vm3, %v14547_v34, %v5471_v41  ;;  %6432 = vmatprep.subr.bf16.mxu1 %v16747_v58  ;;  %v5172_v33 = vld [vmem:[#allocation2 + $0x122] sm:$0xff]  ;;  %v5419_v11 = vpop.permute.xlu0 %5418  ;;  %v5322_v41 = vpack.c.bf16 %v5287_v40, %v5286_v28  ;;  %v5288_v13 = vld [vmem:[#allocation2 + $0x35] sm:$0xff]  ;;  %v5291_v40 = vld [vmem:[#allocation2 + $0x4d] sm:$0xff] }
 0x5de   : > { %6295 = vmatprep.mubr.bf16.mxu1 %v5692_v26  ;;  %v12683_v34 = vld [vmem:[%s16662_s6 + $0xa8] sm:$0xff]   ;;  %v5049_v26 = vpack.c.bf16 %v5017_v7, %v5016_v14  ;;  %v12685_v7 = vld [vmem:[%s16662_s6 + $0xb8] sm:$0xff]  }
 0x5df   : > { %5520 = vrot.lane.b32.xlu0 %v5265_v52, %s12784_s30  ;;  %6296 = vmatmul.mubr.bf16.gmra.mrb[164].mxu1 %v5620_v4  ;;  %v5173_v61 = vld [vmem:[#allocation2 + $0x12a] sm:$0xff]  ;;  %v14811_v52 = vpack.c.bf16 %v5234_v18, %v5233_v49  ;;  %v5238_v18 = vld [vmem:[#allocation2 + $0x5c] sm:$0xff] }
 0x5e0   : > { %v5174_v44 = vpack.c.bf16 %v5173_v61, %v5172_v33  ;;  %6433 = vmatpush1.bf16.msra.mxu1 %v12682_v37  ;;  %v5236_v4 = vld [vmem:[#allocation2 + $0x4c] sm:$0xff]  ;;  %v5624_v61 = vsel %vm2904_vm3, %v5049_v26, %v5419_v11  ;;  %v5237_v11 = vld [vmem:[#allocation2 + $0x54] sm:$0xff]  ;;  %v5018_v26 = vld [vmem:[#allocation2 + $0x40] sm:$0xff] }
 0x5e1   : > { %6434 = vmatprep.subr.bf16.mxu1 %v16747_v58  ;;  %v12684_v33 = vld [vmem:[%s16662_s6 + $0xb0] sm:$0xff]   ;;  %v5019_v28 = vld [vmem:[#allocation2 + $0x48] sm:$0xff] }
 0x5e2   : > { %5500 = vrot.lane.b32.xlu1 %v5174_v44, %s12784_s30  ;;  %v5235_v44 = vld [vmem:[#allocation2 + $0x44] sm:$0xff]  ;;  %v5316_v32 = vld [vmem:[#allocation2 + $0x115] sm:$0xff] }
 0x5e3   : > { %5522 = vrot.lane.b32.xlu0 %v14802_v20, %s12784_s30  ;;  %v5290_v49 = vld [vmem:[#allocation2 + $0x45] sm:$0xff] }
 0x5e4   : > { %v5473_v63 = vpop.permute.xlu1 %5472  ;;  %6435 = vmatpush1.bf16.msra.mxu1 %v12683_v34  ;;  %v14823_v34 = vpack.c.bf16 %v5236_v4, %v5235_v44  ;;  %v5324_v14 = vpack.c.bf16 %v5291_v40, %v5290_v49  ;;  %v5050_v4 = vpack.c.bf16 %v5019_v28, %v5018_v26  ;;  %v5239_v40 = vld [vmem:[#allocation2 + $0x64] sm:$0xff]  ;;  %v5242_v28 = vld [vmem:[#allocation2 + $0x7c] sm:$0xff] }
 0x5e5   : > { %v5696_v37 = vsel %vm2904_vm3, %v14562_v60, %v5473_v63  ;;  %6436 = vmatprep.subr.bf16.mxu1 %v16747_v58  ;;  %v5323_v60 = vpack.c.bf16 %v5289_v54, %v5288_v13  ;;  %v5421_v63 = vpop.permute.xlu0 %5420  ;;  %v12686_v13 = vld [vmem:[%s16662_s6 + $0xc0] sm:$0xff]   ;;  %v12687_v49 = vld [vmem:[%s16662_s6 + $0xc8] sm:$0xff]  }
 0x5e6   : > { %5574 = vrot.lane.b32.xlu1 %v5322_v41, %s12784_s30  ;;  %6303 = vmatprep.mubr.bf16.mxu1 %v5696_v37  ;;  %v14832_v37 = vpack.c.bf16 %v5238_v18, %v5237_v11  ;;  %v5628_v44 = vsel %vm2904_vm3, %v5050_v4, %v5421_v63  ;;  %v5021_v11 = vld [vmem:[#allocation2 + $0x58] sm:$0xff]  ;;  %v5294_v63 = vld [vmem:[#allocation2 + $0x65] sm:$0xff] }
 0x5e7   : > { %5524 = vrot.lane.b32.xlu0 %v14811_v52, %s12784_s30  ;;  %6304 = vmatmul.mubr.bf16.gmra.mrb[168].mxu1 %v5624_v61  ;;  %v5240_v61 = vld [vmem:[#allocation2 + $0x6c] sm:$0xff] }
 0x5e8   : > { %6437 = vmatpush1.bf16.msra.mxu1 %v12684_v33  ;;  %v5293_v33 = vld [vmem:[#allocation2 + $0x5d] sm:$0xff]  ;;  %v14844_v18 = vpack.c.bf16 %v5240_v61, %v5239_v40  ;;  %v12688_v40 = vld [vmem:[%s16662_s6 + $0xd0] sm:$0xff]  }
 0x5e9   : > { %6438 = vmatprep.subr.bf16.mxu1 %v16747_v58 }
 0x5ea   : > { %5576 = vrot.lane.b32.xlu1 %v5323_v60, %s12784_s30  ;;  %v5292_v60 = vld [vmem:[#allocation2 + $0x55] sm:$0xff] }
 0x5eb   : > { %5526 = vrot.lane.b32.xlu0 %v14823_v34, %s12784_s30 }
 0x5ec   : > { %v5475_v41 = vpop.permute.xlu1 %5474  ;;  %6439 = vmatpush1.bf16.msra.mxu1 %v12685_v7  ;;  %v5295_v7 = vld [vmem:[#allocation2 + $0x6d] sm:$0xff] }
 0x5ed   : > { %v5700_v54 = vsel %vm2904_vm3, %v14577_v3, %v5475_v41  ;;  %6440 = vmatprep.subr.bf16.mxu1 %v16747_v58  ;;  %v5325_v3 = vpack.c.bf16 %v5293_v33, %v5292_v60  ;;  %v5241_v41 = vld [vmem:[#allocation2 + $0x74] sm:$0xff]  ;;  %v5244_v60 = vld [vmem:[#allocation2 + $0x8c] sm:$0xff] }
 0x5ee   : > { %5578 = vrot.lane.b32.xlu1 %v5324_v14, %s12784_s30  ;;  %6311 = vmatprep.mubr.bf16.mxu1 %v5700_v54  ;;  %v5423_v14 = vpop.permute.xlu0 %5422  ;;  %v5326_v54 = vpack.c.bf16 %v5295_v7, %v5294_v63  ;;  %v14853_v4 = vpack.c.bf16 %v5242_v28, %v5241_v41  ;;  %v5020_v33 = vld [vmem:[#allocation2 + $0x50] sm:$0xff]  ;;  %v5243_v28 = vld [vmem:[#allocation2 + $0x84] sm:$0xff]  ;;  %v5246_v63 = vld [vmem:[#allocation2 + $0x9c] sm:$0xff] }
 0x5ef   : > { %5528 = vrot.lane.b32.xlu0 %v14832_v37, %s12784_s30  ;;  %6312 = vmatmul.mubr.bf16.gmra.mrb[172].mxu1 %v5628_v44  ;;  %v5297_v44 = vld [vmem:[#allocation2 + $0x7d] sm:$0xff]  ;;  %v5296_v7 = vld [vmem:[#allocation2 + $0x75] sm:$0xff] }
 0x5f0   : > { %6441 = vmatpush1.bf16.msra.mxu1 %v12686_v13  ;;  %v5051_v13 = vpack.c.bf16 %v5021_v11, %v5020_v33  ;;  %v14865_v11 = vpack.c.bf16 %v5244_v60, %v5243_v28  ;;  %v12689_v41 = vld [vmem:[%s16662_s6 + $0xd8] sm:$0xff]   ;;  %v5022_v60 = vld [vmem:[#allocation2 + $0x60] sm:$0xff]  ;;  %v5248_v28 = vld [vmem:[#allocation2 + $0xac] sm:$0xff] }
 0x5f1   : > { %6442 = vmatprep.subr.bf16.mxu1 %v16747_v58 }
 0x5f2   : > { %5580 = vrot.lane.b32.xlu1 %v5325_v3, %s12784_s30  ;;  %v5632_v3 = vsel %vm2904_vm3, %v5051_v13, %v5423_v14  ;;  %v5023_v14 = vld [vmem:[#allocation2 + $0x68] sm:$0xff] }
 0x5f3   : > { %5530 = vrot.lane.b32.xlu0 %v14844_v18, %s12784_s30 }
 0x5f4   : > { %v5477_v26 = vpop.permute.xlu1 %5476  ;;  %6443 = vmatpush1.bf16.msra.mxu1 %v12687_v49  ;;  %v5299_v49 = vld [vmem:[#allocation2 + $0x8d] sm:$0xff] }
 0x5f5   : > { %v5704_v61 = vsel %vm2904_vm3, %v14592_v10, %v5477_v26  ;;  %6444 = vmatprep.subr.bf16.mxu1 %v16747_v58  ;;  %v5327_v10 = vpack.c.bf16 %v5297_v44, %v5296_v7  ;;  %v5298_v26 = vld [vmem:[#allocation2 + $0x85] sm:$0xff]  ;;  %v5425_v33 = vpop.permute.xlu0 %5424  ;;  %v5301_v7 = vld [vmem:[#allocation2 + $0x9d] sm:$0xff] }
 0x5f6   : > { %5582 = vrot.lane.b32.xlu1 %v5326_v54, %s12784_s30  ;;  %6319 = vmatprep.mubr.bf16.mxu1 %v5704_v61  ;;  %v5245_v54 = vld [vmem:[#allocation2 + $0x94] sm:$0xff]  ;;  %v5328_v13 = vpack.c.bf16 %v5299_v49, %v5298_v26  ;;  %v5247_v26 = vld [vmem:[#allocation2 + $0xa4] sm:$0xff] }
 0x5f7   : > { %5532 = vrot.lane.b32.xlu0 %v14853_v4, %s12784_s30  ;;  %6320 = vmatmul.mubr.bf16.gmra.mrb[176].mxu1 %v5632_v3  ;;  %v14874_v44 = vpack.c.bf16 %v5246_v63, %v5245_v54  ;;  %v5052_v3 = vpack.c.bf16 %v5023_v14, %v5022_v60  ;;  %v5300_v63 = vld [vmem:[#allocation2 + $0x95] sm:$0xff]  ;;  %v14886_v14 = vpack.c.bf16 %v5248_v28, %v5247_v26  ;;  %v5305_v26 = vld [vmem:[#allocation2 + $0xbd] sm:$0xff] }
 0x5f8   : > { %6445 = vmatpush1.bf16.msra.mxu1 %v12688_v40  ;;  %v5250_v54 = vld [vmem:[#allocation2 + $0xbc] sm:$0xff]  ;;  %v5249_v60 = vld [vmem:[#allocation2 + $0xb4] sm:$0xff] }
 0x5f9   : > { %6446 = vmatprep.subr.bf16.mxu1 %v16747_v58  ;;  %v5636_v49 = vsel %vm2904_vm3, %v5052_v3, %v5425_v33  ;;  %v5025_v33 = vld [vmem:[#allocation2 + $0x78] sm:$0xff]  ;;  %v14895_v28 = vpack.c.bf16 %v5250_v54, %v5249_v60 }
 0x5fa   : > { %5584 = vrot.lane.b32.xlu1 %v5327_v10, %s12784_s30  ;;  %v12690_v10 = vld [vmem:[%s16662_s6 + $0xe0] sm:$0xff]   ;;  %v5304_v54 = vld [vmem:[#allocation2 + $0xb5] sm:$0xff] }
 0x5fb   : > { %5534 = vrot.lane.b32.xlu0 %v14865_v11, %s12784_s30  ;;  %v5254_v60 = vld [vmem:[#allocation2 + $0xdc] sm:$0xff] }
 0x5fc   : > { %v5479_v61 = vpop.permute.xlu1 %5478  ;;  %6447 = vmatpush1.bf16.msra.mxu1 %v12689_v41  ;;  %v5303_v41 = vld [vmem:[#allocation2 + $0xad] sm:$0xff] }
 0x5fd   : > { %v5708_v40 = vsel %vm2904_vm3, %v14607_v0, %v5479_v61  ;;  %6448 = vmatprep.subr.bf16.mxu1 %v16747_v58  ;;  %v5329_v0 = vpack.c.bf16 %v5301_v7, %v5300_v63  ;;  %v12691_v61 = vld [vmem:[%s16662_s6 + $0xe8] sm:$0xff]  }
 0x5fe   : > { %5586 = vrot.lane.b32.xlu1 %v5328_v13, %s12784_s30  ;;  %6327 = vmatprep.mubr.bf16.mxu1 %v5708_v40  ;;  %v5302_v13 = vld [vmem:[#allocation2 + $0xa5] sm:$0xff]  ;;  %v5427_v40 = vpop.permute.xlu0 %5426 }
 0x5ff   : > { %5536 = vrot.lane.b32.xlu0 %v14874_v44, %s12784_s30  ;;  %6328 = vmatmul.mubr.bf16.gmra.mrb[180].mxu1 %v5636_v49  ;;  %v5330_v7 = vpack.c.bf16 %v5303_v41, %v5302_v13  ;;  %v5251_v13 = vld [vmem:[#allocation2 + $0xc4] sm:$0xff] }
 0x600   : > { %6449 = vmatpush1.bf16.msra.mxu1 %v12690_v10  ;;  %v5024_v10 = vld [vmem:[#allocation2 + $0x70] sm:$0xff] }
 0x601   : > { %6450 = vmatprep.subr.bf16.mxu1 %v16747_v58  ;;  %v5053_v63 = vpack.c.bf16 %v5025_v33, %v5024_v10  ;;  %v5253_v10 = vld [vmem:[#allocation2 + $0xd4] sm:$0xff] }
 0x602   : > { %5588 = vrot.lane.b32.xlu1 %v5329_v0, %s12784_s30  ;;  %v5252_v0 = vld [vmem:[#allocation2 + $0xcc] sm:$0xff] }
 0x603   : > { %5538 = vrot.lane.b32.xlu0 %v14886_v14, %s12784_s30  ;;  %v5640_v41 = vsel %vm2904_vm3, %v5053_v63, %v5427_v40  ;;  %v14907_v33 = vpack.c.bf16 %v5252_v0, %v5251_v13  ;;  %v5027_v40 = vld [vmem:[#allocation2 + $0x88] sm:$0xff]  ;;  %v14921_v0 = vpack.c.bf16 %v5254_v60, %v5253_v10 }
 0x604   : > { %v5481_v3 = vpop.permute.xlu1 %5480  ;;  %6451 = vmatpush1.bf16.msra.mxu1 %v12691_v61  ;;  %v5307_v61 = vld [vmem:[#allocation2 + $0xcd] sm:$0xff]  ;;  %v5310_v10 = vld [vmem:[#allocation2 + $0xe5] sm:$0xff] }
 0x605   : > { %v5712_v49 = vsel %vm2904_vm3, %v14622_v55, %v5481_v3  ;;  %6452 = vmatprep.subr.bf16.mxu1 %v16747_v58  ;;  %v5331_v55 = vpack.c.bf16 %v5305_v26, %v5304_v54  ;;  %v12693_v3 = vld [vmem:[%s16662_s6 + $0xf8] sm:$0xff]  }
 0x606   : > { %5590 = vrot.lane.b32.xlu1 %v5330_v7, %s12784_s30  ;;  %6335 = vmatprep.mubr.bf16.mxu1 %v5712_v49  ;;  %v5306_v7 = vld [vmem:[#allocation2 + $0xc5] sm:$0xff] }
 0x607   : > { %5540 = vrot.lane.b32.xlu0 %v14895_v28, %s12784_s30  ;;  %6336 = vmatmul.mubr.bf16.gmra.mrb[184].mxu1 %v5640_v41  ;;  %v14919_v49 = vld [vmem:[%s16662_s6 + $0x100] sm:$0xff]   ;;  %v5332_v26 = vpack.c.bf16 %v5307_v61, %v5306_v7 }
 0x608   : > { %6453 = vmatpush1.bf16.msra.mxu1 %v12692_v50  ;;  %v5429_v50 = vpop.permute.xlu0 %5428  ;;  %v5026_v41 = vld [vmem:[#allocation2 + $0x80] sm:$0xff] }
 0x609   : > { %6454 = vmatprep.subr.bf16.mxu1 %v16747_v58  ;;  %v5054_v13 = vpack.c.bf16 %v5027_v40, %v5026_v41  ;;  %v5255_v61 = vld [vmem:[#allocation2 + $0xe4] sm:$0xff]  ;;  %v5258_v40 = vld [vmem:[#allocation2 + $0xfc] sm:$0xff] }
 0x60a   : > { %5592 = vrot.lane.b32.xlu1 %v5331_v55, %s12784_s30  ;;  %v5309_v55 = vld [vmem:[#allocation2 + $0xdd] sm:$0xff]  ;;  %v14930_v7 = vpack.c.bf16 %v5256_v12, %v5255_v61 }
 0x60b   : > { %5542 = vrot.lane.b32.xlu0 %v14907_v33, %s12784_s30  ;;  %v5644_v23 = vsel %vm2904_vm3, %v5054_v13, %v5429_v50  ;;  %v5333_v60 = vpack.c.bf16 %v5309_v55, %v5308_v1  ;;  %v5028_v13 = vld [vmem:[#allocation2 + $0x90] sm:$0xff]  ;;  %v5313_v12 = vld [vmem:[#allocation2 + $0xfd] sm:$0xff] }
 0x60c   : > { %v5483_v63 = vpop.permute.xlu1 %5482  ;;  %6455 = vmatpush1.bf16.msra.mxu1 %v12693_v3  ;;  %v5029_v3 = vld [vmem:[#allocation2 + $0x98] sm:$0xff]  ;;  %v5260_v55 = vld [vmem:[#allocation2 + $0x10c] sm:$0xff] }
 0x60d   : > { %v5716_v54 = vsel %vm2904_vm3, %v14637_v21, %v5483_v63  ;;  %11535 = vmatprep.subr.bf16.mxu1 %v14919_v49  ;;  %v5311_v21 = vld [vmem:[#allocation2 + $0xed] sm:$0xff] }
 0x60e   : > { %5594 = vrot.lane.b32.xlu1 %v5332_v26, %s12784_s30  ;;  %6343 = vmatprep.mubr.bf16.mxu1 %v5716_v54  ;;  %v5257_v63 = vld [vmem:[#allocation2 + $0xf4] sm:$0xff]  ;;  %v5431_v26 = vpop.permute.xlu0 %5430  ;;  %v5334_v41 = vpack.c.bf16 %v5311_v21, %v5310_v10 }
 0x60f   : > { %5544 = vrot.lane.b32.xlu0 %v14921_v0, %s12784_s30  ;;  %6344 = vmatmul.mubr.bf16.gmra.mrb[188].mxu1 %v5644_v23  ;;  %v14935_v54 = vpack.c.bf16 %v5258_v40, %v5257_v63  ;;  %v5055_v23 = vpack.c.bf16 %v5029_v3, %v5028_v13  ;;  %v14943_v40 = vpack.c.bf16 %v5260_v55, %v5259_v17  ;;  %v5315_v10 = vld [vmem:[#allocation2 + $0x10d] sm:$0xff]  ;;  %v5262_v63 = vld [vmem:[#allocation2 + $0x11c] sm:$0xff]  ;;  %v5314_v3 = vld [vmem:[#allocation2 + $0x105] sm:$0xff] }
 0x610   : > { %v5317_v55 = vld [vmem:[#allocation2 + $0x11d] sm:$0xff] }
 0x611   : > { %v5648_v61 = vsel %vm2904_vm3, %v5055_v23, %v5431_v26  ;;  %v5030_v23 = vld [vmem:[#allocation2 + $0xa0] sm:$0xff] }
 0x612   : > { %5596 = vrot.lane.b32.xlu1 %v5333_v60, %s12784_s30  ;;  %v5312_v60 = vld [vmem:[#allocation2 + $0xf5] sm:$0xff] }
 0x613   : > { %5546 = vrot.lane.b32.xlu0 %v14930_v7, %s12784_s30  ;;  %v5335_v21 = vpack.c.bf16 %v5313_v12, %v5312_v60  ;;  %v5264_v60 = vld [vmem:[#allocation2 + $0x12c] sm:$0xff] }
 0x614   : > { %v5485_v50 = vpop.permute.xlu1 %5484 }
 0x615   : > { %v5720_v1 = vsel %vm2904_vm3, %v14652_v8, %v5485_v50  ;;  %v5031_v8 = vld [vmem:[#allocation2 + $0xa8] sm:$0xff]  ;;  %v5261_v50 = vld [vmem:[#allocation2 + $0x114] sm:$0xff] }
 0x616   : > { %5598 = vrot.lane.b32.xlu1 %v5334_v41, %s12784_s30  ;;  %6351 = vmatprep.mubr.bf16.mxu1 %v5720_v1  ;;  %v5433_v41 = vpop.permute.xlu0 %5432  ;;  %v5336_v1 = vpack.c.bf16 %v5315_v10, %v5314_v3  ;;  %v14948_v26 = vpack.c.bf16 %v5262_v63, %v5261_v50  ;;  %v5056_v12 = vpack.c.bf16 %v5031_v8, %v5030_v23  ;;  %v5318_v3 = vld [vmem:[#allocation2 + $0x125] sm:$0xff]  ;;  %v5319_v50 = vld [vmem:[#allocation2 + $0x12d] sm:$0xff]  ;;  %v5320_v8 = vld [vmem:[#allocation2 + $0x135] sm:$0xff] }
 0x617   : > { %5548 = vrot.lane.b32.xlu0 %v14935_v54, %s12784_s30  ;;  %6352 = vmatmul.mubr.bf16.gmra.mrb[192].mxu1 %v5648_v61  ;;  %v5263_v61 = vld [vmem:[#allocation2 + $0x124] sm:$0xff]  ;;  %v5337_v10 = vpack.c.bf16 %v5317_v55, %v5316_v32 }
 0x618   : > { %v14956_v63 = vpack.c.bf16 %v5264_v60, %v5263_v61  ;;  %v5035_v61 = vld [vmem:[#allocation2 + $0xc8] sm:$0xff] }
 0x61a   : > { %5600 = vrot.lane.b32.xlu1 %v5335_v21, %s12784_s30  ;;  %v5652_v21 = vsel %vm2904_vm3, %v5056_v12, %v5433_v41 }
 0x61b   : > { %5550 = vrot.lane.b32.xlu0 %v14943_v40, %s12784_s30 }
 0x61c   : > { %v5487_v13 = vpop.permute.xlu1 %5486 }
 0x61d   : > { %v5724_v17 = vsel %vm2904_vm3, %v14667_v22, %v5487_v13  ;;  %v5033_v22 = vld [vmem:[#allocation2 + $0xb8] sm:$0xff] }
 0x61e   : > { %5602 = vrot.lane.b32.xlu1 %v5336_v1, %s12784_s30  ;;  %6359 = vmatprep.mubr.bf16.mxu1 %v5724_v17  ;;  %v5321_v13 = vld [vmem:[#allocation2 + $0x13d] sm:$0xff]  ;;  %v5435_v1 = vpop.permute.xlu0 %5434  ;;  %v5338_v17 = vpack.c.bf16 %v5319_v50, %v5318_v3  ;;  %v5057_v32 = vpack.c.bf16 %v5033_v22, %v5032_v53 }
 0x61f   : > { %5552 = vrot.lane.b32.xlu0 %v14948_v26, %s12784_s30  ;;  %6360 = vmatmul.mubr.bf16.gmra.mrb[196].mxu1 %v5652_v21  ;;  %v5339_v12 = vpack.c.bf16 %v5321_v13, %v5320_v8  ;;  %v5036_v13 = vld [vmem:[#allocation2 + $0xd0] sm:$0xff] }
 0x620   : > { %v5656_v55 = vsel %vm2904_vm3, %v5057_v32, %v5435_v1 }
 0x622   : > { %5604 = vrot.lane.b32.xlu1 %v5337_v10, %s12784_s30  ;;  %v5034_v10 = vld [vmem:[#allocation2 + $0xc0] sm:$0xff] }
 0x623   : > { %5554 = vrot.lane.b32.xlu0 %v14956_v63, %s12784_s30  ;;  %v5058_v50 = vpack.c.bf16 %v5035_v61, %v5034_v10 }
 0x624   : > { %v5489_v23 = vpop.permute.xlu1 %5488 }
 0x625   : > { %v5728_v41 = vsel %vm2904_vm3, %v14682_v51, %v5489_v23  ;;  %v5437_v60 = vpop.permute.xlu0 %5436  ;;  %v5037_v51 = vld [vmem:[#allocation2 + $0xd8] sm:$0xff] }
 0x626   : > { %5606 = vrot.lane.b32.xlu1 %v5338_v17, %s12784_s30  ;;  %6367 = vmatprep.mubr.bf16.mxu1 %v5728_v41  ;;  %v5660_v53 = vsel %vm2904_vm3, %v5058_v50, %v5437_v60  ;;  %v5059_v23 = vpack.c.bf16 %v5037_v51, %v5036_v13  ;;  %v5039_v41 = vld [vmem:[#allocation2 + $0xe8] sm:$0xff]  ;;  %v5042_v13 = vld [vmem:[#allocation2 + $0x100] sm:$0xff] }
 0x627   : > { %6368 = vmatmul.mubr.bf16.gmra.mrb[200].mxu1 %v5656_v55 }
 0x62a   : > { %5608 = vrot.lane.b32.xlu1 %v5339_v12, %s12784_s30  ;;  %v5038_v12 = vld [vmem:[#allocation2 + $0xe0] sm:$0xff] }
 0x62b   : > { %v5060_v61 = vpack.c.bf16 %v5039_v41, %v5038_v12  ;;  %v5045_v41 = vld [vmem:[#allocation2 + $0x118] sm:$0xff] }
 0x62c   : > { %v5491_v21 = vpop.permute.xlu1 %5490 }
 0x62d   : > { %v5732_v3 = vsel %vm2904_vm3, %v14697_v19, %v5491_v21  ;;  %v5439_v22 = vpop.permute.xlu0 %5438  ;;  %v5041_v21 = vld [vmem:[#allocation2 + $0xf8] sm:$0xff] }
 0x62e   : > { %6375 = vmatprep.mubr.bf16.mxu1 %v5732_v3  ;;  %v5664_v17 = vsel %vm2904_vm3, %v5059_v23, %v5439_v22  ;;  %v5040_v3 = vld [vmem:[#allocation2 + $0xf0] sm:$0xff]  ;;  %v5043_v22 = vld [vmem:[#allocation2 + $0x108] sm:$0xff] }
 0x62f   : > { %6376 = vmatmul.mubr.bf16.gmra.mrb[204].mxu1 %v5660_v53  ;;  %v5061_v53 = vpack.c.bf16 %v5041_v21, %v5040_v3  ;;  %v5062_v23 = vpack.c.bf16 %v5043_v22, %v5042_v13  ;;  %v5176_v21 = vld [vmem:[#allocation2 + $0x1b] sm:$0xff]  ;;  %v12696_v22 = vld [vmem:[%s16662_s6 + $0x110] sm:$0xff]  }
 0x634   : > { %v5493_v8 = vpop.permute.xlu1 %5492 }
 0x635   : > { %v5736_v1 = vsel %vm2904_vm3, %v14712_v39, %v5493_v8  ;;  %v5441_v32 = vpop.permute.xlu0 %5440 }
 0x636   : > { %6383 = vmatprep.mubr.bf16.mxu1 %v5736_v1  ;;  %v5668_v60 = vsel %vm2904_vm3, %v5060_v61, %v5441_v32 }
 0x637   : > { %6384 = vmatmul.mubr.bf16.gmra.mrb[208].mxu1 %v5664_v17 }
 0x63d   : > { %v5495_v19 = vpop.permute.xlu1 %5494 }
 0x63e   : > { %v5740_v55 = vsel %vm2904_vm3, %v14727_v59, %v5495_v19  ;;  %v5443_v10 = vpop.permute.xlu0 %5442  ;;  %v5044_v19 = vld [vmem:[#allocation2 + $0x110] sm:$0xff] }
 0x63f   : > { %6391 = vmatprep.mubr.bf16.mxu1 %v5740_v55  ;;  %v5672_v51 = vsel %vm2904_vm3, %v5061_v53, %v5443_v10  ;;  %v5063_v55 = vpack.c.bf16 %v5045_v41, %v5044_v19  ;;  %v5175_v10 = vld [vmem:[#allocation2 + $0x13] sm:$0xff]  ;;  %v12695_v53 = vld [vmem:[%s16662_s6 + $0x108] sm:$0xff]  }
 0x640   : > { %6392 = vmatmul.mubr.bf16.gmra.mrb[212].mxu1 %v5668_v60  ;;  %v5211_v3 = vpack.c.bf16 %v5176_v21, %v5175_v10 }
 0x644   : > { %v5497_v39 = vpop.permute.xlu1 %5496 }
 0x645   : > { %v5744_v50 = vsel %vm2904_vm3, %v14742_v57, %v5497_v39  ;;  %v5445_v8 = vpop.permute.xlu0 %5444 }
 0x646   : > { %6399 = vmatprep.mubr.bf16.mxu1 %v5744_v50  ;;  %v5676_v17 = vsel %vm2904_vm3, %v5062_v23, %v5445_v8  ;;  %v12697_v23 = vld [vmem:[%s16662_s6 + $0x118] sm:$0xff]  }
 0x648   : > { %6400 = vmatmul.mubr.bf16.gmra.mrb[216].mxu1 %v5672_v51 }
 0x64c   : > { %v5499_v59 = vpop.permute.xlu1 %5498 }
 0x64d   : > { %v5748_v1 = vsel %vm2904_vm3, %v14762_v16, %v5499_v59  ;;  %v5447_v32 = vpop.permute.xlu0 %5446  ;;  %v5177_v59 = vld [vmem:[#allocation2 + $0x23] sm:$0xff] }
 0x64e   : > { %6407 = vmatprep.mubr.bf16.mxu1 %v5748_v1  ;;  %v5680_v61 = vsel %vm2904_vm3, %v5063_v55, %v5447_v32  ;;  %v5179_v32 = vld [vmem:[#allocation2 + $0x33] sm:$0xff] }
 0x650   : > { %6408 = vmatmul.mubr.bf16.gmra.mrb[220].mxu1 %v5676_v17  ;;  %v5180_v17 = vld [vmem:[#allocation2 + $0x3b] sm:$0xff] }
 0x651   : > { %v5521_v39 = vpop.permute.xlu0 %5520  ;;  %v5213_v19 = vpack.c.bf16 %v5180_v17, %v5179_v32  ;;  %v5187_v17 = vld [vmem:[#allocation2 + $0x73] sm:$0xff] }
 0x654   : > { %v5501_v57 = vpop.permute.xlu1 %5500 }
 0x655   : > { %v5752_v12 = vsel %vm2904_vm3, %v14785_v5, %v5501_v57  ;;  %v5756_v5 = vsel %vm2904_vm3, %v5211_v3, %v5521_v39  ;;  %v5523_v8 = vpop.permute.xlu0 %5522  ;;  %v5184_v3 = vld [vmem:[#allocation2 + $0x5b] sm:$0xff] }
 0x656   : > { %6415 = vmatprep.mubr.bf16.mxu1 %v5752_v12 }
 0x658   : > { %6416 = vmatmul.mubr.bf16.gmra.mrb[224].mxu1 %v5680_v61  ;;  %v5575_v60 = vpop.permute.xlu1 %5574  ;;  %v5182_v61 = vld [vmem:[#allocation2 + $0x4b] sm:$0xff] }
 0x659   : > { %v5828_v16 = vsel %vm2904_vm3, %v14802_v20, %v5575_v60  ;;  %v5178_v20 = vld [vmem:[#allocation2 + $0x2b] sm:$0xff]  ;;  %v5525_v41 = vpop.permute.xlu0 %5524  ;;  %v5181_v60 = vld [vmem:[#allocation2 + $0x43] sm:$0xff] }
 0x65a   : > { %6456 = vmatprep.mubr.bf16.mxu1 %v5828_v16  ;;  %v5212_v1 = vpack.c.bf16 %v5178_v20, %v5177_v59  ;;  %v5764_v12 = vsel %vm2904_vm3, %v5213_v19, %v5525_v41  ;;  %v5214_v21 = vpack.c.bf16 %v5182_v61, %v5181_v60  ;;  %v5185_v59 = vld [vmem:[#allocation2 + $0x63] sm:$0xff]  ;;  %v5190_v19 = vld [vmem:[#allocation2 + $0x8b] sm:$0xff] }
 0x65c   : > { %v5577_v50 = vpop.permute.xlu1 %5576 }
 0x65d   : > { %v5832_v51 = vsel %vm2904_vm3, %v14811_v52, %v5577_v50  ;;  %v5760_v52 = vsel %vm2904_vm3, %v5212_v1, %v5523_v8 }
 0x660   : > { %6457 = vmatmul.mubr.bf16.vlgmr.msra.gmra.mrb[156].mxu1 %v5756_v5  ;;  %v5579_v13 = vpop.permute.xlu1 %5578 }
 0x661   : > { %11536 = vmatpush3.bf16.msra.mxu1 %v14919_v49  ;;  %6464 = vmatprep.mubr.bf16.mxu1 %v5832_v51  ;;  %v5836_v49 = vsel %vm2904_vm3, %v14823_v34, %v5579_v13  ;;  %v5527_v34 = vpop.permute.xlu0 %5526 }
 0x662   : > { %11537 = vmatprep.subr.bf16.mxu1 %v12695_v53  ;;  %v5768_v10 = vsel %vm2904_vm3, %v5214_v21, %v5527_v34 }
 0x664   : > { %v5581_v57 = vpop.permute.xlu1 %5580 }
 0x665   : > { %11538 = vmatpush3.bf16.msra.mxu1 %v12695_v53  ;;  %v5840_v55 = vsel %vm2904_vm3, %v14832_v37, %v5581_v57  ;;  %v5529_v50 = vpop.permute.xlu0 %5528  ;;  %v5183_v53 = vld [vmem:[#allocation2 + $0x53] sm:$0xff] }
 0x666   : > { %11539 = vmatprep.subr.bf16.mxu1 %v12696_v22  ;;  %v5215_v51 = vpack.c.bf16 %v5184_v3, %v5183_v53  ;;  %v5194_v53 = vld [vmem:[#allocation2 + $0xab] sm:$0xff] }
 0x668   : > { %6465 = vmatmul.mubr.bf16.gmra.mrb[160].mxu1 %v5760_v52  ;;  %v5583_v16 = vpop.permute.xlu1 %5582  ;;  %v5772_v37 = vsel %vm2904_vm3, %v5215_v51, %v5529_v50  ;;  %v5188_v52 = vld [vmem:[#allocation2 + $0x7b] sm:$0xff]  ;;  %v5193_v51 = vld [vmem:[#allocation2 + $0xa3] sm:$0xff] }
 0x669   : > { %6472 = vmatprep.mubr.bf16.mxu1 %v5836_v49  ;;  %11540 = vmatpush3.bf16.msra.mxu1 %v12696_v22  ;;  %v5844_v39 = vsel %vm2904_vm3, %v14844_v18, %v5583_v16  ;;  %v5186_v22 = vld [vmem:[#allocation2 + $0x6b] sm:$0xff]  ;;  %v5531_v8 = vpop.permute.xlu0 %5530  ;;  %v5217_v32 = vpack.c.bf16 %v5188_v52, %v5187_v17  ;;  %v5192_v16 = vld [vmem:[#allocation2 + $0x9b] sm:$0xff]  ;;  %v5197_v17 = vld [vmem:[#allocation2 + $0xc3] sm:$0xff] }
 0x66a   : > { %11541 = vmatprep.subr.bf16.mxu1 %v12697_v23  ;;  %v5216_v1 = vpack.c.bf16 %v5186_v22, %v5185_v59  ;;  %v5198_v52 = vld [vmem:[#allocation2 + $0xcb] sm:$0xff] }
 0x66c   : > { %v5585_v5 = vpop.permute.xlu1 %5584  ;;  %v5776_v18 = vsel %vm2904_vm3, %v5216_v1, %v5531_v8  ;;  %v5196_v8 = vld [vmem:[#allocation2 + $0xbb] sm:$0xff] }
 0x66d   : > { %11542 = vmatpush3.bf16.msra.mxu1 %v12697_v23  ;;  %v5848_v20 = vsel %vm2904_vm3, %v14853_v4, %v5585_v5  ;;  %v5533_v49 = vpop.permute.xlu0 %5532 }
 0x66e   : > { %8195 = vmatprep.subr.bf16.mxu1 %v16747_v58  ;;  %v5780_v4 = vsel %vm2904_vm3, %v5217_v32, %v5533_v49  ;;  %v5222_v32 = vpack.c.bf16 %v5198_v52, %v5197_v17 }
 0x670   : > { %6473 = vmatmul.mubr.bf16.gmra.mrb[164].mxu1 %v5764_v12  ;;  %v5587_v13 = vpop.permute.xlu1 %5586 }
 0x671   : > { %6480 = vmatprep.mubr.bf16.mxu1 %v5840_v55  ;;  %v5852_v23 = vsel %vm2904_vm3, %v14865_v11, %v5587_v13  ;;  %v5535_v12 = vpop.permute.xlu0 %5534  ;;  %v5189_v55 = vld [vmem:[#allocation2 + $0x83] sm:$0xff]  ;;  %v5195_v13 = vld [vmem:[#allocation2 + $0xb3] sm:$0xff] }
 0x672   : > { %v5218_v34 = vpack.c.bf16 %v5190_v19, %v5189_v55 }
 0x674   : > { %v5589_v41 = vpop.permute.xlu1 %5588  ;;  %v5784_v11 = vsel %vm2904_vm3, %v5218_v34, %v5535_v12  ;;  %v5199_v12 = vld [vmem:[#allocation2 + $0xd3] sm:$0xff] }
 0x675   : > { %v5856_v57 = vsel %vm2904_vm3, %v14874_v44, %v5589_v41  ;;  %v5537_v21 = vpop.permute.xlu0 %5536 }
 0x678   : > { %6481 = vmatmul.mubr.bf16.gmra.mrb[168].mxu1 %v5768_v10  ;;  %v5591_v61 = vpop.permute.xlu1 %5590  ;;  %v5191_v10 = vld [vmem:[#allocation2 + $0x93] sm:$0xff] }
 0x679   : > { %6488 = vmatprep.mubr.bf16.mxu1 %v5844_v39  ;;  %v5860_v60 = vsel %vm2904_vm3, %v14886_v14, %v5591_v61  ;;  %v5219_v3 = vpack.c.bf16 %v5192_v16, %v5191_v10  ;;  %v5539_v5 = vpop.permute.xlu0 %5538  ;;  %v5201_v16 = vld [vmem:[#allocation2 + $0xe3] sm:$0xff] }
 0x67b   : > { %v5788_v44 = vsel %vm2904_vm3, %v5219_v3, %v5537_v21  ;;  %v5204_v3 = vld [vmem:[#allocation2 + $0xfb] sm:$0xff] }
 0x67c   : > { %v5593_v39 = vpop.permute.xlu1 %5592 }
 0x67d   : > { %v5864_v50 = vsel %vm2904_vm3, %v14895_v28, %v5593_v39  ;;  %v5541_v59 = vpop.permute.xlu0 %5540 }
 0x680   : > { %6489 = vmatmul.mubr.bf16.gmra.mrb[172].mxu1 %v5772_v37  ;;  %v5595_v37 = vpop.permute.xlu1 %5594 }
 0x681   : > { %6496 = vmatprep.mubr.bf16.mxu1 %v5848_v20  ;;  %v5220_v20 = vpack.c.bf16 %v5194_v53, %v5193_v51  ;;  %v5868_v22 = vsel %vm2904_vm3, %v14907_v33, %v5595_v37  ;;  %v5543_v49 = vpop.permute.xlu0 %5542  ;;  %v5206_v37 = vld [vmem:[#allocation2 + $0x10b] sm:$0xff] }
 0x682   : > { %v5800_v33 = vsel %vm2904_vm3, %v5222_v32, %v5543_v49  ;;  %v5210_v32 = vld [vmem:[#allocation2 + $0x12b] sm:$0xff] }
 0x683   : > { %v5792_v14 = vsel %vm2904_vm3, %v5220_v20, %v5539_v5 }
 0x684   : > { %v5597_v1 = vpop.permute.xlu1 %5596 }
 0x685   : > { %v5545_v19 = vpop.permute.xlu0 %5544 }
 0x688   : > { %6497 = vmatmul.mubr.bf16.gmra.mrb[176].mxu1 %v5776_v18  ;;  %v5221_v18 = vpack.c.bf16 %v5196_v8, %v5195_v13  ;;  %v5599_v41 = vpop.permute.xlu1 %5598  ;;  %v5284_v13 = vld [vmem:[#allocation2 + $0x13c] sm:$0xff] }
 0x689   : > { %6504 = vmatprep.mubr.bf16.mxu1 %v5852_v23  ;;  %v5872_v23 = vsel %vm2904_vm3, %v14921_v0, %v5597_v1 }
 0x68a   : > { %v5796_v28 = vsel %vm2904_vm3, %v5221_v18, %v5541_v59  ;;  %v5283_v59 = vld [vmem:[#allocation2 + $0x134] sm:$0xff] }
 0x68b   : > { %v5208_v18 = vld [vmem:[#allocation2 + $0x11b] sm:$0xff] }
 0x68c   : > { %v5601_v55 = vpop.permute.xlu1 %5600 }
 0x68d   : > { %v5880_v34 = vsel %vm2904_vm3, %v14935_v54, %v5601_v55 }
 0x690   : > { %6505 = vmatmul.mubr.bf16.gmra.mrb[180].mxu1 %v5780_v4  ;;  %v5876_v4 = vsel %vm2904_vm3, %v14930_v7, %v5599_v41  ;;  %v5603_v21 = vpop.permute.xlu1 %5602 }
 0x691   : > { %6512 = vmatprep.mubr.bf16.mxu1 %v5856_v57  ;;  %v5200_v57 = vld [vmem:[#allocation2 + $0xdb] sm:$0xff]  ;;  %v5884_v39 = vsel %vm2904_vm3, %v14943_v40, %v5603_v21 }
 0x692   : > { %v5223_v61 = vpack.c.bf16 %v5200_v57, %v5199_v12  ;;  %v5341_v57 = vld [vmem:[#allocation2 + $0x2e] sm:$0xff]  ;;  %v5340_v12 = vld [vmem:[#allocation2 + $0x26] sm:$0xff]  ;;  %v5347_v21 = vld [vmem:[#allocation2 + $0x5e] sm:$0xff] }
 0x693   : > { %v5376_v55 = vpack.c.bf16 %v5341_v57, %v5340_v12  ;;  %v5369_v57 = vld [vmem:[#allocation2 + $0x10e] sm:$0xff] }
 0x694   : > { %v5804_v0 = vsel %vm2904_vm3, %v5223_v61, %v5545_v19  ;;  %v5605_v53 = vpop.permute.xlu1 %5604  ;;  %v5343_v61 = vld [vmem:[#allocation2 + $0x3e] sm:$0xff] }
 0x695   : > { %v5888_v51 = vsel %vm2904_vm3, %v14948_v26, %v5605_v53  ;;  %v5207_v26 = vld [vmem:[#allocation2 + $0x113] sm:$0xff] }
 0x696   : > { %v5227_v49 = vpack.c.bf16 %v5208_v18, %v5207_v26  ;;  %v5353_v53 = vld [vmem:[#allocation2 + $0x8e] sm:$0xff]  ;;  %v5358_v18 = vld [vmem:[#allocation2 + $0xb6] sm:$0xff]  ;;  %v5363_v26 = vld [vmem:[#allocation2 + $0xde] sm:$0xff] }
 0x698   : > { %6513 = vmatmul.mubr.bf16.gmra.mrb[184].mxu1 %v5784_v11  ;;  %v5202_v11 = vld [vmem:[#allocation2 + $0xeb] sm:$0xff] }
 0x699   : > { %6520 = vmatprep.mubr.bf16.mxu1 %v5860_v60  ;;  %v5547_v60 = vpop.permute.xlu0 %5546  ;;  %v5224_v10 = vpack.c.bf16 %v5202_v11, %v5201_v16 }
 0x69b   : > { %v5808_v7 = vsel %vm2904_vm3, %v5224_v10, %v5547_v60  ;;  %v5344_v60 = vld [vmem:[#allocation2 + $0x46] sm:$0xff]  ;;  %v5349_v10 = vld [vmem:[#allocation2 + $0x6e] sm:$0xff] }
 0x6a0   : > { %6521 = vmatmul.mubr.bf16.gmra.mrb[188].mxu1 %v5788_v44  ;;  %v5549_v44 = vpop.permute.xlu0 %5548 }
 0x6a1   : > { %6528 = vmatprep.mubr.bf16.mxu1 %v5864_v50  ;;  %v5203_v50 = vld [vmem:[#allocation2 + $0xf3] sm:$0xff] }
 0x6a2   : > { %v5225_v5 = vpack.c.bf16 %v5204_v3, %v5203_v50  ;;  %v5348_v3 = vld [vmem:[#allocation2 + $0x66] sm:$0xff]  ;;  %v5351_v50 = vld [vmem:[#allocation2 + $0x7e] sm:$0xff] }
 0x6a4   : > { %v5812_v54 = vsel %vm2904_vm3, %v5225_v5, %v5549_v44  ;;  %v5551_v20 = vpop.permute.xlu0 %5550  ;;  %v5380_v44 = vpack.c.bf16 %v5349_v10, %v5348_v3  ;;  %v5350_v5 = vld [vmem:[#allocation2 + $0x76] sm:$0xff]  ;;  %v5375_v10 = vld [vmem:[#allocation2 + $0x13e] sm:$0xff] }
 0x6a8   : > { %6529 = vmatmul.mubr.bf16.gmra.mrb[192].mxu1 %v5792_v14  ;;  %v5205_v14 = vld [vmem:[#allocation2 + $0x103] sm:$0xff]  ;;  %v5553_v52 = vpop.permute.xlu0 %5552 }
 0x6a9   : > { %6536 = vmatprep.mubr.bf16.mxu1 %v5868_v22  ;;  %v5607_v22 = vpop.permute.xlu1 %5606  ;;  %v5226_v8 = vpack.c.bf16 %v5206_v37, %v5205_v14  ;;  %v5820_v41 = vsel %vm2904_vm3, %v5227_v49, %v5553_v52  ;;  %v5357_v14 = vld [vmem:[#allocation2 + $0xae] sm:$0xff] }
 0x6aa   : > { %v5892_v1 = vsel %vm2904_vm3, %v14956_v63, %v5607_v22  ;;  %v5354_v22 = vld [vmem:[#allocation2 + $0x96] sm:$0xff]  ;;  %v5365_v49 = vld [vmem:[#allocation2 + $0xee] sm:$0xff] }
 0x6ab   : > { %v5816_v40 = vsel %vm2904_vm3, %v5226_v8, %v5551_v20  ;;  %v5355_v20 = vld [vmem:[#allocation2 + $0x9e] sm:$0xff] }
 0x6ac   : > { %v5383_v8 = vpack.c.bf16 %v5355_v20, %v5354_v22 }
 0x6b0   : > { %6537 = vmatmul.mubr.bf16.gmra.mrb[196].mxu1 %v5796_v28  ;;  %v5285_v28 = vpack.c.bf16 %v5284_v13, %v5283_v59  ;;  %v5359_v13 = vld [vmem:[#allocation2 + $0xbe] sm:$0xff] }
 0x6b1   : > { %6544 = vmatprep.mubr.bf16.mxu1 %v5872_v23  ;;  %v5609_v23 = vpop.permute.xlu1 %5608 }
 0x6b2   : > { %v5896_v17 = vsel %vm2904_vm3, %v5285_v28, %v5609_v23  ;;  %v5385_v28 = vpack.c.bf16 %v5359_v13, %v5358_v18  ;;  %v5360_v23 = vld [vmem:[#allocation2 + $0xc6] sm:$0xff] }
 0x6b8   : > { %6545 = vmatmul.mubr.bf16.gmra.mrb[200].mxu1 %v5800_v33  ;;  %v5555_v33 = vpop.permute.xlu0 %5554 }
 0x6b9   : > { %6552 = vmatprep.mubr.bf16.mxu1 %v5876_v4  ;;  %v5209_v4 = vld [vmem:[#allocation2 + $0x123] sm:$0xff] }
 0x6ba   : > { %v5228_v19 = vpack.c.bf16 %v5210_v32, %v5209_v4  ;;  %v5364_v32 = vld [vmem:[#allocation2 + $0xe6] sm:$0xff]  ;;  %v5367_v4 = vld [vmem:[#allocation2 + $0xfe] sm:$0xff] }
 0x6bc   : > { %v5824_v63 = vsel %vm2904_vm3, %v5228_v19, %v5555_v33  ;;  %v5388_v33 = vpack.c.bf16 %v5365_v49, %v5364_v32  ;;  %v5366_v19 = vld [vmem:[#allocation2 + $0xf6] sm:$0xff]  ;;  %v12699_v49 = vld [vmem:[%s16663_s7 + $0x108] sm:$0xff]  }
 0x6bd   : > { %v5389_v12 = vpack.c.bf16 %v5367_v4, %v5366_v19  ;;  %v12700_v32 = vld [vmem:[%s16663_s7 + $0x110] sm:$0xff]   ;;  %v12701_v19 = vld [vmem:[%s16663_s7 + $0x118] sm:$0xff]  }
 0x6c0   : > { %6553 = vmatmul.mubr.bf16.gmra.mrb[204].mxu1 %v5804_v0  ;;  %v5345_v0 = vld [vmem:[#allocation2 + $0x4e] sm:$0xff] }
 0x6c1   : > { %6560 = vmatprep.mubr.bf16.mxu1 %v5880_v34  ;;  %v5342_v34 = vld [vmem:[#allocation2 + $0x36] sm:$0xff]  ;;  %v5378_v16 = vpack.c.bf16 %v5345_v0, %v5344_v60  ;;  %v5372_v0 = vld [vmem:[#allocation2 + $0x126] sm:$0xff] }
 0x6c2   : > { %v5377_v11 = vpack.c.bf16 %v5343_v61, %v5342_v34  ;;  %v5371_v61 = vld [vmem:[#allocation2 + $0x11e] sm:$0xff]  ;;  %v5373_v34 = vld [vmem:[#allocation2 + $0x12e] sm:$0xff] }
 0x6c8   : > { %6561 = vmatmul.mubr.bf16.gmra.mrb[208].mxu1 %v5808_v7  ;;  %v5346_v7 = vld [vmem:[#allocation2 + $0x56] sm:$0xff] }
 0x6c9   : > { %6568 = vmatprep.mubr.bf16.mxu1 %v5884_v39  ;;  %v5379_v39 = vpack.c.bf16 %v5347_v21, %v5346_v7  ;;  %v5374_v21 = vld [vmem:[#allocation2 + $0x136] sm:$0xff] }
 0x6ca   : > { %v5393_v7 = vpack.c.bf16 %v5375_v10, %v5374_v21 }
 0x6d0   : > { %6569 = vmatmul.mubr.bf16.gmra.mrb[212].mxu1 %v5812_v54  ;;  %v5381_v54 = vpack.c.bf16 %v5351_v50, %v5350_v5 }
 0x6d1   : > { %6576 = vmatprep.mubr.bf16.mxu1 %v5888_v51  ;;  %v5352_v51 = vld [vmem:[#allocation2 + $0x86] sm:$0xff] }
 0x6d2   : > { %v5382_v37 = vpack.c.bf16 %v5353_v53, %v5352_v51 }
 0x6d8   : > { %6577 = vmatmul.mubr.bf16.gmra.mrb[216].mxu1 %v5816_v40  ;;  %v5356_v40 = vld [vmem:[#allocation2 + $0xa6] sm:$0xff] }
 0x6d9   : > { %6584 = vmatprep.mubr.bf16.mxu1 %v5892_v1  ;;  %v5384_v59 = vpack.c.bf16 %v5357_v14, %v5356_v40  ;;  %v5361_v1 = vld [vmem:[#allocation2 + $0xce] sm:$0xff] }
 0x6da   : > { %v5386_v52 = vpack.c.bf16 %v5361_v1, %v5360_v23  ;;  %v12698_v1 = vld [vmem:[%s16663_s7 + $0x100] sm:$0xff]  }
 0x6db   : > { %11579 = vmatprep.subr.bf16.mxu0 %v12698_v1  ;;  %v7012_v23 = vld [vmem:[#allocation2 + $0x1] sm:$0xff] }
 0x6dc   : > { %11580 = vmatpush3.bf16.msra.mxu0 %v12698_v1 }
 0x6dd   : > { %11581 = vmatprep.subr.bf16.mxu0 %v12699_v49 }
 0x6e0   : > { %6585 = vmatmul.mubr.bf16.gmra.mrb[220].mxu1 %v5820_v41  ;;  %11582 = vmatpush3.bf16.msra.mxu0 %v12699_v49  ;;  %v12702_v49 = vld [vmem:[%s16663_s7] sm:$0xff]  }
 0x6e1   : > { %6592 = vmatprep.mubr.bf16.mxu1 %v5896_v17  ;;  %v5362_v17 = vld [vmem:[#allocation2 + $0xd6] sm:$0xff]  ;;  %11583 = vmatprep.subr.bf16.mxu0 %v12700_v32 }
 0x6e2   : > { %v5387_v41 = vpack.c.bf16 %v5363_v26, %v5362_v17 }
 0x6e4   : > { %11584 = vmatpush3.bf16.msra.mxu0 %v12700_v32 }
 0x6e5   : > { %11585 = vmatprep.subr.bf16.mxu0 %v12701_v19 }
 0x6e8   : > { %6593 = vmatmul.mubr.bf16.gmra.mrb[224].mxu1 %v5824_v63  ;;  %v5368_v63 = vld [vmem:[#allocation2 + $0x106] sm:$0xff]  ;;  %11586 = vmatpush3.bf16.msra.mxu0 %v12701_v19 }
 0x6e9   : > { %11543 = vmatprep.mubr.msk.bf16.mxu1 %vm2904_vm3, %v5376_v55  ;;  %v5390_v55 = vpack.c.bf16 %v5369_v57, %v5368_v63  ;;  %10143 = vmatprep.subr.bf16.mxu0 %v16747_v58 }
 0x6f0   : > { %11544 = vmatmul.mubr.msk.bf16.vlgmr.msra.gmra.mrb[228].mxu1 %vm2904_vm3, %v5377_v11  ;;  %v5370_v11 = vld [vmem:[#allocation2 + $0x116] sm:$0xff] }
 0x6f1   : > { %11547 = vmatprep.mubr.msk.bf16.mxu1 %vm2904_vm3, %v5378_v16  ;;  %v5391_v60 = vpack.c.bf16 %v5371_v61, %v5370_v11  ;;  %v5392_v16 = vpack.c.bf16 %v5373_v34, %v5372_v0  ;;  %8196 = vmatpush1.bf16.msra.mxu1 %v12702_v49 }
 0x6f2   : > { %8197 = vmatprep.subr.bf16.mxu1 %v16747_v58 }
 0x6f8   : > { %11548 = vmatmul.mubr.msk.bf16.gmra.mrb[232].mxu1 %vm2904_vm3, %v5379_v39 }
 0x6f9   : > { %11551 = vmatprep.mubr.msk.bf16.mxu1 %vm2904_vm3, %v5380_v44 }
 0x700   : > { %11552 = vmatmul.mubr.msk.bf16.gmra.mrb[236].mxu1 %vm2904_vm3, %v5381_v54 }
 0x701   : > { %11555 = vmatprep.mubr.msk.bf16.mxu1 %vm2904_vm3, %v5382_v37 }
 0x708   : > { %11556 = vmatmul.mubr.msk.bf16.gmra.mrb[240].mxu1 %vm2904_vm3, %v5383_v8 }
 0x709   : > { %11559 = vmatprep.mubr.msk.bf16.mxu1 %vm2904_vm3, %v5384_v59 }
 0x710   : > { %11560 = vmatmul.mubr.msk.bf16.gmra.mrb[244].mxu1 %vm2904_vm3, %v5385_v28 }
 0x711   : > { %11563 = vmatprep.mubr.msk.bf16.mxu1 %vm2904_vm3, %v5386_v52  ;;  %v7013_v52 = vld [vmem:[#allocation2 + $0x9] sm:$0xff] }
 0x712   : > { %v7048_v17 = vpack.c.bf16 %v7013_v52, %v7012_v23 }
 0x714   : > { %7360 = vrot.lane.b32.xlu0 %v7048_v17, %s12784_s30 }
 0x718   : > { %11564 = vmatmul.mubr.msk.bf16.gmra.mrb[248].mxu1 %vm2904_vm3, %v5387_v41 }
 0x719   : > { %11567 = vmatprep.mubr.msk.bf16.mxu1 %vm2904_vm3, %v5388_v33 }
 0x720   : > { %11568 = vmatmul.mubr.msk.bf16.gmra.mrb[252].mxu1 %vm2904_vm3, %v5389_v12 }
 0x721   : > { %11571 = vmatprep.mubr.msk.bf16.mxu1 %vm2904_vm3, %v5390_v55 }
 0x728   : > { %11572 = vmatmul.mubr.msk.bf16.gmra.mrb[0].mxu1 %vm2904_vm3, %v5391_v60 }
 0x729   : > { %11575 = vmatprep.mubr.msk.bf16.mxu1 %vm2904_vm3, %v5392_v16 }
 0x730   : > { %11576 = vmatmul.mubr.msk.bf16.gmra.mrb[4].mxu1 %vm2904_vm3, %v5393_v7 }
 0x733   : > { %v15066_v39 = vpop.f32.mrb[156].mxu1 }
 0x734   : > { %v6460_v3 = vpop.f32.mrb[157].mxu1 }
 0x735   : > { %v15068_v44 = vpop.f32.mrb[158].mxu1 }
 0x736   : > { %v6463_v50 = vpop.f32.mrb[159].mxu1 }
 0x73b   : > { %v15070_v53 = vpop.f32.mrb[160].mxu1 }
 0x73c   : > { %v6468_v5 = vpop.f32.mrb[161].mxu1 }
 0x73d   : > { %v15072_v54 = vpop.f32.mrb[162].mxu1 }
 0x73e   : > { %v6471_v51 = vpop.f32.mrb[163].mxu1 }
 0x743   : > { %v15074_v37 = vpop.f32.mrb[164].mxu1 }
 0x744   : > { %v6476_v20 = vpop.f32.mrb[165].mxu1 }
 0x745   : > { %v15076_v14 = vpop.f32.mrb[166].mxu1 }
 0x746   : > { %v6479_v22 = vpop.f32.mrb[167].mxu1 }
 0x74b   : > { %v15078_v8 = vpop.f32.mrb[168].mxu1 }
 0x74c   : > { %v6484_v40 = vpop.f32.mrb[169].mxu1 }
 0x74d   : > { %v15080_v59 = vpop.f32.mrb[170].mxu1 }
 0x74e   : > { %v6487_v13 = vpop.f32.mrb[171].mxu1 }
 0x753   : > { %v15085_v18 = vpop.f32.mrb[172].mxu1 }
 0x754   : > { %v6492_v28 = vpop.f32.mrb[173].mxu1 }
 0x755   : > { %v15087_v26 = vpop.f32.mrb[174].mxu1 }
 0x756   : > { %v6495_v41 = vpop.f32.mrb[175].mxu1 }
 0x757   : > { %v12703_v41 = vld [vmem:[%s16663_s7 + $0x8] sm:$0xff]  }
 0x758   : > { %8198 = vmatpush1.bf16.msra.mxu1 %v12703_v41  ;;  %v12709_v41 = vld [vmem:[%s16663_s7 + $0x38] sm:$0xff]  }
 0x759   : > { %8199 = vmatprep.subr.bf16.mxu1 %v16747_v58 }
 0x75b   : > { %v15096_v33 = vpop.f32.mrb[176].mxu1 }
 0x75c   : > { %v6500_v4 = vpop.f32.mrb[177].mxu1 }
 0x75d   : > { %v15098_v57 = vpop.f32.mrb[178].mxu1  ;;  %v12704_v4 = vld [vmem:[%s16663_s7 + $0x10] sm:$0xff]  }
 0x75e   : > { %v6503_v12 = vpop.f32.mrb[179].mxu1  ;;  %8200 = vmatpush1.bf16.msra.mxu1 %v12704_v4 }
 0x75f   : > { %8201 = vmatprep.subr.bf16.mxu1 %v16747_v58 }
 0x763   : > { %v15104_v63 = vpop.f32.mrb[180].mxu1 }
 0x764   : > { %v6508_v55 = vpop.f32.mrb[181].mxu1 }
 0x765   : > { %v15106_v61 = vpop.f32.mrb[182].mxu1 }
 0x766   : > { %v6511_v0 = vpop.f32.mrb[183].mxu1 }
 0x767   : > { %v12705_v0 = vld [vmem:[%s16663_s7 + $0x18] sm:$0xff]  }
 0x768   : > { %8202 = vmatpush1.bf16.msra.mxu1 %v12705_v0 }
 0x769   : > { %8203 = vmatprep.subr.bf16.mxu1 %v16747_v58 }
 0x76b   : > { %v15108_v34 = vpop.f32.mrb[184].mxu1 }
 0x76c   : > { %v6516_v11 = vpop.f32.mrb[185].mxu1 }
 0x76d   : > { %v15110_v60 = vpop.f32.mrb[186].mxu1 }
 0x76e   : > { %v6519_v16 = vpop.f32.mrb[187].mxu1 }
 0x76f   : > { %v12706_v16 = vld [vmem:[%s16663_s7 + $0x20] sm:$0xff]  }
 0x770   : > { %8204 = vmatpush1.bf16.msra.mxu1 %v12706_v16 }
 0x771   : > { %8205 = vmatprep.subr.bf16.mxu1 %v16747_v58 }
 0x773   : > { %v15112_v21 = vpop.f32.mrb[188].mxu1 }
 0x774   : > { %v6524_v10 = vpop.f32.mrb[189].mxu1 }
 0x775   : > { %v15114_v7 = vpop.f32.mrb[190].mxu1 }
 0x776   : > { %v6527_v3 = vpop.f32.mrb[191].mxu1 }
 0x77b   : > { %v15116_v50 = vpop.f32.mrb[192].mxu1 }
 0x77c   : > { %v6532_v5 = vpop.f32.mrb[193].mxu1 }
 0x77d   : > { %v15118_v51 = vpop.f32.mrb[194].mxu1 }
 0x77e   : > { %v6535_v20 = vpop.f32.mrb[195].mxu1 }
 0x77f   : > { %v12707_v20 = vld [vmem:[%s16663_s7 + $0x28] sm:$0xff]  }
 0x780   : > { %8206 = vmatpush1.bf16.msra.mxu1 %v12707_v20  ;;  %v12712_v20 = vld [vmem:[%s16663_s7 + $0x50] sm:$0xff]  }
 0x781   : > { %8207 = vmatprep.subr.bf16.mxu1 %v16747_v58 }
 0x783   : > { %v15120_v22 = vpop.f32.mrb[196].mxu1 }
 0x784   : > { %v6540_v40 = vpop.f32.mrb[197].mxu1 }
 0x785   : > { %v15122_v13 = vpop.f32.mrb[198].mxu1 }
 0x786   : > { %v6543_v1 = vpop.f32.mrb[199].mxu1 }
 0x787   : > { %v12708_v1 = vld [vmem:[%s16663_s7 + $0x30] sm:$0xff]  }
 0x788   : > { %8208 = vmatpush1.bf16.msra.mxu1 %v12708_v1 }
 0x789   : > { %8209 = vmatprep.subr.bf16.mxu1 %v16747_v58 }
 0x78b   : > { %v15124_v28 = vpop.f32.mrb[200].mxu1 }
 0x78c   : > { %v6548_v23 = vpop.f32.mrb[201].mxu1  ;;  %8210 = vmatpush1.bf16.msra.mxu1 %v12709_v41  ;;  %v12713_v41 = vld [vmem:[%s16663_s7 + $0x58] sm:$0xff]  }
 0x78d   : > { %v15126_v52 = vpop.f32.mrb[202].mxu1  ;;  %8211 = vmatprep.subr.bf16.mxu1 %v16747_v58 }
 0x78e   : > { %v6551_v17 = vpop.f32.mrb[203].mxu1 }
 0x793   : > { %v15135_v32 = vpop.f32.mrb[204].mxu1 }
 0x794   : > { %v6556_v19 = vpop.f32.mrb[205].mxu1 }
 0x795   : > { %v15141_v12 = vpop.f32.mrb[206].mxu1  ;;  %v12710_v19 = vld [vmem:[%s16663_s7 + $0x40] sm:$0xff]  }
 0x796   : > { %v6559_v55 = vpop.f32.mrb[207].mxu1  ;;  %8212 = vmatpush1.bf16.msra.mxu1 %v12710_v19 }
 0x797   : > { %8213 = vmatprep.subr.bf16.mxu1 %v16747_v58 }
 0x79b   : > { %v15147_v11 = vpop.f32.mrb[208].mxu1 }
 0x79c   : > { %v6564_v10 = vpop.f32.mrb[209].mxu1 }
 0x79d   : > { %v15153_v3 = vpop.f32.mrb[210].mxu1  ;;  %v12711_v10 = vld [vmem:[%s16663_s7 + $0x48] sm:$0xff]  }
 0x79e   : > { %v6567_v5 = vpop.f32.mrb[211].mxu1  ;;  %8214 = vmatpush1.bf16.msra.mxu1 %v12711_v10 }
 0x79f   : > { %8215 = vmatprep.subr.bf16.mxu1 %v16747_v58 }
 0x7a2   : > { %8216 = vmatpush1.bf16.msra.mxu1 %v12712_v20  ;;  %v12715_v20 = vld [vmem:[%s16663_s7 + $0x68] sm:$0xff]  }
 0x7a3   : > { %v15159_v40 = vpop.f32.mrb[212].mxu1  ;;  %8217 = vmatprep.subr.bf16.mxu1 %v16747_v58 }
 0x7a4   : > { %16804 = vst [vmem:[#allocation4_spill] sm:$0xff] %v15159_v40  ;;  %v6572_v23 = vpop.f32.mrb[213].mxu1 }
 0x7a5   : > { %v15165_v49 = vpop.f32.mrb[214].mxu1 }
 0x7a6   : > { %16805 = vst [vmem:[#allocation28_spill] sm:$0xff] %v15165_v49  ;;  %v6575_v17 = vpop.f32.mrb[215].mxu1  ;;  %8218 = vmatpush1.bf16.msra.mxu1 %v12713_v41 }
 0x7a7   : > { %8219 = vmatprep.subr.bf16.mxu1 %v16747_v58 }
 0x7ab   : > { %v15171_v4 = vpop.f32.mrb[216].mxu1 }
 0x7ac   : > { %16806 = vst [vmem:[#allocation30_spill] sm:$0xff] %v15171_v4  ;;  %v6580_v55 = vpop.f32.mrb[217].mxu1 }
 0x7ad   : > { %v15177_v0 = vpop.f32.mrb[218].mxu1  ;;  %v12714_v55 = vld [vmem:[%s16663_s7 + $0x60] sm:$0xff]  }
 0x7ae   : > { %16807 = vst [vmem:[#allocation27_spill] sm:$0xff] %v15177_v0  ;;  %v6583_v16 = vpop.f32.mrb[219].mxu1  ;;  %8220 = vmatpush1.bf16.msra.mxu1 %v12714_v55  ;;  %v12716_v55 = vld [vmem:[%s16663_s7 + $0x70] sm:$0xff]  }
 0x7af   : > { %8221 = vmatprep.subr.bf16.mxu1 %v16747_v58 }
 0x7b2   : > { %8222 = vmatpush1.bf16.msra.mxu1 %v12715_v20 }
 0x7b3   : > { %v15183_v5 = vpop.f32.mrb[220].mxu1  ;;  %8223 = vmatprep.subr.bf16.mxu1 %v16747_v58 }
 0x7b4   : > { %16808 = vst [vmem:[#allocation29_spill] sm:$0xff] %v15183_v5  ;;  %v6588_v1 = vpop.f32.mrb[221].mxu1 }
 0x7b5   : > { %v15189_v23 = vpop.f32.mrb[222].mxu1 }
 0x7b6   : > { %16809 = vst [vmem:[#allocation32_spill] sm:$0xff] %v15189_v23  ;;  %v6591_v17 = vpop.f32.mrb[223].mxu1  ;;  %8224 = vmatpush1.bf16.msra.mxu1 %v12716_v55 }
 0x7b7   : > { %v15209_v17 = vld [vmem:[%s16667_s11] ss:$0 sm:$0xff]  ;;  %8225 = vmatprep.subr.bf16.mxu1 %v16747_v58 }
 0x7b8   : > { %v11705_v41 = vadd.f32 %v15209_v17, %v15070_v53  ;;  %v11704_v5 = vadd.f32 %v15209_v17, %v15068_v44 }
 0x7bb   : > { %v15195_v19 = vpop.f32.mrb[224].mxu1 }
 0x7bc   : > { %16810 = vst [vmem:[#allocation34_spill] sm:$0xff] %v15195_v19  ;;  %v6596_v16 = vpop.f32.mrb[225].mxu1 }
 0x7bd   : > { %v15201_v10 = vpop.f32.mrb[226].mxu1  ;;  %v11703_v16 = vadd.f32 %v15209_v17, %v15066_v39 }
 0x7be   : > { %16811 = vst [vmem:[#allocation31_spill] sm:$0xff] %v15201_v10  ;;  %v6599_v1 = vpop.f32.mrb[227].mxu1 }
 0x7bf   : > { %v11706_v1 = vadd.f32 %v15209_v17, %v15072_v54 }
 0x7c3   : > { %v11545_v23 = vpop.f32.mrb[228].mxu1 }
 0x7c4   : > { %v6644_v10 = vadd.f32 %v11705_v41, %v11545_v23  ;;  %v6635_v19 = vpop.f32.mrb[229].mxu1 }
 0x7c5   : > { %v6636_v53 = vadd.f32 %v11703_v16, %v6635_v19  ;;  %v11546_v49 = vpop.f32.mrb[230].mxu1 }
 0x7c6   : > { %vm6780_vm10 = vcmp.ge.f32.partialorder %v6644_v10, 0.0  ;;  %v6816_v39 = vmul.f32 %v6644_v10, %v14488_v24  ;;  %v6647_v20 = vadd.f32 %v11706_v1, %v11546_v49  ;;  %v6638_v0 = vpop.f32.mrb[231].mxu1  ;;  %v11709_v49 = vadd.f32 %v15209_v17, %v15078_v8 }
 0x7c7   : > { %vm6778_vm11 = vcmp.ge.f32.partialorder %v6636_v53, 0.0  ;;  %v6814_v4 = vmul.f32 %v6636_v53, %v14488_v24  ;;  %v6639_v40 = vadd.f32 %v11704_v5, %v6638_v0  ;;  %v12717_v0 = vld [vmem:[%s16663_s7 + $0x78] sm:$0xff]   ;;  %v11707_v5 = vadd.f32 %v15209_v17, %v15074_v37 }
 0x7c8   : > { %v6852_v54 = vsel %vm6780_vm10, %v6644_v10, %v6816_v39  ;;  %vm6781_vm12 = vcmp.ge.f32.partialorder %v6647_v20, 0.0  ;;  %v6817_v23 = vmul.f32 %v6647_v20, %v14488_v24  ;;  %8226 = vmatpush1.bf16.msra.mxu1 %v12717_v0 }
 0x7c9   : > { %v6888_v44 = vmul.f32 %v6852_v54, %v13877_v9  ;;  %v6850_v19 = vsel %vm6778_vm11, %v6636_v53, %v6814_v4  ;;  %vm6779_vm13 = vcmp.ge.f32.partialorder %v6639_v40, 0.0  ;;  %v6815_v41 = vmul.f32 %v6639_v40, %v14488_v24  ;;  %8372 = vmatprep.subr.bf16.mxu1 %v16747_v58 }
 0x7ca   : > { %v6886_v16 = vmul.f32 %v6850_v19, %v13871_v62  ;;  %v6853_v1 = vsel %vm6781_vm12, %v6647_v20, %v6817_v23  ;;  %v11710_v53 = vadd.f32 %v15209_v17, %v15080_v59  ;;  %v11708_v54 = vadd.f32 %v15209_v17, %v15076_v14 }
 0x7cb   : > { %6924 = vst.msk [vmem:[#allocation2 + $0x23] sm:$0xff] %vm2904_vm3, %v6888_v44  ;;  %v6889_v4 = vmul.f32 %v6853_v1, %v13879_v15  ;;  %v6851_v10 = vsel %vm6779_vm13, %v6639_v40, %v6815_v41  ;;  %v11549_v55 = vpop.f32.mrb[232].mxu1 }
 0x7cc   : > { %6922 = vst.msk [vmem:[#allocation2 + $0x13] sm:$0xff] %vm2904_vm3, %v6886_v16  ;;  %v6887_v8 = vmul.f32 %v6851_v10, %v13869_v45  ;;  %v6660_v39 = vadd.f32 %v11709_v49, %v11549_v55  ;;  %v6651_v20 = vpop.f32.mrb[233].mxu1  ;;  %v11711_v55 = vadd.f32 %v15209_v17, %v15085_v18 }
 0x7cd   : > { %6925 = vst.msk [vmem:[#allocation2 + $0x2b] sm:$0xff] %vm2904_vm3, %v6889_v4  ;;  %v6652_v37 = vadd.f32 %v11707_v5, %v6651_v20  ;;  %v11550_v23 = vpop.f32.mrb[234].mxu1  ;;  %v11713_v5 = vadd.f32 %v15209_v17, %v15096_v33  ;;  %v11714_v20 = vadd.f32 %v15209_v17, %v15098_v57 }
 0x7ce   : > { %6923 = vst.msk [vmem:[#allocation2 + $0x1b] sm:$0xff] %vm2904_vm3, %v6887_v8  ;;  %vm6784_vm14 = vcmp.ge.f32.partialorder %v6660_v39, 0.0  ;;  %v6820_v59 = vmul.f32 %v6660_v39, %v14488_v24  ;;  %v6663_v40 = vadd.f32 %v11710_v53, %v11550_v23  ;;  %v6654_v44 = vpop.f32.mrb[235].mxu1  ;;  %v11712_v23 = vadd.f32 %v15209_v17, %v15087_v26 }
 0x7cf   : > { %vm6782_vm15 = vcmp.ge.f32.partialorder %v6652_v37, 0.0  ;;  %v6818_v19 = vmul.f32 %v6652_v37, %v14488_v24  ;;  %v6655_v41 = vadd.f32 %v11708_v54, %v6654_v44 }
 0x7d0   : > { %v6856_v49 = vsel %vm6784_vm14, %v6660_v39, %v6820_v59  ;;  %vm6785_vm0 = vcmp.ge.f32.partialorder %v6663_v40, 0.0  ;;  %v6821_v14 = vmul.f32 %v6663_v40, %v14488_v24 }
 0x7d1   : > { %v6892_v16 = vmul.f32 %v6856_v49, %v13908_v46  ;;  %v6854_v1 = vsel %vm6782_vm15, %v6652_v37, %v6818_v19  ;;  %vm6783_vm1 = vcmp.ge.f32.partialorder %v6655_v41, 0.0  ;;  %v6819_v0 = vmul.f32 %v6655_v41, %v14488_v24 }
 0x7d2   : > { %v6890_v4 = vmul.f32 %v6854_v1, %v13888_v25  ;;  %v6857_v10 = vsel %vm6785_vm0, %v6663_v40, %v6821_v14 }
 0x7d3   : > { %6928 = vst.msk [vmem:[#allocation2 + $0x43] sm:$0xff] %vm2904_vm3, %v6892_v16  ;;  %v6893_v53 = vmul.f32 %v6857_v10, %v13910_v47  ;;  %v6855_v8 = vsel %vm6783_vm1, %v6655_v41, %v6819_v0  ;;  %v11553_v39 = vpop.f32.mrb[236].mxu1  ;;  %v7068_v40 = vld [vmem:[#allocation2 + $0x12] sm:$0xff] }
 0x7d4   : > { %6926 = vst.msk [vmem:[#allocation2 + $0x33] sm:$0xff] %vm2904_vm3, %v6890_v4  ;;  %v6891_v54 = vmul.f32 %v6855_v8, %v13898_v36  ;;  %v6676_v33 = vadd.f32 %v11713_v5, %v11553_v39  ;;  %v6667_v37 = vpop.f32.mrb[237].mxu1  ;;  %v7014_v16 = vld [vmem:[#allocation2 + $0x11] sm:$0xff]  ;;  %v7017_v8 = vld [vmem:[#allocation2 + $0x29] sm:$0xff] }
 0x7d5   : > { %6929 = vst.msk [vmem:[#allocation2 + $0x4b] sm:$0xff] %vm2904_vm3, %v6893_v53  ;;  %v6668_v18 = vadd.f32 %v11711_v55, %v6667_v37  ;;  %v11554_v59 = vpop.f32.mrb[238].mxu1  ;;  %v7069_v44 = vld [vmem:[#allocation2 + $0x1a] sm:$0xff]  ;;  %v7070_v5 = vld [vmem:[#allocation2 + $0x22] sm:$0xff]  ;;  %v7071_v4 = vld [vmem:[#allocation2 + $0x2a] sm:$0xff]  ;;  %v11717_v37 = vadd.f32 %v15209_v17, %v15108_v34  ;;  %v11718_v34 = vadd.f32 %v15209_v17, %v15110_v60 }
 0x7d6   : > { %v7015_v19 = vld [vmem:[#allocation2 + $0x19] sm:$0xff]  ;;  %6927 = vst.msk [vmem:[#allocation2 + $0x3b] sm:$0xff] %vm2904_vm3, %v6891_v54  ;;  %vm6788_vm2 = vcmp.ge.f32.partialorder %v6676_v33, 0.0  ;;  %v6824_v57 = vmul.f32 %v6676_v33, %v14488_v24  ;;  %v6679_v41 = vadd.f32 %v11714_v20, %v11554_v59  ;;  %v6670_v49 = vpop.f32.mrb[239].mxu1  ;;  %v15270_v14 = vpack.c.bf16 %v7069_v44, %v7068_v40  ;;  %v7016_v53 = vld [vmem:[#allocation2 + $0x21] sm:$0xff] }
 0x7d7   : > { %vm6786_vm4 = vcmp.ge.f32.partialorder %v6668_v18, 0.0  ;;  %v6822_v26 = vmul.f32 %v6668_v18, %v14488_v24  ;;  %v6671_v1 = vadd.f32 %v11712_v23, %v6670_v49  ;;  %v7049_v0 = vpack.c.bf16 %v7015_v19, %v7014_v16  ;;  %v7288_v49 = vld [vmem:[#allocation2 + $0x26] sm:$0xff] }
 0x7d8   : > { %v6860_v10 = vsel %vm6788_vm2, %v6676_v33, %v6824_v57  ;;  %vm6789_vm5 = vcmp.ge.f32.partialorder %v6679_v41, 0.0  ;;  %v6825_v55 = vmul.f32 %v6679_v41, %v14488_v24  ;;  %7414 = vrot.lane.b32.xlu1 %v15270_v14, %s12784_s30  ;;  %v15282_v59 = vpack.c.bf16 %v7071_v4, %v7070_v5 }
 0x7d9   : > { %v6896_v39 = vmul.f32 %v6860_v10, %v13950_v43  ;;  %v6858_v20 = vsel %vm6786_vm4, %v6668_v18, %v6822_v26  ;;  %vm6787_vm6 = vcmp.ge.f32.partialorder %v6671_v1, 0.0  ;;  %v6823_v54 = vmul.f32 %v6671_v1, %v14488_v24  ;;  %7362 = vrot.lane.b32.xlu0 %v7049_v0, %s12784_s30 }
 0x7da   : > { %v6894_v33 = vmul.f32 %v6858_v20, %v13925_v31  ;;  %v6861_v23 = vsel %vm6789_vm5, %v6679_v41, %v6825_v55  ;;  %v11715_v40 = vadd.f32 %v15209_v17, %v15104_v63  ;;  %v7050_v57 = vpack.c.bf16 %v7017_v8, %v7016_v53 }
 0x7db   : > { %6932 = vst.msk [vmem:[#allocation2 + $0x63] sm:$0xff] %vm2904_vm3, %v6896_v39  ;;  %v6897_v18 = vmul.f32 %v6861_v23, %v13954_v56  ;;  %v6859_v44 = vsel %vm6787_vm6, %v6671_v1, %v6823_v54  ;;  %v11557_v19 = vpop.f32.mrb[240].mxu1  ;;  %v7289_v16 = vld [vmem:[#allocation2 + $0x2e] sm:$0xff]  ;;  %v11716_v1 = vadd.f32 %v15209_v17, %v15106_v61 }
 0x7dc   : > { %6930 = vst.msk [vmem:[#allocation2 + $0x53] sm:$0xff] %vm2904_vm3, %v6894_v33  ;;  %v6895_v41 = vmul.f32 %v6859_v44, %v13936_v48  ;;  %v6692_v26 = vadd.f32 %v11717_v37, %v11557_v19  ;;  %v6683_v0 = vpop.f32.mrb[241].mxu1  ;;  %7416 = vrot.lane.b32.xlu1 %v15282_v59, %s12784_s30  ;;  %v7324_v63 = vpack.c.bf16 %v7289_v16, %v7288_v49  ;;  %v7072_v61 = vld [vmem:[#allocation2 + $0x32] sm:$0xff]  ;;  %v7075_v49 = vld [vmem:[#allocation2 + $0x4a] sm:$0xff] }
 0x7dd   : > { %6933 = vst.msk [vmem:[#allocation2 + $0x6b] sm:$0xff] %vm2904_vm3, %v6897_v18  ;;  %v6684_v5 = vadd.f32 %v11715_v40, %v6683_v0  ;;  %7364 = vrot.lane.b32.xlu0 %v7050_v57, %s12784_s30  ;;  %v11558_v4 = vpop.f32.mrb[242].mxu1  ;;  %v7290_v60 = vld [vmem:[#allocation2 + $0x36] sm:$0xff]  ;;  %v7291_v10 = vld [vmem:[#allocation2 + $0x3e] sm:$0xff] }
 0x7de   : > { %v7073_v55 = vld [vmem:[#allocation2 + $0x3a] sm:$0xff]  ;;  %6931 = vst.msk [vmem:[#allocation2 + $0x5b] sm:$0xff] %vm2904_vm3, %v6895_v41  ;;  %vm6792_vm7 = vcmp.ge.f32.partialorder %v6692_v26, 0.0  ;;  %v6828_v53 = vmul.f32 %v6692_v26, %v14488_v24  ;;  %v6695_v8 = vadd.f32 %v11718_v34, %v11558_v4  ;;  %v6686_v39 = vpop.f32.mrb[243].mxu1  ;;  %11587 = vmatprep.mubr.msk.bf16.mxu0 %vm2904_vm3, %v7324_v63  ;;  %v7325_v20 = vpack.c.bf16 %v7291_v10, %v7290_v60  ;;  %v7018_v40 = vld [vmem:[#allocation2 + $0x31] sm:$0xff]  ;;  %v7074_v57 = vld [vmem:[#allocation2 + $0x42] sm:$0xff] }
 0x7df   : > { %v7019_v54 = vld [vmem:[#allocation2 + $0x39] sm:$0xff]  ;;  %vm6790_vm8 = vcmp.ge.f32.partialorder %v6684_v5, 0.0  ;;  %v6826_v37 = vmul.f32 %v6684_v5, %v14488_v24  ;;  %v6687_v33 = vadd.f32 %v11716_v1, %v6686_v39  ;;  %v15302_v23 = vpack.c.bf16 %v7073_v55, %v7072_v61  ;;  %v7020_v0 = vld [vmem:[#allocation2 + $0x41] sm:$0xff]  ;;  %v7021_v63 = vld [vmem:[#allocation2 + $0x49] sm:$0xff] }
 0x7e0   : > { %v6864_v18 = vsel %vm6792_vm7, %v6692_v26, %v6828_v53  ;;  %vm6793_vm9 = vcmp.ge.f32.partialorder %v6695_v8, 0.0  ;;  %v6829_v44 = vmul.f32 %v6695_v8, %v14488_v24  ;;  %11588 = vmatmul.mubr.msk.bf16.vlgmr.msra.gmra.mrb[132].mxu0 %vm2904_vm3, %v7325_v20  ;;  %v7051_v19 = vpack.c.bf16 %v7019_v54, %v7018_v40 }
 0x7e1   : > { %v6900_v16 = vmul.f32 %v6864_v18, %v13987_v42  ;;  %v6862_v34 = vsel %vm6790_vm8, %v6684_v5, %v6826_v37  ;;  %vm6791_vm10 = vcmp.ge.f32.partialorder %v6687_v33, 0.0  ;;  %v6827_v41 = vmul.f32 %v6687_v33, %v14488_v24  ;;  %7418 = vrot.lane.b32.xlu1 %v15302_v23, %s12784_s30 }
 0x7e2   : > { %v11719_v26 = vadd.f32 %v15209_v17, %v15112_v21  ;;  %v11721_v1 = vadd.f32 %v15209_v17, %v15116_v50  ;;  %v6898_v4 = vmul.f32 %v6862_v34, %v16766_v35  ;;  %v6865_v60 = vsel %vm6793_vm9, %v6695_v8, %v6829_v44  ;;  %7366 = vrot.lane.b32.xlu0 %v7051_v19, %s12784_s30  ;;  %v7292_v21 = vld [vmem:[#allocation2 + $0x46] sm:$0xff] }
 0x7e3   : > { %v11722_v5 = vadd.f32 %v15209_v17, %v15118_v51  ;;  %6936 = vst.msk [vmem:[#allocation2 + $0x83] sm:$0xff] %vm2904_vm3, %v6900_v16  ;;  %v6901_v10 = vmul.f32 %v6865_v60, %v16767_v30  ;;  %v6863_v55 = vsel %vm6791_vm10, %v6687_v33, %v6827_v41  ;;  %v11561_v53 = vpop.f32.mrb[244].mxu1  ;;  %v15321_v39 = vpack.c.bf16 %v7075_v49, %v7074_v57  ;;  %v7293_v20 = vld [vmem:[#allocation2 + $0x4e] sm:$0xff] }
 0x7e4   : > { %6934 = vst.msk [vmem:[#allocation2 + $0x73] sm:$0xff] %vm2904_vm3, %v6898_v4  ;;  %v6899_v50 = vmul.f32 %v6863_v55, %v13975_v38  ;;  %v6708_v8 = vadd.f32 %v11721_v1, %v11561_v53  ;;  %v6699_v61 = vpop.f32.mrb[245].mxu1  ;;  %v7052_v54 = vpack.c.bf16 %v7021_v63, %v7020_v0  ;;  %v7326_v37 = vpack.c.bf16 %v7293_v20, %v7292_v21  ;;  %v7076_v34 = vld [vmem:[#allocation2 + $0x52] sm:$0xff]  ;;  %v7079_v55 = vld [vmem:[#allocation2 + $0x6a] sm:$0xff] }
 0x7e5   : > { %v11720_v51 = vadd.f32 %v15209_v17, %v15114_v7  ;;  %6937 = vst.msk [vmem:[#allocation2 + $0x8b] sm:$0xff] %vm2904_vm3, %v6901_v10  ;;  %v6700_v40 = vadd.f32 %v11719_v26, %v6699_v61  ;;  %7420 = vrot.lane.b32.xlu1 %v15321_v39, %s12784_s30  ;;  %v11562_v33 = vpop.f32.mrb[246].mxu1  ;;  %v7294_v18 = vld [vmem:[#allocation2 + $0x56] sm:$0xff]  ;;  %v7295_v44 = vld [vmem:[#allocation2 + $0x5e] sm:$0xff]  ;;  %v7025_v61 = vld [vmem:[#allocation2 + $0x69] sm:$0xff] }
 0x7e6   : > { %v7077_v19 = vld [vmem:[#allocation2 + $0x5a] sm:$0xff]  ;;  %6935 = vst.msk [vmem:[#allocation2 + $0x7b] sm:$0xff] %vm2904_vm3, %v6899_v50  ;;  %vm6796_vm11 = vcmp.ge.f32.partialorder %v6708_v8, 0.0  ;;  %v6832_v57 = vmul.f32 %v6708_v8, %v14488_v24  ;;  %7368 = vrot.lane.b32.xlu0 %v7052_v54, %s12784_s30  ;;  %v6711_v49 = vadd.f32 %v11722_v5, %v11562_v33  ;;  %v6702_v16 = vpop.f32.mrb[247].mxu1  ;;  %11591 = vmatprep.mubr.msk.bf16.mxu0 %vm2904_vm3, %v7326_v37  ;;  %v7022_v1 = vld [vmem:[#allocation2 + $0x51] sm:$0xff]  ;;  %v7078_v10 = vld [vmem:[#allocation2 + $0x62] sm:$0xff] }
 0x7e7   : > { %v7327_v7 = vpack.c.bf16 %v7295_v44, %v7294_v18  ;;  %v7023_v41 = vld [vmem:[#allocation2 + $0x59] sm:$0xff]  ;;  %vm6794_vm12 = vcmp.ge.f32.partialorder %v6700_v40, 0.0  ;;  %v6830_v0 = vmul.f32 %v6700_v40, %v14488_v24  ;;  %v6703_v63 = vadd.f32 %v11720_v51, %v6702_v16  ;;  %v7024_v50 = vld [vmem:[#allocation2 + $0x61] sm:$0xff] }
 0x7e8   : > { %v15335_v26 = vpack.c.bf16 %v7077_v19, %v7076_v34  ;;  %v6868_v4 = vsel %vm6796_vm11, %v6708_v8, %v6832_v57  ;;  %vm6797_vm13 = vcmp.ge.f32.partialorder %v6711_v49, 0.0  ;;  %v6833_v60 = vmul.f32 %v6711_v49, %v14488_v24 }
 0x7e9   : > { %11592 = vmatmul.mubr.msk.bf16.gmra.mrb[136].mxu0 %vm2904_vm3, %v7327_v7  ;;  %v7053_v5 = vpack.c.bf16 %v7023_v41, %v7022_v1  ;;  %v6904_v53 = vmul.f32 %v6868_v4, %v16774_v2  ;;  %v6866_v21 = vsel %vm6794_vm12, %v6700_v40, %v6830_v0  ;;  %vm6795_vm14 = vcmp.ge.f32.partialorder %v6703_v63, 0.0 }
 0x7ea   : > { %v6831_v20 = vmul.f32 %v6703_v63, %v14488_v24  ;;  %7422 = vrot.lane.b32.xlu1 %v15335_v26, %s12784_s30  ;;  %v11723_v8 = vadd.f32 %v15209_v17, %v15120_v22  ;;  %v11725_v54 = vadd.f32 %v15209_v17, %v15124_v28  ;;  %v6902_v37 = vmul.f32 %v6866_v21, %v16770_v27  ;;  %v7296_v22 = vld [vmem:[#allocation2 + $0x66] sm:$0xff] }
 0x7eb   : > { %v6869_v51 = vsel %vm6797_vm13, %v6711_v49, %v6833_v60  ;;  %7370 = vrot.lane.b32.xlu0 %v7053_v5, %s12784_s30  ;;  %v11726_v40 = vadd.f32 %v15209_v17, %v15126_v52  ;;  %6940 = vst.msk [vmem:[#allocation2 + $0xa3] sm:$0xff] %vm2904_vm3, %v6904_v53  ;;  %v11565_v44 = vpop.f32.mrb[248].mxu1  ;;  %v15354_v19 = vpack.c.bf16 %v7079_v55, %v7078_v10  ;;  %v7297_v57 = vld [vmem:[#allocation2 + $0x6e] sm:$0xff] }
 0x7ec   : > { %v6905_v33 = vmul.f32 %v6869_v51, %v16775_v6  ;;  %v6867_v18 = vsel %vm6795_vm14, %v6703_v63, %v6831_v20  ;;  %6938 = vst.msk [vmem:[#allocation2 + $0x93] sm:$0xff] %vm2904_vm3, %v6902_v37  ;;  %v6724_v49 = vadd.f32 %v11725_v54, %v11565_v44  ;;  %v6715_v16 = vpop.f32.mrb[249].mxu1  ;;  %v7054_v7 = vpack.c.bf16 %v7025_v61, %v7024_v50  ;;  %v7080_v55 = vld [vmem:[#allocation2 + $0x72] sm:$0xff] }
 0x7ed   : > { %v6903_v28 = vmul.f32 %v6867_v18, %v16771_v29  ;;  %v7328_v34 = vpack.c.bf16 %v7297_v57, %v7296_v22  ;;  %v11724_v52 = vadd.f32 %v15209_v17, %v15122_v13  ;;  %v6716_v41 = vadd.f32 %v11723_v8, %v6715_v16  ;;  %v11566_v0 = vpop.f32.mrb[250].mxu1  ;;  %v7298_v63 = vld [vmem:[#allocation2 + $0x76] sm:$0xff]  ;;  %v7299_v1 = vld [vmem:[#allocation2 + $0x7e] sm:$0xff] }
 0x7ee   : > { %6941 = vst.msk [vmem:[#allocation2 + $0xab] sm:$0xff] %vm2904_vm3, %v6905_v33  ;;  %7424 = vrot.lane.b32.xlu1 %v15354_v19, %s12784_s30  ;;  %v7081_v4 = vld [vmem:[#allocation2 + $0x7a] sm:$0xff]  ;;  %vm6800_vm15 = vcmp.ge.f32.partialorder %v6724_v49, 0.0  ;;  %v6836_v60 = vmul.f32 %v6724_v49, %v14488_v24  ;;  %v6727_v5 = vadd.f32 %v11726_v40, %v11566_v0  ;;  %v6718_v10 = vpop.f32.mrb[251].mxu1  ;;  %v7329_v13 = vpack.c.bf16 %v7299_v1, %v7298_v63  ;;  %v7026_v61 = vld [vmem:[#allocation2 + $0x71] sm:$0xff]  ;;  %v7082_v51 = vld [vmem:[#allocation2 + $0x82] sm:$0xff] }
 0x7ef   : > { %6939 = vst.msk [vmem:[#allocation2 + $0x9b] sm:$0xff] %vm2904_vm3, %v6903_v28  ;;  %7372 = vrot.lane.b32.xlu0 %v7054_v7, %s12784_s30  ;;  %11595 = vmatprep.mubr.msk.bf16.mxu0 %vm2904_vm3, %v7328_v34  ;;  %v7027_v53 = vld [vmem:[#allocation2 + $0x79] sm:$0xff]  ;;  %vm6798_vm0 = vcmp.ge.f32.partialorder %v6716_v41, 0.0  ;;  %v6834_v21 = vmul.f32 %v6716_v41, %v14488_v24  ;;  %v6719_v20 = vadd.f32 %v11724_v52, %v6718_v10  ;;  %v7083_v40 = vld [vmem:[#allocation2 + $0x8a] sm:$0xff]  ;;  %v7028_v57 = vld [vmem:[#allocation2 + $0x81] sm:$0xff] }
 0x7f0   : > { %v15368_v50 = vpack.c.bf16 %v7081_v4, %v7080_v55  ;;  %v6872_v8 = vsel %vm6800_vm15, %v6724_v49, %v6836_v60  ;;  %vm6801_vm1 = vcmp.ge.f32.partialorder %v6727_v5, 0.0  ;;  %v6837_v54 = vmul.f32 %v6727_v5, %v14488_v24  ;;  %v16812_v33 = vld [vmem:[#allocation13_spill] sm:$0xff]  ;;  %v16813_v7 = vld [vmem:[#allocation11_spill] sm:$0xff]  ;;  %v16814_v0 = vld [vmem:[#allocation14_spill] sm:$0xff] }
 0x7f1   : > { %11596 = vmatmul.mubr.msk.bf16.gmra.mrb[140].mxu0 %vm2904_vm3, %v7329_v13  ;;  %v7055_v37 = vpack.c.bf16 %v7027_v53, %v7026_v61  ;;  %v6908_v18 = vmul.f32 %v6872_v8, %v16812_v33  ;;  %v6870_v44 = vsel %vm6798_vm0, %v6716_v41, %v6834_v21  ;;  %vm6799_vm2 = vcmp.ge.f32.partialorder %v6719_v20, 0.0  ;;  %v7029_v28 = vld [vmem:[#allocation2 + $0x89] sm:$0xff] }
 0x7f2   : > { %v6835_v22 = vmul.f32 %v6719_v20, %v14488_v24  ;;  %7426 = vrot.lane.b32.xlu1 %v15368_v50, %s12784_s30  ;;  %v11727_v49 = vadd.f32 %v15209_v17, %v15135_v32  ;;  %v11729_v16 = vadd.f32 %v15209_v17, %v15147_v11  ;;  %v6906_v34 = vmul.f32 %v6870_v44, %v16813_v7  ;;  %v7300_v32 = vld [vmem:[#allocation2 + $0x86] sm:$0xff] }
 0x7f3   : > { %v6873_v52 = vsel %vm6801_vm1, %v6727_v5, %v6837_v54  ;;  %7374 = vrot.lane.b32.xlu0 %v7055_v37, %s12784_s30  ;;  %v11730_v41 = vadd.f32 %v15209_v17, %v15153_v3  ;;  %6944 = vst.msk [vmem:[#allocation2 + $0xc3] sm:$0xff] %vm2904_vm3, %v6908_v18  ;;  %v11569_v4 = vpop.f32.mrb[252].mxu1  ;;  %v15387_v60 = vpack.c.bf16 %v7083_v40, %v7082_v51  ;;  %v7301_v10 = vld [vmem:[#allocation2 + $0x8e] sm:$0xff] }
 0x7f4   : > { %v6909_v63 = vmul.f32 %v6873_v52, %v16814_v0  ;;  %v6871_v1 = vsel %vm6799_vm2, %v6719_v20, %v6835_v22  ;;  %6942 = vst.msk [vmem:[#allocation2 + $0xb3] sm:$0xff] %vm2904_vm3, %v6906_v34  ;;  %v16815_v11 = vld [vmem:[#allocation12_spill] sm:$0xff]  ;;  %v6740_v5 = vadd.f32 %v11729_v16, %v11569_v4  ;;  %v6731_v55 = vpop.f32.mrb[253].mxu1  ;;  %v7056_v53 = vpack.c.bf16 %v7029_v28, %v7028_v57  ;;  %v7084_v44 = vld [vmem:[#allocation2 + $0x92] sm:$0xff] }
 0x7f5   : > { %v6907_v13 = vmul.f32 %v6871_v1, %v16815_v11  ;;  %v7330_v21 = vpack.c.bf16 %v7301_v10, %v7300_v32  ;;  %v11728_v3 = vadd.f32 %v15209_v17, %v15141_v12  ;;  %v6732_v61 = vadd.f32 %v11727_v49, %v6731_v55  ;;  %v11570_v20 = vpop.f32.mrb[254].mxu1  ;;  %v7030_v16 = vld [vmem:[#allocation2 + $0x91] sm:$0xff]  ;;  %v16831_v0 = vld [vmem:[#allocation32_spill] sm:$0xff] }
 0x7f6   : > { %6945 = vst.msk [vmem:[#allocation2 + $0xcb] sm:$0xff] %vm2904_vm3, %v6909_v63  ;;  %7428 = vrot.lane.b32.xlu1 %v15387_v60, %s12784_s30  ;;  %v7302_v8 = vld [vmem:[#allocation2 + $0x96] sm:$0xff]  ;;  %v7303_v54 = vld [vmem:[#allocation2 + $0x9e] sm:$0xff]  ;;  %vm6804_vm4 = vcmp.ge.f32.partialorder %v6740_v5, 0.0  ;;  %v6840_v51 = vmul.f32 %v6740_v5, %v14488_v24  ;;  %v6743_v40 = vadd.f32 %v11730_v41, %v11570_v20  ;;  %v6734_v18 = vpop.f32.mrb[255].mxu1  ;;  %v7087_v1 = vld [vmem:[#allocation2 + $0xaa] sm:$0xff] }
 0x7f7   : > { %v7085_v37 = vld [vmem:[#allocation2 + $0x9a] sm:$0xff]  ;;  %6943 = vst.msk [vmem:[#allocation2 + $0xbb] sm:$0xff] %vm2904_vm3, %v6907_v13  ;;  %7376 = vrot.lane.b32.xlu0 %v7056_v53, %s12784_s30  ;;  %11599 = vmatprep.mubr.msk.bf16.mxu0 %vm2904_vm3, %v7330_v21  ;;  %v7331_v12 = vpack.c.bf16 %v7303_v54, %v7302_v8  ;;  %vm6802_vm5 = vcmp.ge.f32.partialorder %v6732_v61, 0.0  ;;  %v6838_v57 = vmul.f32 %v6732_v61, %v14488_v24  ;;  %v7086_v63 = vld [vmem:[#allocation2 + $0xa2] sm:$0xff]  ;;  %v16816_v4 = vld [vmem:[#allocation17_spill] sm:$0xff] }
 0x7f8   : > { %v7031_v22 = vld [vmem:[#allocation2 + $0x99] sm:$0xff]  ;;  %v6735_v28 = vadd.f32 %v11728_v3, %v6734_v18  ;;  %v15401_v49 = vpack.c.bf16 %v7085_v37, %v7084_v44  ;;  %v6876_v34 = vsel %vm6804_vm4, %v6740_v5, %v6840_v51  ;;  %vm6805_vm6 = vcmp.ge.f32.partialorder %v6743_v40, 0.0  ;;  %v7032_v55 = vld [vmem:[#allocation2 + $0xa1] sm:$0xff]  ;;  %v7033_v53 = vld [vmem:[#allocation2 + $0xa9] sm:$0xff] }
 0x7f9   : > { %v6841_v52 = vmul.f32 %v6743_v40, %v14488_v24  ;;  %11600 = vmatmul.mubr.msk.bf16.gmra.mrb[144].mxu0 %vm2904_vm3, %v7331_v12  ;;  %v7057_v41 = vpack.c.bf16 %v7031_v22, %v7030_v16  ;;  %v6912_v32 = vmul.f32 %v6876_v34, %v16816_v4  ;;  %v6874_v10 = vsel %vm6802_vm5, %v6732_v61, %v6838_v57  ;;  %v16817_v5 = vld [vmem:[#allocation4_spill] sm:$0xff]  ;;  %v16818_v3 = vld [vmem:[#allocation30_spill] sm:$0xff]  ;;  %v16819_v8 = vld [vmem:[#allocation15_spill] sm:$0xff] }
 0x7fa   : > { %vm6803_vm7 = vcmp.ge.f32.partialorder %v6735_v28, 0.0  ;;  %v6839_v13 = vmul.f32 %v6735_v28, %v14488_v24  ;;  %7430 = vrot.lane.b32.xlu1 %v15401_v49, %s12784_s30  ;;  %v11731_v21 = vadd.f32 %v15209_v17, %v16817_v5  ;;  %v11733_v20 = vadd.f32 %v15209_v17, %v16818_v3  ;;  %v16820_v61 = vld [vmem:[#allocation27_spill] sm:$0xff]  ;;  %v16821_v18 = vld [vmem:[#allocation18_spill] sm:$0xff]  ;;  %v16823_v4 = vld [vmem:[#allocation28_spill] sm:$0xff] }
 0x7fb   : > { %v6910_v54 = vmul.f32 %v6874_v10, %v16819_v8  ;;  %v6877_v37 = vsel %vm6805_vm6, %v6743_v40, %v6841_v52  ;;  %7378 = vrot.lane.b32.xlu0 %v7057_v41, %s12784_s30  ;;  %v11734_v51 = vadd.f32 %v15209_v17, %v16820_v61  ;;  %6948 = vst.msk [vmem:[#allocation2 + $0xe3] sm:$0xff] %vm2904_vm3, %v6912_v32  ;;  %v11573_v22 = vpop.f32.mrb[0].mxu1  ;;  %v7304_v16 = vld [vmem:[#allocation2 + $0xa6] sm:$0xff]  ;;  %v7305_v34 = vld [vmem:[#allocation2 + $0xae] sm:$0xff] }
 0x7fc   : > { %v6913_v12 = vmul.f32 %v6877_v37, %v16821_v18  ;;  %v6875_v44 = vsel %vm6803_vm7, %v6735_v28, %v6839_v13  ;;  %v15420_v57 = vpack.c.bf16 %v7087_v1, %v7086_v63  ;;  %v16822_v10 = vld [vmem:[#allocation16_spill] sm:$0xff]  ;;  %v6756_v40 = vadd.f32 %v11733_v20, %v11573_v22  ;;  %v6747_v52 = vpop.f32.mrb[1].mxu1  ;;  %v7034_v22 = vld [vmem:[#allocation2 + $0xb1] sm:$0xff] }
 0x7fd   : > { %6946 = vst.msk [vmem:[#allocation2 + $0xd3] sm:$0xff] %vm2904_vm3, %v6910_v54  ;;  %v6911_v5 = vmul.f32 %v6875_v44, %v16822_v10  ;;  %v7058_v41 = vpack.c.bf16 %v7033_v53, %v7032_v55  ;;  %v7332_v3 = vpack.c.bf16 %v7305_v34, %v7304_v16  ;;  %v11732_v61 = vadd.f32 %v15209_v17, %v16823_v4  ;;  %v11574_v28 = vpop.f32.mrb[2].mxu1  ;;  %v7067_v33 = vld [vmem:[#allocation2 + $0xa] sm:$0xff] }
 0x7fe   : > { %6949 = vst.msk [vmem:[#allocation2 + $0xeb] sm:$0xff] %vm2904_vm3, %v6913_v12  ;;  %v6748_v32 = vadd.f32 %v11731_v21, %v6747_v52  ;;  %7432 = vrot.lane.b32.xlu1 %v15420_v57, %s12784_s30  ;;  %v7306_v63 = vld [vmem:[#allocation2 + $0xb6] sm:$0xff]  ;;  %v7307_v1 = vld [vmem:[#allocation2 + $0xbe] sm:$0xff]  ;;  %vm6808_vm8 = vcmp.ge.f32.partialorder %v6756_v40, 0.0  ;;  %v6844_v20 = vmul.f32 %v6756_v40, %v14488_v24  ;;  %v6759_v55 = vadd.f32 %v11734_v51, %v11574_v28  ;;  %v6750_v53 = vpop.f32.mrb[3].mxu1  ;;  %v7091_v52 = vld [vmem:[#allocation2 + $0xca] sm:$0xff] }
 0x7ff   : > { %v7089_v13 = vld [vmem:[#allocation2 + $0xba] sm:$0xff]  ;;  %6947 = vst.msk [vmem:[#allocation2 + $0xdb] sm:$0xff] %vm2904_vm3, %v6911_v5  ;;  %7380 = vrot.lane.b32.xlu0 %v7058_v41, %s12784_s30  ;;  %11603 = vmatprep.mubr.msk.bf16.mxu0 %vm2904_vm3, %v7332_v3  ;;  %v7333_v4 = vpack.c.bf16 %v7307_v1, %v7306_v63  ;;  %v7088_v21 = vld [vmem:[#allocation2 + $0xb2] sm:$0xff]  ;;  %v6751_v12 = vadd.f32 %v11732_v61, %v6750_v53  ;;  %v7090_v5 = vld [vmem:[#allocation2 + $0xc2] sm:$0xff] }
 0x800   : > { %v7035_v54 = vld [vmem:[#allocation2 + $0xb9] sm:$0xff]  ;;  %vm6806_vm9 = vcmp.ge.f32.partialorder %v6748_v32, 0.0  ;;  %v6842_v37 = vmul.f32 %v6748_v32, %v14488_v24  ;;  %v15434_v44 = vpack.c.bf16 %v7089_v13, %v7088_v21  ;;  %v6880_v16 = vsel %vm6808_vm8, %v6756_v40, %v6844_v20  ;;  %v16824_v41 = vld [vmem:[#allocation21_spill] sm:$0xff]  ;;  %v7036_v61 = vld [vmem:[#allocation2 + $0xc1] sm:$0xff] }
 0x801   : > { %vm6809_vm10 = vcmp.ge.f32.partialorder %v6759_v55, 0.0  ;;  %v6845_v34 = vmul.f32 %v6759_v55, %v14488_v24  ;;  %11604 = vmatmul.mubr.msk.bf16.gmra.mrb[148].mxu0 %vm2904_vm3, %v7333_v4  ;;  %v7059_v51 = vpack.c.bf16 %v7035_v54, %v7034_v22  ;;  %v6916_v3 = vmul.f32 %v6880_v16, %v16824_v41  ;;  %v7037_v1 = vld [vmem:[#allocation2 + $0xc9] sm:$0xff]  ;;  %v16826_v20 = vld [vmem:[#allocation34_spill] sm:$0xff]  ;;  %v16827_v4 = vld [vmem:[#allocation19_spill] sm:$0xff] }
 0x802   : > { %v6878_v28 = vsel %vm6806_vm9, %v6748_v32, %v6842_v37  ;;  %vm6807_vm11 = vcmp.ge.f32.partialorder %v6751_v12, 0.0  ;;  %v6843_v63 = vmul.f32 %v6751_v12, %v14488_v24  ;;  %7434 = vrot.lane.b32.xlu1 %v15434_v44, %s12784_s30  ;;  %v16825_v40 = vld [vmem:[#allocation29_spill] sm:$0xff]  ;;  %v11737_v53 = vadd.f32 %v15209_v17, %v16826_v20  ;;  %v16828_v32 = vld [vmem:[#allocation31_spill] sm:$0xff]  ;;  %v16829_v22 = vld [vmem:[#allocation22_spill] sm:$0xff] }
 0x803   : > { %v11735_v13 = vadd.f32 %v15209_v17, %v16825_v40  ;;  %v6914_v21 = vmul.f32 %v6878_v28, %v16827_v4  ;;  %v6881_v54 = vsel %vm6809_vm10, %v6759_v55, %v6845_v34  ;;  %7382 = vrot.lane.b32.xlu0 %v7059_v51, %s12784_s30  ;;  %v11738_v37 = vadd.f32 %v15209_v17, %v16828_v32  ;;  %v11577_v18 = vpop.f32.mrb[4].mxu1  ;;  %v7308_v40 = vld [vmem:[#allocation2 + $0xc6] sm:$0xff] }
 0x804   : > { %6952 = vst.msk [vmem:[#allocation2 + $0x103] sm:$0xff] %vm2904_vm3, %v6916_v3  ;;  %v6917_v16 = vmul.f32 %v6881_v54, %v16829_v22  ;;  %v6879_v41 = vsel %vm6807_vm11, %v6751_v12, %v6843_v63  ;;  %v15453_v10 = vpack.c.bf16 %v7091_v52, %v7090_v5  ;;  %v7309_v8 = vld [vmem:[#allocation2 + $0xce] sm:$0xff]  ;;  %v6772_v55 = vadd.f32 %v11737_v53, %v11577_v18  ;;  %v6763_v34 = vpop.f32.mrb[5].mxu1  ;;  %v7199_v11 = vld [vmem:[#allocation2 + $0xc4] sm:$0xff] }
 0x805   : > { %6950 = vst.msk [vmem:[#allocation2 + $0xf3] sm:$0xff] %vm2904_vm3, %v6914_v21  ;;  %v16830_v28 = vld [vmem:[#allocation20_spill] sm:$0xff]  ;;  %v7060_v51 = vpack.c.bf16 %v7037_v1, %v7036_v61  ;;  %v7334_v4 = vpack.c.bf16 %v7309_v8, %v7308_v40  ;;  %v11736_v32 = vadd.f32 %v15209_v17, %v16831_v0  ;;  %v6764_v3 = vadd.f32 %v11735_v13, %v6763_v34  ;;  %v11578_v12 = vpop.f32.mrb[6].mxu1  ;;  %v7092_v0 = vld [vmem:[#allocation2 + $0xd2] sm:$0xff] }
 0x806   : > { %v6915_v20 = vmul.f32 %v6879_v41, %v16830_v28  ;;  %6953 = vst.msk [vmem:[#allocation2 + $0x10b] sm:$0xff] %vm2904_vm3, %v6917_v16  ;;  %7436 = vrot.lane.b32.xlu1 %v15453_v10, %s12784_s30  ;;  %v7310_v5 = vld [vmem:[#allocation2 + $0xd6] sm:$0xff]  ;;  %v7311_v52 = vld [vmem:[#allocation2 + $0xde] sm:$0xff]  ;;  %vm6812_vm12 = vcmp.ge.f32.partialorder %v6772_v55, 0.0  ;;  %v6848_v18 = vmul.f32 %v6772_v55, %v14488_v24  ;;  %v6775_v8 = vadd.f32 %v11738_v37, %v11578_v12  ;;  %v6766_v41 = vpop.f32.mrb[7].mxu1 }
 0x807   : > { %v7093_v63 = vld [vmem:[#allocation2 + $0xda] sm:$0xff]  ;;  %7384 = vrot.lane.b32.xlu0 %v7060_v51, %s12784_s30  ;;  %11607 = vmatprep.mubr.msk.bf16.mxu0 %vm2904_vm3, %v7334_v4  ;;  %v7335_v17 = vpack.c.bf16 %v7311_v52, %v7310_v5  ;;  %vm6810_vm13 = vcmp.ge.f32.partialorder %v6764_v3, 0.0  ;;  %v6846_v1 = vmul.f32 %v6764_v3, %v14488_v24  ;;  %v6767_v13 = vadd.f32 %v11736_v32, %v6766_v41  ;;  %v7038_v21 = vld [vmem:[#allocation2 + $0xd1] sm:$0xff]  ;;  %v7094_v40 = vld [vmem:[#allocation2 + $0xe2] sm:$0xff] }
 0x808   : > { %6951 = vst.msk [vmem:[#allocation2 + $0xfb] sm:$0xff] %vm2904_vm3, %v6915_v20  ;;  %v7039_v61 = vld [vmem:[#allocation2 + $0xd9] sm:$0xff]  ;;  %v15467_v53 = vpack.c.bf16 %v7093_v63, %v7092_v0  ;;  %v6884_v54 = vsel %vm6812_vm12, %v6772_v55, %v6848_v18  ;;  %vm6813_vm14 = vcmp.ge.f32.partialorder %v6775_v8, 0.0  ;;  %v6849_v16 = vmul.f32 %v6775_v8, %v14488_v24  ;;  %v7095_v20 = vld [vmem:[#allocation2 + $0xea] sm:$0xff]  ;;  %v7040_v32 = vld [vmem:[#allocation2 + $0xe1] sm:$0xff] }
 0x809   : > { %11608 = vmatmul.mubr.msk.bf16.gmra.mrb[152].mxu0 %vm2904_vm3, %v7335_v17  ;;  %v7061_v37 = vpack.c.bf16 %v7039_v61, %v7038_v21  ;;  %v16832_v4 = vld [vmem:[#allocation25_spill] sm:$0xff]  ;;  %v6882_v51 = vsel %vm6810_vm13, %v6764_v3, %v6846_v1  ;;  %vm6811_vm15 = vcmp.ge.f32.partialorder %v6767_v13, 0.0  ;;  %v6847_v12 = vmul.f32 %v6767_v13, %v14488_v24  ;;  %v16833_v55 = vld [vmem:[#allocation23_spill] sm:$0xff]  ;;  %v16834_v18 = vld [vmem:[#allocation26_spill] sm:$0xff] }
 0x80a   : > { %v6920_v34 = vmul.f32 %v6884_v54, %v16832_v4  ;;  %7438 = vrot.lane.b32.xlu1 %v15467_v53, %s12784_s30  ;;  %v7041_v5 = vld [vmem:[#allocation2 + $0xe9] sm:$0xff]  ;;  %v6918_v52 = vmul.f32 %v6882_v51, %v16833_v55  ;;  %v6885_v63 = vsel %vm6813_vm14, %v6775_v8, %v6849_v16  ;;  %v15479_v0 = vpack.c.bf16 %v7095_v20, %v7094_v40  ;;  %v7253_v55 = vld [vmem:[#allocation2 + $0xbd] sm:$0xff]  ;;  %v7197_v28 = vld [vmem:[#allocation2 + $0xb4] sm:$0xff] }
 0x80b   : > { %7386 = vrot.lane.b32.xlu0 %v7061_v37, %s12784_s30  ;;  %v6921_v41 = vmul.f32 %v6885_v63, %v16834_v18  ;;  %v6883_v17 = vsel %vm6811_vm15, %v6767_v13, %v6847_v12  ;;  %v7312_v3 = vld [vmem:[#allocation2 + $0xe6] sm:$0xff]  ;;  %v7062_v54 = vpack.c.bf16 %v7041_v5, %v7040_v32  ;;  %v7249_v18 = vld [vmem:[#allocation2 + $0x9d] sm:$0xff] }
 0x80c   : > { %6956 = vst.msk [vmem:[#allocation2 + $0x123] sm:$0xff] %vm2904_vm3, %v6920_v34  ;;  %v7313_v61 = vld [vmem:[#allocation2 + $0xee] sm:$0xff]  ;;  %6954 = vst.msk [vmem:[#allocation2 + $0x113] sm:$0xff] %vm2904_vm3, %v6918_v52  ;;  %v7202_v2 = vld [vmem:[#allocation2 + $0xdc] sm:$0xff] }
 0x80d   : > { %v16835_v1 = vld [vmem:[#allocation24_spill] sm:$0xff]  ;;  %v7336_v4 = vpack.c.bf16 %v7313_v61, %v7312_v3  ;;  %v7096_v22 = vld [vmem:[#allocation2 + $0xf2] sm:$0xff]  ;;  %6957 = vst.msk [vmem:[#allocation2 + $0x12b] sm:$0xff] %vm2904_vm3, %v6921_v41 }
 0x80e   : > { %v6919_v21 = vmul.f32 %v6883_v17, %v16835_v1  ;;  %7440 = vrot.lane.b32.xlu1 %v15479_v0, %s12784_s30  ;;  %v7042_v20 = vld [vmem:[#allocation2 + $0xf1] sm:$0xff]  ;;  %v7045_v52 = vld [vmem:[#allocation2 + $0x109] sm:$0xff] }
 0x80f   : > { %v7314_v8 = vld [vmem:[#allocation2 + $0xf6] sm:$0xff]  ;;  %v7315_v16 = vld [vmem:[#allocation2 + $0xfe] sm:$0xff]  ;;  %7388 = vrot.lane.b32.xlu0 %v7062_v54, %s12784_s30  ;;  %11611 = vmatprep.mubr.msk.bf16.mxu0 %vm2904_vm3, %v7336_v4  ;;  %v7099_v32 = vld [vmem:[#allocation2 + $0x10a] sm:$0xff] }
 0x810   : > { %v7097_v37 = vld [vmem:[#allocation2 + $0xfa] sm:$0xff]  ;;  %6955 = vst.msk [vmem:[#allocation2 + $0x11b] sm:$0xff] %vm2904_vm3, %v6919_v21  ;;  %v7337_v13 = vpack.c.bf16 %v7315_v16, %v7314_v8  ;;  %v7098_v12 = vld [vmem:[#allocation2 + $0x102] sm:$0xff] }
 0x811   : > { %v15489_v40 = vpack.c.bf16 %v7097_v37, %v7096_v22  ;;  %v7043_v34 = vld [vmem:[#allocation2 + $0xf9] sm:$0xff]  ;;  %v7044_v5 = vld [vmem:[#allocation2 + $0x101] sm:$0xff]  ;;  %v15495_v63 = vpack.c.bf16 %v7099_v32, %v7098_v12 }
 0x812   : > { %v7063_v51 = vpack.c.bf16 %v7043_v34, %v7042_v20  ;;  %11612 = vmatmul.mubr.msk.bf16.gmra.mrb[156].mxu0 %vm2904_vm3, %v7337_v13  ;;  %v7316_v4 = vld [vmem:[#allocation2 + $0x106] sm:$0xff]  ;;  %v7064_v22 = vpack.c.bf16 %v7045_v52, %v7044_v5  ;;  %v7177_v52 = vld [vmem:[#allocation2 + $0x14] sm:$0xff] }
 0x813   : > { %7442 = vrot.lane.b32.xlu1 %v15489_v40, %s12784_s30  ;;  %v7317_v41 = vld [vmem:[#allocation2 + $0x10e] sm:$0xff] }
 0x814   : > { %7390 = vrot.lane.b32.xlu0 %v7063_v51, %s12784_s30  ;;  %v7338_v17 = vpack.c.bf16 %v7317_v41, %v7316_v4  ;;  %v7100_v3 = vld [vmem:[#allocation2 + $0x112] sm:$0xff]  ;;  %v7320_v61 = vld [vmem:[#allocation2 + $0x126] sm:$0xff]  ;;  %v7178_v4 = vld [vmem:[#allocation2 + $0x1c] sm:$0xff] }
 0x815   : > { %v7321_v21 = vld [vmem:[#allocation2 + $0x12e] sm:$0xff] }
 0x816   : > { %11615 = vmatprep.mubr.msk.bf16.mxu0 %vm2904_vm3, %v7338_v17  ;;  %v7046_v20 = vld [vmem:[#allocation2 + $0x111] sm:$0xff]  ;;  %v7340_v12 = vpack.c.bf16 %v7321_v21, %v7320_v61  ;;  %v7234_v61 = vld [vmem:[#allocation2 + $0x25] sm:$0xff] }
 0x817   : > { %7444 = vrot.lane.b32.xlu1 %v15495_v63, %s12784_s30  ;;  %v7318_v54 = vld [vmem:[#allocation2 + $0x116] sm:$0xff]  ;;  %v7319_v8 = vld [vmem:[#allocation2 + $0x11e] sm:$0xff]  ;;  %v7121_v5 = vld [vmem:[#allocation2 + $0x12a] sm:$0xff] }
 0x818   : > { %v7101_v16 = vld [vmem:[#allocation2 + $0x11a] sm:$0xff]  ;;  %7392 = vrot.lane.b32.xlu0 %v7064_v22, %s12784_s30  ;;  %v7339_v37 = vpack.c.bf16 %v7319_v8, %v7318_v54  ;;  %v7120_v32 = vld [vmem:[#allocation2 + $0x122] sm:$0xff]  ;;  %v7213_v22 = vpack.c.bf16 %v7178_v4, %v7177_v52  ;;  %v7235_v17 = vld [vmem:[#allocation2 + $0x2d] sm:$0xff] }
 0x819   : > { %v15501_v13 = vpack.c.bf16 %v7101_v16, %v7100_v3  ;;  %v7047_v34 = vld [vmem:[#allocation2 + $0x119] sm:$0xff]  ;;  %v7122_v41 = vpack.c.bf16 %v7121_v5, %v7120_v32  ;;  %v7180_v3 = vld [vmem:[#allocation2 + $0x2c] sm:$0xff]  ;;  %v7270_v21 = vpack.c.bf16 %v7235_v17, %v7234_v61  ;;  %v7179_v54 = vld [vmem:[#allocation2 + $0x24] sm:$0xff] }
 0x81a   : > { %v7065_v51 = vpack.c.bf16 %v7047_v34, %v7046_v20  ;;  %11616 = vmatmul.mubr.msk.bf16.gmra.mrb[160].mxu0 %vm2904_vm3, %v7339_v37  ;;  %v15510_v8 = vpack.c.bf16 %v7180_v3, %v7179_v54  ;;  %v7236_v16 = vld [vmem:[#allocation2 + $0x35] sm:$0xff]  ;;  %v7237_v37 = vld [vmem:[#allocation2 + $0x3d] sm:$0xff]  ;;  %v7239_v32 = vld [vmem:[#allocation2 + $0x4d] sm:$0xff] }
 0x81b   : > { %7446 = vrot.lane.b32.xlu1 %v15501_v13, %s12784_s30  ;;  %11619 = vmatprep.mubr.msk.bf16.mxu0 %vm2904_vm3, %v7340_v12  ;;  %v7181_v20 = vld [vmem:[#allocation2 + $0x34] sm:$0xff]  ;;  %v7182_v34 = vld [vmem:[#allocation2 + $0x3c] sm:$0xff]  ;;  %v7184_v5 = vld [vmem:[#allocation2 + $0x4c] sm:$0xff] }
 0x81c   : > { %7394 = vrot.lane.b32.xlu0 %v7065_v51, %s12784_s30  ;;  %v7271_v51 = vpack.c.bf16 %v7237_v37, %v7236_v16  ;;  %v15515_v12 = vpack.c.bf16 %v7182_v34, %v7181_v20  ;;  %v7238_v52 = vld [vmem:[#allocation2 + $0x45] sm:$0xff]  ;;  %v7240_v17 = vld [vmem:[#allocation2 + $0x55] sm:$0xff]  ;;  %v7241_v3 = vld [vmem:[#allocation2 + $0x5d] sm:$0xff] }
 0x81d   : > { %v7272_v4 = vpack.c.bf16 %v7239_v32, %v7238_v52  ;;  %v7185_v61 = vld [vmem:[#allocation2 + $0x54] sm:$0xff]  ;;  %v7273_v54 = vpack.c.bf16 %v7241_v3, %v7240_v17  ;;  %v7188_v20 = vld [vmem:[#allocation2 + $0x6c] sm:$0xff]  ;;  %v7187_v32 = vld [vmem:[#allocation2 + $0x64] sm:$0xff] }
 0x81e   : > { %v7243_v37 = vld [vmem:[#allocation2 + $0x6d] sm:$0xff]  ;;  %v7242_v34 = vld [vmem:[#allocation2 + $0x65] sm:$0xff]  ;;  %v7244_v52 = vld [vmem:[#allocation2 + $0x75] sm:$0xff] }
 0x81f   : > { %7448 = vrot.lane.b32.xlu1 %v7122_v41, %s12784_s30  ;;  %v7183_v41 = vld [vmem:[#allocation2 + $0x44] sm:$0xff]  ;;  %v7190_v17 = vld [vmem:[#allocation2 + $0x7c] sm:$0xff]  ;;  %v7193_v1 = vld [vmem:[#allocation2 + $0x94] sm:$0xff] }
 0x820   : > { %7468 = vrot.lane.b32.xlu0 %v7213_v22, %s12784_s30  ;;  %v15520_v22 = vpack.c.bf16 %v7184_v5, %v7183_v41  ;;  %v15530_v5 = vpack.c.bf16 %v7188_v20, %v7187_v32  ;;  %v7189_v41 = vld [vmem:[#allocation2 + $0x74] sm:$0xff] }
 0x821   : > { %v7267_v30 = vld [vmem:[#allocation2 + $0x12d] sm:$0xff] }
 0x823   : > { %7522 = vrot.lane.b32.xlu1 %v7270_v21, %s12784_s30  ;;  %v7186_v21 = vld [vmem:[#allocation2 + $0x5c] sm:$0xff] }
 0x824   : > { %7470 = vrot.lane.b32.xlu0 %v15510_v8, %s12784_s30  ;;  %v15525_v16 = vpack.c.bf16 %v7186_v21, %v7185_v61  ;;  %v15535_v61 = vpack.c.bf16 %v7190_v17, %v7189_v41  ;;  %v7247_v21 = vld [vmem:[#allocation2 + $0x8d] sm:$0xff] }
 0x825   : > { %v7251_v17 = vld [vmem:[#allocation2 + $0xad] sm:$0xff] }
 0x827   : > { %7524 = vrot.lane.b32.xlu1 %v7271_v51, %s12784_s30  ;;  %v7274_v51 = vpack.c.bf16 %v7243_v37, %v7242_v34  ;;  %v7246_v37 = vld [vmem:[#allocation2 + $0x85] sm:$0xff] }
 0x828   : > { %7472 = vrot.lane.b32.xlu0 %v15515_v12, %s12784_s30  ;;  %v7276_v20 = vpack.c.bf16 %v7247_v21, %v7246_v37  ;;  %v7191_v34 = vld [vmem:[#allocation2 + $0x84] sm:$0xff] }
 0x829   : > { %v7250_v21 = vld [vmem:[#allocation2 + $0xa5] sm:$0xff] }
 0x82a   : > { %v7195_v37 = vld [vmem:[#allocation2 + $0xa4] sm:$0xff] }
 0x82b   : > { %7526 = vrot.lane.b32.xlu1 %v7272_v4, %s12784_s30  ;;  %v7245_v4 = vld [vmem:[#allocation2 + $0x7d] sm:$0xff] }
 0x82c   : > { %7474 = vrot.lane.b32.xlu0 %v15520_v22, %s12784_s30  ;;  %v7275_v3 = vpack.c.bf16 %v7245_v4, %v7244_v52  ;;  %v7194_v52 = vld [vmem:[#allocation2 + $0x9c] sm:$0xff] }
 0x82d   : > { %v15545_v41 = vpack.c.bf16 %v7194_v52, %v7193_v1  ;;  %v7255_v52 = vld [vmem:[#allocation2 + $0xcd] sm:$0xff] }
 0x82f   : > { %7528 = vrot.lane.b32.xlu1 %v7273_v54, %s12784_s30  ;;  %v7192_v54 = vld [vmem:[#allocation2 + $0x8c] sm:$0xff] }
 0x830   : > { %7476 = vrot.lane.b32.xlu0 %v15525_v16, %s12784_s30  ;;  %v15540_v32 = vpack.c.bf16 %v7192_v54, %v7191_v34  ;;  %v7278_v54 = vpack.c.bf16 %v7251_v17, %v7250_v21  ;;  %v7200_v17 = vld [vmem:[#allocation2 + $0xcc] sm:$0xff] }
 0x831   : > { %v15560_v6 = vpack.c.bf16 %v7200_v17, %v7199_v11  ;;  %v7259_v17 = vld [vmem:[#allocation2 + $0xed] sm:$0xff] }
 0x833   : > { %7530 = vrot.lane.b32.xlu1 %v7274_v51, %s12784_s30  ;;  %v7248_v51 = vld [vmem:[#allocation2 + $0x95] sm:$0xff] }
 0x834   : > { %7478 = vrot.lane.b32.xlu0 %v15530_v5, %s12784_s30  ;;  %v7277_v4 = vpack.c.bf16 %v7249_v18, %v7248_v51  ;;  %v7198_v18 = vld [vmem:[#allocation2 + $0xbc] sm:$0xff] }
 0x835   : > { %v15555_v51 = vpack.c.bf16 %v7198_v18, %v7197_v28  ;;  %v7257_v28 = vld [vmem:[#allocation2 + $0xdd] sm:$0xff]  ;;  %v7201_v18 = vld [vmem:[#allocation2 + $0xd4] sm:$0xff] }
 0x837   : > { %7532 = vrot.lane.b32.xlu1 %v7275_v3, %s12784_s30  ;;  %v7196_v3 = vld [vmem:[#allocation2 + $0xac] sm:$0xff] }
 0x838   : > { %7480 = vrot.lane.b32.xlu0 %v15535_v61, %s12784_s30  ;;  %v15550_v34 = vpack.c.bf16 %v7196_v3, %v7195_v37  ;;  %v12772_v3 = vld [vmem:[#allocation2] sm:$0xff] }
 0x839   : > { %v6994_v21 = vpack.c.bf16 %v12772_v3, %v12772_v3  ;;  %v7204_v3 = vld [vmem:[#allocation2 + $0xec] sm:$0xff] }
 0x83b   : > { %7534 = vrot.lane.b32.xlu1 %v7276_v20, %s12784_s30  ;;  %v7252_v20 = vld [vmem:[#allocation2 + $0xb5] sm:$0xff] }
 0x83c   : > { %7482 = vrot.lane.b32.xlu0 %v15540_v32, %s12784_s30  ;;  %v7279_v1 = vpack.c.bf16 %v7253_v55, %v7252_v20  ;;  %v7256_v55 = vld [vmem:[#allocation2 + $0xd5] sm:$0xff]  ;;  %v7361_v20 = vpop.permute.xlu0 %7360 }
 0x83f   : > { %7536 = vrot.lane.b32.xlu1 %v7277_v4, %s12784_s30  ;;  %v7066_v4 = vld [vmem:[#allocation2 + $0x2] sm:$0xff] }
 0x840   : > { %7484 = vrot.lane.b32.xlu0 %v15545_v41, %s12784_s30  ;;  %v7102_v7 = vpack.c.bf16 %v7067_v33, %v7066_v4  ;;  %v7281_v33 = vpack.c.bf16 %v7257_v28, %v7256_v55  ;;  %v15570_v4 = vpack.c.bf16 %v7202_v2, %v7201_v18  ;;  %v6961_v55 = vld [vmem:[#allocation2 + $0x18] sm:$0xff] }
 0x841   : > { %v7261_v18 = vld [vmem:[#allocation2 + $0xfd] sm:$0xff] }
 0x843   : > { %7538 = vrot.lane.b32.xlu1 %v7278_v54, %s12784_s30  ;;  %v7254_v54 = vld [vmem:[#allocation2 + $0xc5] sm:$0xff] }
 0x844   : > { %7486 = vrot.lane.b32.xlu0 %v15550_v34, %s12784_s30  ;;  %v7280_v37 = vpack.c.bf16 %v7255_v52, %v7254_v54  ;;  %v12718_v52 = vld [vmem:[%s16663_s7 + $0x80] sm:$0xff]  }
 0x845   : > { %v7258_v54 = vld [vmem:[#allocation2 + $0xe5] sm:$0xff] }
 0x847   : > { %7540 = vrot.lane.b32.xlu1 %v7279_v1, %s12784_s30  ;;  %v7560_v1 = vsel %vm2904_vm3, %v6994_v21, %v7361_v20  ;;  %v7260_v20 = vld [vmem:[#allocation2 + $0xf5] sm:$0xff] }
 0x848   : > { %7488 = vrot.lane.b32.xlu0 %v15555_v51, %s12784_s30 }
 0x84a   : > { %v7415_v29 = vpop.permute.xlu1 %7414 }
 0x84b   : > { %7542 = vrot.lane.b32.xlu1 %v7280_v37, %s12784_s30  ;;  %v7632_v11 = vsel %vm2904_vm3, %v7102_v7, %v7415_v29  ;;  %v12719_v37 = vld [vmem:[%s16663_s7 + $0x88] sm:$0xff]   ;;  %v7282_v29 = vpack.c.bf16 %v7259_v17, %v7258_v54  ;;  %v7283_v17 = vpack.c.bf16 %v7261_v18, %v7260_v20 }
 0x84c   : > { %7490 = vrot.lane.b32.xlu0 %v15560_v6, %s12784_s30  ;;  %8227 = vmatprep.mubr.bf16.mxu1 %v7632_v11  ;;  %v7203_v7 = vld [vmem:[#allocation2 + $0xe4] sm:$0xff]  ;;  %v7206_v11 = vld [vmem:[#allocation2 + $0xfc] sm:$0xff] }
 0x84d   : > { %8228 = vmatmul.mubr.bf16.vlgmr.msra.gmra.mrb[8].mxu1 %v7560_v1  ;;  %v15581_v28 = vpack.c.bf16 %v7204_v3, %v7203_v7  ;;  %v7363_v1 = vpop.permute.xlu0 %7362  ;;  %v12720_v3 = vld [vmem:[%s16663_s7 + $0x90] sm:$0xff]   ;;  %v7262_v7 = vld [vmem:[#allocation2 + $0x105] sm:$0xff] }
 0x84e   : > { %8373 = vmatpush1.bf16.msra.mxu1 %v12718_v52  ;;  %v7417_v21 = vpop.permute.xlu1 %7416  ;;  %v6960_v52 = vld [vmem:[#allocation2 + $0x10] sm:$0xff]  ;;  %v6963_v20 = vld [vmem:[#allocation2 + $0x28] sm:$0xff] }
 0x84f   : > { %7544 = vrot.lane.b32.xlu1 %v7281_v33, %s12784_s30  ;;  %v7636_v2 = vsel %vm2904_vm3, %v15270_v14, %v7417_v21  ;;  %8374 = vmatprep.subr.bf16.mxu1 %v16747_v58  ;;  %v7205_v33 = vld [vmem:[#allocation2 + $0xf4] sm:$0xff]  ;;  %v6995_v27 = vpack.c.bf16 %v6961_v55, %v6960_v52  ;;  %v7207_v52 = vld [vmem:[#allocation2 + $0x104] sm:$0xff] }
 0x850   : > { %7492 = vrot.lane.b32.xlu0 %v15570_v4, %s12784_s30  ;;  %8235 = vmatprep.mubr.bf16.mxu1 %v7636_v2  ;;  %v15591_v54 = vpack.c.bf16 %v7206_v11, %v7205_v33  ;;  %v6962_v2 = vld [vmem:[#allocation2 + $0x20] sm:$0xff]  ;;  %v7264_v33 = vld [vmem:[#allocation2 + $0x115] sm:$0xff] }
 0x851   : > { %v7564_v21 = vsel %vm2904_vm3, %v6995_v27, %v7363_v1  ;;  %v12721_v27 = vld [vmem:[%s16663_s7 + $0x98] sm:$0xff]  }
 0x852   : > { %8375 = vmatpush1.bf16.msra.mxu1 %v12719_v37  ;;  %v7208_v37 = vld [vmem:[#allocation2 + $0x10c] sm:$0xff]  ;;  %v7265_v11 = vld [vmem:[#allocation2 + $0x11d] sm:$0xff] }
 0x853   : > { %7546 = vrot.lane.b32.xlu1 %v7282_v29, %s12784_s30  ;;  %v7419_v14 = vpop.permute.xlu1 %7418  ;;  %8376 = vmatprep.subr.bf16.mxu1 %v16747_v58  ;;  %v7263_v29 = vld [vmem:[#allocation2 + $0x10d] sm:$0xff]  ;;  %v15601_v1 = vpack.c.bf16 %v7208_v37, %v7207_v52  ;;  %v7266_v52 = vld [vmem:[#allocation2 + $0x125] sm:$0xff] }
 0x854   : > { %7494 = vrot.lane.b32.xlu0 %v15581_v28, %s12784_s30  ;;  %v7640_v55 = vsel %vm2904_vm3, %v15282_v59, %v7419_v14  ;;  %v7284_v18 = vpack.c.bf16 %v7263_v29, %v7262_v7  ;;  %v7365_v59 = vpop.permute.xlu0 %7364  ;;  %v7209_v14 = vld [vmem:[#allocation2 + $0x114] sm:$0xff]  ;;  %v12722_v29 = vld [vmem:[%s16663_s7 + $0xa0] sm:$0xff]  }
 0x855   : > { %8236 = vmatmul.mubr.bf16.gmra.mrb[12].mxu1 %v7564_v21  ;;  %v6996_v21 = vpack.c.bf16 %v6963_v20, %v6962_v2  ;;  %v7211_v20 = vld [vmem:[#allocation2 + $0x124] sm:$0xff] }
 0x856   : > { %8243 = vmatprep.mubr.bf16.mxu1 %v7640_v55  ;;  %8377 = vmatpush1.bf16.msra.mxu1 %v12720_v3  ;;  %v7285_v3 = vpack.c.bf16 %v7265_v11, %v7264_v33  ;;  %v7286_v33 = vpack.c.bf16 %v7267_v30, %v7266_v52  ;;  %v12723_v11 = vld [vmem:[%s16663_s7 + $0xa8] sm:$0xff]   ;;  %v12724_v30 = vld [vmem:[%s16663_s7 + $0xb0] sm:$0xff]   ;;  %v12725_v52 = vld [vmem:[%s16663_s7 + $0xb8] sm:$0xff]  }
 0x857   : > { %7548 = vrot.lane.b32.xlu1 %v7283_v17, %s12784_s30  ;;  %8378 = vmatprep.subr.bf16.mxu1 %v16747_v58  ;;  %v7210_v17 = vld [vmem:[#allocation2 + $0x11c] sm:$0xff]  ;;  %v7421_v55 = vpop.permute.xlu1 %7420  ;;  %v7568_v37 = vsel %vm2904_vm3, %v6996_v21, %v7365_v59 }
 0x858   : > { %7496 = vrot.lane.b32.xlu0 %v15591_v54, %s12784_s30  ;;  %v15611_v7 = vpack.c.bf16 %v7210_v17, %v7209_v14  ;;  %v7644_v2 = vsel %vm2904_vm3, %v15302_v23, %v7421_v55  ;;  %v6964_v14 = vld [vmem:[#allocation2 + $0x30] sm:$0xff]  ;;  %v7367_v17 = vpop.permute.xlu0 %7366 }
 0x85a   : > { %8379 = vmatpush1.bf16.msra.mxu1 %v12721_v27  ;;  %v6965_v27 = vld [vmem:[#allocation2 + $0x38] sm:$0xff] }
 0x85b   : > { %7550 = vrot.lane.b32.xlu1 %v7284_v18, %s12784_s30  ;;  %8380 = vmatprep.subr.bf16.mxu1 %v16747_v58  ;;  %v7212_v18 = vld [vmem:[#allocation2 + $0x12c] sm:$0xff]  ;;  %v6997_v23 = vpack.c.bf16 %v6965_v27, %v6964_v14  ;;  %v12726_v27 = vld [vmem:[%s16663_s7 + $0xc0] sm:$0xff]  }
 0x85c   : > { %7498 = vrot.lane.b32.xlu0 %v15601_v1, %s12784_s30  ;;  %v15622_v59 = vpack.c.bf16 %v7212_v18, %v7211_v20  ;;  %v7423_v21 = vpop.permute.xlu1 %7422  ;;  %v7269_v14 = vld [vmem:[#allocation2 + $0x13d] sm:$0xff] }
 0x85d   : > { %8244 = vmatmul.mubr.bf16.gmra.mrb[16].mxu1 %v7568_v37  ;;  %v7572_v55 = vsel %vm2904_vm3, %v6997_v23, %v7367_v17  ;;  %v6967_v37 = vld [vmem:[#allocation2 + $0x48] sm:$0xff]  ;;  %v6969_v17 = vld [vmem:[#allocation2 + $0x58] sm:$0xff] }
 0x85e   : > { %8251 = vmatprep.mubr.bf16.mxu1 %v7644_v2  ;;  %8381 = vmatpush1.bf16.msra.mxu1 %v12722_v29  ;;  %v6966_v29 = vld [vmem:[#allocation2 + $0x40] sm:$0xff]  ;;  %v7369_v2 = vpop.permute.xlu0 %7368  ;;  %v12727_v23 = vld [vmem:[%s16663_s7 + $0xc8] sm:$0xff]  }
 0x85f   : > { %7552 = vrot.lane.b32.xlu1 %v7285_v3, %s12784_s30  ;;  %8382 = vmatprep.subr.bf16.mxu1 %v16747_v58  ;;  %v7648_v3 = vsel %vm2904_vm3, %v15321_v39, %v7423_v21  ;;  %v6998_v20 = vpack.c.bf16 %v6967_v37, %v6966_v29 }
 0x860   : > { %7500 = vrot.lane.b32.xlu0 %v15611_v7, %s12784_s30  ;;  %v7425_v18 = vpop.permute.xlu1 %7424 }
 0x861   : > { %v7576_v39 = vsel %vm2904_vm3, %v6998_v20, %v7369_v2  ;;  %v6970_v2 = vld [vmem:[#allocation2 + $0x60] sm:$0xff]  ;;  %v6971_v20 = vld [vmem:[#allocation2 + $0x68] sm:$0xff] }
 0x862   : > { %8383 = vmatpush1.bf16.msra.mxu1 %v12723_v11  ;;  %v7268_v11 = vld [vmem:[#allocation2 + $0x135] sm:$0xff] }
 0x863   : > { %7554 = vrot.lane.b32.xlu1 %v7286_v33, %s12784_s30  ;;  %8384 = vmatprep.subr.bf16.mxu1 %v16747_v58  ;;  %v7652_v33 = vsel %vm2904_vm3, %v15335_v26, %v7425_v18  ;;  %v7287_v21 = vpack.c.bf16 %v7269_v14, %v7268_v11  ;;  %v12728_v26 = vld [vmem:[%s16663_s7 + $0xd0] sm:$0xff]   ;;  %v12729_v18 = vld [vmem:[%s16663_s7 + $0xd8] sm:$0xff]   ;;  %v12730_v11 = vld [vmem:[%s16663_s7 + $0xe0] sm:$0xff]  }
 0x864   : > { %7502 = vrot.lane.b32.xlu0 %v15622_v59, %s12784_s30  ;;  %v7427_v29 = vpop.permute.xlu1 %7426 }
 0x865   : > { %8252 = vmatmul.mubr.bf16.gmra.mrb[20].mxu1 %v7572_v55  ;;  %v7371_v55 = vpop.permute.xlu0 %7370 }
 0x866   : > { %8259 = vmatprep.mubr.bf16.mxu1 %v7648_v3  ;;  %8385 = vmatpush1.bf16.msra.mxu1 %v12724_v30  ;;  %v6968_v30 = vld [vmem:[#allocation2 + $0x50] sm:$0xff] }
 0x867   : > { %8386 = vmatprep.subr.bf16.mxu1 %v16747_v58  ;;  %7556 = vrot.lane.b32.xlu1 %v7287_v21, %s12784_s30  ;;  %v6999_v3 = vpack.c.bf16 %v6969_v17, %v6968_v30  ;;  %v6973_v17 = vld [vmem:[#allocation2 + $0x78] sm:$0xff]  ;;  %v6972_v21 = vld [vmem:[#allocation2 + $0x70] sm:$0xff] }
 0x869   : > { %v7580_v37 = vsel %vm2904_vm3, %v6999_v3, %v7371_v55  ;;  %v7001_v55 = vpack.c.bf16 %v6973_v17, %v6972_v21 }
 0x86a   : > { %8387 = vmatpush1.bf16.msra.mxu1 %v12725_v52  ;;  %v7656_v52 = vsel %vm2904_vm3, %v15354_v19, %v7427_v29  ;;  %v12732_v29 = vld [vmem:[%s16663_s7 + $0xf0] sm:$0xff]  }
 0x86b   : > { %8388 = vmatprep.subr.bf16.mxu1 %v16747_v58 }
 0x86d   : > { %8260 = vmatmul.mubr.bf16.gmra.mrb[24].mxu1 %v7576_v39  ;;  %v7000_v39 = vpack.c.bf16 %v6971_v20, %v6970_v2  ;;  %v12733_v2 = vld [vmem:[%s16663_s7 + $0xf8] sm:$0xff]  }
 0x86e   : > { %8267 = vmatprep.mubr.bf16.mxu1 %v7652_v33  ;;  %8389 = vmatpush1.bf16.msra.mxu1 %v12726_v27  ;;  %v7373_v27 = vpop.permute.xlu0 %7372  ;;  %v7429_v33 = vpop.permute.xlu1 %7428 }
 0x86f   : > { %8390 = vmatprep.subr.bf16.mxu1 %v16747_v58  ;;  %v7584_v19 = vsel %vm2904_vm3, %v7000_v39, %v7373_v27  ;;  %v7660_v14 = vsel %vm2904_vm3, %v15368_v50, %v7429_v33  ;;  %v6977_v33 = vld [vmem:[#allocation2 + $0x98] sm:$0xff] }
 0x872   : > { %8391 = vmatpush1.bf16.msra.mxu1 %v12727_v23  ;;  %v12731_v23 = vld [vmem:[%s16663_s7 + $0xe8] sm:$0xff]   ;;  %v7375_v30 = vpop.permute.xlu0 %7374  ;;  %v7431_v3 = vpop.permute.xlu1 %7430 }
 0x873   : > { %8392 = vmatprep.subr.bf16.mxu1 %v16747_v58  ;;  %v7588_v50 = vsel %vm2904_vm3, %v7001_v55, %v7375_v30  ;;  %v6978_v30 = vld [vmem:[#allocation2 + $0xa0] sm:$0xff]  ;;  %v6979_v55 = vld [vmem:[#allocation2 + $0xa8] sm:$0xff] }
 0x875   : > { %8268 = vmatmul.mubr.bf16.gmra.mrb[28].mxu1 %v7580_v37  ;;  %v6974_v37 = vld [vmem:[#allocation2 + $0x80] sm:$0xff] }
 0x876   : > { %8275 = vmatprep.mubr.bf16.mxu1 %v7656_v52  ;;  %8393 = vmatpush1.bf16.msra.mxu1 %v12728_v26  ;;  %v7664_v26 = vsel %vm2904_vm3, %v15387_v60, %v7431_v3  ;;  %v6975_v52 = vld [vmem:[#allocation2 + $0x88] sm:$0xff]  ;;  %v7377_v20 = vpop.permute.xlu0 %7376  ;;  %v7433_v27 = vpop.permute.xlu1 %7432 }
 0x877   : > { %8394 = vmatprep.subr.bf16.mxu1 %v16747_v58  ;;  %v7668_v60 = vsel %vm2904_vm3, %v15401_v49, %v7433_v27 }
 0x87a   : > { %8395 = vmatpush1.bf16.msra.mxu1 %v12729_v18  ;;  %v7002_v18 = vpack.c.bf16 %v6975_v52, %v6974_v37  ;;  %v7435_v17 = vpop.permute.xlu1 %7434  ;;  %v6981_v37 = vld [vmem:[#allocation2 + $0xb8] sm:$0xff]  ;;  %v6980_v52 = vld [vmem:[#allocation2 + $0xb0] sm:$0xff] }
 0x87b   : > { %8396 = vmatprep.subr.bf16.mxu1 %v16747_v58  ;;  %v7672_v21 = vsel %vm2904_vm3, %v15420_v57, %v7435_v17  ;;  %v6985_v17 = vld [vmem:[#allocation2 + $0xd8] sm:$0xff] }
 0x87c   : > { %v7592_v39 = vsel %vm2904_vm3, %v7002_v18, %v7377_v20  ;;  %v7005_v20 = vpack.c.bf16 %v6981_v37, %v6980_v52  ;;  %v6987_v37 = vld [vmem:[#allocation2 + $0xe8] sm:$0xff] }
 0x87d   : > { %8276 = vmatmul.mubr.bf16.gmra.mrb[32].mxu1 %v7584_v19  ;;  %v7379_v19 = vpop.permute.xlu0 %7378 }
 0x87e   : > { %8283 = vmatprep.mubr.bf16.mxu1 %v7660_v14  ;;  %8397 = vmatpush1.bf16.msra.mxu1 %v12730_v11  ;;  %v6976_v11 = vld [vmem:[#allocation2 + $0x90] sm:$0xff] }
 0x87f   : > { %8398 = vmatprep.subr.bf16.mxu1 %v16747_v58  ;;  %v7003_v14 = vpack.c.bf16 %v6977_v33, %v6976_v11 }
 0x881   : > { %v7381_v3 = vpop.permute.xlu0 %7380 }
 0x882   : > { %8399 = vmatpush1.bf16.msra.mxu1 %v12731_v23  ;;  %v7596_v23 = vsel %vm2904_vm3, %v7003_v14, %v7379_v19 }
 0x883   : > { %8400 = vmatprep.subr.bf16.mxu1 %v16747_v58 }
 0x885   : > { %8284 = vmatmul.mubr.bf16.gmra.mrb[36].mxu1 %v7588_v50  ;;  %v7437_v50 = vpop.permute.xlu1 %7436 }
 0x886   : > { %8291 = vmatprep.mubr.bf16.mxu1 %v7664_v26  ;;  %8401 = vmatpush1.bf16.msra.mxu1 %v12732_v29  ;;  %v7004_v29 = vpack.c.bf16 %v6979_v55, %v6978_v30  ;;  %v7676_v26 = vsel %vm2904_vm3, %v15434_v44, %v7437_v50 }
 0x887   : > { %8402 = vmatprep.subr.bf16.mxu1 %v16747_v58 }
 0x888   : > { %v7600_v49 = vsel %vm2904_vm3, %v7004_v29, %v7381_v3 }
 0x889   : > { %v7439_v18 = vpop.permute.xlu1 %7438 }
 0x88a   : > { %8403 = vmatpush1.bf16.msra.mxu1 %v12733_v2  ;;  %v7383_v2 = vpop.permute.xlu0 %7382  ;;  %v7680_v27 = vsel %vm2904_vm3, %v15453_v10, %v7439_v18 }
 0x88b   : > { %v7604_v57 = vsel %vm2904_vm3, %v7005_v20, %v7383_v2 }
 0x88d   : > { %8292 = vmatmul.mubr.bf16.gmra.mrb[40].mxu1 %v7592_v39  ;;  %v6982_v39 = vld [vmem:[#allocation2 + $0xc0] sm:$0xff]  ;;  %v7441_v19 = vpop.permute.xlu1 %7440 }
 0x88e   : > { %8299 = vmatprep.mubr.bf16.mxu1 %v7668_v60  ;;  %v6983_v60 = vld [vmem:[#allocation2 + $0xc8] sm:$0xff]  ;;  %v7385_v33 = vpop.permute.xlu0 %7384  ;;  %v7684_v14 = vsel %vm2904_vm3, %v15467_v53, %v7441_v19  ;;  %v6986_v53 = vld [vmem:[#allocation2 + $0xe0] sm:$0xff] }
 0x88f   : > { %v7006_v11 = vpack.c.bf16 %v6983_v60, %v6982_v39  ;;  %v7008_v2 = vpack.c.bf16 %v6987_v37, %v6986_v53 }
 0x891   : > { %v7608_v44 = vsel %vm2904_vm3, %v7006_v11, %v7385_v33  ;;  %v7443_v55 = vpop.permute.xlu1 %7442  ;;  %v6989_v33 = vld [vmem:[#allocation2 + $0xf8] sm:$0xff]  ;;  %v6988_v11 = vld [vmem:[#allocation2 + $0xf0] sm:$0xff] }
 0x895   : > { %8300 = vmatmul.mubr.bf16.gmra.mrb[44].mxu1 %v7596_v23  ;;  %v6984_v23 = vld [vmem:[#allocation2 + $0xd0] sm:$0xff]  ;;  %v7445_v20 = vpop.permute.xlu1 %7444 }
 0x896   : > { %8307 = vmatprep.mubr.bf16.mxu1 %v7672_v21  ;;  %v7387_v21 = vpop.permute.xlu0 %7386  ;;  %v7007_v30 = vpack.c.bf16 %v6985_v17, %v6984_v23 }
 0x898   : > { %v7612_v10 = vsel %vm2904_vm3, %v7007_v30, %v7387_v21 }
 0x89a   : > { %v7389_v52 = vpop.permute.xlu0 %7388 }
 0x89d   : > { %8308 = vmatmul.mubr.bf16.gmra.mrb[48].mxu1 %v7600_v49  ;;  %v7688_v49 = vsel %vm2904_vm3, %v15479_v0, %v7443_v55  ;;  %v7692_v0 = vsel %vm2904_vm3, %v15489_v40, %v7445_v20 }
 0x89e   : > { %8315 = vmatprep.mubr.bf16.mxu1 %v7676_v26  ;;  %v7391_v19 = vpop.permute.xlu0 %7390 }
 0x8a2   : > { %v7393_v53 = vpop.permute.xlu0 %7392 }
 0x8a5   : > { %8316 = vmatmul.mubr.bf16.gmra.mrb[52].mxu1 %v7604_v57  ;;  %v7616_v57 = vsel %vm2904_vm3, %v7008_v2, %v7389_v52 }
 0x8a6   : > { %8323 = vmatprep.mubr.bf16.mxu1 %v7680_v27 }
 0x8ad   : > { %8324 = vmatmul.mubr.bf16.gmra.mrb[56].mxu1 %v7608_v44  ;;  %v7009_v44 = vpack.c.bf16 %v6989_v33, %v6988_v11  ;;  %v6993_v11 = vld [vmem:[#allocation2 + $0x118] sm:$0xff] }
 0x8ae   : > { %8331 = vmatprep.mubr.bf16.mxu1 %v7684_v14  ;;  %v7447_v14 = vpop.permute.xlu1 %7446 }
 0x8af   : > { %v7620_v23 = vsel %vm2904_vm3, %v7009_v44, %v7391_v19  ;;  %v7696_v40 = vsel %vm2904_vm3, %v15495_v63, %v7447_v14  ;;  %v6992_v19 = vld [vmem:[#allocation2 + $0x110] sm:$0xff]  ;;  %v7395_v44 = vpop.permute.xlu0 %7394 }
 0x8b0   : > { %v7011_v14 = vpack.c.bf16 %v6993_v11, %v6992_v19  ;;  %v7123_v19 = vld [vmem:[#allocation2 + $0x13] sm:$0xff] }
 0x8b2   : > { %v7449_v52 = vpop.permute.xlu1 %7448 }
 0x8b3   : > { %v15699_v3 = vpop.f32.mrb[132].mxu0  ;;  %v7700_v63 = vsel %vm2904_vm3, %v15501_v13, %v7449_v52  ;;  %v7322_v52 = vld [vmem:[#allocation2 + $0x136] sm:$0xff]  ;;  %v7469_v42 = vpop.permute.xlu0 %7468 }
 0x8b4   : > { %v15702_v29 = vpop.f32.mrb[133].mxu0 }
 0x8b5   : > { %8332 = vmatmul.mubr.bf16.gmra.mrb[60].mxu1 %v7612_v10  ;;  %v15704_v50 = vpop.f32.mrb[134].mxu0  ;;  %v6990_v10 = vld [vmem:[#allocation2 + $0x100] sm:$0xff] }
 0x8b6   : > { %v15708_v26 = vpop.f32.mrb[135].mxu0  ;;  %8339 = vmatprep.mubr.bf16.mxu1 %v7688_v49  ;;  %v6991_v49 = vld [vmem:[#allocation2 + $0x108] sm:$0xff] }
 0x8b7   : > { %v7010_v37 = vpack.c.bf16 %v6991_v49, %v6990_v10  ;;  %v7628_v10 = vsel %vm2904_vm3, %v7011_v14, %v7395_v44 }
 0x8b9   : > { %v7624_v20 = vsel %vm2904_vm3, %v7010_v37, %v7393_v53 }
 0x8bc   : > { %v15710_v18 = vpop.f32.mrb[136].mxu0 }
 0x8bd   : > { %v15713_v27 = vpop.f32.mrb[137].mxu0  ;;  %8340 = vmatmul.mubr.bf16.gmra.mrb[64].mxu1 %v7616_v57 }
 0x8be   : > { %v15715_v39 = vpop.f32.mrb[138].mxu0  ;;  %8347 = vmatprep.mubr.bf16.mxu1 %v7692_v0 }
 0x8bf   : > { %v15719_v60 = vpop.f32.mrb[139].mxu0 }
 0x8c4   : > { %v15721_v17 = vpop.f32.mrb[140].mxu0 }
 0x8c5   : > { %v15724_v21 = vpop.f32.mrb[141].mxu0  ;;  %8348 = vmatmul.mubr.bf16.gmra.mrb[68].mxu1 %v7620_v23  ;;  %v7523_v23 = vpop.permute.xlu1 %7522 }
 0x8c6   : > { %v15726_v30 = vpop.f32.mrb[142].mxu0  ;;  %8355 = vmatprep.mubr.bf16.mxu1 %v7696_v40  ;;  %v7776_v13 = vsel %vm2904_vm3, %v15510_v8, %v7523_v23 }
 0x8c7   : > { %v15730_v55 = vpop.f32.mrb[143].mxu0 }
 0x8c9   : > { %v7525_v14 = vpop.permute.xlu1 %7524 }
 0x8ca   : > { %v7780_v23 = vsel %vm2904_vm3, %v15515_v12, %v7525_v14 }
 0x8cc   : > { %v15732_v2 = vpop.f32.mrb[144].mxu0 }
 0x8cd   : > { %v15735_v57 = vpop.f32.mrb[145].mxu0  ;;  %8356 = vmatmul.mubr.bf16.gmra.mrb[72].mxu1 %v7624_v20  ;;  %v7323_v20 = vld [vmem:[#allocation2 + $0x13e] sm:$0xff] }
 0x8ce   : > { %v15737_v0 = vpop.f32.mrb[146].mxu0  ;;  %8363 = vmatprep.mubr.bf16.mxu1 %v7700_v63  ;;  %v7124_v63 = vld [vmem:[#allocation2 + $0x1b] sm:$0xff]  ;;  %v7341_v11 = vpack.c.bf16 %v7323_v20, %v7322_v52  ;;  %v7126_v52 = vld [vmem:[#allocation2 + $0x2b] sm:$0xff]  ;;  %v7125_v20 = vld [vmem:[#allocation2 + $0x23] sm:$0xff] }
 0x8cf   : > { %v15741_v33 = vpop.f32.mrb[147].mxu0  ;;  %v7159_v44 = vpack.c.bf16 %v7124_v63, %v7123_v19  ;;  %v7160_v63 = vpack.c.bf16 %v7126_v52, %v7125_v20  ;;  %v7527_v19 = vpop.permute.xlu1 %7526 }
 0x8d0   : > { %11620 = vmatmul.mubr.msk.bf16.gmra.mrb[164].mxu0 %vm2904_vm3, %v7341_v11  ;;  %v7471_v11 = vpop.permute.xlu0 %7470  ;;  %v7784_v12 = vsel %vm2904_vm3, %v15520_v22, %v7527_v19 }
 0x8d3   : > { %v7529_v20 = vpop.permute.xlu1 %7528 }
 0x8d4   : > { %v15743_v40 = vpop.f32.mrb[148].mxu0  ;;  %v7788_v22 = vsel %vm2904_vm3, %v15525_v16, %v7529_v20 }
 0x8d5   : > { %16836 = vst [vmem:[#allocation33_spill] sm:$0xff] %v15743_v40  ;;  %v15746_v49 = vpop.f32.mrb[149].mxu0  ;;  %8364 = vmatmul.mubr.bf16.gmra.mrb[76].mxu1 %v7628_v10  ;;  %v7704_v10 = vsel %vm2904_vm3, %v7159_v44, %v7469_v42  ;;  %v7708_v42 = vsel %vm2904_vm3, %v7160_v63, %v7471_v11 }
 0x8d6   : > { %v15748_v53 = vpop.f32.mrb[150].mxu0  ;;  %8404 = vmatprep.mubr.bf16.mxu1 %v7776_v13 }
 0x8d7   : > { %16837 = vst [vmem:[#allocation36_spill] sm:$0xff] %v15748_v53  ;;  %v15752_v37 = vpop.f32.mrb[151].mxu0 }
 0x8d8   : > { %16838 = vst [vmem:[#allocation38_spill] sm:$0xff] %v15752_v37 }
 0x8dc   : > { %v15755_v40 = vpop.f32.mrb[152].mxu0 }
 0x8dd   : > { %16839 = vst [vmem:[#allocation35_spill] sm:$0xff] %v15755_v40  ;;  %v15758_v53 = vpop.f32.mrb[153].mxu0  ;;  %8405 = vmatmul.mubr.bf16.vlgmr.msra.gmra.mrb[8].mxu1 %v7704_v10  ;;  %v7473_v40 = vpop.permute.xlu0 %7472 }
 0x8de   : > { %v15760_v8 = vpop.f32.mrb[154].mxu0  ;;  %8412 = vmatprep.mubr.bf16.mxu1 %v7780_v23  ;;  %v7128_v23 = vld [vmem:[#allocation2 + $0x3b] sm:$0xff] }
 0x8df   : > { %16840 = vst [vmem:[#allocation37_spill] sm:$0xff] %v15760_v8  ;;  %v15764_v13 = vpop.f32.mrb[155].mxu0  ;;  %v7127_v8 = vld [vmem:[#allocation2 + $0x33] sm:$0xff] }
 0x8e0   : > { %16841 = vst [vmem:[#allocation40_spill] sm:$0xff] %v15764_v13  ;;  %v7161_v52 = vpack.c.bf16 %v7128_v23, %v7127_v8  ;;  %v7531_v23 = vpop.permute.xlu1 %7530 }
 0x8e2   : > { %v7712_v11 = vsel %vm2904_vm3, %v7161_v52, %v7473_v40  ;;  %v7792_v40 = vsel %vm2904_vm3, %v15530_v5, %v7531_v23  ;;  %v7132_v52 = vld [vmem:[#allocation2 + $0x5b] sm:$0xff] }
 0x8e4   : > { %v7533_v16 = vpop.permute.xlu1 %7532 }
 0x8e5   : > { %v15766_v37 = vpop.f32.mrb[156].mxu0  ;;  %8413 = vmatmul.mubr.bf16.gmra.mrb[12].mxu1 %v7708_v42 }
 0x8e6   : > { %16842 = vst [vmem:[#allocation42_spill] sm:$0xff] %v15766_v37  ;;  %v15769_v44 = vpop.f32.mrb[157].mxu0  ;;  %8420 = vmatprep.mubr.bf16.mxu1 %v7784_v12  ;;  %v7130_v12 = vld [vmem:[#allocation2 + $0x4b] sm:$0xff]  ;;  %v7475_v37 = vpop.permute.xlu0 %7474 }
 0x8e7   : > { %v15771_v10 = vpop.f32.mrb[158].mxu0 }
 0x8e8   : > { %16843 = vst [vmem:[#allocation39_spill] sm:$0xff] %v15771_v10  ;;  %v15775_v14 = vpop.f32.mrb[159].mxu0  ;;  %v7129_v10 = vld [vmem:[#allocation2 + $0x43] sm:$0xff] }
 0x8e9   : > { %v7162_v8 = vpack.c.bf16 %v7130_v12, %v7129_v10  ;;  %v7134_v10 = vld [vmem:[#allocation2 + $0x6b] sm:$0xff]  ;;  %v7133_v12 = vld [vmem:[#allocation2 + $0x63] sm:$0xff] }
 0x8ed   : > { %v15777_v13 = vpop.f32.mrb[160].mxu0  ;;  %8421 = vmatmul.mubr.bf16.gmra.mrb[16].mxu1 %v7712_v11  ;;  %v7131_v11 = vld [vmem:[#allocation2 + $0x53] sm:$0xff] }
 0x8ee   : > { %16844 = vst [vmem:[#allocation41_spill] sm:$0xff] %v15777_v13  ;;  %v15780_v63 = vpop.f32.mrb[161].mxu0  ;;  %8428 = vmatprep.mubr.bf16.mxu1 %v7788_v22  ;;  %v7716_v13 = vsel %vm2904_vm3, %v7162_v8, %v7475_v37  ;;  %v7796_v22 = vsel %vm2904_vm3, %v15535_v61, %v7533_v16  ;;  %v7535_v8 = vpop.permute.xlu1 %7534 }
 0x8ef   : > { %16845 = vst [vmem:[#allocation4_spill] sm:$0xff] %v15780_v63  ;;  %v15782_v42 = vpop.f32.mrb[162].mxu0  ;;  %v7163_v63 = vpack.c.bf16 %v7132_v52, %v7131_v11  ;;  %v7800_v23 = vsel %vm2904_vm3, %v15540_v32, %v7535_v8  ;;  %v7135_v52 = vld [vmem:[#allocation2 + $0x73] sm:$0xff]  ;;  %v7140_v8 = vld [vmem:[#allocation2 + $0x9b] sm:$0xff] }
 0x8f0   : > { %16846 = vst [vmem:[#allocation30_spill] sm:$0xff] %v15782_v42  ;;  %v15786_v19 = vpop.f32.mrb[163].mxu0  ;;  %v7477_v42 = vpop.permute.xlu0 %7476 }
 0x8f1   : > { %v7720_v20 = vsel %vm2904_vm3, %v7163_v63, %v7477_v42 }
 0x8f2   : > { %v7537_v11 = vpop.permute.xlu1 %7536 }
 0x8f3   : > { %v7804_v16 = vsel %vm2904_vm3, %v15545_v41, %v7537_v11  ;;  %v7141_v11 = vld [vmem:[#allocation2 + $0xa3] sm:$0xff] }
 0x8f4   : > { %v7479_v37 = vpop.permute.xlu0 %7478 }
 0x8f5   : > { %8429 = vmatmul.mubr.bf16.gmra.mrb[20].mxu1 %v7716_v13  ;;  %v7164_v13 = vpack.c.bf16 %v7134_v10, %v7133_v12 }
 0x8f6   : > { %8436 = vmatprep.mubr.bf16.mxu1 %v7792_v40  ;;  %v7136_v40 = vld [vmem:[#allocation2 + $0x7b] sm:$0xff] }
 0x8f7   : > { %v7724_v5 = vsel %vm2904_vm3, %v7164_v13, %v7479_v37  ;;  %v7165_v42 = vpack.c.bf16 %v7136_v40, %v7135_v52  ;;  %v7539_v37 = vpop.permute.xlu1 %7538 }
 0x8f8   : > { %v7481_v63 = vpop.permute.xlu0 %7480  ;;  %v7808_v13 = vsel %vm2904_vm3, %v15550_v34, %v7539_v37 }
 0x8f9   : > { %v7728_v61 = vsel %vm2904_vm3, %v7165_v42, %v7481_v63  ;;  %v7142_v42 = vld [vmem:[#allocation2 + $0xab] sm:$0xff] }
 0x8fb   : > { %v7541_v52 = vpop.permute.xlu1 %7540 }
 0x8fc   : > { %v7483_v10 = vpop.permute.xlu0 %7482  ;;  %v7812_v63 = vsel %vm2904_vm3, %v15555_v51, %v7541_v52 }
 0x8fd   : > { %8437 = vmatmul.mubr.bf16.gmra.mrb[24].mxu1 %v7720_v20  ;;  %v7138_v20 = vld [vmem:[#allocation2 + $0x8b] sm:$0xff] }
 0x8fe   : > { %8444 = vmatprep.mubr.bf16.mxu1 %v7796_v22  ;;  %v7137_v22 = vld [vmem:[#allocation2 + $0x83] sm:$0xff] }
 0x8ff   : > { %v7166_v12 = vpack.c.bf16 %v7138_v20, %v7137_v22  ;;  %v7543_v20 = vpop.permute.xlu1 %7542 }
 0x900   : > { %v7816_v22 = vsel %vm2904_vm3, %v15560_v6, %v7543_v20 }
 0x901   : > { %v7732_v32 = vsel %vm2904_vm3, %v7166_v12, %v7483_v10  ;;  %v7144_v10 = vld [vmem:[#allocation2 + $0xbb] sm:$0xff]  ;;  %v7143_v12 = vld [vmem:[#allocation2 + $0xb3] sm:$0xff] }
 0x905   : > { %8445 = vmatmul.mubr.bf16.gmra.mrb[28].mxu1 %v7724_v5  ;;  %v7139_v5 = vld [vmem:[#allocation2 + $0x93] sm:$0xff] }
 0x906   : > { %8452 = vmatprep.mubr.bf16.mxu1 %v7800_v23  ;;  %v7485_v23 = vpop.permute.xlu0 %7484  ;;  %v7167_v40 = vpack.c.bf16 %v7140_v8, %v7139_v5  ;;  %v7146_v5 = vld [vmem:[#allocation2 + $0xcb] sm:$0xff] }
 0x908   : > { %v7736_v41 = vsel %vm2904_vm3, %v7167_v40, %v7485_v23  ;;  %v7145_v23 = vld [vmem:[#allocation2 + $0xc3] sm:$0xff] }
 0x909   : > { %v7170_v52 = vpack.c.bf16 %v7146_v5, %v7145_v23 }
 0x90d   : > { %8453 = vmatmul.mubr.bf16.gmra.mrb[32].mxu1 %v7728_v61  ;;  %v7487_v61 = vpop.permute.xlu0 %7486 }
 0x90e   : > { %8460 = vmatprep.mubr.bf16.mxu1 %v7804_v16  ;;  %v7168_v16 = vpack.c.bf16 %v7142_v42, %v7141_v11  ;;  %v7148_v42 = vld [vmem:[#allocation2 + $0xdb] sm:$0xff]  ;;  %v7147_v11 = vld [vmem:[#allocation2 + $0xd3] sm:$0xff] }
 0x910   : > { %v7740_v34 = vsel %vm2904_vm3, %v7168_v16, %v7487_v61  ;;  %v7171_v16 = vpack.c.bf16 %v7148_v42, %v7147_v11  ;;  %v7154_v42 = vld [vmem:[#allocation2 + $0x10b] sm:$0xff] }
 0x911   : > { %v7489_v37 = vpop.permute.xlu0 %7488 }
 0x915   : > { %8461 = vmatmul.mubr.bf16.gmra.mrb[36].mxu1 %v7732_v32  ;;  %v7169_v32 = vpack.c.bf16 %v7144_v10, %v7143_v12  ;;  %v7491_v40 = vpop.permute.xlu0 %7490  ;;  %v7149_v10 = vld [vmem:[#allocation2 + $0xe3] sm:$0xff] }
 0x916   : > { %8468 = vmatprep.mubr.bf16.mxu1 %v7808_v13  ;;  %v7545_v13 = vpop.permute.xlu1 %7544  ;;  %v7748_v6 = vsel %vm2904_vm3, %v7170_v52, %v7491_v40  ;;  %v8960_v52 = vld [vmem:[#allocation2 + $0x1] sm:$0xff] }
 0x917   : > { %v7744_v51 = vsel %vm2904_vm3, %v7169_v32, %v7489_v37  ;;  %v7820_v8 = vsel %vm2904_vm3, %v15570_v4, %v7545_v13 }
 0x919   : > { %v7493_v61 = vpop.permute.xlu0 %7492 }
 0x91a   : > { %v7752_v4 = vsel %vm2904_vm3, %v7171_v16, %v7493_v61 }
 0x91d   : > { %8469 = vmatmul.mubr.bf16.gmra.mrb[40].mxu1 %v7736_v41  ;;  %v7547_v41 = vpop.permute.xlu1 %7546  ;;  %v7495_v12 = vpop.permute.xlu0 %7494 }
 0x91e   : > { %8476 = vmatprep.mubr.bf16.mxu1 %v7812_v63  ;;  %v7824_v63 = vsel %vm2904_vm3, %v15581_v28, %v7547_v41 }
 0x921   : > { %v7549_v20 = vpop.permute.xlu1 %7548  ;;  %v7497_v5 = vpop.permute.xlu0 %7496 }
 0x925   : > { %8477 = vmatmul.mubr.bf16.gmra.mrb[44].mxu1 %v7740_v34  ;;  %v7828_v34 = vsel %vm2904_vm3, %v15591_v54, %v7549_v20  ;;  %v7551_v32 = vpop.permute.xlu1 %7550  ;;  %v8961_v54 = vld [vmem:[#allocation2 + $0x9] sm:$0xff]  ;;  %v7499_v11 = vpop.permute.xlu0 %7498 }
 0x926   : > { %8484 = vmatprep.mubr.bf16.mxu1 %v7816_v22  ;;  %v7150_v22 = vld [vmem:[#allocation2 + $0xeb] sm:$0xff]  ;;  %v7832_v13 = vsel %vm2904_vm3, %v15601_v1, %v7551_v32  ;;  %v8996_v41 = vpack.c.bf16 %v8961_v54, %v8960_v52  ;;  %v7153_v1 = vld [vmem:[#allocation2 + $0x103] sm:$0xff]  ;;  %v7155_v32 = vld [vmem:[#allocation2 + $0x113] sm:$0xff] }
 0x927   : > { %v7172_v37 = vpack.c.bf16 %v7150_v22, %v7149_v10  ;;  %v7174_v61 = vpack.c.bf16 %v7154_v42, %v7153_v1  ;;  %v12734_v22 = vld [vmem:[%s16664_s8 + $0x100] sm:$0xff]   ;;  %v12739_v42 = vld [vmem:[%s16664_s8 + $0x8] sm:$0xff]   ;;  %v12740_v1 = vld [vmem:[%s16664_s8 + $0x10] sm:$0xff]  }
 0x928   : > { %9308 = vrot.lane.b32.xlu0 %v8996_v41, %s12784_s30  ;;  %11623 = vmatprep.subr.bf16.mxu1 %v12734_v22  ;;  %v7156_v10 = vld [vmem:[#allocation2 + $0x11b] sm:$0xff] }
 0x929   : > { %v7756_v28 = vsel %vm2904_vm3, %v7172_v37, %v7495_v12  ;;  %v7553_v40 = vpop.permute.xlu1 %7552  ;;  %v7764_v20 = vsel %vm2904_vm3, %v7174_v61, %v7499_v11  ;;  %11624 = vmatpush3.bf16.msra.mxu1 %v12734_v22  ;;  %v12737_v41 = vld [vmem:[%s16664_s8 + $0x118] sm:$0xff]   ;;  %v12742_v61 = vld [vmem:[%s16664_s8 + $0x20] sm:$0xff]   ;;  %v12747_v22 = vld [vmem:[%s16664_s8 + $0x48] sm:$0xff]  }
 0x92a   : > { %v12741_v11 = vld [vmem:[%s16664_s8 + $0x18] sm:$0xff]  }
 0x92d   : > { %8485 = vmatmul.mubr.bf16.gmra.mrb[48].mxu1 %v7744_v51  ;;  %v7152_v51 = vld [vmem:[#allocation2 + $0xfb] sm:$0xff]  ;;  %v7555_v16 = vpop.permute.xlu1 %7554 }
 0x92e   : > { %8492 = vmatprep.mubr.bf16.mxu1 %v7820_v8  ;;  %v7151_v8 = vld [vmem:[#allocation2 + $0xf3] sm:$0xff] }
 0x92f   : > { %v7173_v23 = vpack.c.bf16 %v7152_v51, %v7151_v8  ;;  %v12735_v51 = vld [vmem:[%s16664_s8 + $0x108] sm:$0xff]  }
 0x930   : > { %11625 = vmatprep.subr.bf16.mxu1 %v12735_v51 }
 0x931   : > { %v7557_v37 = vpop.permute.xlu1 %7556  ;;  %11626 = vmatpush3.bf16.msra.mxu1 %v12735_v51  ;;  %v12750_v51 = vld [vmem:[%s16664_s8 + $0x60] sm:$0xff]  }
 0x935   : > { %8493 = vmatmul.mubr.bf16.gmra.mrb[52].mxu1 %v7748_v6  ;;  %v7760_v6 = vsel %vm2904_vm3, %v7173_v23, %v7497_v5  ;;  %v7158_v23 = vld [vmem:[#allocation2 + $0x12b] sm:$0xff] }
 0x936   : > { %8500 = vmatprep.mubr.bf16.mxu1 %v7824_v63  ;;  %v7836_v63 = vsel %vm2904_vm3, %v15611_v7, %v7553_v40  ;;  %v7840_v7 = vsel %vm2904_vm3, %v15622_v59, %v7555_v16  ;;  %v12736_v59 = vld [vmem:[%s16664_s8 + $0x110] sm:$0xff]   ;;  %v7157_v40 = vld [vmem:[#allocation2 + $0x123] sm:$0xff] }
 0x937   : > { %11627 = vmatprep.subr.bf16.mxu1 %v12736_v59  ;;  %v7176_v54 = vpack.c.bf16 %v7158_v23, %v7157_v40  ;;  %v12743_v16 = vld [vmem:[%s16664_s8 + $0x28] sm:$0xff]  }
 0x938   : > { %11628 = vmatpush3.bf16.msra.mxu1 %v12736_v59  ;;  %v12751_v40 = vld [vmem:[%s16664_s8 + $0x68] sm:$0xff]  }
 0x939   : > { %11629 = vmatprep.subr.bf16.mxu1 %v12737_v41 }
 0x93c   : > { %11630 = vmatpush3.bf16.msra.mxu1 %v12737_v41 }
 0x93d   : > { %8501 = vmatmul.mubr.bf16.gmra.mrb[56].mxu1 %v7752_v4  ;;  %v7231_v4 = vld [vmem:[#allocation2 + $0x134] sm:$0xff] }
 0x93e   : > { %8508 = vmatprep.mubr.bf16.mxu1 %v7828_v34  ;;  %v7232_v34 = vld [vmem:[#allocation2 + $0x13c] sm:$0xff] }
 0x93f   : > { %v7233_v12 = vpack.c.bf16 %v7232_v34, %v7231_v4  ;;  %v12745_v4 = vld [vmem:[%s16664_s8 + $0x38] sm:$0xff]   ;;  %v12746_v34 = vld [vmem:[%s16664_s8 + $0x40] sm:$0xff]  }
 0x941   : > { %v7844_v8 = vsel %vm2904_vm3, %v7233_v12, %v7557_v37  ;;  %v15893_v12 = vld [vmem:[%s16668_s12] ss:$0 sm:$0xff] }
 0x945   : > { %8509 = vmatmul.mubr.bf16.gmra.mrb[60].mxu1 %v7756_v28  ;;  %v7501_v28 = vpop.permute.xlu0 %7500 }
 0x946   : > { %8516 = vmatprep.mubr.bf16.mxu1 %v7832_v13  ;;  %v7175_v13 = vpack.c.bf16 %v7156_v10, %v7155_v32  ;;  %v12749_v10 = vld [vmem:[%s16664_s8 + $0x58] sm:$0xff]  }
 0x948   : > { %v7768_v5 = vsel %vm2904_vm3, %v7175_v13, %v7501_v28 }
 0x949   : > { %v7503_v52 = vpop.permute.xlu0 %7502 }
 0x94d   : > { %8517 = vmatmul.mubr.bf16.gmra.mrb[64].mxu1 %v7760_v6  ;;  %v7772_v6 = vsel %vm2904_vm3, %v7176_v54, %v7503_v52 }
 0x94e   : > { %8524 = vmatprep.mubr.bf16.mxu1 %v7836_v63  ;;  %v12738_v63 = vld [vmem:[%s16664_s8] sm:$0xff]  }
 0x94f   : > { %10144 = vmatpush1.bf16.msra.mxu0 %v12738_v63 }
 0x950   : > { %10145 = vmatprep.subr.bf16.mxu0 %v16747_v58 }
 0x953   : > { %10146 = vmatpush1.bf16.msra.mxu0 %v12739_v42 }
 0x954   : > { %10147 = vmatprep.subr.bf16.mxu0 %v16747_v58 }
 0x955   : > { %8525 = vmatmul.mubr.bf16.gmra.mrb[68].mxu1 %v7764_v20  ;;  %v12744_v20 = vld [vmem:[%s16664_s8 + $0x30] sm:$0xff]  }
 0x956   : > { %8532 = vmatprep.mubr.bf16.mxu1 %v7840_v7  ;;  %v12748_v7 = vld [vmem:[%s16664_s8 + $0x50] sm:$0xff]  }
 0x957   : > { %10148 = vmatpush1.bf16.msra.mxu0 %v12740_v1 }
 0x958   : > { %10149 = vmatprep.subr.bf16.mxu0 %v16747_v58 }
 0x95b   : > { %10150 = vmatpush1.bf16.msra.mxu0 %v12741_v11 }
 0x95c   : > { %10151 = vmatprep.subr.bf16.mxu0 %v16747_v58 }
 0x95d   : > { %8533 = vmatmul.mubr.bf16.gmra.mrb[72].mxu1 %v7768_v5 }
 0x95e   : > { %8540 = vmatprep.mubr.bf16.mxu1 %v7844_v8 }
 0x95f   : > { %10152 = vmatpush1.bf16.msra.mxu0 %v12742_v61 }
 0x960   : > { %10153 = vmatprep.subr.bf16.mxu0 %v16747_v58 }
 0x963   : > { %10154 = vmatpush1.bf16.msra.mxu0 %v12743_v16 }
 0x964   : > { %10155 = vmatprep.subr.bf16.mxu0 %v16747_v58 }
 0x965   : > { %8541 = vmatmul.mubr.bf16.gmra.mrb[76].mxu1 %v7772_v6 }
 0x967   : > { %10156 = vmatpush1.bf16.msra.mxu0 %v12744_v20 }
 0x968   : > { %10157 = vmatprep.subr.bf16.mxu0 %v16747_v58 }
 0x96b   : > { %10158 = vmatpush1.bf16.msra.mxu0 %v12745_v4 }
 0x96c   : > { %10159 = vmatprep.subr.bf16.mxu0 %v16747_v58 }
 0x96f   : > { %10160 = vmatpush1.bf16.msra.mxu0 %v12746_v34 }
 0x970   : > { %10161 = vmatprep.subr.bf16.mxu0 %v16747_v58 }
 0x973   : > { %10162 = vmatpush1.bf16.msra.mxu0 %v12747_v22 }
 0x974   : > { %10163 = vmatprep.subr.bf16.mxu0 %v16747_v58 }
 0x977   : > { %10164 = vmatpush1.bf16.msra.mxu0 %v12748_v7  ;;  %v12752_v7 = vld [vmem:[%s16664_s8 + $0x70] sm:$0xff]  }
 0x978   : > { %10165 = vmatprep.subr.bf16.mxu0 %v16747_v58 }
 0x97b   : > { %10166 = vmatpush1.bf16.msra.mxu0 %v12749_v10 }
 0x97c   : > { %10167 = vmatprep.subr.bf16.mxu0 %v16747_v58 }
 0x97f   : > { %10168 = vmatpush1.bf16.msra.mxu0 %v12750_v51 }
 0x980   : > { %10169 = vmatprep.subr.bf16.mxu0 %v16747_v58 }
 0x983   : > { %10170 = vmatpush1.bf16.msra.mxu0 %v12751_v40 }
 0x984   : > { %10171 = vmatprep.subr.bf16.mxu0 %v16747_v58 }
 0x987   : > { %10172 = vmatpush1.bf16.msra.mxu0 %v12752_v7 }
 0x988   : > { %10173 = vmatprep.subr.bf16.mxu0 %v16747_v58 }
 0x9a3   : > { %v15902_v23 = vpop.f32.mrb[164].mxu0 }
 0x9a4   : > { %v15910_v41 = vpop.f32.mrb[165].mxu0 }
 0x9a5   : > { %v15918_v20 = vpop.f32.mrb[166].mxu0 }
 0x9a6   : > { %v15922_v22 = vpop.f32.mrb[167].mxu0 }
 0x9b0   : > { %v8406_v37 = vpop.f32.mrb[8].mxu1 }
 0x9b1   : > { %v11739_v32 = vadd.f32 %v15893_v12, %v8406_v37  ;;  %v8408_v28 = vpop.f32.mrb[9].mxu1 }
 0x9b2   : > { %v8409_v13 = vpop.f32.mrb[10].mxu1 }
 0x9b3   : > { %v8584_v8 = vadd.f32 %v11739_v32, %v15702_v29  ;;  %v11740_v5 = vadd.f32 %v15893_v12, %v8409_v13  ;;  %v8411_v59 = vpop.f32.mrb[11].mxu1 }
 0x9b5   : > { %vm8726_vm0 = vcmp.ge.f32.partialorder %v8584_v8, 0.0  ;;  %v8762_v52 = vmul.f32 %v8584_v8, %v14488_v24  ;;  %v8587_v54 = vadd.f32 %v11740_v5, %v15708_v26 }
 0x9b7   : > { %v8798_v29 = vsel %vm8726_vm0, %v8584_v8, %v8762_v52  ;;  %vm8727_vm1 = vcmp.ge.f32.partialorder %v8587_v54, 0.0  ;;  %v8763_v6 = vmul.f32 %v8587_v54, %v14488_v24 }
 0x9b8   : > { %v8834_v63 = vmul.f32 %v8798_v29, %v13871_v62  ;;  %v8414_v42 = vpop.f32.mrb[12].mxu1 }
 0x9b9   : > { %v8799_v1 = vsel %vm8727_vm1, %v8587_v54, %v8763_v6  ;;  %v11741_v11 = vadd.f32 %v15893_v12, %v8414_v42  ;;  %v8416_v61 = vpop.f32.mrb[13].mxu1 }
 0x9ba   : > { %8870 = vst.msk [vmem:[#allocation2 + $0x13] sm:$0xff] %vm2904_vm3, %v8834_v63  ;;  %v8835_v26 = vmul.f32 %v8799_v1, %v13869_v45  ;;  %v8417_v16 = vpop.f32.mrb[14].mxu1 }
 0x9bb   : > { %v8592_v4 = vadd.f32 %v11741_v11, %v15699_v3  ;;  %v11742_v34 = vadd.f32 %v15893_v12, %v8417_v16  ;;  %v8419_v62 = vpop.f32.mrb[15].mxu1  ;;  %v12753_v3 = vld [vmem:[%s16664_s8 + $0x78] sm:$0xff]  }
 0x9bc   : > { %8871 = vst.msk [vmem:[#allocation2 + $0x1b] sm:$0xff] %vm2904_vm3, %v8835_v26  ;;  %10174 = vmatpush1.bf16.msra.mxu0 %v12753_v3 }
 0x9bd   : > { %vm8728_vm2 = vcmp.ge.f32.partialorder %v8592_v4, 0.0  ;;  %v8764_v10 = vmul.f32 %v8592_v4, %v14488_v24  ;;  %v8595_v45 = vadd.f32 %v11742_v34, %v15704_v50  ;;  %10320 = vmatprep.subr.bf16.mxu0 %v16747_v58 }
 0x9bf   : > { %v8800_v37 = vsel %vm8728_vm2, %v8592_v4, %v8764_v10  ;;  %vm8729_vm4 = vcmp.ge.f32.partialorder %v8595_v45, 0.0  ;;  %v8765_v32 = vmul.f32 %v8595_v45, %v14488_v24 }
 0x9c0   : > { %v8836_v28 = vmul.f32 %v8800_v37, %v13877_v9  ;;  %v8422_v13 = vpop.f32.mrb[16].mxu1 }
 0x9c1   : > { %v8801_v51 = vsel %vm8729_vm4, %v8595_v45, %v8765_v32  ;;  %v11743_v8 = vadd.f32 %v15893_v12, %v8422_v13  ;;  %v8424_v5 = vpop.f32.mrb[17].mxu1  ;;  %v9016_v40 = vld [vmem:[#allocation2 + $0x12] sm:$0xff] }
 0x9c2   : > { %8872 = vst.msk [vmem:[#allocation2 + $0x23] sm:$0xff] %vm2904_vm3, %v8836_v28  ;;  %v8837_v50 = vmul.f32 %v8801_v51, %v13879_v15  ;;  %v8425_v59 = vpop.f32.mrb[18].mxu1  ;;  %v8962_v63 = vld [vmem:[#allocation2 + $0x11] sm:$0xff] }
 0x9c3   : > { %v8600_v52 = vadd.f32 %v11743_v8, %v15713_v27  ;;  %v11744_v54 = vadd.f32 %v15893_v12, %v8425_v59  ;;  %v8427_v29 = vpop.f32.mrb[19].mxu1  ;;  %v9017_v6 = vld [vmem:[#allocation2 + $0x1a] sm:$0xff] }
 0x9c4   : > { %v8963_v9 = vld [vmem:[#allocation2 + $0x19] sm:$0xff]  ;;  %8873 = vst.msk [vmem:[#allocation2 + $0x2b] sm:$0xff] %vm2904_vm3, %v8837_v50  ;;  %v15943_v42 = vpack.c.bf16 %v9017_v6, %v9016_v40 }
 0x9c5   : > { %v8997_v1 = vpack.c.bf16 %v8963_v9, %v8962_v63  ;;  %vm8730_vm5 = vcmp.ge.f32.partialorder %v8600_v52, 0.0  ;;  %v8766_v15 = vmul.f32 %v8600_v52, %v14488_v24  ;;  %v8603_v11 = vadd.f32 %v11744_v54, %v15719_v60 }
 0x9c6   : > { %9362 = vrot.lane.b32.xlu1 %v15943_v42, %s12784_s30 }
 0x9c7   : > { %9310 = vrot.lane.b32.xlu0 %v8997_v1, %s12784_s30  ;;  %v8802_v27 = vsel %vm8730_vm5, %v8600_v52, %v8766_v15  ;;  %vm8731_vm6 = vcmp.ge.f32.partialorder %v8603_v11, 0.0  ;;  %v8767_v61 = vmul.f32 %v8603_v11, %v14488_v24 }
 0x9c8   : > { %v8838_v26 = vmul.f32 %v8802_v27, %v13888_v25  ;;  %v8430_v16 = vpop.f32.mrb[20].mxu1 }
 0x9c9   : > { %v8803_v4 = vsel %vm8731_vm6, %v8603_v11, %v8767_v61  ;;  %v11745_v34 = vadd.f32 %v15893_v12, %v8430_v16  ;;  %v8432_v62 = vpop.f32.mrb[21].mxu1  ;;  %v9018_v10 = vld [vmem:[#allocation2 + $0x22] sm:$0xff] }
 0x9ca   : > { %8874 = vst.msk [vmem:[#allocation2 + $0x33] sm:$0xff] %vm2904_vm3, %v8838_v26  ;;  %v8839_v60 = vmul.f32 %v8803_v4, %v13898_v36  ;;  %v8433_v7 = vpop.f32.mrb[22].mxu1  ;;  %v8964_v28 = vld [vmem:[#allocation2 + $0x21] sm:$0xff] }
 0x9cb   : > { %v8608_v45 = vadd.f32 %v11745_v34, %v15710_v18  ;;  %v11746_v3 = vadd.f32 %v15893_v12, %v8433_v7  ;;  %v8435_v37 = vpop.f32.mrb[23].mxu1  ;;  %v9019_v32 = vld [vmem:[#allocation2 + $0x2a] sm:$0xff] }
 0x9cc   : > { %v8965_v13 = vld [vmem:[#allocation2 + $0x29] sm:$0xff]  ;;  %8875 = vst.msk [vmem:[#allocation2 + $0x3b] sm:$0xff] %vm2904_vm3, %v8839_v60  ;;  %v15958_v25 = vpack.c.bf16 %v9019_v32, %v9018_v10 }
 0x9cd   : > { %v8998_v51 = vpack.c.bf16 %v8965_v13, %v8964_v28  ;;  %vm8732_vm7 = vcmp.ge.f32.partialorder %v8608_v45, 0.0  ;;  %v8768_v8 = vmul.f32 %v8608_v45, %v14488_v24  ;;  %v8611_v36 = vadd.f32 %v11746_v3, %v15715_v39  ;;  %v9236_v29 = vld [vmem:[#allocation2 + $0x26] sm:$0xff] }
 0x9ce   : > { %9364 = vrot.lane.b32.xlu1 %v15958_v25, %s12784_s30 }
 0x9cf   : > { %9312 = vrot.lane.b32.xlu0 %v8998_v51, %s12784_s30  ;;  %v8804_v18 = vsel %vm8732_vm7, %v8608_v45, %v8768_v8  ;;  %vm8733_vm8 = vcmp.ge.f32.partialorder %v8611_v36, 0.0  ;;  %v8769_v5 = vmul.f32 %v8611_v36, %v14488_v24 }
 0x9d0   : > { %v8840_v50 = vmul.f32 %v8804_v18, %v13908_v46  ;;  %v8438_v59 = vpop.f32.mrb[24].mxu1 }
 0x9d1   : > { %v8805_v40 = vsel %vm8733_vm8, %v8611_v36, %v8769_v5  ;;  %v11747_v52 = vadd.f32 %v15893_v12, %v8438_v59  ;;  %v8440_v54 = vpop.f32.mrb[25].mxu1  ;;  %v9237_v6 = vld [vmem:[#allocation2 + $0x2e] sm:$0xff] }
 0x9d2   : > { %8876 = vst.msk [vmem:[#allocation2 + $0x43] sm:$0xff] %vm2904_vm3, %v8840_v50  ;;  %v8841_v39 = vmul.f32 %v8805_v40, %v13910_v47  ;;  %v8441_v63 = vpop.f32.mrb[26].mxu1  ;;  %v9272_v9 = vpack.c.bf16 %v9237_v6, %v9236_v29  ;;  %v9020_v1 = vld [vmem:[#allocation2 + $0x32] sm:$0xff] }
 0x9d3   : > { %v8616_v15 = vadd.f32 %v11747_v52, %v15724_v21  ;;  %v11748_v11 = vadd.f32 %v15893_v12, %v8441_v63  ;;  %v8443_v27 = vpop.f32.mrb[27].mxu1  ;;  %v9021_v46 = vld [vmem:[#allocation2 + $0x3a] sm:$0xff]  ;;  %v8966_v61 = vld [vmem:[#allocation2 + $0x31] sm:$0xff] }
 0x9d4   : > { %v8967_v26 = vld [vmem:[#allocation2 + $0x39] sm:$0xff]  ;;  %8877 = vst.msk [vmem:[#allocation2 + $0x4b] sm:$0xff] %vm2904_vm3, %v8841_v39  ;;  %11631 = vmatprep.mubr.msk.bf16.mxu1 %vm2904_vm3, %v9272_v9  ;;  %v15974_v16 = vpack.c.bf16 %v9021_v46, %v9020_v1 }
 0x9d5   : > { %v8999_v4 = vpack.c.bf16 %v8967_v26, %v8966_v61  ;;  %vm8734_vm9 = vcmp.ge.f32.partialorder %v8616_v15, 0.0  ;;  %v8770_v47 = vmul.f32 %v8616_v15, %v14488_v24  ;;  %v8619_v34 = vadd.f32 %v11748_v11, %v15730_v55  ;;  %v9238_v37 = vld [vmem:[#allocation2 + $0x36] sm:$0xff] }
 0x9d6   : > { %9366 = vrot.lane.b32.xlu1 %v15974_v16, %s12784_s30 }
 0x9d7   : > { %9314 = vrot.lane.b32.xlu0 %v8999_v4, %s12784_s30  ;;  %v8806_v21 = vsel %vm8734_vm9, %v8616_v15, %v8770_v47  ;;  %vm8735_vm10 = vcmp.ge.f32.partialorder %v8619_v34, 0.0  ;;  %v8771_v62 = vmul.f32 %v8619_v34, %v14488_v24 }
 0x9d8   : > { %v8842_v60 = vmul.f32 %v8806_v21, %v13925_v31  ;;  %v8446_v7 = vpop.f32.mrb[28].mxu1 }
 0x9d9   : > { %v8807_v10 = vsel %vm8735_vm10, %v8619_v34, %v8771_v62  ;;  %v11749_v45 = vadd.f32 %v15893_v12, %v8446_v7  ;;  %v8448_v3 = vpop.f32.mrb[29].mxu1  ;;  %v9239_v32 = vld [vmem:[#allocation2 + $0x3e] sm:$0xff] }
 0x9da   : > { %8878 = vst.msk [vmem:[#allocation2 + $0x53] sm:$0xff] %vm2904_vm3, %v8842_v60  ;;  %v8843_v55 = vmul.f32 %v8807_v10, %v13936_v48  ;;  %v8449_v28 = vpop.f32.mrb[30].mxu1  ;;  %v9273_v13 = vpack.c.bf16 %v9239_v32, %v9238_v37  ;;  %v9022_v51 = vld [vmem:[#allocation2 + $0x42] sm:$0xff] }
 0x9db   : > { %v8624_v8 = vadd.f32 %v11749_v45, %v15721_v17  ;;  %v11750_v36 = vadd.f32 %v15893_v12, %v8449_v28  ;;  %v8451_v18 = vpop.f32.mrb[31].mxu1  ;;  %v9023_v31 = vld [vmem:[#allocation2 + $0x4a] sm:$0xff]  ;;  %v8968_v5 = vld [vmem:[#allocation2 + $0x41] sm:$0xff] }
 0x9dc   : > { %v8969_v50 = vld [vmem:[#allocation2 + $0x49] sm:$0xff]  ;;  %8879 = vst.msk [vmem:[#allocation2 + $0x5b] sm:$0xff] %vm2904_vm3, %v8843_v55  ;;  %11632 = vmatmul.mubr.msk.bf16.vlgmr.msra.gmra.mrb[80].mxu1 %vm2904_vm3, %v9273_v13  ;;  %v15990_v59 = vpack.c.bf16 %v9023_v31, %v9022_v51 }
 0x9dd   : > { %v9000_v40 = vpack.c.bf16 %v8969_v50, %v8968_v5  ;;  %vm8736_vm11 = vcmp.ge.f32.partialorder %v8624_v8, 0.0  ;;  %v8772_v48 = vmul.f32 %v8624_v8, %v14488_v24  ;;  %v8627_v52 = vadd.f32 %v11750_v36, %v15726_v30  ;;  %v9240_v1 = vld [vmem:[#allocation2 + $0x46] sm:$0xff] }
 0x9de   : > { %9368 = vrot.lane.b32.xlu1 %v15990_v59, %s12784_s30 }
 0x9df   : > { %9316 = vrot.lane.b32.xlu0 %v9000_v40, %s12784_s30  ;;  %v8808_v17 = vsel %vm8736_vm11, %v8624_v8, %v8772_v48  ;;  %vm8737_vm12 = vcmp.ge.f32.partialorder %v8627_v52, 0.0  ;;  %v8773_v54 = vmul.f32 %v8627_v52, %v14488_v24 }
 0x9e0   : > { %v8844_v29 = vmul.f32 %v8808_v17, %v13950_v43  ;;  %v8454_v6 = vpop.f32.mrb[32].mxu1 }
 0x9e1   : > { %v8809_v39 = vsel %vm8737_vm12, %v8627_v52, %v8773_v54  ;;  %v11751_v63 = vadd.f32 %v15893_v12, %v8454_v6  ;;  %v8456_v9 = vpop.f32.mrb[33].mxu1  ;;  %v9241_v15 = vld [vmem:[#allocation2 + $0x4e] sm:$0xff] }
 0x9e2   : > { %8880 = vst.msk [vmem:[#allocation2 + $0x63] sm:$0xff] %vm2904_vm3, %v8844_v29  ;;  %v8845_v30 = vmul.f32 %v8809_v39, %v13954_v56  ;;  %v8457_v11 = vpop.f32.mrb[34].mxu1  ;;  %v9274_v27 = vpack.c.bf16 %v9241_v15, %v9240_v1  ;;  %v9024_v46 = vld [vmem:[#allocation2 + $0x52] sm:$0xff] }
 0x9e3   : > { %v8632_v61 = vadd.f32 %v11751_v63, %v15735_v57  ;;  %v11752_v26 = vadd.f32 %v15893_v12, %v8457_v11  ;;  %v8459_v4 = vpop.f32.mrb[35].mxu1  ;;  %v9025_v43 = vld [vmem:[#allocation2 + $0x5a] sm:$0xff]  ;;  %v8970_v47 = vld [vmem:[#allocation2 + $0x51] sm:$0xff] }
 0x9e4   : > { %v8971_v34 = vld [vmem:[#allocation2 + $0x59] sm:$0xff]  ;;  %8881 = vst.msk [vmem:[#allocation2 + $0x6b] sm:$0xff] %vm2904_vm3, %v8845_v30  ;;  %11635 = vmatprep.mubr.msk.bf16.mxu1 %vm2904_vm3, %v9274_v27  ;;  %v16006_v21 = vpack.c.bf16 %v9025_v43, %v9024_v46  ;;  %v16847_v54 = vld [vmem:[#allocation5_spill] sm:$0xff] }
 0x9e5   : > { %v9001_v62 = vpack.c.bf16 %v8971_v34, %v8970_v47  ;;  %vm8738_vm13 = vcmp.ge.f32.partialorder %v8632_v61, 0.0  ;;  %v8774_v56 = vmul.f32 %v8632_v61, %v14488_v24  ;;  %v8635_v60 = vadd.f32 %v11752_v26, %v15741_v33  ;;  %v9242_v55 = vld [vmem:[#allocation2 + $0x56] sm:$0xff] }
 0x9e6   : > { %9370 = vrot.lane.b32.xlu1 %v16006_v21, %s12784_s30 }
 0x9e7   : > { %9318 = vrot.lane.b32.xlu0 %v9001_v62, %s12784_s30  ;;  %v8810_v57 = vsel %vm8738_vm13, %v8632_v61, %v8774_v56  ;;  %vm8739_vm14 = vcmp.ge.f32.partialorder %v8635_v60, 0.0  ;;  %v8775_v7 = vmul.f32 %v8635_v60, %v14488_v24 }
 0x9e8   : > { %v8846_v10 = vmul.f32 %v8810_v57, %v16766_v35  ;;  %v8462_v45 = vpop.f32.mrb[36].mxu1  ;;  %v16849_v57 = vld [vmem:[#allocation38_spill] sm:$0xff] }
 0x9e9   : > { %v8811_v3 = vsel %vm8739_vm14, %v8635_v60, %v8775_v7  ;;  %v11753_v37 = vadd.f32 %v15893_v12, %v8462_v45  ;;  %v8464_v32 = vpop.f32.mrb[37].mxu1  ;;  %v9243_v28 = vld [vmem:[#allocation2 + $0x5e] sm:$0xff] }
 0x9ea   : > { %8882 = vst.msk [vmem:[#allocation2 + $0x73] sm:$0xff] %vm2904_vm3, %v8846_v10  ;;  %v8847_v33 = vmul.f32 %v8811_v3, %v13975_v38  ;;  %v8465_v13 = vpop.f32.mrb[38].mxu1  ;;  %v9275_v51 = vpack.c.bf16 %v9243_v28, %v9242_v55  ;;  %v9026_v8 = vld [vmem:[#allocation2 + $0x62] sm:$0xff] }
 0x9eb   : > { %v8640_v36 = vadd.f32 %v11753_v37, %v15732_v2  ;;  %v11754_v18 = vadd.f32 %v15893_v12, %v8465_v13  ;;  %v8467_v31 = vpop.f32.mrb[39].mxu1  ;;  %v9027_v35 = vld [vmem:[#allocation2 + $0x6a] sm:$0xff]  ;;  %v8972_v5 = vld [vmem:[#allocation2 + $0x61] sm:$0xff] }
 0x9ec   : > { %v8973_v50 = vld [vmem:[#allocation2 + $0x69] sm:$0xff]  ;;  %8883 = vst.msk [vmem:[#allocation2 + $0x7b] sm:$0xff] %vm2904_vm3, %v8847_v33  ;;  %11636 = vmatmul.mubr.msk.bf16.gmra.mrb[84].mxu1 %vm2904_vm3, %v9275_v51  ;;  %v16022_v40 = vpack.c.bf16 %v9027_v35, %v9026_v8  ;;  %v16850_v45 = vld [vmem:[#allocation7_spill] sm:$0xff] }
 0x9ed   : > { %v9002_v48 = vpack.c.bf16 %v8973_v50, %v8972_v5  ;;  %vm8740_vm15 = vcmp.ge.f32.partialorder %v8640_v36, 0.0  ;;  %v8776_v38 = vmul.f32 %v8640_v36, %v14488_v24  ;;  %v8643_v52 = vadd.f32 %v11754_v18, %v15737_v0  ;;  %v9244_v1 = vld [vmem:[#allocation2 + $0x66] sm:$0xff]  ;;  %v16848_v0 = vld [vmem:[#allocation6_spill] sm:$0xff]  ;;  %v16852_v35 = vld [vmem:[#allocation33_spill] sm:$0xff] }
 0x9ee   : > { %9372 = vrot.lane.b32.xlu1 %v16022_v40, %s12784_s30  ;;  %v16851_v51 = vld [vmem:[#allocation8_spill] sm:$0xff] }
 0x9ef   : > { %9320 = vrot.lane.b32.xlu0 %v9002_v48, %s12784_s30  ;;  %v8812_v2 = vsel %vm8740_vm15, %v8640_v36, %v8776_v38  ;;  %vm8741_vm0 = vcmp.ge.f32.partialorder %v8643_v52, 0.0  ;;  %v8777_v17 = vmul.f32 %v8643_v52, %v14488_v24 }
 0x9f0   : > { %v8848_v29 = vmul.f32 %v8812_v2, %v16847_v54  ;;  %v8470_v6 = vpop.f32.mrb[40].mxu1 }
 0x9f1   : > { %v8813_v39 = vsel %vm8741_vm0, %v8643_v52, %v8777_v17  ;;  %v11755_v63 = vadd.f32 %v15893_v12, %v8470_v6  ;;  %v8472_v9 = vpop.f32.mrb[41].mxu1  ;;  %v9245_v15 = vld [vmem:[#allocation2 + $0x6e] sm:$0xff] }
 0x9f2   : > { %8884 = vst.msk [vmem:[#allocation2 + $0x83] sm:$0xff] %vm2904_vm3, %v8848_v29  ;;  %v8849_v30 = vmul.f32 %v8813_v39, %v16848_v0  ;;  %v8473_v11 = vpop.f32.mrb[42].mxu1  ;;  %v9276_v27 = vpack.c.bf16 %v9245_v15, %v9244_v1  ;;  %v9028_v46 = vld [vmem:[#allocation2 + $0x72] sm:$0xff]  ;;  %v16853_v6 = vld [vmem:[#allocation36_spill] sm:$0xff] }
 0x9f3   : > { %v8648_v61 = vadd.f32 %v11755_v63, %v15746_v49  ;;  %v11756_v26 = vadd.f32 %v15893_v12, %v8473_v11  ;;  %v8475_v4 = vpop.f32.mrb[43].mxu1  ;;  %v9029_v43 = vld [vmem:[#allocation2 + $0x7a] sm:$0xff]  ;;  %v8974_v47 = vld [vmem:[#allocation2 + $0x71] sm:$0xff] }
 0x9f4   : > { %v8975_v34 = vld [vmem:[#allocation2 + $0x79] sm:$0xff]  ;;  %8885 = vst.msk [vmem:[#allocation2 + $0x8b] sm:$0xff] %vm2904_vm3, %v8849_v30  ;;  %11639 = vmatprep.mubr.msk.bf16.mxu1 %vm2904_vm3, %v9276_v27  ;;  %v16038_v62 = vpack.c.bf16 %v9029_v43, %v9028_v46  ;;  %v16854_v1 = vld [vmem:[#allocation9_spill] sm:$0xff] }
 0x9f5   : > { %v9003_v56 = vpack.c.bf16 %v8975_v34, %v8974_v47  ;;  %vm8742_vm1 = vcmp.ge.f32.partialorder %v8648_v61, 0.0  ;;  %v8778_v60 = vmul.f32 %v8648_v61, %v14488_v24  ;;  %v8651_v7 = vadd.f32 %v11756_v26, %v16849_v57  ;;  %v9246_v33 = vld [vmem:[#allocation2 + $0x76] sm:$0xff] }
 0x9f6   : > { %9374 = vrot.lane.b32.xlu1 %v16038_v62, %s12784_s30  ;;  %v16855_v26 = vld [vmem:[#allocation10_spill] sm:$0xff] }
 0x9f7   : > { %9322 = vrot.lane.b32.xlu0 %v9003_v56, %s12784_s30  ;;  %v8814_v49 = vsel %vm8742_vm1, %v8648_v61, %v8778_v60  ;;  %vm8743_vm2 = vcmp.ge.f32.partialorder %v8651_v7, 0.0  ;;  %v8779_v10 = vmul.f32 %v8651_v7, %v14488_v24 }
 0x9f8   : > { %v8850_v3 = vmul.f32 %v8814_v49, %v16850_v45  ;;  %v8478_v37 = vpop.f32.mrb[44].mxu1 }
 0x9f9   : > { %v8815_v32 = vsel %vm8743_vm2, %v8651_v7, %v8779_v10  ;;  %v11757_v55 = vadd.f32 %v15893_v12, %v8478_v37  ;;  %v8480_v28 = vpop.f32.mrb[45].mxu1  ;;  %v9247_v13 = vld [vmem:[#allocation2 + $0x7e] sm:$0xff] }
 0x9fa   : > { %8886 = vst.msk [vmem:[#allocation2 + $0x93] sm:$0xff] %vm2904_vm3, %v8850_v3  ;;  %v8851_v8 = vmul.f32 %v8815_v32, %v16851_v51  ;;  %v8481_v36 = vpop.f32.mrb[46].mxu1  ;;  %v9277_v18 = vpack.c.bf16 %v9247_v13, %v9246_v33  ;;  %v9030_v31 = vld [vmem:[#allocation2 + $0x82] sm:$0xff] }
 0x9fb   : > { %v8656_v5 = vadd.f32 %v11757_v55, %v16852_v35  ;;  %v11758_v50 = vadd.f32 %v15893_v12, %v8481_v36  ;;  %v8483_v48 = vpop.f32.mrb[47].mxu1  ;;  %v9031_v38 = vld [vmem:[#allocation2 + $0x8a] sm:$0xff]  ;;  %v8976_v52 = vld [vmem:[#allocation2 + $0x81] sm:$0xff] }
 0x9fc   : > { %v8977_v2 = vld [vmem:[#allocation2 + $0x89] sm:$0xff]  ;;  %8887 = vst.msk [vmem:[#allocation2 + $0x9b] sm:$0xff] %vm2904_vm3, %v8851_v8  ;;  %11640 = vmatmul.mubr.msk.bf16.gmra.mrb[88].mxu1 %vm2904_vm3, %v9277_v18  ;;  %v16054_v17 = vpack.c.bf16 %v9031_v38, %v9030_v31  ;;  %v16857_v33 = vld [vmem:[#allocation11_spill] sm:$0xff] }
 0x9fd   : > { %v9004_v54 = vpack.c.bf16 %v8977_v2, %v8976_v52  ;;  %vm8744_vm4 = vcmp.ge.f32.partialorder %v8656_v5, 0.0  ;;  %v8780_v29 = vmul.f32 %v8656_v5, %v14488_v24  ;;  %v8659_v39 = vadd.f32 %v11758_v50, %v16853_v6  ;;  %v9248_v46 = vld [vmem:[#allocation2 + $0x86] sm:$0xff] }
 0x9fe   : > { %9376 = vrot.lane.b32.xlu1 %v16054_v17, %s12784_s30  ;;  %v16856_v32 = vld [vmem:[#allocation40_spill] sm:$0xff]  ;;  %v16859_v2 = vld [vmem:[#allocation35_spill] sm:$0xff] }
 0x9ff   : > { %9324 = vrot.lane.b32.xlu0 %v9004_v54, %s12784_s30  ;;  %v8816_v63 = vsel %vm8744_vm4, %v8656_v5, %v8780_v29  ;;  %vm8745_vm5 = vcmp.ge.f32.partialorder %v8659_v39, 0.0  ;;  %v8781_v9 = vmul.f32 %v8659_v39, %v14488_v24  ;;  %v16858_v5 = vld [vmem:[#allocation12_spill] sm:$0xff] }
 0xa00   : > { %v8852_v15 = vmul.f32 %v8816_v63, %v16854_v1  ;;  %v8486_v0 = vpop.f32.mrb[48].mxu1 }
 0xa01   : > { %v8817_v30 = vsel %vm8745_vm5, %v8659_v39, %v8781_v9  ;;  %v11759_v11 = vadd.f32 %v15893_v12, %v8486_v0  ;;  %v8488_v27 = vpop.f32.mrb[49].mxu1  ;;  %v9249_v61 = vld [vmem:[#allocation2 + $0x8e] sm:$0xff] }
 0xa02   : > { %8888 = vst.msk [vmem:[#allocation2 + $0xa3] sm:$0xff] %vm2904_vm3, %v8852_v15  ;;  %v8853_v4 = vmul.f32 %v8817_v30, %v16855_v26  ;;  %v8489_v43 = vpop.f32.mrb[50].mxu1  ;;  %v9278_v47 = vpack.c.bf16 %v9249_v61, %v9248_v46  ;;  %v9032_v34 = vld [vmem:[#allocation2 + $0x92] sm:$0xff] }
 0xa03   : > { %v8664_v56 = vadd.f32 %v11759_v11, %v15758_v53  ;;  %v11760_v60 = vadd.f32 %v15893_v12, %v8489_v43  ;;  %v8491_v57 = vpop.f32.mrb[51].mxu1  ;;  %v9033_v7 = vld [vmem:[#allocation2 + $0x9a] sm:$0xff]  ;;  %v8978_v49 = vld [vmem:[#allocation2 + $0x91] sm:$0xff] }
 0xa04   : > { %v8979_v10 = vld [vmem:[#allocation2 + $0x99] sm:$0xff]  ;;  %8889 = vst.msk [vmem:[#allocation2 + $0xab] sm:$0xff] %vm2904_vm3, %v8853_v4  ;;  %11643 = vmatprep.mubr.msk.bf16.mxu1 %vm2904_vm3, %v9278_v47  ;;  %v16070_v45 = vpack.c.bf16 %v9033_v7, %v9032_v34  ;;  %v16860_v30 = vld [vmem:[#allocation37_spill] sm:$0xff] }
 0xa05   : > { %v9005_v3 = vpack.c.bf16 %v8979_v10, %v8978_v49  ;;  %vm8746_vm6 = vcmp.ge.f32.partialorder %v8664_v56, 0.0  ;;  %v8782_v37 = vmul.f32 %v8664_v56, %v14488_v24  ;;  %v8667_v55 = vadd.f32 %v11760_v60, %v16856_v32  ;;  %v9250_v31 = vld [vmem:[#allocation2 + $0x96] sm:$0xff] }
 0xa06   : > { %9378 = vrot.lane.b32.xlu1 %v16070_v45, %s12784_s30  ;;  %v16861_v61 = vld [vmem:[#allocation13_spill] sm:$0xff]  ;;  %v16862_v57 = vld [vmem:[#allocation14_spill] sm:$0xff] }
 0xa07   : > { %9326 = vrot.lane.b32.xlu0 %v9005_v3, %s12784_s30  ;;  %v8818_v53 = vsel %vm8746_vm6, %v8664_v56, %v8782_v37  ;;  %vm8747_vm7 = vcmp.ge.f32.partialorder %v8667_v55, 0.0  ;;  %v8783_v28 = vmul.f32 %v8667_v55, %v14488_v24 }
 0xa08   : > { %v8854_v13 = vmul.f32 %v8818_v53, %v16857_v33  ;;  %v8494_v51 = vpop.f32.mrb[52].mxu1 }
 0xa09   : > { %v8819_v8 = vsel %vm8747_vm7, %v8667_v55, %v8783_v28  ;;  %v11761_v36 = vadd.f32 %v15893_v12, %v8494_v51  ;;  %v8496_v18 = vpop.f32.mrb[53].mxu1  ;;  %v9251_v35 = vld [vmem:[#allocation2 + $0x9e] sm:$0xff] }
 0xa0a   : > { %8890 = vst.msk [vmem:[#allocation2 + $0xb3] sm:$0xff] %vm2904_vm3, %v8854_v13  ;;  %v8855_v50 = vmul.f32 %v8819_v8, %v16858_v5  ;;  %v8497_v48 = vpop.f32.mrb[54].mxu1  ;;  %v9279_v38 = vpack.c.bf16 %v9251_v35, %v9250_v31  ;;  %v9034_v52 = vld [vmem:[#allocation2 + $0xa2] sm:$0xff] }
 0xa0b   : > { %v8672_v54 = vadd.f32 %v11761_v36, %v16859_v2  ;;  %v11762_v29 = vadd.f32 %v15893_v12, %v8497_v48  ;;  %v8499_v6 = vpop.f32.mrb[55].mxu1  ;;  %v9035_v39 = vld [vmem:[#allocation2 + $0xaa] sm:$0xff]  ;;  %v8980_v63 = vld [vmem:[#allocation2 + $0xa1] sm:$0xff] }
 0xa0c   : > { %v8981_v9 = vld [vmem:[#allocation2 + $0xa9] sm:$0xff]  ;;  %8891 = vst.msk [vmem:[#allocation2 + $0xbb] sm:$0xff] %vm2904_vm3, %v8855_v50  ;;  %11644 = vmatmul.mubr.msk.bf16.gmra.mrb[92].mxu1 %vm2904_vm3, %v9279_v38  ;;  %v16086_v1 = vpack.c.bf16 %v9035_v39, %v9034_v52  ;;  %v16863_v31 = vld [vmem:[#allocation15_spill] sm:$0xff] }
 0xa0d   : > { %v9006_v15 = vpack.c.bf16 %v8981_v9, %v8980_v63  ;;  %vm8748_vm8 = vcmp.ge.f32.partialorder %v8672_v54, 0.0  ;;  %v8784_v0 = vmul.f32 %v8672_v54, %v14488_v24  ;;  %v8675_v11 = vadd.f32 %v11762_v29, %v16860_v30  ;;  %v9252_v56 = vld [vmem:[#allocation2 + $0xa6] sm:$0xff]  ;;  %v16865_v63 = vld [vmem:[#allocation42_spill] sm:$0xff] }
 0xa0e   : > { %9380 = vrot.lane.b32.xlu1 %v16086_v1, %s12784_s30 }
 0xa0f   : > { %9328 = vrot.lane.b32.xlu0 %v9006_v15, %s12784_s30  ;;  %v8820_v27 = vsel %vm8748_vm8, %v8672_v54, %v8784_v0  ;;  %vm8749_vm9 = vcmp.ge.f32.partialorder %v8675_v11, 0.0  ;;  %v8785_v46 = vmul.f32 %v8675_v11, %v14488_v24 }
 0xa10   : > { %v8856_v26 = vmul.f32 %v8820_v27, %v16861_v61  ;;  %v8502_v4 = vpop.f32.mrb[56].mxu1 }
 0xa11   : > { %v8821_v43 = vsel %vm8749_vm9, %v8675_v11, %v8785_v46  ;;  %v11763_v47 = vadd.f32 %v15893_v12, %v8502_v4  ;;  %v8504_v34 = vpop.f32.mrb[57].mxu1  ;;  %v9253_v60 = vld [vmem:[#allocation2 + $0xae] sm:$0xff]  ;;  %v16866_v4 = vld [vmem:[#allocation39_spill] sm:$0xff] }
 0xa12   : > { %8892 = vst.msk [vmem:[#allocation2 + $0xc3] sm:$0xff] %vm2904_vm3, %v8856_v26  ;;  %v8857_v7 = vmul.f32 %v8821_v43, %v16862_v57  ;;  %v8505_v49 = vpop.f32.mrb[58].mxu1  ;;  %v9280_v10 = vpack.c.bf16 %v9253_v60, %v9252_v56  ;;  %v9036_v3 = vld [vmem:[#allocation2 + $0xb2] sm:$0xff] }
 0xa13   : > { %v8680_v37 = vadd.f32 %v11763_v47, %v15769_v44  ;;  %v11764_v32 = vadd.f32 %v15893_v12, %v8505_v49  ;;  %v8507_v55 = vpop.f32.mrb[59].mxu1  ;;  %v9037_v53 = vld [vmem:[#allocation2 + $0xba] sm:$0xff]  ;;  %v8982_v28 = vld [vmem:[#allocation2 + $0xb1] sm:$0xff] }
 0xa14   : > { %v8983_v33 = vld [vmem:[#allocation2 + $0xb9] sm:$0xff]  ;;  %8893 = vst.msk [vmem:[#allocation2 + $0xcb] sm:$0xff] %vm2904_vm3, %v8857_v7  ;;  %11647 = vmatprep.mubr.msk.bf16.mxu1 %vm2904_vm3, %v9280_v10  ;;  %v16102_v13 = vpack.c.bf16 %v9037_v53, %v9036_v3  ;;  %v16867_v56 = vld [vmem:[#allocation17_spill] sm:$0xff] }
 0xa15   : > { %v9007_v51 = vpack.c.bf16 %v8983_v33, %v8982_v28  ;;  %vm8750_vm10 = vcmp.ge.f32.partialorder %v8680_v37, 0.0  ;;  %v8786_v8 = vmul.f32 %v8680_v37, %v14488_v24  ;;  %v8683_v36 = vadd.f32 %v11764_v32, %v15775_v14  ;;  %v9254_v52 = vld [vmem:[#allocation2 + $0xb6] sm:$0xff]  ;;  %v16864_v14 = vld [vmem:[#allocation16_spill] sm:$0xff] }
 0xa16   : > { %9382 = vrot.lane.b32.xlu1 %v16102_v13, %s12784_s30  ;;  %v16868_v32 = vld [vmem:[#allocation18_spill] sm:$0xff] }
 0xa17   : > { %9330 = vrot.lane.b32.xlu0 %v9007_v51, %s12784_s30  ;;  %v8822_v44 = vsel %vm8750_vm10, %v8680_v37, %v8786_v8  ;;  %vm8751_vm11 = vcmp.ge.f32.partialorder %v8683_v36, 0.0  ;;  %v8787_v18 = vmul.f32 %v8683_v36, %v14488_v24  ;;  %v16869_v51 = vld [vmem:[#allocation4_spill] sm:$0xff] }
 0xa18   : > { %v8858_v35 = vmul.f32 %v8822_v44, %v16863_v31  ;;  %v8510_v5 = vpop.f32.mrb[60].mxu1 }
 0xa19   : > { %v8823_v50 = vsel %vm8751_vm11, %v8683_v36, %v8787_v18  ;;  %v11765_v48 = vadd.f32 %v15893_v12, %v8510_v5  ;;  %v8512_v38 = vpop.f32.mrb[61].mxu1  ;;  %v9255_v2 = vld [vmem:[#allocation2 + $0xbe] sm:$0xff] }
 0xa1a   : > { %8894 = vst.msk [vmem:[#allocation2 + $0xd3] sm:$0xff] %vm2904_vm3, %v8858_v35  ;;  %v8859_v54 = vmul.f32 %v8823_v50, %v16864_v14  ;;  %v8513_v29 = vpop.f32.mrb[62].mxu1  ;;  %v9281_v6 = vpack.c.bf16 %v9255_v2, %v9254_v52  ;;  %v9038_v39 = vld [vmem:[#allocation2 + $0xc2] sm:$0xff] }
 0xa1b   : > { %v8688_v9 = vadd.f32 %v11765_v48, %v16865_v63  ;;  %v11766_v15 = vadd.f32 %v15893_v12, %v8513_v29  ;;  %v8515_v0 = vpop.f32.mrb[63].mxu1  ;;  %v9039_v30 = vld [vmem:[#allocation2 + $0xca] sm:$0xff]  ;;  %v8984_v11 = vld [vmem:[#allocation2 + $0xc1] sm:$0xff] }
 0xa1c   : > { %v8985_v27 = vld [vmem:[#allocation2 + $0xc9] sm:$0xff]  ;;  %8895 = vst.msk [vmem:[#allocation2 + $0xdb] sm:$0xff] %vm2904_vm3, %v8859_v54  ;;  %11648 = vmatmul.mubr.msk.bf16.gmra.mrb[96].mxu1 %vm2904_vm3, %v9281_v6  ;;  %v16118_v46 = vpack.c.bf16 %v9039_v30, %v9038_v39  ;;  %v16870_v14 = vld [vmem:[#allocation19_spill] sm:$0xff] }
 0xa1d   : > { %v9008_v61 = vpack.c.bf16 %v8985_v27, %v8984_v11  ;;  %vm8752_vm12 = vcmp.ge.f32.partialorder %v8688_v9, 0.0  ;;  %v8788_v26 = vmul.f32 %v8688_v9, %v14488_v24  ;;  %v8691_v43 = vadd.f32 %v11766_v15, %v16866_v4  ;;  %v9256_v3 = vld [vmem:[#allocation2 + $0xc6] sm:$0xff] }
 0xa1e   : > { %9384 = vrot.lane.b32.xlu1 %v16118_v46, %s12784_s30 }
 0xa1f   : > { %9332 = vrot.lane.b32.xlu0 %v9008_v61, %s12784_s30  ;;  %v8824_v47 = vsel %vm8752_vm12, %v8688_v9, %v8788_v26  ;;  %vm8753_vm13 = vcmp.ge.f32.partialorder %v8691_v43, 0.0  ;;  %v8789_v34 = vmul.f32 %v8691_v43, %v14488_v24  ;;  %v16872_v61 = vld [vmem:[#allocation41_spill] sm:$0xff] }
 0xa20   : > { %v8860_v60 = vmul.f32 %v8824_v47, %v16867_v56  ;;  %v8518_v57 = vpop.f32.mrb[64].mxu1 }
 0xa21   : > { %v8825_v7 = vsel %vm8753_vm13, %v8691_v43, %v8789_v34  ;;  %v11767_v49 = vadd.f32 %v15893_v12, %v8518_v57  ;;  %v8520_v10 = vpop.f32.mrb[65].mxu1  ;;  %v9257_v37 = vld [vmem:[#allocation2 + $0xce] sm:$0xff] }
 0xa22   : > { %8896 = vst.msk [vmem:[#allocation2 + $0xe3] sm:$0xff] %vm2904_vm3, %v8860_v60  ;;  %v8861_v55 = vmul.f32 %v8825_v7, %v16868_v32  ;;  %v8521_v53 = vpop.f32.mrb[66].mxu1  ;;  %v9282_v28 = vpack.c.bf16 %v9257_v37, %v9256_v3  ;;  %v9040_v33 = vld [vmem:[#allocation2 + $0xd2] sm:$0xff] }
 0xa23   : > { %v8696_v8 = vadd.f32 %v11767_v49, %v16869_v51  ;;  %v11768_v36 = vadd.f32 %v15893_v12, %v8521_v53  ;;  %v8523_v44 = vpop.f32.mrb[67].mxu1  ;;  %v9041_v18 = vld [vmem:[#allocation2 + $0xda] sm:$0xff]  ;;  %v8986_v31 = vld [vmem:[#allocation2 + $0xd1] sm:$0xff] }
 0xa24   : > { %v8987_v35 = vld [vmem:[#allocation2 + $0xd9] sm:$0xff]  ;;  %8897 = vst.msk [vmem:[#allocation2 + $0xeb] sm:$0xff] %vm2904_vm3, %v8861_v55  ;;  %11651 = vmatprep.mubr.msk.bf16.mxu1 %vm2904_vm3, %v9282_v28  ;;  %v16134_v5 = vpack.c.bf16 %v9041_v18, %v9040_v33  ;;  %v16874_v32 = vld [vmem:[#allocation21_spill] sm:$0xff] }
 0xa25   : > { %v9009_v50 = vpack.c.bf16 %v8987_v35, %v8986_v31  ;;  %vm8754_vm14 = vcmp.ge.f32.partialorder %v8696_v8, 0.0  ;;  %v8790_v48 = vmul.f32 %v8696_v8, %v14488_v24  ;;  %v8699_v38 = vadd.f32 %v11768_v36, %v15786_v19  ;;  %v9258_v9 = vld [vmem:[#allocation2 + $0xd6] sm:$0xff]  ;;  %v16871_v19 = vld [vmem:[#allocation20_spill] sm:$0xff] }
 0xa26   : > { %9386 = vrot.lane.b32.xlu1 %v16134_v5, %s12784_s30  ;;  %v16873_v49 = vld [vmem:[#allocation30_spill] sm:$0xff] }
 0xa27   : > { %9334 = vrot.lane.b32.xlu0 %v9009_v50, %s12784_s30  ;;  %v8826_v52 = vsel %vm8754_vm14, %v8696_v8, %v8790_v48  ;;  %vm8755_vm15 = vcmp.ge.f32.partialorder %v8699_v38, 0.0  ;;  %v8791_v2 = vmul.f32 %v8699_v38, %v14488_v24  ;;  %v16875_v44 = vld [vmem:[#allocation22_spill] sm:$0xff]  ;;  %v9014_v48 = vld [vmem:[#allocation2 + $0x2] sm:$0xff] }
 0xa28   : > { %v8862_v54 = vmul.f32 %v8826_v52, %v16870_v14  ;;  %v8526_v29 = vpop.f32.mrb[68].mxu1 }
 0xa29   : > { %v8827_v6 = vsel %vm8755_vm15, %v8699_v38, %v8791_v2  ;;  %v11769_v39 = vadd.f32 %v15893_v12, %v8526_v29  ;;  %v8528_v63 = vpop.f32.mrb[69].mxu1  ;;  %v9259_v15 = vld [vmem:[#allocation2 + $0xde] sm:$0xff]  ;;  %v9015_v38 = vld [vmem:[#allocation2 + $0xa] sm:$0xff] }
 0xa2a   : > { %8898 = vst.msk [vmem:[#allocation2 + $0xf3] sm:$0xff] %vm2904_vm3, %v8862_v54  ;;  %v8863_v0 = vmul.f32 %v8827_v6, %v16871_v19  ;;  %v8529_v30 = vpop.f32.mrb[70].mxu1  ;;  %v9283_v11 = vpack.c.bf16 %v9259_v15, %v9258_v9  ;;  %v9042_v27 = vld [vmem:[#allocation2 + $0xe2] sm:$0xff] }
 0xa2b   : > { %v8704_v26 = vadd.f32 %v11769_v39, %v16872_v61  ;;  %v11770_v4 = vadd.f32 %v15893_v12, %v8529_v30  ;;  %v8531_v43 = vpop.f32.mrb[71].mxu1  ;;  %v9043_v47 = vld [vmem:[#allocation2 + $0xea] sm:$0xff]  ;;  %v8988_v34 = vld [vmem:[#allocation2 + $0xe1] sm:$0xff] }
 0xa2c   : > { %v8989_v56 = vld [vmem:[#allocation2 + $0xe9] sm:$0xff]  ;;  %8899 = vst.msk [vmem:[#allocation2 + $0xfb] sm:$0xff] %vm2904_vm3, %v8863_v0  ;;  %11652 = vmatmul.mubr.msk.bf16.gmra.mrb[100].mxu1 %vm2904_vm3, %v9283_v11  ;;  %v16150_v60 = vpack.c.bf16 %v9043_v47, %v9042_v27  ;;  %v12773_v39 = vld [vmem:[#allocation2] sm:$0xff]  ;;  %v9050_v0 = vpack.c.bf16 %v9015_v38, %v9014_v48  ;;  %v9309_v27 = vpop.permute.xlu0 %9308  ;;  %v8909_v48 = vld [vmem:[#allocation2 + $0x18] sm:$0xff] }
 0xa2d   : > { %v9010_v57 = vpack.c.bf16 %v8989_v56, %v8988_v34  ;;  %vm8756_vm0 = vcmp.ge.f32.partialorder %v8704_v26, 0.0  ;;  %v8792_v7 = vmul.f32 %v8704_v26, %v14488_v24  ;;  %v8707_v10 = vadd.f32 %v11770_v4, %v16873_v49  ;;  %v9260_v8 = vld [vmem:[#allocation2 + $0xe6] sm:$0xff] }
 0xa2e   : > { %9388 = vrot.lane.b32.xlu1 %v16150_v60, %s12784_s30  ;;  %v8942_v63 = vpack.c.bf16 %v12773_v39, %v12773_v39  ;;  %v16876_v61 = vld [vmem:[#allocation23_spill] sm:$0xff] }
 0xa2f   : > { %9336 = vrot.lane.b32.xlu0 %v9010_v57, %s12784_s30  ;;  %v8828_v3 = vsel %vm8756_vm0, %v8704_v26, %v8792_v7  ;;  %vm8757_vm1 = vcmp.ge.f32.partialorder %v8707_v10, 0.0  ;;  %v8793_v37 = vmul.f32 %v8707_v10, %v14488_v24 }
 0xa30   : > { %v8864_v55 = vmul.f32 %v8828_v3, %v16874_v32  ;;  %v8534_v53 = vpop.f32.mrb[72].mxu1  ;;  %v9508_v4 = vsel %vm2904_vm3, %v8942_v63, %v9309_v27  ;;  %v16877_v3 = vld [vmem:[#allocation24_spill] sm:$0xff] }
 0xa31   : > { %v8829_v28 = vsel %vm8757_vm1, %v8707_v10, %v8793_v37  ;;  %v11771_v33 = vadd.f32 %v15893_v12, %v8534_v53  ;;  %v8536_v51 = vpop.f32.mrb[73].mxu1  ;;  %v9261_v36 = vld [vmem:[#allocation2 + $0xee] sm:$0xff] }
 0xa32   : > { %8900 = vst.msk [vmem:[#allocation2 + $0x103] sm:$0xff] %vm2904_vm3, %v8864_v55  ;;  %v8865_v18 = vmul.f32 %v8829_v28, %v16875_v44  ;;  %v8537_v31 = vpop.f32.mrb[74].mxu1  ;;  %v9284_v35 = vpack.c.bf16 %v9261_v36, %v9260_v8  ;;  %v9044_v50 = vld [vmem:[#allocation2 + $0xf2] sm:$0xff] }
 0xa33   : > { %v8712_v52 = vadd.f32 %v11771_v33, %v15910_v41  ;;  %v11772_v2 = vadd.f32 %v15893_v12, %v8537_v31  ;;  %v8539_v14 = vpop.f32.mrb[75].mxu1  ;;  %v9045_v54 = vld [vmem:[#allocation2 + $0xfa] sm:$0xff]  ;;  %v8990_v29 = vld [vmem:[#allocation2 + $0xf1] sm:$0xff] }
 0xa34   : > { %v8991_v6 = vld [vmem:[#allocation2 + $0xf9] sm:$0xff]  ;;  %8901 = vst.msk [vmem:[#allocation2 + $0x10b] sm:$0xff] %vm2904_vm3, %v8865_v18  ;;  %11655 = vmatprep.mubr.msk.bf16.mxu1 %vm2904_vm3, %v9284_v35  ;;  %v16166_v9 = vpack.c.bf16 %v9045_v54, %v9044_v50  ;;  %v8908_v14 = vld [vmem:[#allocation2 + $0x10] sm:$0xff] }
 0xa35   : > { %v9011_v15 = vpack.c.bf16 %v8991_v6, %v8990_v29  ;;  %vm8758_vm2 = vcmp.ge.f32.partialorder %v8712_v52, 0.0  ;;  %v8794_v19 = vmul.f32 %v8712_v52, %v14488_v24  ;;  %v8715_v41 = vadd.f32 %v11772_v2, %v15922_v22  ;;  %v12754_v22 = vld [vmem:[%s16664_s8 + $0x80] sm:$0xff]   ;;  %v9262_v49 = vld [vmem:[#allocation2 + $0xf6] sm:$0xff] }
 0xa36   : > { %9390 = vrot.lane.b32.xlu1 %v16166_v9, %s12784_s30  ;;  %v12774_v33 = vld [vmem:[%s16668_s12] ss:$0 sm:$0xff]  ;;  %v16878_v54 = vld [vmem:[#allocation25_spill] sm:$0xff]  ;;  %v8943_v39 = vpack.c.bf16 %v8909_v48, %v8908_v14  ;;  %v9182_v14 = vld [vmem:[#allocation2 + $0x25] sm:$0xff] }
 0xa37   : > { %9338 = vrot.lane.b32.xlu0 %v9011_v15, %s12784_s30  ;;  %v8830_v30 = vsel %vm8758_vm2, %v8712_v52, %v8794_v19  ;;  %vm8759_vm4 = vcmp.ge.f32.partialorder %v8715_v41, 0.0  ;;  %v8795_v11 = vmul.f32 %v8715_v41, %v14488_v24  ;;  %v9183_v48 = vld [vmem:[#allocation2 + $0x2d] sm:$0xff] }
 0xa38   : > { %v8866_v26 = vmul.f32 %v8830_v30, %v16876_v61  ;;  %v8542_v43 = vpop.f32.mrb[76].mxu1  ;;  %v9363_v47 = vpop.permute.xlu1 %9362 }
 0xa39   : > { %v8831_v34 = vsel %vm8759_vm4, %v8715_v41, %v8795_v11  ;;  %v11773_v56 = vadd.f32 %v15893_v12, %v8542_v43  ;;  %v8544_v57 = vpop.f32.mrb[77].mxu1  ;;  %v9580_v7 = vsel %vm2904_vm3, %v9050_v0, %v9363_v47  ;;  %v9263_v10 = vld [vmem:[#allocation2 + $0xfe] sm:$0xff]  ;;  %v9311_v52 = vpop.permute.xlu0 %9310 }
 0xa3a   : > { %8902 = vst.msk [vmem:[#allocation2 + $0x113] sm:$0xff] %vm2904_vm3, %v8866_v26  ;;  %v8867_v37 = vmul.f32 %v8831_v34, %v16877_v3  ;;  %v8545_v32 = vpop.f32.mrb[78].mxu1  ;;  %10175 = vmatprep.mubr.bf16.mxu0 %v9580_v7  ;;  %v9285_v55 = vpack.c.bf16 %v9263_v10, %v9262_v49  ;;  %v9046_v53 = vld [vmem:[#allocation2 + $0x102] sm:$0xff]  ;;  %v9512_v30 = vsel %vm2904_vm3, %v8943_v39, %v9311_v52  ;;  %v12757_v47 = vld [vmem:[%s16664_s8 + $0x98] sm:$0xff]  }
 0xa3b   : > { %v8720_v28 = vadd.f32 %v11773_v56, %v15902_v23  ;;  %v11774_v12 = vadd.f32 %v12774_v33, %v8545_v32  ;;  %v8547_v51 = vpop.f32.mrb[79].mxu1  ;;  %10176 = vmatmul.mubr.bf16.vlgmr.msra.gmra.mrb[168].mxu0 %v9508_v4  ;;  %v9047_v8 = vld [vmem:[#allocation2 + $0x10a] sm:$0xff]  ;;  %v8992_v36 = vld [vmem:[#allocation2 + $0x101] sm:$0xff]  ;;  %v9125_v57 = vld [vmem:[#allocation2 + $0x14] sm:$0xff] }
 0xa3c   : > { %v8993_v44 = vld [vmem:[#allocation2 + $0x109] sm:$0xff]  ;;  %8903 = vst.msk [vmem:[#allocation2 + $0x11b] sm:$0xff] %vm2904_vm3, %v8867_v37  ;;  %10321 = vmatpush1.bf16.msra.mxu0 %v12754_v22  ;;  %11656 = vmatmul.mubr.msk.bf16.gmra.mrb[104].mxu1 %vm2904_vm3, %v9285_v55  ;;  %v16189_v18 = vpack.c.bf16 %v9047_v8, %v9046_v53  ;;  %v9126_v22 = vld [vmem:[#allocation2 + $0x1c] sm:$0xff]  ;;  %v9129_v39 = vld [vmem:[#allocation2 + $0x34] sm:$0xff] }
 0xa3d   : > { %v9012_v31 = vpack.c.bf16 %v8993_v44, %v8992_v36  ;;  %v12755_v23 = vld [vmem:[%s16664_s8 + $0x88] sm:$0xff]   ;;  %vm8760_vm5 = vcmp.ge.f32.partialorder %v8720_v28, 0.0  ;;  %v8796_v35 = vmul.f32 %v8720_v28, %v14488_v24  ;;  %v8723_v50 = vadd.f32 %v11774_v12, %v15918_v20  ;;  %10322 = vmatprep.subr.bf16.mxu0 %v16747_v58  ;;  %v12756_v20 = vld [vmem:[%s16664_s8 + $0x90] sm:$0xff]   ;;  %v8910_v7 = vld [vmem:[#allocation2 + $0x20] sm:$0xff] }
 0xa3e   : > { %9392 = vrot.lane.b32.xlu1 %v16189_v18, %s12784_s30  ;;  %v9264_v19 = vld [vmem:[#allocation2 + $0x106] sm:$0xff]  ;;  %v9161_v10 = vpack.c.bf16 %v9126_v22, %v9125_v57  ;;  %v9130_v52 = vld [vmem:[#allocation2 + $0x3c] sm:$0xff] }
 0xa3f   : > { %9340 = vrot.lane.b32.xlu0 %v9012_v31, %s12784_s30  ;;  %v8832_v38 = vsel %vm8760_vm5, %v8720_v28, %v8796_v35  ;;  %vm8761_vm6 = vcmp.ge.f32.partialorder %v8723_v50, 0.0  ;;  %v8797_v2 = vmul.f32 %v8723_v50, %v14488_v24  ;;  %v16879_v24 = vld [vmem:[#allocation26_spill] sm:$0xff]  ;;  %v8911_v34 = vld [vmem:[#allocation2 + $0x28] sm:$0xff]  ;;  %v12758_v37 = vld [vmem:[%s16664_s8 + $0xa0] sm:$0xff]  }
 0xa40   : > { %v8868_v29 = vmul.f32 %v8832_v38, %v16878_v54  ;;  %v9365_v6 = vpop.permute.xlu1 %9364  ;;  %10323 = vmatpush1.bf16.msra.mxu0 %v12755_v23  ;;  %v8944_v3 = vpack.c.bf16 %v8911_v34, %v8910_v7  ;;  %v9128_v51 = vld [vmem:[#allocation2 + $0x2c] sm:$0xff]  ;;  %v9127_v23 = vld [vmem:[#allocation2 + $0x24] sm:$0xff]  ;;  %v8913_v38 = vld [vmem:[#allocation2 + $0x38] sm:$0xff] }
 0xa41   : > { %v8833_v63 = vsel %vm8761_vm6, %v8723_v50, %v8797_v2  ;;  %v9584_v15 = vsel %vm2904_vm3, %v15943_v42, %v9365_v6  ;;  %v9265_v41 = vld [vmem:[#allocation2 + $0x10e] sm:$0xff]  ;;  %10324 = vmatprep.subr.bf16.mxu0 %v16747_v58  ;;  %v9313_v56 = vpop.permute.xlu0 %9312  ;;  %v16234_v50 = vpack.c.bf16 %v9128_v51, %v9127_v23  ;;  %v9218_v6 = vpack.c.bf16 %v9183_v48, %v9182_v14  ;;  %v9186_v22 = vld [vmem:[#allocation2 + $0x45] sm:$0xff] }
 0xa42   : > { %8904 = vst.msk [vmem:[#allocation2 + $0x123] sm:$0xff] %vm2904_vm3, %v8868_v29  ;;  %v8869_v0 = vmul.f32 %v8833_v63, %v16879_v24  ;;  %10183 = vmatprep.mubr.bf16.mxu0 %v9584_v15  ;;  %v9286_v11 = vpack.c.bf16 %v9265_v41, %v9264_v19  ;;  %v9048_v27 = vld [vmem:[#allocation2 + $0x112] sm:$0xff]  ;;  %v9516_v28 = vsel %vm2904_vm3, %v8944_v3, %v9313_v56  ;;  %v12759_v35 = vld [vmem:[%s16664_s8 + $0xa8] sm:$0xff]   ;;  %v9185_v41 = vld [vmem:[#allocation2 + $0x3d] sm:$0xff] }
 0xa43   : > { %10184 = vmatmul.mubr.bf16.gmra.mrb[172].mxu0 %v9512_v30  ;;  %v9049_v61 = vld [vmem:[#allocation2 + $0x11a] sm:$0xff]  ;;  %v8994_v26 = vld [vmem:[#allocation2 + $0x111] sm:$0xff]  ;;  %v16244_v15 = vpack.c.bf16 %v9130_v52, %v9129_v39 }
 0xa44   : > { %v8995_v4 = vld [vmem:[#allocation2 + $0x119] sm:$0xff]  ;;  %8905 = vst.msk [vmem:[#allocation2 + $0x12b] sm:$0xff] %vm2904_vm3, %v8869_v0  ;;  %11659 = vmatprep.mubr.msk.bf16.mxu1 %vm2904_vm3, %v9286_v11  ;;  %v16213_v42 = vpack.c.bf16 %v9049_v61, %v9048_v27  ;;  %10325 = vmatpush1.bf16.msra.mxu0 %v12756_v20  ;;  %v8912_v54 = vld [vmem:[#allocation2 + $0x30] sm:$0xff]  ;;  %v9131_v27 = vld [vmem:[#allocation2 + $0x44] sm:$0xff] }
 0xa45   : > { %v9013_v43 = vpack.c.bf16 %v8995_v4, %v8994_v26  ;;  %10326 = vmatprep.subr.bf16.mxu0 %v16747_v58  ;;  %v9266_v55 = vld [vmem:[#allocation2 + $0x116] sm:$0xff]  ;;  %v8945_v20 = vpack.c.bf16 %v8913_v38, %v8912_v54  ;;  %v9132_v0 = vld [vmem:[#allocation2 + $0x4c] sm:$0xff]  ;;  %v8914_v34 = vld [vmem:[#allocation2 + $0x40] sm:$0xff] }
 0xa46   : > { %9394 = vrot.lane.b32.xlu1 %v16213_v42, %s12784_s30  ;;  %v12760_v63 = vld [vmem:[%s16664_s8 + $0xb0] sm:$0xff]   ;;  %v16256_v61 = vpack.c.bf16 %v9132_v0, %v9131_v27  ;;  %v8915_v4 = vld [vmem:[#allocation2 + $0x48] sm:$0xff] }
 0xa47   : > { %9342 = vrot.lane.b32.xlu0 %v9013_v43, %s12784_s30  ;;  %v9184_v30 = vld [vmem:[#allocation2 + $0x35] sm:$0xff]  ;;  %v9187_v26 = vld [vmem:[#allocation2 + $0x4d] sm:$0xff]  ;;  %v9194_v27 = vld [vmem:[#allocation2 + $0x85] sm:$0xff] }
 0xa48   : > { %v9367_v49 = vpop.permute.xlu1 %9366  ;;  %10327 = vmatpush1.bf16.msra.mxu0 %v12757_v47  ;;  %v9219_v11 = vpack.c.bf16 %v9185_v41, %v9184_v30  ;;  %v9134_v43 = vld [vmem:[#allocation2 + $0x5c] sm:$0xff]  ;;  %v9220_v57 = vpack.c.bf16 %v9187_v26, %v9186_v22  ;;  %v9133_v7 = vld [vmem:[#allocation2 + $0x54] sm:$0xff]  ;;  %v9140_v39 = vld [vmem:[#allocation2 + $0x8c] sm:$0xff] }
 0xa49   : > { %v9588_v32 = vsel %vm2904_vm3, %v15958_v25, %v9367_v49  ;;  %v9267_v53 = vld [vmem:[#allocation2 + $0x11e] sm:$0xff]  ;;  %10328 = vmatprep.subr.bf16.mxu0 %v16747_v58  ;;  %v9315_v2 = vpop.permute.xlu0 %9314  ;;  %v8946_v49 = vpack.c.bf16 %v8915_v4, %v8914_v34  ;;  %v16265_v3 = vpack.c.bf16 %v9134_v43, %v9133_v7  ;;  %v8916_v23 = vld [vmem:[#allocation2 + $0x50] sm:$0xff]  ;;  %v8919_v0 = vld [vmem:[#allocation2 + $0x68] sm:$0xff] }
 0xa4a   : > { %10191 = vmatprep.mubr.bf16.mxu0 %v9588_v32  ;;  %v9287_v33 = vpack.c.bf16 %v9267_v53, %v9266_v55  ;;  %v9068_v12 = vld [vmem:[#allocation2 + $0x122] sm:$0xff]  ;;  %v9520_v24 = vsel %vm2904_vm3, %v8945_v20, %v9315_v2  ;;  %v9136_v53 = vld [vmem:[#allocation2 + $0x6c] sm:$0xff]  ;;  %v9137_v38 = vld [vmem:[#allocation2 + $0x74] sm:$0xff] }
 0xa4b   : > { %9416 = vrot.lane.b32.xlu0 %v9161_v10, %s12784_s30  ;;  %10192 = vmatmul.mubr.bf16.gmra.mrb[176].mxu0 %v9516_v28  ;;  %v9268_v8 = vld [vmem:[#allocation2 + $0x126] sm:$0xff]  ;;  %v9269_v36 = vld [vmem:[#allocation2 + $0x12e] sm:$0xff]  ;;  %v9189_v32 = vld [vmem:[#allocation2 + $0x5d] sm:$0xff] }
 0xa4c   : > { %v9069_v44 = vld [vmem:[#allocation2 + $0x12a] sm:$0xff]  ;;  %11660 = vmatmul.mubr.msk.bf16.gmra.mrb[108].mxu1 %vm2904_vm3, %v9287_v33  ;;  %v9288_v31 = vpack.c.bf16 %v9269_v36, %v9268_v8  ;;  %10329 = vmatpush1.bf16.msra.mxu0 %v12758_v37  ;;  %v12762_v10 = vld [vmem:[%s16664_s8 + $0xc0] sm:$0xff]   ;;  %v9188_v28 = vld [vmem:[#allocation2 + $0x55] sm:$0xff] }
 0xa4d   : > { %v9070_v25 = vpack.c.bf16 %v9069_v44, %v9068_v12  ;;  %10330 = vmatprep.subr.bf16.mxu0 %v16747_v58  ;;  %v9221_v33 = vpack.c.bf16 %v9189_v32, %v9188_v28  ;;  %v9135_v12 = vld [vmem:[#allocation2 + $0x64] sm:$0xff]  ;;  %v9191_v8 = vld [vmem:[#allocation2 + $0x6d] sm:$0xff]  ;;  %v8917_v36 = vld [vmem:[#allocation2 + $0x58] sm:$0xff] }
 0xa4e   : > { %11663 = vmatprep.mubr.msk.bf16.mxu1 %vm2904_vm3, %v9288_v31  ;;  %v16277_v51 = vpack.c.bf16 %v9136_v53, %v9135_v12  ;;  %v9138_v44 = vld [vmem:[#allocation2 + $0x7c] sm:$0xff]  ;;  %v8947_v52 = vpack.c.bf16 %v8917_v36, %v8916_v23  ;;  %v12764_v2 = vld [vmem:[%s16664_s8 + $0xd0] sm:$0xff]   ;;  %v9143_v32 = vld [vmem:[#allocation2 + $0xa4] sm:$0xff] }
 0xa4f   : > { %9396 = vrot.lane.b32.xlu1 %v9070_v25, %s12784_s30  ;;  %9418 = vrot.lane.b32.xlu0 %v16234_v50, %s12784_s30  ;;  %v9190_v25 = vld [vmem:[#allocation2 + $0x65] sm:$0xff]  ;;  %v16286_v14 = vpack.c.bf16 %v9138_v44, %v9137_v38  ;;  %v9192_v20 = vld [vmem:[#allocation2 + $0x75] sm:$0xff]  ;;  %v9199_v53 = vld [vmem:[#allocation2 + $0xad] sm:$0xff] }
 0xa50   : > { %v9369_v29 = vpop.permute.xlu1 %9368  ;;  %10331 = vmatpush1.bf16.msra.mxu0 %v12759_v35  ;;  %v9222_v48 = vpack.c.bf16 %v9191_v8, %v9190_v25  ;;  %v9142_v30 = vld [vmem:[#allocation2 + $0x9c] sm:$0xff]  ;;  %v9141_v43 = vld [vmem:[#allocation2 + $0x94] sm:$0xff] }
 0xa51   : > { %v9592_v19 = vsel %vm2904_vm3, %v15974_v16, %v9369_v29  ;;  %10332 = vmatprep.subr.bf16.mxu0 %v16747_v58  ;;  %v12761_v16 = vld [vmem:[%s16664_s8 + $0xb8] sm:$0xff]   ;;  %v9317_v47 = vpop.permute.xlu0 %9316  ;;  %v12766_v22 = vld [vmem:[%s16664_s8 + $0xe0] sm:$0xff]   ;;  %v16307_v34 = vpack.c.bf16 %v9142_v30, %v9141_v43  ;;  %v8920_v8 = vld [vmem:[#allocation2 + $0x70] sm:$0xff] }
 0xa52   : > { %10199 = vmatprep.mubr.bf16.mxu0 %v9592_v19  ;;  %v9524_v55 = vsel %vm2904_vm3, %v8946_v49, %v9317_v47  ;;  %v9193_v29 = vld [vmem:[#allocation2 + $0x7d] sm:$0xff]  ;;  %v9144_v49 = vld [vmem:[#allocation2 + $0xac] sm:$0xff] }
 0xa53   : > { %9470 = vrot.lane.b32.xlu1 %v9218_v6, %s12784_s30  ;;  %9420 = vrot.lane.b32.xlu0 %v16244_v15, %s12784_s30  ;;  %v9139_v19 = vld [vmem:[#allocation2 + $0x84] sm:$0xff]  ;;  %v8921_v28 = vld [vmem:[#allocation2 + $0x78] sm:$0xff]  ;;  %v12768_v23 = vld [vmem:[%s16664_s8 + $0xf0] sm:$0xff]  }
 0xa54   : > { %10200 = vmatmul.mubr.bf16.gmra.mrb[180].mxu0 %v9520_v24  ;;  %v16298_v41 = vpack.c.bf16 %v9140_v39, %v9139_v19  ;;  %v9195_v24 = vld [vmem:[#allocation2 + $0x8d] sm:$0xff]  ;;  %v8949_v25 = vpack.c.bf16 %v8921_v28, %v8920_v8  ;;  %v9201_v38 = vld [vmem:[#allocation2 + $0xbd] sm:$0xff] }
 0xa55   : > { %10333 = vmatpush1.bf16.msra.mxu0 %v12760_v63  ;;  %v9223_v63 = vpack.c.bf16 %v9193_v29, %v9192_v20  ;;  %v9224_v4 = vpack.c.bf16 %v9195_v24, %v9194_v27  ;;  %v9203_v20 = vld [vmem:[#allocation2 + $0xcd] sm:$0xff]  ;;  %v9150_v19 = vld [vmem:[#allocation2 + $0xdc] sm:$0xff]  ;;  %v9202_v24 = vld [vmem:[#allocation2 + $0xc5] sm:$0xff] }
 0xa56   : > { %10334 = vmatprep.subr.bf16.mxu0 %v16747_v58  ;;  %v9149_v27 = vld [vmem:[#allocation2 + $0xd4] sm:$0xff] }
 0xa57   : > { %9472 = vrot.lane.b32.xlu1 %v9219_v11, %s12784_s30  ;;  %9422 = vrot.lane.b32.xlu0 %v16256_v61, %s12784_s30 }
 0xa58   : > { %v9371_v56 = vpop.permute.xlu1 %9370 }
 0xa59   : > { %10335 = vmatpush1.bf16.msra.mxu0 %v12761_v16  ;;  %v9596_v37 = vsel %vm2904_vm3, %v15990_v59, %v9371_v56  ;;  %v12763_v59 = vld [vmem:[%s16664_s8 + $0xc8] sm:$0xff]   ;;  %v9319_v31 = vpop.permute.xlu0 %9318  ;;  %v8918_v16 = vld [vmem:[#allocation2 + $0x60] sm:$0xff] }
 0xa5a   : > { %10336 = vmatprep.subr.bf16.mxu0 %v16747_v58  ;;  %10207 = vmatprep.mubr.bf16.mxu0 %v9596_v37  ;;  %v9528_v6 = vsel %vm2904_vm3, %v8947_v52, %v9319_v31  ;;  %v8948_v47 = vpack.c.bf16 %v8919_v0, %v8918_v16  ;;  %v9145_v31 = vld [vmem:[#allocation2 + $0xb4] sm:$0xff]  ;;  %v8922_v0 = vld [vmem:[#allocation2 + $0x80] sm:$0xff] }
 0xa5b   : > { %9474 = vrot.lane.b32.xlu1 %v9220_v57, %s12784_s30  ;;  %9424 = vrot.lane.b32.xlu0 %v16265_v3, %s12784_s30  ;;  %v9197_v57 = vld [vmem:[#allocation2 + $0x9d] sm:$0xff] }
 0xa5c   : > { %10208 = vmatmul.mubr.bf16.gmra.mrb[184].mxu0 %v9524_v55  ;;  %v16319_v55 = vpack.c.bf16 %v9144_v49, %v9143_v32  ;;  %v9207_v49 = vld [vmem:[#allocation2 + $0xed] sm:$0xff]  ;;  %v9206_v32 = vld [vmem:[#allocation2 + $0xe5] sm:$0xff] }
 0xa5d   : > { %10337 = vmatpush1.bf16.msra.mxu0 %v12762_v10  ;;  %v9196_v10 = vld [vmem:[#allocation2 + $0x95] sm:$0xff]  ;;  %v9230_v28 = vpack.c.bf16 %v9207_v49, %v9206_v32  ;;  %v9217_v49 = vld [vmem:[#allocation2 + $0x13d] sm:$0xff] }
 0xa5e   : > { %10338 = vmatprep.subr.bf16.mxu0 %v16747_v58  ;;  %v9225_v37 = vpack.c.bf16 %v9197_v57, %v9196_v10  ;;  %v9151_v57 = vld [vmem:[#allocation2 + $0xe4] sm:$0xff]  ;;  %v8925_v10 = vld [vmem:[#allocation2 + $0x98] sm:$0xff] }
 0xa5f   : > { %9476 = vrot.lane.b32.xlu1 %v9221_v33, %s12784_s30  ;;  %9426 = vrot.lane.b32.xlu0 %v16277_v51, %s12784_s30  ;;  %v9146_v33 = vld [vmem:[#allocation2 + $0xbc] sm:$0xff] }
 0xa60   : > { %v9373_v35 = vpop.permute.xlu1 %9372 }
 0xa61   : > { %10339 = vmatpush1.bf16.msra.mxu0 %v12763_v59  ;;  %v9600_v54 = vsel %vm2904_vm3, %v16006_v21, %v9373_v35  ;;  %v12765_v21 = vld [vmem:[%s16664_s8 + $0xd8] sm:$0xff]   ;;  %v9321_v11 = vpop.permute.xlu0 %9320  ;;  %v9198_v59 = vld [vmem:[#allocation2 + $0xa5] sm:$0xff]  ;;  %v16328_v35 = vpack.c.bf16 %v9146_v33, %v9145_v31 }
 0xa62   : > { %10340 = vmatprep.subr.bf16.mxu0 %v16747_v58  ;;  %10215 = vmatprep.mubr.bf16.mxu0 %v9600_v54  ;;  %v9532_v7 = vsel %vm2904_vm3, %v8948_v47, %v9321_v11  ;;  %v9226_v44 = vpack.c.bf16 %v9199_v53, %v9198_v59  ;;  %v9200_v54 = vld [vmem:[#allocation2 + $0xb5] sm:$0xff]  ;;  %v9228_v11 = vpack.c.bf16 %v9203_v20, %v9202_v24  ;;  %v9152_v47 = vld [vmem:[#allocation2 + $0xec] sm:$0xff] }
 0xa63   : > { %9478 = vrot.lane.b32.xlu1 %v9222_v48, %s12784_s30  ;;  %9428 = vrot.lane.b32.xlu0 %v16286_v14, %s12784_s30  ;;  %v9227_v29 = vpack.c.bf16 %v9201_v38, %v9200_v54  ;;  %v9153_v33 = vld [vmem:[#allocation2 + $0xf4] sm:$0xff]  ;;  %v9156_v31 = vld [vmem:[#allocation2 + $0x10c] sm:$0xff] }
 0xa64   : > { %10216 = vmatmul.mubr.bf16.gmra.mrb[188].mxu0 %v9528_v6  ;;  %v9147_v6 = vld [vmem:[#allocation2 + $0xc4] sm:$0xff] }
 0xa65   : > { %10341 = vmatpush1.bf16.msra.mxu0 %v12764_v2  ;;  %v9148_v2 = vld [vmem:[#allocation2 + $0xcc] sm:$0xff] }
 0xa66   : > { %10342 = vmatprep.subr.bf16.mxu0 %v16747_v58  ;;  %v16340_v39 = vpack.c.bf16 %v9148_v2, %v9147_v6  ;;  %v8927_v2 = vld [vmem:[#allocation2 + $0xa8] sm:$0xff]  ;;  %v8926_v6 = vld [vmem:[#allocation2 + $0xa0] sm:$0xff] }
 0xa67   : > { %9480 = vrot.lane.b32.xlu1 %v9223_v63, %s12784_s30  ;;  %9430 = vrot.lane.b32.xlu0 %v16298_v41, %s12784_s30  ;;  %v8923_v63 = vld [vmem:[#allocation2 + $0x88] sm:$0xff] }
 0xa68   : > { %v9375_v26 = vpop.permute.xlu1 %9374  ;;  %v8950_v16 = vpack.c.bf16 %v8923_v63, %v8922_v0  ;;  %v9157_v63 = vld [vmem:[#allocation2 + $0x114] sm:$0xff]  ;;  %v9213_v0 = vld [vmem:[#allocation2 + $0x11d] sm:$0xff] }
 0xa69   : > { %10343 = vmatpush1.bf16.msra.mxu0 %v12765_v21  ;;  %v9604_v56 = vsel %vm2904_vm3, %v16022_v40, %v9375_v26  ;;  %v12767_v40 = vld [vmem:[%s16664_s8 + $0xe8] sm:$0xff]   ;;  %v9323_v12 = vpop.permute.xlu0 %9322  ;;  %v16346_v26 = vpack.c.bf16 %v9150_v19, %v9149_v27  ;;  %v8952_v19 = vpack.c.bf16 %v8927_v2, %v8926_v6  ;;  %v8934_v6 = vld [vmem:[#allocation2 + $0xe0] sm:$0xff] }
 0xa6a   : > { %10344 = vmatprep.subr.bf16.mxu0 %v16747_v58  ;;  %10223 = vmatprep.mubr.bf16.mxu0 %v9604_v56  ;;  %v9536_v52 = vsel %vm2904_vm3, %v8949_v25, %v9323_v12  ;;  %v9208_v25 = vld [vmem:[#allocation2 + $0xf5] sm:$0xff]  ;;  %v9160_v27 = vld [vmem:[#allocation2 + $0x12c] sm:$0xff] }
 0xa6b   : > { %9482 = vrot.lane.b32.xlu1 %v9224_v4, %s12784_s30  ;;  %9432 = vrot.lane.b32.xlu0 %v16307_v34, %s12784_s30 }
 0xa6c   : > { %10224 = vmatmul.mubr.bf16.gmra.mrb[192].mxu0 %v9532_v7  ;;  %v16354_v7 = vpack.c.bf16 %v9152_v47, %v9151_v57  ;;  %v9215_v47 = vld [vmem:[#allocation2 + $0x12d] sm:$0xff]  ;;  %v9216_v57 = vld [vmem:[#allocation2 + $0x135] sm:$0xff] }
 0xa6d   : > { %10345 = vmatpush1.bf16.msra.mxu0 %v12766_v22  ;;  %v9204_v22 = vld [vmem:[#allocation2 + $0xd5] sm:$0xff] }
 0xa6e   : > { %10346 = vmatprep.subr.bf16.mxu0 %v16747_v58 }
 0xa6f   : > { %9484 = vrot.lane.b32.xlu1 %v9225_v37, %s12784_s30  ;;  %9434 = vrot.lane.b32.xlu0 %v16319_v55, %s12784_s30 }
 0xa70   : > { %v9377_v36 = vpop.permute.xlu1 %9376 }
 0xa71   : > { %10347 = vmatpush1.bf16.msra.mxu0 %v12767_v40  ;;  %v9608_v48 = vsel %vm2904_vm3, %v16038_v62, %v9377_v36  ;;  %v12769_v62 = vld [vmem:[%s16664_s8 + $0xf8] sm:$0xff]   ;;  %v9325_v21 = vpop.permute.xlu0 %9324  ;;  %v8924_v40 = vld [vmem:[#allocation2 + $0x90] sm:$0xff] }
 0xa72   : > { %10348 = vmatprep.subr.bf16.mxu0 %v16747_v58  ;;  %10231 = vmatprep.mubr.bf16.mxu0 %v9608_v48  ;;  %v9540_v43 = vsel %vm2904_vm3, %v8950_v16, %v9325_v21  ;;  %v8951_v12 = vpack.c.bf16 %v8925_v10, %v8924_v40  ;;  %v9209_v36 = vld [vmem:[#allocation2 + $0xfd] sm:$0xff]  ;;  %v9212_v16 = vld [vmem:[#allocation2 + $0x115] sm:$0xff] }
 0xa73   : > { %9486 = vrot.lane.b32.xlu1 %v9226_v44, %s12784_s30  ;;  %9436 = vrot.lane.b32.xlu0 %v16328_v35, %s12784_s30  ;;  %v9155_v48 = vld [vmem:[#allocation2 + $0x104] sm:$0xff] }
 0xa74   : > { %10232 = vmatmul.mubr.bf16.gmra.mrb[196].mxu0 %v9536_v52  ;;  %v16367_v38 = vpack.c.bf16 %v9156_v31, %v9155_v48  ;;  %v9211_v52 = vld [vmem:[#allocation2 + $0x10d] sm:$0xff]  ;;  %v8933_v31 = vld [vmem:[#allocation2 + $0xd8] sm:$0xff] }
 0xa75   : > { %10349 = vmatpush1.bf16.msra.mxu0 %v12768_v23  ;;  %v9231_v23 = vpack.c.bf16 %v9209_v36, %v9208_v25 }
 0xa76   : > { %10350 = vmatprep.subr.bf16.mxu0 %v16747_v58  ;;  %v9205_v58 = vld [vmem:[#allocation2 + $0xdd] sm:$0xff] }
 0xa77   : > { %9488 = vrot.lane.b32.xlu1 %v9227_v29, %s12784_s30  ;;  %9438 = vrot.lane.b32.xlu0 %v16340_v39, %s12784_s30  ;;  %v9229_v56 = vpack.c.bf16 %v9205_v58, %v9204_v22  ;;  %v9210_v29 = vld [vmem:[#allocation2 + $0x105] sm:$0xff]  ;;  %v8929_v22 = vld [vmem:[#allocation2 + $0xb8] sm:$0xff] }
 0xa78   : > { %v9379_v30 = vpop.permute.xlu1 %9378  ;;  %v9232_v20 = vpack.c.bf16 %v9211_v52, %v9210_v29 }
 0xa79   : > { %10351 = vmatpush1.bf16.msra.mxu0 %v12769_v62  ;;  %v9612_v4 = vsel %vm2904_vm3, %v16054_v17, %v9379_v30  ;;  %v9154_v17 = vld [vmem:[#allocation2 + $0xfc] sm:$0xff]  ;;  %v9327_v37 = vpop.permute.xlu0 %9326 }
 0xa7a   : > { %10239 = vmatprep.mubr.bf16.mxu0 %v9612_v4  ;;  %v16359_v59 = vpack.c.bf16 %v9154_v17, %v9153_v33  ;;  %v9544_v44 = vsel %vm2904_vm3, %v8951_v12, %v9327_v37  ;;  %v9233_v4 = vpack.c.bf16 %v9213_v0, %v9212_v16  ;;  %v8930_v12 = vld [vmem:[#allocation2 + $0xc0] sm:$0xff] }
 0xa7b   : > { %9490 = vrot.lane.b32.xlu1 %v9228_v11, %s12784_s30  ;;  %9440 = vrot.lane.b32.xlu0 %v16346_v26, %s12784_s30  ;;  %v9159_v11 = vld [vmem:[#allocation2 + $0x124] sm:$0xff] }
 0xa7c   : > { %10240 = vmatmul.mubr.bf16.gmra.mrb[200].mxu0 %v9540_v43  ;;  %v16380_v58 = vpack.c.bf16 %v9160_v27, %v9159_v11  ;;  %v9214_v43 = vld [vmem:[#allocation2 + $0x125] sm:$0xff] }
 0xa7d   : > { %v9234_v17 = vpack.c.bf16 %v9215_v47, %v9214_v43  ;;  %v8939_v47 = vld [vmem:[#allocation2 + $0x108] sm:$0xff] }
 0xa7f   : > { %9492 = vrot.lane.b32.xlu1 %v9229_v56, %s12784_s30  ;;  %9442 = vrot.lane.b32.xlu0 %v16354_v7, %s12784_s30  ;;  %v8928_v56 = vld [vmem:[#allocation2 + $0xb0] sm:$0xff] }
 0xa80   : > { %v9381_v53 = vpop.permute.xlu1 %9380  ;;  %v8953_v37 = vpack.c.bf16 %v8929_v22, %v8928_v56 }
 0xa81   : > { %v9616_v8 = vsel %vm2904_vm3, %v16070_v45, %v9381_v53  ;;  %v9158_v45 = vld [vmem:[#allocation2 + $0x11c] sm:$0xff]  ;;  %v9329_v54 = vpop.permute.xlu0 %9328  ;;  %v9235_v53 = vpack.c.bf16 %v9217_v49, %v9216_v57 }
 0xa82   : > { %10247 = vmatprep.mubr.bf16.mxu0 %v9616_v8  ;;  %v16372_v21 = vpack.c.bf16 %v9158_v45, %v9157_v63  ;;  %v9548_v30 = vsel %vm2904_vm3, %v8952_v19, %v9329_v54  ;;  %v8935_v54 = vld [vmem:[#allocation2 + $0xe8] sm:$0xff]  ;;  %v8937_v19 = vld [vmem:[#allocation2 + $0xf8] sm:$0xff] }
 0xa83   : > { %9494 = vrot.lane.b32.xlu1 %v9230_v28, %s12784_s30  ;;  %9444 = vrot.lane.b32.xlu0 %v16359_v59, %s12784_s30  ;;  %v8931_v28 = vld [vmem:[#allocation2 + $0xc8] sm:$0xff] }
 0xa84   : > { %10248 = vmatmul.mubr.bf16.gmra.mrb[204].mxu0 %v9544_v44  ;;  %v8954_v36 = vpack.c.bf16 %v8931_v28, %v8930_v12 }
 0xa87   : > { %9496 = vrot.lane.b32.xlu1 %v9231_v23, %s12784_s30  ;;  %9446 = vrot.lane.b32.xlu0 %v16367_v38, %s12784_s30  ;;  %v8932_v23 = vld [vmem:[#allocation2 + $0xd0] sm:$0xff] }
 0xa88   : > { %v9383_v62 = vpop.permute.xlu1 %9382  ;;  %v8955_v52 = vpack.c.bf16 %v8933_v31, %v8932_v23  ;;  %v9071_v31 = vld [vmem:[#allocation2 + $0x13] sm:$0xff] }
 0xa89   : > { %v9620_v24 = vsel %vm2904_vm3, %v16086_v1, %v9383_v62  ;;  %v9331_v1 = vpop.permute.xlu0 %9330  ;;  %v8956_v62 = vpack.c.bf16 %v8935_v54, %v8934_v6 }
 0xa8a   : > { %10255 = vmatprep.mubr.bf16.mxu0 %v9620_v24  ;;  %v9552_v40 = vsel %vm2904_vm3, %v8953_v37, %v9331_v1  ;;  %v8938_v1 = vld [vmem:[#allocation2 + $0x100] sm:$0xff] }
 0xa8b   : > { %9498 = vrot.lane.b32.xlu1 %v9232_v20, %s12784_s30  ;;  %9448 = vrot.lane.b32.xlu0 %v16372_v21, %s12784_s30  ;;  %v8958_v57 = vpack.c.bf16 %v8939_v47, %v8938_v1 }
 0xa8c   : > { %10256 = vmatmul.mubr.bf16.gmra.mrb[208].mxu0 %v9548_v30 }
 0xa8f   : > { %9500 = vrot.lane.b32.xlu1 %v9233_v4, %s12784_s30  ;;  %9450 = vrot.lane.b32.xlu0 %v16380_v58, %s12784_s30 }
 0xa90   : > { %v9385_v10 = vpop.permute.xlu1 %9384 }
 0xa91   : > { %v9624_v32 = vsel %vm2904_vm3, %v16102_v13, %v9385_v10  ;;  %v9333_v33 = vpop.permute.xlu0 %9332 }
 0xa92   : > { %10263 = vmatprep.mubr.bf16.mxu0 %v9624_v32  ;;  %v9556_v13 = vsel %vm2904_vm3, %v8954_v36, %v9333_v33  ;;  %v8940_v32 = vld [vmem:[#allocation2 + $0x110] sm:$0xff] }
 0xa93   : > { %9502 = vrot.lane.b32.xlu1 %v9234_v17, %s12784_s30  ;;  %v8941_v17 = vld [vmem:[#allocation2 + $0x118] sm:$0xff] }
 0xa94   : > { %10264 = vmatmul.mubr.bf16.gmra.mrb[212].mxu0 %v9552_v40  ;;  %v8959_v28 = vpack.c.bf16 %v8941_v17, %v8940_v32 }
 0xa97   : > { %9504 = vrot.lane.b32.xlu1 %v9235_v53, %s12784_s30  ;;  %s12245_s30 = smul.u32 288, %s16881_s21 }
 0xa98   : > { %v9387_v8 = vpop.permute.xlu1 %9386 }
 0xa99   : > { %v9628_v44 = vsel %vm2904_vm3, %v16118_v46, %v9387_v8  ;;  %v9335_v25 = vpop.permute.xlu0 %9334  ;;  %s16536_s28 = scalar_lea.vmem %s16671_s15, %s12245_s30 }
 0xa9a   : > { %10271 = vmatprep.mubr.bf16.mxu0 %v9628_v44  ;;  %v9560_v45 = vsel %vm2904_vm3, %v8955_v52, %v9335_v25  ;;  %v9072_v44 = vld [vmem:[#allocation2 + $0x1b] sm:$0xff] }
 0xa9b   : > { %v9107_v23 = vpack.c.bf16 %v9072_v44, %v9071_v31 }
 0xa9c   : > { %10272 = vmatmul.mubr.bf16.gmra.mrb[216].mxu0 %v9556_v13 }
 0xaa0   : > { %v9389_v48 = vpop.permute.xlu1 %9388 }
 0xaa1   : > { %v9632_v2 = vsel %vm2904_vm3, %v16134_v5, %v9389_v48  ;;  %v9337_v29 = vpop.permute.xlu0 %9336  ;;  %v8936_v5 = vld [vmem:[#allocation2 + $0xf0] sm:$0xff] }
 0xaa2   : > { %10279 = vmatprep.mubr.bf16.mxu0 %v9632_v2  ;;  %v9564_v63 = vsel %vm2904_vm3, %v8956_v62, %v9337_v29  ;;  %v8957_v27 = vpack.c.bf16 %v8937_v19, %v8936_v5  ;;  %v9270_v2 = vld [vmem:[#allocation2 + $0x136] sm:$0xff]  ;;  %v9074_v29 = vld [vmem:[#allocation2 + $0x2b] sm:$0xff] }
 0xaa4   : > { %10280 = vmatmul.mubr.bf16.gmra.mrb[220].mxu0 %v9560_v45  ;;  %v9271_v45 = vld [vmem:[#allocation2 + $0x13e] sm:$0xff] }
 0xaa5   : > { %v9289_v54 = vpack.c.bf16 %v9271_v45, %v9270_v2 }
 0xaa7   : > { %11664 = vmatmul.mubr.msk.bf16.gmra.mrb[112].mxu1 %vm2904_vm3, %v9289_v54 }
 0xaa8   : > { %v9391_v46 = vpop.permute.xlu1 %9390 }
 0xaa9   : > { %v9636_v20 = vsel %vm2904_vm3, %v16150_v60, %v9391_v46  ;;  %v9339_v24 = vpop.permute.xlu0 %9338  ;;  %v9073_v46 = vld [vmem:[#allocation2 + $0x23] sm:$0xff] }
 0xaaa   : > { %10287 = vmatprep.mubr.bf16.mxu0 %v9636_v20  ;;  %v9568_v43 = vsel %vm2904_vm3, %v8957_v27, %v9339_v24 }
 0xaac   : > { %10288 = vmatmul.mubr.bf16.gmra.mrb[224].mxu0 %v9564_v63  ;;  %v9108_v63 = vpack.c.bf16 %v9074_v29, %v9073_v46  ;;  %v9084_v46 = vld [vmem:[#allocation2 + $0x7b] sm:$0xff] }
 0xaaf   : > { %v16399_v0 = vpop.f32.mrb[80].mxu1 }
 0xab0   : > { %v16401_v30 = vpop.f32.mrb[81].mxu1  ;;  %v9393_v11 = vpop.permute.xlu1 %9392 }
 0xab1   : > { %v16403_v16 = vpop.f32.mrb[82].mxu1  ;;  %v9640_v4 = vsel %vm2904_vm3, %v16166_v9, %v9393_v11  ;;  %v9341_v22 = vpop.permute.xlu0 %9340  ;;  %v9076_v11 = vld [vmem:[#allocation2 + $0x3b] sm:$0xff] }
 0xab2   : > { %10295 = vmatprep.mubr.bf16.mxu0 %v9640_v4  ;;  %v16407_v60 = vpop.f32.mrb[83].mxu1  ;;  %v9572_v10 = vsel %vm2904_vm3, %v8958_v57, %v9341_v22  ;;  %v9075_v4 = vld [vmem:[#allocation2 + $0x33] sm:$0xff] }
 0xab3   : > { %v9109_v47 = vpack.c.bf16 %v9076_v11, %v9075_v4  ;;  %v9086_v4 = vld [vmem:[#allocation2 + $0x8b] sm:$0xff] }
 0xab4   : > { %10296 = vmatmul.mubr.bf16.gmra.mrb[228].mxu0 %v9568_v43 }
 0xab8   : > { %v9395_v56 = vpop.permute.xlu1 %9394 }
 0xab9   : > { %v9644_v49 = vsel %vm2904_vm3, %v16189_v18, %v9395_v56  ;;  %v9343_v9 = vpop.permute.xlu0 %9342  ;;  %v9078_v56 = vld [vmem:[#allocation2 + $0x4b] sm:$0xff] }
 0xaba   : > { %10303 = vmatprep.mubr.bf16.mxu0 %v9644_v49  ;;  %v9576_v8 = vsel %vm2904_vm3, %v8959_v28, %v9343_v9 }
 0xabc   : > { %10304 = vmatmul.mubr.bf16.gmra.mrb[232].mxu0 %v9572_v10  ;;  %v9077_v10 = vld [vmem:[#allocation2 + $0x43] sm:$0xff] }
 0xabd   : > { %v9417_v25 = vpop.permute.xlu0 %9416  ;;  %v9110_v9 = vpack.c.bf16 %v9078_v56, %v9077_v10 }
 0xabe   : > { %v9652_v52 = vsel %vm2904_vm3, %v9107_v23, %v9417_v25  ;;  %v9082_v23 = vld [vmem:[#allocation2 + $0x6b] sm:$0xff] }
 0xabf   : > { %v16413_v37 = vpop.f32.mrb[84].mxu1 }
 0xac0   : > { %v16415_v40 = vpop.f32.mrb[85].mxu1 }
 0xac1   : > { %v9397_v53 = vpop.permute.xlu1 %9396  ;;  %v16417_v33 = vpop.f32.mrb[86].mxu1 }
 0xac2   : > { %v9648_v12 = vsel %vm2904_vm3, %v16213_v42, %v9397_v53  ;;  %v16421_v18 = vpop.f32.mrb[87].mxu1  ;;  %v9419_v6 = vpop.permute.xlu0 %9418 }
 0xac3   : > { %10311 = vmatprep.mubr.bf16.mxu0 %v9648_v12  ;;  %v9080_v12 = vld [vmem:[#allocation2 + $0x5b] sm:$0xff] }
 0xac4   : > { %10312 = vmatmul.mubr.bf16.gmra.mrb[236].mxu0 %v9576_v8 }
 0xac5   : > { %v9471_v36 = vpop.permute.xlu1 %9470 }
 0xac6   : > { %v9724_v13 = vsel %vm2904_vm3, %v16234_v50, %v9471_v36  ;;  %v9421_v27 = vpop.permute.xlu0 %9420  ;;  %v9079_v36 = vld [vmem:[#allocation2 + $0x53] sm:$0xff] }
 0xac7   : > { %10352 = vmatprep.mubr.bf16.mxu0 %v9724_v13  ;;  %v9660_v22 = vsel %vm2904_vm3, %v9109_v47, %v9421_v27  ;;  %v9111_v13 = vpack.c.bf16 %v9080_v12, %v9079_v36 }
 0xac9   : > { %v9473_v48 = vpop.permute.xlu1 %9472 }
 0xaca   : > { %v9728_v42 = vsel %vm2904_vm3, %v16244_v15, %v9473_v48  ;;  %v9656_v15 = vsel %vm2904_vm3, %v9108_v63, %v9419_v6  ;;  %v9423_v57 = vpop.permute.xlu0 %9422  ;;  %v9083_v63 = vld [vmem:[#allocation2 + $0x73] sm:$0xff] }
 0xacb   : > { %v9664_v28 = vsel %vm2904_vm3, %v9110_v9, %v9423_v57  ;;  %v9088_v9 = vld [vmem:[#allocation2 + $0x9b] sm:$0xff] }
 0xacc   : > { %10353 = vmatmul.mubr.bf16.vlgmr.msra.gmra.mrb[168].mxu0 %v9652_v52 }
 0xacd   : > { %10360 = vmatprep.mubr.bf16.mxu0 %v9728_v42  ;;  %v9475_v62 = vpop.permute.xlu1 %9474  ;;  %v9081_v42 = vld [vmem:[#allocation2 + $0x63] sm:$0xff] }
 0xace   : > { %v9732_v5 = vsel %vm2904_vm3, %v16256_v61, %v9475_v62  ;;  %v9425_v8 = vpop.permute.xlu0 %9424  ;;  %v9112_v45 = vpack.c.bf16 %v9082_v23, %v9081_v42  ;;  %v9089_v23 = vld [vmem:[#allocation2 + $0xa3] sm:$0xff] }
 0xacf   : > { %v16430_v50 = vpop.f32.mrb[88].mxu1  ;;  %v9668_v31 = vsel %vm2904_vm3, %v9111_v13, %v9425_v8  ;;  %v9090_v13 = vld [vmem:[#allocation2 + $0xab] sm:$0xff] }
 0xad0   : > { %v16432_v20 = vpop.f32.mrb[89].mxu1  ;;  %v9116_v42 = vpack.c.bf16 %v9090_v13, %v9089_v23 }
 0xad1   : > { %v16434_v19 = vpop.f32.mrb[90].mxu1  ;;  %v9477_v43 = vpop.permute.xlu1 %9476 }
 0xad2   : > { %v16436_v24 = vpop.f32.mrb[91].mxu1  ;;  %v9736_v1 = vsel %vm2904_vm3, %v16265_v3, %v9477_v43  ;;  %v9427_v48 = vpop.permute.xlu0 %9426 }
 0xad3   : > { %v9672_v6 = vsel %vm2904_vm3, %v9112_v45, %v9427_v48 }
 0xad4   : > { %10361 = vmatmul.mubr.bf16.gmra.mrb[172].mxu0 %v9656_v15 }
 0xad5   : > { %10368 = vmatprep.mubr.bf16.mxu0 %v9732_v5  ;;  %v9479_v17 = vpop.permute.xlu1 %9478  ;;  %v9113_v5 = vpack.c.bf16 %v9084_v46, %v9083_v63 }
 0xad6   : > { %v9740_v3 = vsel %vm2904_vm3, %v16277_v51, %v9479_v17  ;;  %v9429_v62 = vpop.permute.xlu0 %9428 }
 0xad7   : > { %v9676_v11 = vsel %vm2904_vm3, %v9113_v5, %v9429_v62  ;;  %v9091_v62 = vld [vmem:[#allocation2 + $0xb3] sm:$0xff] }
 0xad9   : > { %v9481_v44 = vpop.permute.xlu1 %9480 }
 0xada   : > { %v9744_v25 = vsel %vm2904_vm3, %v16286_v14, %v9481_v44  ;;  %v9431_v43 = vpop.permute.xlu0 %9430 }
 0xadc   : > { %10369 = vmatmul.mubr.bf16.gmra.mrb[176].mxu0 %v9660_v22  ;;  %v9085_v22 = vld [vmem:[#allocation2 + $0x83] sm:$0xff] }
 0xadd   : > { %10376 = vmatprep.mubr.bf16.mxu0 %v9736_v1  ;;  %v9483_v2 = vpop.permute.xlu1 %9482  ;;  %v9114_v56 = vpack.c.bf16 %v9086_v4, %v9085_v22  ;;  %v9093_v22 = vld [vmem:[#allocation2 + $0xc3] sm:$0xff] }
 0xade   : > { %v9748_v14 = vsel %vm2904_vm3, %v16298_v41, %v9483_v2 }
 0xadf   : > { %v16444_v49 = vpop.f32.mrb[92].mxu1  ;;  %v9680_v17 = vsel %vm2904_vm3, %v9114_v56, %v9431_v43 }
 0xae0   : > { %v16446_v61 = vpop.f32.mrb[93].mxu1 }
 0xae1   : > { %v16448_v32 = vpop.f32.mrb[94].mxu1  ;;  %v9485_v15 = vpop.permute.xlu1 %9484 }
 0xae2   : > { %v16450_v53 = vpop.f32.mrb[95].mxu1  ;;  %v9752_v27 = vsel %vm2904_vm3, %v16307_v34, %v9485_v15 }
 0xae4   : > { %10377 = vmatmul.mubr.bf16.gmra.mrb[180].mxu0 %v9664_v28  ;;  %v9433_v28 = vpop.permute.xlu0 %9432 }
 0xae5   : > { %10384 = vmatprep.mubr.bf16.mxu0 %v9740_v3  ;;  %v9487_v1 = vpop.permute.xlu1 %9486  ;;  %v9087_v3 = vld [vmem:[#allocation2 + $0x93] sm:$0xff] }
 0xae6   : > { %v9756_v34 = vsel %vm2904_vm3, %v16319_v55, %v9487_v1  ;;  %v9115_v8 = vpack.c.bf16 %v9088_v9, %v9087_v3 }
 0xae8   : > { %v9684_v36 = vsel %vm2904_vm3, %v9115_v8, %v9433_v28  ;;  %v9096_v28 = vld [vmem:[#allocation2 + $0xdb] sm:$0xff] }
 0xae9   : > { %v9489_v12 = vpop.permute.xlu1 %9488 }
 0xaea   : > { %v9760_v44 = vsel %vm2904_vm3, %v16328_v35, %v9489_v12  ;;  %v9095_v12 = vld [vmem:[#allocation2 + $0xd3] sm:$0xff] }
 0xaec   : > { %10385 = vmatmul.mubr.bf16.gmra.mrb[184].mxu0 %v9668_v31  ;;  %v9435_v31 = vpop.permute.xlu0 %9434 }
 0xaed   : > { %10392 = vmatprep.mubr.bf16.mxu0 %v9744_v25  ;;  %v9491_v48 = vpop.permute.xlu1 %9490 }
 0xaee   : > { %v9764_v35 = vsel %vm2904_vm3, %v16340_v39, %v9491_v48  ;;  %v9097_v48 = vld [vmem:[#allocation2 + $0xe3] sm:$0xff] }
 0xaef   : > { %v16458_v52 = vpop.f32.mrb[96].mxu1 }
 0xaf0   : > { %v16460_v51 = vpop.f32.mrb[97].mxu1  ;;  %v9437_v46 = vpop.permute.xlu0 %9436 }
 0xaf1   : > { %v16462_v54 = vpop.f32.mrb[98].mxu1  ;;  %v9493_v63 = vpop.permute.xlu1 %9492 }
 0xaf2   : > { %v16464_v29 = vpop.f32.mrb[99].mxu1 }
 0xaf4   : > { %10393 = vmatmul.mubr.bf16.gmra.mrb[188].mxu0 %v9672_v6  ;;  %v9688_v6 = vsel %vm2904_vm3, %v9116_v42, %v9435_v31  ;;  %v9439_v4 = vpop.permute.xlu0 %9438  ;;  %v9098_v31 = vld [vmem:[#allocation2 + $0xeb] sm:$0xff] }
 0xaf5   : > { %10400 = vmatprep.mubr.bf16.mxu0 %v9748_v14  ;;  %v9092_v14 = vld [vmem:[#allocation2 + $0xbb] sm:$0xff]  ;;  %v9495_v1 = vpop.permute.xlu1 %9494 }
 0xaf6   : > { %v9117_v15 = vpack.c.bf16 %v9092_v14, %v9091_v62  ;;  %v9100_v14 = vld [vmem:[#allocation2 + $0xfb] sm:$0xff]  ;;  %v9099_v62 = vld [vmem:[#allocation2 + $0xf3] sm:$0xff] }
 0xaf8   : > { %v9692_v5 = vsel %vm2904_vm3, %v9117_v15, %v9437_v46  ;;  %v9441_v3 = vpop.permute.xlu0 %9440  ;;  %v9121_v15 = vpack.c.bf16 %v9100_v14, %v9099_v62 }
 0xaf9   : > { %v9497_v8 = vpop.permute.xlu1 %9496 }
 0xafa   : > { %v9776_v13 = vsel %vm2904_vm3, %v16359_v59, %v9497_v8  ;;  %v9103_v8 = vld [vmem:[#allocation2 + $0x113] sm:$0xff] }
 0xafc   : > { %10401 = vmatmul.mubr.bf16.gmra.mrb[192].mxu0 %v9676_v11  ;;  %v9768_v11 = vsel %vm2904_vm3, %v16346_v26, %v9493_v63  ;;  %v9772_v26 = vsel %vm2904_vm3, %v16354_v7, %v9495_v1  ;;  %v9443_v23 = vpop.permute.xlu0 %9442 }
 0xafd   : > { %10408 = vmatprep.mubr.bf16.mxu0 %v9752_v27  ;;  %v9094_v27 = vld [vmem:[#allocation2 + $0xcb] sm:$0xff]  ;;  %v9499_v42 = vpop.permute.xlu1 %9498 }
 0xafe   : > { %v9118_v56 = vpack.c.bf16 %v9094_v27, %v9093_v22 }
 0xaff   : > { %v16472_v47 = vpop.f32.mrb[100].mxu1 }
 0xb00   : > { %v16474_v41 = vpop.f32.mrb[101].mxu1  ;;  %v9696_v9 = vsel %vm2904_vm3, %v9118_v56, %v9439_v4  ;;  %v9445_v46 = vpop.permute.xlu0 %9444  ;;  %v9101_v4 = vld [vmem:[#allocation2 + $0x103] sm:$0xff]  ;;  %v9179_v56 = vld [vmem:[#allocation2 + $0x134] sm:$0xff] }
 0xb01   : > { %v16476_v57 = vpop.f32.mrb[102].mxu1  ;;  %v9501_v63 = vpop.permute.xlu1 %9500  ;;  %v9708_v59 = vsel %vm2904_vm3, %v9121_v15, %v9445_v46 }
 0xb02   : > { %v16478_v10 = vpop.f32.mrb[103].mxu1 }
 0xb04   : > { %10409 = vmatmul.mubr.bf16.gmra.mrb[196].mxu0 %v9680_v17  ;;  %v9447_v27 = vpop.permute.xlu0 %9446 }
 0xb05   : > { %10416 = vmatprep.mubr.bf16.mxu0 %v9756_v34  ;;  %v9503_v22 = vpop.permute.xlu1 %9502 }
 0xb0c   : > { %10417 = vmatmul.mubr.bf16.gmra.mrb[200].mxu0 %v9684_v36  ;;  %v9119_v36 = vpack.c.bf16 %v9096_v28, %v9095_v12  ;;  %v9104_v28 = vld [vmem:[#allocation2 + $0x11b] sm:$0xff]  ;;  %v9505_v12 = vpop.permute.xlu1 %9504 }
 0xb0d   : > { %10424 = vmatprep.mubr.bf16.mxu0 %v9760_v44 }
 0xb0e   : > { %v9700_v44 = vsel %vm2904_vm3, %v9119_v36, %v9441_v3  ;;  %v9123_v36 = vpack.c.bf16 %v9104_v28, %v9103_v8 }
 0xb0f   : > { %v16486_v25 = vpop.f32.mrb[104].mxu1 }
 0xb10   : > { %v16488_v55 = vpop.f32.mrb[105].mxu1 }
 0xb11   : > { %v16490_v2 = vpop.f32.mrb[106].mxu1 }
 0xb12   : > { %v16492_v45 = vpop.f32.mrb[107].mxu1 }
 0xb14   : > { %10425 = vmatmul.mubr.bf16.gmra.mrb[204].mxu0 %v9688_v6  ;;  %v9120_v6 = vpack.c.bf16 %v9098_v31, %v9097_v48  ;;  %v9106_v31 = vld [vmem:[#allocation2 + $0x12b] sm:$0xff]  ;;  %v9105_v48 = vld [vmem:[#allocation2 + $0x123] sm:$0xff] }
 0xb15   : > { %10432 = vmatprep.mubr.bf16.mxu0 %v9764_v35  ;;  %v9780_v35 = vsel %vm2904_vm3, %v16367_v38, %v9499_v42  ;;  %v9124_v42 = vpack.c.bf16 %v9106_v31, %v9105_v48 }
 0xb16   : > { %v9704_v7 = vsel %vm2904_vm3, %v9120_v6, %v9443_v23  ;;  %v16530_v6 = vld [vmem:[%s16669_s13] ss:$0 sm:$0xff] }
 0xb1c   : > { %10433 = vmatmul.mubr.bf16.gmra.mrb[208].mxu0 %v9692_v5  ;;  %v9784_v5 = vsel %vm2904_vm3, %v16372_v21, %v9501_v63  ;;  %v9449_v21 = vpop.permute.xlu0 %9448 }
 0xb1d   : > { %10440 = vmatprep.mubr.bf16.mxu0 %v9768_v11  ;;  %v9102_v11 = vld [vmem:[#allocation2 + $0x10b] sm:$0xff] }
 0xb1e   : > { %v9122_v1 = vpack.c.bf16 %v9102_v11, %v9101_v4 }
 0xb1f   : > { %v16500_v43 = vpop.f32.mrb[108].mxu1 }
 0xb20   : > { %v16502_v39 = vpop.f32.mrb[109].mxu1  ;;  %v9712_v38 = vsel %vm2904_vm3, %v9122_v1, %v9447_v27  ;;  %v9451_v23 = vpop.permute.xlu0 %9450 }
 0xb21   : > { %v16504_v17 = vpop.f32.mrb[110].mxu1 }
 0xb22   : > { %v16506_v34 = vpop.f32.mrb[111].mxu1 }
 0xb24   : > { %10441 = vmatmul.mubr.bf16.gmra.mrb[212].mxu0 %v9696_v9  ;;  %v9180_v9 = vld [vmem:[#allocation2 + $0x13c] sm:$0xff] }
 0xb25   : > { %10448 = vmatprep.mubr.bf16.mxu0 %v9772_v26  ;;  %v9788_v26 = vsel %vm2904_vm3, %v16380_v58, %v9503_v22  ;;  %v9181_v3 = vpack.c.bf16 %v9180_v9, %v9179_v56  ;;  %v9720_v58 = vsel %vm2904_vm3, %v9124_v42, %v9451_v23 }
 0xb2c   : > { %10449 = vmatmul.mubr.bf16.gmra.mrb[216].mxu0 %v9700_v44  ;;  %v9792_v44 = vsel %vm2904_vm3, %v9181_v3, %v9505_v12 }
 0xb2d   : > { %10456 = vmatprep.mubr.bf16.mxu0 %v9776_v13  ;;  %v9716_v13 = vsel %vm2904_vm3, %v9123_v36, %v9449_v21 }
 0xb34   : > { %10457 = vmatmul.mubr.bf16.gmra.mrb[220].mxu0 %v9704_v7 }
 0xb35   : > { %10464 = vmatprep.mubr.bf16.mxu0 %v9780_v35 }
 0xb3c   : > { %10465 = vmatmul.mubr.bf16.gmra.mrb[224].mxu0 %v9708_v59 }
 0xb3d   : > { %10472 = vmatprep.mubr.bf16.mxu0 %v9784_v5 }
 0xb44   : > { %10473 = vmatmul.mubr.bf16.gmra.mrb[228].mxu0 %v9712_v38 }
 0xb45   : > { %10480 = vmatprep.mubr.bf16.mxu0 %v9788_v26 }
 0xb4c   : > { %10481 = vmatmul.mubr.bf16.gmra.mrb[232].mxu0 %v9716_v13 }
 0xb4d   : > { %10488 = vmatprep.mubr.bf16.mxu0 %v9792_v44 }
 0xb54   : > { %10489 = vmatmul.mubr.bf16.gmra.mrb[236].mxu0 %v9720_v58 }
 0xb7a   : > { %v16540_v59 = vpop.f32.mrb[112].mxu1 }
 0xb7b   : > { %v16542_v5 = vpop.f32.mrb[113].mxu1 }
 0xb7c   : > { %v16546_v27 = vpop.f32.mrb[114].mxu1 }
 0xb7d   : > { %v16548_v4 = vpop.f32.mrb[115].mxu1 }
 0xb9f   : > { %v10354_v7 = vpop.f32.mrb[168].mxu0 }
 0xba0   : > { %v11775_v35 = vadd.f32 %v16530_v6, %v10354_v7  ;;  %v10356_v14 = vpop.f32.mrb[169].mxu0 }
 0xba1   : > { %v10357_v46 = vpop.f32.mrb[170].mxu0 }
 0xba2   : > { %v10532_v62 = vadd.f32 %v11775_v35, %v16401_v30  ;;  %v11776_v63 = vadd.f32 %v16530_v6, %v10357_v46  ;;  %v10359_v15 = vpop.f32.mrb[171].mxu0 }
 0xba4   : > { %10674 = vst [vmem:[%s16536_s28] sm:$0xff] %v10532_v62  ;;  %v10535_v11 = vadd.f32 %v11776_v63, %v16407_v60 }
 0xba6   : > { %10675 = vst [vmem:[%s16536_s28 + $0x8] sm:$0xff] %v10535_v11 }
 0xba7   : > { %v10362_v22 = vpop.f32.mrb[172].mxu0 }
 0xba8   : > { %v11777_v30 = vadd.f32 %v16530_v6, %v10362_v22  ;;  %v10364_v1 = vpop.f32.mrb[173].mxu0 }
 0xba9   : > { %v10365_v38 = vpop.f32.mrb[174].mxu0 }
 0xbaa   : > { %v10540_v56 = vadd.f32 %v11777_v30, %v16399_v0  ;;  %v11778_v9 = vadd.f32 %v16530_v6, %v10365_v38  ;;  %v10367_v26 = vpop.f32.mrb[175].mxu0 }
 0xbac   : > { %10676 = vst [vmem:[%s16536_s28 + $0x10] sm:$0xff] %v10540_v56  ;;  %v10543_v60 = vadd.f32 %v11778_v9, %v16403_v16 }
 0xbae   : > { %10677 = vst [vmem:[%s16536_s28 + $0x18] sm:$0xff] %v10543_v60 }
 0xbaf   : > { %v10370_v28 = vpop.f32.mrb[176].mxu0 }
 0xbb0   : > { %v11779_v3 = vadd.f32 %v16530_v6, %v10370_v28  ;;  %v10372_v12 = vpop.f32.mrb[177].mxu0 }
 0xbb1   : > { %v10373_v21 = vpop.f32.mrb[178].mxu0 }
 0xbb2   : > { %v10548_v8 = vadd.f32 %v11779_v3, %v16415_v40  ;;  %v11780_v36 = vadd.f32 %v16530_v6, %v10373_v21  ;;  %v10375_v44 = vpop.f32.mrb[179].mxu0 }
 0xbb4   : > { %10678 = vst [vmem:[%s16536_s28 + $0x20] sm:$0xff] %v10548_v8  ;;  %v10551_v0 = vadd.f32 %v11780_v36, %v16421_v18 }
 0xbb6   : > { %10679 = vst [vmem:[%s16536_s28 + $0x28] sm:$0xff] %v10551_v0 }
 0xbb7   : > { %v10378_v13 = vpop.f32.mrb[180].mxu0 }
 0xbb8   : > { %v11781_v16 = vadd.f32 %v16530_v6, %v10378_v13  ;;  %v10380_v31 = vpop.f32.mrb[181].mxu0 }
 0xbb9   : > { %v10381_v23 = vpop.f32.mrb[182].mxu0 }
 0xbba   : > { %v10556_v48 = vadd.f32 %v11781_v16, %v16413_v37  ;;  %v11782_v42 = vadd.f32 %v16530_v6, %v10381_v23  ;;  %v10383_v58 = vpop.f32.mrb[183].mxu0 }
 0xbbc   : > { %10680 = vst [vmem:[%s16536_s28 + $0x30] sm:$0xff] %v10556_v48  ;;  %v10559_v40 = vadd.f32 %v11782_v42, %v16417_v33 }
 0xbbe   : > { %10681 = vst [vmem:[%s16536_s28 + $0x38] sm:$0xff] %v10559_v40 }
 0xbbf   : > { %v10386_v7 = vpop.f32.mrb[184].mxu0 }
 0xbc0   : > { %v11783_v18 = vadd.f32 %v16530_v6, %v10386_v7  ;;  %v10388_v35 = vpop.f32.mrb[185].mxu0 }
 0xbc1   : > { %v10389_v14 = vpop.f32.mrb[186].mxu0 }
 0xbc2   : > { %v10564_v46 = vadd.f32 %v11783_v18, %v16432_v20  ;;  %v11784_v62 = vadd.f32 %v16530_v6, %v10389_v14  ;;  %v10391_v63 = vpop.f32.mrb[187].mxu0 }
 0xbc4   : > { %10682 = vst [vmem:[%s16536_s28 + $0x40] sm:$0xff] %v10564_v46  ;;  %v10567_v37 = vadd.f32 %v11784_v62, %v16436_v24 }
 0xbc6   : > { %10683 = vst [vmem:[%s16536_s28 + $0x48] sm:$0xff] %v10567_v37 }
 0xbc7   : > { %v10394_v15 = vpop.f32.mrb[188].mxu0 }
 0xbc8   : > { %v11785_v33 = vadd.f32 %v16530_v6, %v10394_v15  ;;  %v10396_v11 = vpop.f32.mrb[189].mxu0 }
 0xbc9   : > { %v10397_v22 = vpop.f32.mrb[190].mxu0 }
 0xbca   : > { %v10572_v30 = vadd.f32 %v11785_v33, %v16430_v50  ;;  %v11786_v1 = vadd.f32 %v16530_v6, %v10397_v22  ;;  %v10399_v38 = vpop.f32.mrb[191].mxu0 }
 0xbcc   : > { %10684 = vst [vmem:[%s16536_s28 + $0x50] sm:$0xff] %v10572_v30  ;;  %v10575_v20 = vadd.f32 %v11786_v1, %v16434_v19 }
 0xbce   : > { %10685 = vst [vmem:[%s16536_s28 + $0x58] sm:$0xff] %v10575_v20 }
 0xbcf   : > { %v10402_v56 = vpop.f32.mrb[192].mxu0 }
 0xbd0   : > { %v11787_v24 = vadd.f32 %v16530_v6, %v10402_v56  ;;  %v10404_v9 = vpop.f32.mrb[193].mxu0 }
 0xbd1   : > { %v10405_v26 = vpop.f32.mrb[194].mxu0 }
 0xbd2   : > { %v10580_v60 = vadd.f32 %v11787_v24, %v16446_v61  ;;  %v11788_v28 = vadd.f32 %v16530_v6, %v10405_v26  ;;  %v10407_v3 = vpop.f32.mrb[195].mxu0 }
 0xbd4   : > { %10686 = vst [vmem:[%s16536_s28 + $0x60] sm:$0xff] %v10580_v60  ;;  %v10583_v50 = vadd.f32 %v11788_v28, %v16450_v53 }
 0xbd6   : > { %10687 = vst [vmem:[%s16536_s28 + $0x68] sm:$0xff] %v10583_v50 }
 0xbd7   : > { %v10410_v12 = vpop.f32.mrb[196].mxu0 }
 0xbd8   : > { %v11789_v19 = vadd.f32 %v16530_v6, %v10410_v12  ;;  %v10412_v21 = vpop.f32.mrb[197].mxu0 }
 0xbd9   : > { %v10413_v8 = vpop.f32.mrb[198].mxu0 }
 0xbda   : > { %v10588_v36 = vadd.f32 %v11789_v19, %v16444_v49  ;;  %v11790_v44 = vadd.f32 %v16530_v6, %v10413_v8  ;;  %v10415_v0 = vpop.f32.mrb[199].mxu0 }
 0xbdc   : > { %10688 = vst [vmem:[%s16536_s28 + $0x70] sm:$0xff] %v10588_v36  ;;  %v10591_v61 = vadd.f32 %v11790_v44, %v16448_v32 }
 0xbde   : > { %10689 = vst [vmem:[%s16536_s28 + $0x78] sm:$0xff] %v10591_v61 }
 0xbdf   : > { %v10418_v13 = vpop.f32.mrb[200].mxu0 }
 0xbe0   : > { %v11791_v53 = vadd.f32 %v16530_v6, %v10418_v13  ;;  %v10420_v16 = vpop.f32.mrb[201].mxu0 }
 0xbe1   : > { %v10421_v31 = vpop.f32.mrb[202].mxu0 }
 0xbe2   : > { %v10596_v23 = vadd.f32 %v11791_v53, %v16460_v51  ;;  %v11792_v48 = vadd.f32 %v16530_v6, %v10421_v31  ;;  %v10423_v42 = vpop.f32.mrb[203].mxu0 }
 0xbe4   : > { %10690 = vst [vmem:[%s16536_s28 + $0x80] sm:$0xff] %v10596_v23  ;;  %v10599_v49 = vadd.f32 %v11792_v48, %v16464_v29 }
 0xbe6   : > { %10691 = vst [vmem:[%s16536_s28 + $0x88] sm:$0xff] %v10599_v49 }
 0xbe7   : > { %v10426_v58 = vpop.f32.mrb[204].mxu0 }
 0xbe8   : > { %v11793_v32 = vadd.f32 %v16530_v6, %v10426_v58  ;;  %v10428_v40 = vpop.f32.mrb[205].mxu0 }
 0xbe9   : > { %v10429_v7 = vpop.f32.mrb[206].mxu0 }
 0xbea   : > { %v10604_v18 = vadd.f32 %v11793_v32, %v16458_v52  ;;  %v11794_v35 = vadd.f32 %v16530_v6, %v10429_v7  ;;  %v10431_v14 = vpop.f32.mrb[207].mxu0 }
 0xbec   : > { %10692 = vst [vmem:[%s16536_s28 + $0x90] sm:$0xff] %v10604_v18  ;;  %v10607_v51 = vadd.f32 %v11794_v35, %v16462_v54 }
 0xbee   : > { %10693 = vst [vmem:[%s16536_s28 + $0x98] sm:$0xff] %v10607_v51 }
 0xbef   : > { %v10434_v46 = vpop.f32.mrb[208].mxu0 }
 0xbf0   : > { %v11795_v29 = vadd.f32 %v16530_v6, %v10434_v46  ;;  %v10436_v62 = vpop.f32.mrb[209].mxu0 }
 0xbf1   : > { %v10437_v63 = vpop.f32.mrb[210].mxu0 }
 0xbf2   : > { %v10612_v37 = vadd.f32 %v11795_v29, %v16474_v41  ;;  %v11796_v15 = vadd.f32 %v16530_v6, %v10437_v63  ;;  %v10439_v33 = vpop.f32.mrb[211].mxu0 }
 0xbf4   : > { %10694 = vst [vmem:[%s16536_s28 + $0xa0] sm:$0xff] %v10612_v37  ;;  %v10615_v52 = vadd.f32 %v11796_v15, %v16478_v10 }
 0xbf6   : > { %10695 = vst [vmem:[%s16536_s28 + $0xa8] sm:$0xff] %v10615_v52 }
 0xbf7   : > { %v10442_v11 = vpop.f32.mrb[212].mxu0 }
 0xbf8   : > { %v11797_v54 = vadd.f32 %v16530_v6, %v10442_v11  ;;  %v10444_v22 = vpop.f32.mrb[213].mxu0 }
 0xbf9   : > { %v10445_v30 = vpop.f32.mrb[214].mxu0 }
 0xbfa   : > { %v10620_v1 = vadd.f32 %v11797_v54, %v16472_v47  ;;  %v11798_v38 = vadd.f32 %v16530_v6, %v10445_v30  ;;  %v10447_v20 = vpop.f32.mrb[215].mxu0 }
 0xbfc   : > { %10696 = vst [vmem:[%s16536_s28 + $0xb0] sm:$0xff] %v10620_v1  ;;  %v10623_v41 = vadd.f32 %v11798_v38, %v16476_v57 }
 0xbfe   : > { %10697 = vst [vmem:[%s16536_s28 + $0xb8] sm:$0xff] %v10623_v41 }
 0xbff   : > { %v10450_v56 = vpop.f32.mrb[216].mxu0 }
 0xc00   : > { %v11799_v10 = vadd.f32 %v16530_v6, %v10450_v56  ;;  %v10452_v24 = vpop.f32.mrb[217].mxu0 }
 0xc01   : > { %v10453_v9 = vpop.f32.mrb[218].mxu0 }
 0xc02   : > { %v10628_v26 = vadd.f32 %v11799_v10, %v16488_v55  ;;  %v11800_v60 = vadd.f32 %v16530_v6, %v10453_v9  ;;  %v10455_v28 = vpop.f32.mrb[219].mxu0 }
 0xc04   : > { %10698 = vst [vmem:[%s16536_s28 + $0xc0] sm:$0xff] %v10628_v26  ;;  %v10631_v47 = vadd.f32 %v11800_v60, %v16492_v45 }
 0xc06   : > { %10699 = vst [vmem:[%s16536_s28 + $0xc8] sm:$0xff] %v10631_v47 }
 0xc07   : > { %v10458_v3 = vpop.f32.mrb[220].mxu0 }
 0xc08   : > { %v11801_v57 = vadd.f32 %v16530_v6, %v10458_v3  ;;  %v10460_v50 = vpop.f32.mrb[221].mxu0 }
 0xc09   : > { %v10461_v12 = vpop.f32.mrb[222].mxu0 }
 0xc0a   : > { %v10636_v19 = vadd.f32 %v11801_v57, %v16486_v25  ;;  %v11802_v21 = vadd.f32 %v16530_v6, %v10461_v12  ;;  %v10463_v8 = vpop.f32.mrb[223].mxu0 }
 0xc0c   : > { %10700 = vst [vmem:[%s16536_s28 + $0xd0] sm:$0xff] %v10636_v19  ;;  %v10639_v55 = vadd.f32 %v11802_v21, %v16490_v2 }
 0xc0e   : > { %10701 = vst [vmem:[%s16536_s28 + $0xd8] sm:$0xff] %v10639_v55 }
 0xc0f   : > { %v10466_v36 = vpop.f32.mrb[224].mxu0 }
 0xc10   : > { %v11803_v45 = vadd.f32 %v16530_v6, %v10466_v36  ;;  %v10468_v44 = vpop.f32.mrb[225].mxu0 }
 0xc11   : > { %v10469_v0 = vpop.f32.mrb[226].mxu0 }
 0xc12   : > { %v10644_v61 = vadd.f32 %v11803_v45, %v16502_v39  ;;  %v11804_v13 = vadd.f32 %v16530_v6, %v10469_v0  ;;  %v10471_v53 = vpop.f32.mrb[227].mxu0 }
 0xc14   : > { %10702 = vst [vmem:[%s16536_s28 + $0xe0] sm:$0xff] %v10644_v61  ;;  %v10647_v25 = vadd.f32 %v11804_v13, %v16506_v34 }
 0xc16   : > { %10703 = vst [vmem:[%s16536_s28 + $0xe8] sm:$0xff] %v10647_v25 }
 0xc17   : > { %v10474_v16 = vpop.f32.mrb[228].mxu0 }
 0xc18   : > { %v11805_v2 = vadd.f32 %v16530_v6, %v10474_v16  ;;  %v10476_v31 = vpop.f32.mrb[229].mxu0 }
 0xc19   : > { %v10477_v23 = vpop.f32.mrb[230].mxu0 }
 0xc1a   : > { %v10652_v48 = vadd.f32 %v11805_v2, %v16500_v43  ;;  %v11806_v42 = vadd.f32 %v16530_v6, %v10477_v23  ;;  %v10479_v49 = vpop.f32.mrb[231].mxu0 }
 0xc1c   : > { %10704 = vst [vmem:[%s16536_s28 + $0xf0] sm:$0xff] %v10652_v48  ;;  %v10655_v39 = vadd.f32 %v11806_v42, %v16504_v17 }
 0xc1e   : > { %10705 = vst [vmem:[%s16536_s28 + $0xf8] sm:$0xff] %v10655_v39 }
 0xc1f   : > { %v10482_v58 = vpop.f32.mrb[232].mxu0 }
 0xc20   : > { %v11807_v34 = vadd.f32 %v16530_v6, %v10482_v58  ;;  %v10484_v32 = vpop.f32.mrb[233].mxu0 }
 0xc21   : > { %v10485_v40 = vpop.f32.mrb[234].mxu0 }
 0xc22   : > { %v11808_v7 = vadd.f32 %v16530_v6, %v10485_v40  ;;  %v10660_v18 = vadd.f32 %v11807_v34, %v16542_v5  ;;  %v10487_v35 = vpop.f32.mrb[235].mxu0 }
 0xc24   : > { %10706 = vst [vmem:[%s16536_s28 + $0x100] sm:$0xff] %v10660_v18  ;;  %v10663_v43 = vadd.f32 %v11808_v7, %v16548_v4 }
 0xc26   : > { %10707 = vst [vmem:[%s16536_s28 + $0x108] sm:$0xff] %v10663_v43 }
 0xc27   : > { %v10490_v14 = vpop.f32.mrb[236].mxu0 }
 0xc28   : > { %v11809_v17 = vadd.f32 %v16530_v6, %v10490_v14  ;;  %v10492_v51 = vpop.f32.mrb[237].mxu0 }
 0xc29   : > { %v10493_v46 = vpop.f32.mrb[238].mxu0 }
 0xc2a   : > { %v10668_v29 = vadd.f32 %v11809_v17, %v16540_v59  ;;  %v11810_v62 = vadd.f32 %v16530_v6, %v10493_v46  ;;  %v10495_v63 = vpop.f32.mrb[239].mxu0 }
 0xc2c   : > { %10708 = vst [vmem:[%s16536_s28 + $0x110] sm:$0xff] %v10668_v29  ;;  %v10671_v37 = vadd.f32 %v11810_v62, %v16546_v27 }
 0xc2e   : > { %10709 = vst [vmem:[%s16536_s28 + $0x118] sm:$0xff] %v10671_v37 }
 0xc2f PF: > { %s26_s20 = sadd.s32 1, %s12781_s20  }
 0xc30   : > { %p23_p4 = scmp.ge.s32.totalorder %s26_s20, 4  }
 0xc32   :  { %25 = sbr.rel (!%p23_p4) target bundleno = 2 (0x2), region = 113 }

</bundles_post_ra>
